<compile_context>
chip_gen: v5e
topology: v5e:2x2
jax: 0.10.0
libtpu: 0.0.40
codegen_flags: <defaults>
</compile_context>

<pallas_src>
import functools
import numpy as np

import jax
import jax.numpy as jnp
from jax.experimental import pallas as pl
from jax.experimental.pallas import tpu as pltpu

PAD = 128                 # lane-dense output slab width for the merged heads
BF16 = jnp.bfloat16


# ---------------------------------------------------------------------------
# In-kernel helpers
# ---------------------------------------------------------------------------

def _layernorm(x, g, b, eps):
    mu = jnp.mean(x, axis=-1, keepdims=True)
    xc = x - mu
    var = jnp.mean(xc * xc, axis=-1, keepdims=True)
    return xc * jax.lax.rsqrt(var + eps) * g + b


def _mm(x, w):
    # bf16 MXU matmul with f32 accumulation; elementwise math stays f32.
    return jnp.dot(x.astype(BF16), w, preferred_element_type=jnp.float32)


# ---------------------------------------------------------------------------
# Single fused kernel: embedding-LN + 2 BERT layers + projection/fusion/heads
# (one batch element per grid step)
# ---------------------------------------------------------------------------

def _fused_kernel(emb_ref, mask_ref, extra_ref,
                  eg_ref, eb_ref,
                  wq_ref, bq_ref, wk_ref, bk_ref, wv_ref, bv_ref,
                  wo_ref, bo_ref, ln1g_ref, ln1b_ref,
                  wi_ref, bi_ref, wo2_ref, bo2_ref, ln2g_ref, ln2b_ref,
                  pw_ref, pb_ref, plg_ref, plb_ref,
                  favw_ref, favb_ref, faow_ref, faob_ref,
                  ew_ref, eb2_ref, ebns_ref, ebnb_ref,
                  fwa_ref, fwe_ref, fb_ref, flg_ref, flb_ref,
                  h1w_ref, h1b_ref, h1s_ref, h1sh_ref,
                  h2w_ref, h2b_ref,
                  out_ref, *, num_heads, num_classes):
    _, S, H = emb_ref.shape
    L = wq_ref.shape[0]
    dh = H // num_heads
    scale = 1.0 / float(np.sqrt(dh))

    # ---------------- encoder ----------------
    x = emb_ref[0]                                        # [S, H] f32
    h = _layernorm(x, eg_ref[...], eb_ref[...], 1e-12)

    # additive key mask built in-kernel from attention_mask (no [B*S,B*S] array)
    key_bias = (1.0 - mask_ref[0]) * (-1e4)               # [1, S]

    # per-head lane masks so every attention contraction uses full 128 lanes
    lane = jax.lax.broadcasted_iota(jnp.int32, (1, H), 1)
    head_masks = [
        jnp.logical_and(lane >= hd * dh, lane < (hd + 1) * dh).astype(jnp.float32)
        for hd in range(num_heads)]

    for l in range(L):                                    # static (L=2), unrolled
        q = _mm(h, wq_ref[l]) + bq_ref[l]
        k = _mm(h, wk_ref[l]) + bk_ref[l]
        v = _mm(h, wv_ref[l]) + bv_ref[l]
        kt = k.T                                          # one transpose per layer

        ctx = jnp.zeros((S, H), jnp.float32)
        for hd in range(num_heads):                       # static (4), unrolled
            s = jnp.dot(q * head_masks[hd], kt,
                        preferred_element_type=jnp.float32) * scale + key_bias
            s = s - jnp.max(s, axis=-1, keepdims=True)
            p = jnp.exp(s)
            p = p * pl.reciprocal(jnp.sum(p, axis=-1, keepdims=True), approx=True)
            # masked-v keeps each head's context in its own (disjoint) lanes
            ctx = ctx + jnp.dot(p, v * head_masks[hd],
                                preferred_element_type=jnp.float32)
        attn = _mm(ctx, wo_ref[l]) + bo_ref[l]            # single full-width proj

        h2 = _layernorm(attn + h, ln1g_ref[l], ln1b_ref[l], 1e-12)
        ff = _mm(h2, wi_ref[l]) + bi_ref[l]
        # TODO(synk): HF BERT uses exact (erf) GELU; tanh approximation kept here.
        ff = jax.nn.gelu(ff, approximate=True)
        ff = _mm(ff, wo2_ref[l]) + bo2_ref[l]
        h = _layernorm(ff + h2, ln2g_ref[l], ln2b_ref[l], 1e-12)

    cls = h[0:1, :]                                       # CLS row [1, H]

    # ---------------- feature_projection: Linear -> LN -> Dropout(id) -> ReLU ----
    tf = _mm(cls, pw_ref[...]) + pb_ref[...]
    tf = jnp.maximum(_layernorm(tf, plg_ref[...], plb_ref[...], 1e-5), 0.0)

    # ---------------- fusion self-attn over seq_len==1: softmax(1x1)==1 ----------
    fv = _mm(tf, favw_ref[...]) + favb_ref[...]
    attended = _mm(fv, faow_ref[...]) + faob_ref[...]

    # ---------------- extra_projection: Linear -> BN(eval, folded) -> ReLU -------
    ex = _mm(extra_ref[0], ew_ref[...]) + eb2_ref[...]
    ex = jnp.maximum(ex * ebns_ref[...] + ebnb_ref[...], 0.0)

    # ---------------- fusion_layer on concat([attended, extra]) via split weights
    fz = _mm(attended, fwa_ref[...]) + _mm(ex, fwe_ref[...]) + fb_ref[...]
    fz = jnp.maximum(_layernorm(fz, flg_ref[...], flb_ref[...], 1e-5), 0.0)

    # ---------------- merged classifier + sentiment heads ------------------------
    # first layers hstacked ([D, 2*D2]); BN scale/shift padded with 1/0 on the
    # sentiment half (both branches end in ReLU).
    hc = _mm(fz, h1w_ref[...]) + h1b_ref[...]
    hc = jnp.maximum(hc * h1s_ref[...] + h1sh_ref[...], 0.0)
    # second layers vstacked into one lane-dense [2*D2, 128] matmul.
    pre = _mm(hc, h2w_ref[...]) + h2b_ref[...]            # [1, PAD]
    lane_out = jax.lax.broadcasted_iota(jnp.int32, (1, PAD), 1)
    out_ref[0] = jnp.where(lane_out == num_classes, jnp.tanh(pre), pre)


# ---------------------------------------------------------------------------
# Parameters (deterministic synthetic init) + one-time preprocessing
# ---------------------------------------------------------------------------

def init_params(key, cfg):
    H, I, D = cfg['bert_hidden'], cfg['bert_ffn'], cfg['hidden_dim']
    keys = iter(jax.random.split(key, 128))

    def w(shape, scale=0.02):
        return jax.random.normal(next(keys), shape, jnp.float32) * scale

    zeros = lambda n: jnp.zeros((n,), jnp.float32)
    ones = lambda n: jnp.ones((n,), jnp.float32)

    p = {}
    # TODO(synk): pretrained 'bert-base-chinese' weights cannot be loaded here; a
    # deterministically-initialized small BERT encoder of identical structure is used.
    p['word_emb'] = w((cfg['vocab'], H))
    p['pos_emb'] = w((cfg['max_pos'], H))
    p['type_emb'] = w((2, H))
    p['emb_ln_g'], p['emb_ln_b'] = ones(H), zeros(H)
    p['layers'] = []
    for _ in range(cfg['bert_layers']):
        p['layers'].append(dict(
            wq=w((H, H)), bq=zeros(H), wk=w((H, H)), bk=zeros(H),
            wv=w((H, H)), bv=zeros(H), wo=w((H, H)), bo=zeros(H),
            ln1_g=ones(H), ln1_b=zeros(H),
            wi=w((H, I)), bi=zeros(I), wo2=w((I, H)), bo2=zeros(H),
            ln2_g=ones(H), ln2_b=zeros(H)))
    # feature_projection: Linear(H, 512) + LayerNorm(512)
    p['proj_w'], p['proj_b'] = w((H, D)), zeros(D)
    p['proj_ln_g'], p['proj_ln_b'] = ones(D), zeros(D)
    # fusion self-attention (wq/wk are mathematically dead for seq_len == 1)
    p['fa'] = dict(wq=w((D, D)), bq=zeros(D), wk=w((D, D)), bk=zeros(D),
                   wv=w((D, D)), bv=zeros(D), wo=w((D, D)), bo=zeros(D))
    # extra_projection: Linear(20, 256) + BatchNorm1d(256)
    p['extra_w'], p['extra_b'] = w((cfg['extra_dim'], D // 2)), zeros(D // 2)
    p['extra_bn_g'], p['extra_bn_b'] = ones(D // 2), zeros(D // 2)
    p['extra_bn_rm'], p['extra_bn_rv'] = zeros(D // 2), ones(D // 2)
    # fusion_layer: Linear(512 + 256, 512) + LayerNorm(512)
    p['fuse_w'], p['fuse_b'] = w((D + D // 2, D)), zeros(D)
    p['fuse_ln_g'], p['fuse_ln_b'] = ones(D), zeros(D)
    # classifier: Linear(512,256) + BN(256) + Linear(256, num_classes)
    p['cls_w1'], p['cls_b1'] = w((D, D // 2)), zeros(D // 2)
    p['cls_bn_g'], p['cls_bn_b'] = ones(D // 2), zeros(D // 2)
    p['cls_bn_rm'], p['cls_bn_rv'] = zeros(D // 2), ones(D // 2)
    p['cls_w2'], p['cls_b2'] = w((D // 2, cfg['num_classes'])), zeros(cfg['num_classes'])
    # sentiment_predictor: Linear(512,256) + Linear(256,1) + Tanh
    p['sent_w1'], p['sent_b1'] = w((D, D // 2)), zeros(D // 2)
    p['sent_w2'], p['sent_b2'] = w((D // 2, 1)), zeros(1)
    return p


def prepare_params(p, cfg):
    """One-time preprocessing: stack per-layer weights, cast weight matrices to
    bf16, reshape biases to [1,N], fold eval-mode BatchNorm into scale/shift,
    split the fusion weight, and merge classifier+sentiment into two matmuls
    with a zero-padded lane-dense 128-wide output slab."""
    H, I, D = cfg['bert_hidden'], cfg['bert_ffn'], cfg['hidden_dim']
    D2, C, L = D // 2, cfg['num_classes'], cfg['bert_layers']

    stack = lambda k: jnp.stack([lyr[k] for lyr in p['layers']])
    wstack = lambda k: stack(k).astype(BF16)

    enc = dict(
        eg=p['emb_ln_g'].reshape(1, H), eb=p['emb_ln_b'].reshape(1, H),
        wq=wstack('wq'), bq=stack('bq').reshape(L, 1, H),
        wk=wstack('wk'), bk=stack('bk').reshape(L, 1, H),
        wv=wstack('wv'), bv=stack('bv').reshape(L, 1, H),
        wo=wstack('wo'), bo=stack('bo').reshape(L, 1, H),
        ln1g=stack('ln1_g').reshape(L, 1, H), ln1b=stack('ln1_b').reshape(L, 1, H),
        wi=wstack('wi'), bi=stack('bi').reshape(L, 1, I),
        wo2=wstack('wo2'), bo2=stack('bo2').reshape(L, 1, H),
        ln2g=stack('ln2_g').reshape(L, 1, H), ln2b=stack('ln2_b').reshape(L, 1, H))

    eps_bn = 1e-5
    ebn_s = p['extra_bn_g'] / jnp.sqrt(p['extra_bn_rv'] + eps_bn)
    ebn_b = p['extra_bn_b'] - p['extra_bn_rm'] * ebn_s
    cbn_s = p['cls_bn_g'] / jnp.sqrt(p['cls_bn_rv'] + eps_bn)
    cbn_b = p['cls_bn_b'] - p['cls_bn_rm'] * cbn_s

    # merged classifier/sentiment first layer [D, 2*D2]; BN is identity (1/0)
    # on the sentiment half.
    h1w = jnp.concatenate([p['cls_w1'], p['sent_w1']], axis=1).astype(BF16)
    h1b = jnp.concatenate([p['cls_b1'], p['sent_b1']]).reshape(1, 2 * D2)
    h1s = jnp.concatenate([cbn_s, jnp.ones((D2,), jnp.float32)]).reshape(1, 2 * D2)
    h1sh = jnp.concatenate([cbn_b, jnp.zeros((D2,), jnp.float32)]).reshape(1, 2 * D2)

    # merged final layer [2*D2, PAD]: rows [0,D2) carry cls_w2 into lanes [0,C),
    # rows [D2,2*D2) carry sent_w2 into lane C; padded columns stay zero.
    h2w = jnp.zeros((2 * D2, PAD), jnp.float32)
    h2w = h2w.at[:D2, :C].set(p['cls_w2'])
    h2w = h2w.at[D2:, C:C + 1].set(p['sent_w2'])
    h2w = h2w.astype(BF16)
    h2b = jnp.zeros((1, PAD), jnp.float32)
    h2b = h2b.at[0, :C].set(p['cls_b2'])
    h2b = h2b.at[0, C:C + 1].set(p['sent_b2'])

    head = dict(
        pw=p['proj_w'].astype(BF16), pb=p['proj_b'].reshape(1, D),
        plg=p['proj_ln_g'].reshape(1, D), plb=p['proj_ln_b'].reshape(1, D),
        favw=p['fa']['wv'].astype(BF16), favb=p['fa']['bv'].reshape(1, D),
        faow=p['fa']['wo'].astype(BF16), faob=p['fa']['bo'].reshape(1, D),
        ew=p['extra_w'].astype(BF16), eb2=p['extra_b'].reshape(1, D2),
        ebns=ebn_s.reshape(1, D2), ebnb=ebn_b.reshape(1, D2),
        fwa=p['fuse_w'][:D].astype(BF16), fwe=p['fuse_w'][D:].astype(BF16),
        fb=p['fuse_b'].reshape(1, D),
        flg=p['fuse_ln_g'].reshape(1, D), flb=p['fuse_ln_b'].reshape(1, D),
        h1w=h1w, h1b=h1b, h1s=h1s, h1sh=h1sh, h2w=h2w, h2b=h2b)

    emb = dict(word=p['word_emb'], pos=p['pos_emb'], type0=p['type_emb'][0])
    return dict(enc=enc, head=head, emb=emb)


# ---------------------------------------------------------------------------
# Forward pass (single pallas_call, grid over batch)
# ---------------------------------------------------------------------------

def text_only_depression_forward(prep, input_ids, attention_mask, extra_features, cfg):
    B, S = input_ids.shape
    H, E = cfg['bert_hidden'], cfg['extra_dim']
    C = cfg['num_classes']
    enc, head, embp = prep['enc'], prep['head'], prep['emb']

    # ---- embeddings (gather + add, plain JAX glue) ----
    emb = (jnp.take(embp['word'], input_ids, axis=0)
           + embp['pos'][:S][None, :, :]
           + embp['type0'][None, None, :])

    mask3 = attention_mask.astype(jnp.float32).reshape(B, 1, S)
    extra3 = extra_features.reshape(B, 1, E)

    def const_spec(a):
        nd = a.ndim
        return pl.BlockSpec(a.shape, lambda b, _n=nd: (0,) * _n)

    weight_inputs = (
        enc['eg'], enc['eb'],
        enc['wq'], enc['bq'], enc['wk'], enc['bk'], enc['wv'], enc['bv'],
        enc['wo'], enc['bo'], enc['ln1g'], enc['ln1b'],
        enc['wi'], enc['bi'], enc['wo2'], enc['bo2'], enc['ln2g'], enc['ln2b'],
        head['pw'], head['pb'], head['plg'], head['plb'],
        head['favw'], head['favb'], head['faow'], head['faob'],
        head['ew'], head['eb2'], head['ebns'], head['ebnb'],
        head['fwa'], head['fwe'], head['fb'], head['flg'], head['flb'],
        head['h1w'], head['h1b'], head['h1s'], head['h1sh'],
        head['h2w'], head['h2b'])

    in_specs = ([pl.BlockSpec((1, S, H), lambda b: (b, 0, 0)),
                 pl.BlockSpec((1, 1, S), lambda b: (b, 0, 0)),
                 pl.BlockSpec((1, 1, E), lambda b: (b, 0, 0))]
                + [const_spec(a) for a in weight_inputs])

    slab = pl.pallas_call(
        functools.partial(_fused_kernel,
                          num_heads=cfg['bert_heads'], num_classes=C),
        grid=(B,),
        in_specs=in_specs,
        out_specs=pl.BlockSpec((1, 1, PAD), lambda b: (b, 0, 0)),
        out_shape=jax.ShapeDtypeStruct((B, 1, PAD), jnp.float32),
        compiler_params=pltpu.CompilerParams(
            dimension_semantics=("parallel",)),
    )(emb, mask3, extra3, *weight_inputs)

    slab = slab.reshape(B, PAD)
    logits = slab[:, :C]            # [B, num_classes]
    sentiment = slab[:, C:C + 1]    # [B, 1]
    return logits, sentiment


# ---------------------------------------------------------------------------
# Main
# ---------------------------------------------------------------------------

if __name__ == "__main__":
    cfg = dict(vocab=100, max_pos=32, bert_hidden=128, bert_heads=4, bert_layers=2,
               bert_ffn=512, hidden_dim=512, extra_dim=20, num_classes=2)

    key = jax.random.PRNGKey(0)
    pkey, idkey, exkey = jax.random.split(key, 3)
    params = init_params(pkey, cfg)
    prep = prepare_params(params, cfg)

    B, S = 2, 8
    input_ids = jax.random.randint(idkey, (B, S), 0, cfg['vocab'], dtype=jnp.int32)
    attention_mask = jnp.ones((B, S), dtype=jnp.int32)
    extra_features = jax.random.normal(exkey, (B, cfg['extra_dim']), jnp.float32)

    fwd = jax.jit(functools.partial(text_only_depression_forward, cfg=cfg))
    logits, sentiment = fwd(prep, input_ids, attention_mask, extra_features)
    jax.block_until_ready((logits, sentiment))

    assert logits.shape == (B, cfg['num_classes'])
    assert sentiment.shape == (B, 1)
    assert bool(jnp.all(jnp.isfinite(logits))) and bool(jnp.all(jnp.isfinite(sentiment)))
    print("KERNEL_OK")
</pallas_src>

<mosaic_0001>
module attributes {stable_mosaic.version = 11 : i64} {
  func.func @_fused_kernel(%arg0: i32, %arg1: memref<1x8x128xf32, #tpu.memory_space<vmem>>, %arg2: memref<1x1x8xf32, #tpu.memory_space<vmem>>, %arg3: memref<1x1x20xf32, #tpu.memory_space<vmem>>, %arg4: memref<1x128xf32, #tpu.memory_space<vmem>>, %arg5: memref<1x128xf32, #tpu.memory_space<vmem>>, %arg6: memref<2x128x128xbf16, #tpu.memory_space<vmem>>, %arg7: memref<2x1x128xf32, #tpu.memory_space<vmem>>, %arg8: memref<2x128x128xbf16, #tpu.memory_space<vmem>>, %arg9: memref<2x1x128xf32, #tpu.memory_space<vmem>>, %arg10: memref<2x128x128xbf16, #tpu.memory_space<vmem>>, %arg11: memref<2x1x128xf32, #tpu.memory_space<vmem>>, %arg12: memref<2x128x128xbf16, #tpu.memory_space<vmem>>, %arg13: memref<2x1x128xf32, #tpu.memory_space<vmem>>, %arg14: memref<2x1x128xf32, #tpu.memory_space<vmem>>, %arg15: memref<2x1x128xf32, #tpu.memory_space<vmem>>, %arg16: memref<2x128x512xbf16, #tpu.memory_space<vmem>>, %arg17: memref<2x1x512xf32, #tpu.memory_space<vmem>>, %arg18: memref<2x512x128xbf16, #tpu.memory_space<vmem>>, %arg19: memref<2x1x128xf32, #tpu.memory_space<vmem>>, %arg20: memref<2x1x128xf32, #tpu.memory_space<vmem>>, %arg21: memref<2x1x128xf32, #tpu.memory_space<vmem>>, %arg22: memref<128x512xbf16, #tpu.memory_space<vmem>>, %arg23: memref<1x512xf32, #tpu.memory_space<vmem>>, %arg24: memref<1x512xf32, #tpu.memory_space<vmem>>, %arg25: memref<1x512xf32, #tpu.memory_space<vmem>>, %arg26: memref<512x512xbf16, #tpu.memory_space<vmem>>, %arg27: memref<1x512xf32, #tpu.memory_space<vmem>>, %arg28: memref<512x512xbf16, #tpu.memory_space<vmem>>, %arg29: memref<1x512xf32, #tpu.memory_space<vmem>>, %arg30: memref<20x256xbf16, #tpu.memory_space<vmem>>, %arg31: memref<1x256xf32, #tpu.memory_space<vmem>>, %arg32: memref<1x256xf32, #tpu.memory_space<vmem>>, %arg33: memref<1x256xf32, #tpu.memory_space<vmem>>, %arg34: memref<512x512xbf16, #tpu.memory_space<vmem>>, %arg35: memref<256x512xbf16, #tpu.memory_space<vmem>>, %arg36: memref<1x512xf32, #tpu.memory_space<vmem>>, %arg37: memref<1x512xf32, #tpu.memory_space<vmem>>, %arg38: memref<1x512xf32, #tpu.memory_space<vmem>>, %arg39: memref<512x512xbf16, #tpu.memory_space<vmem>>, %arg40: memref<1x512xf32, #tpu.memory_space<vmem>>, %arg41: memref<1x512xf32, #tpu.memory_space<vmem>>, %arg42: memref<1x512xf32, #tpu.memory_space<vmem>>, %arg43: memref<512x128xbf16, #tpu.memory_space<vmem>>, %arg44: memref<1x128xf32, #tpu.memory_space<vmem>>, %arg45: memref<1x1x128xf32, #tpu.memory_space<vmem>>) attributes {dimension_semantics = [#tpu.dimension_semantics<parallel>], iteration_bounds = array<i64: 2>, scalar_prefetch = 0 : i64, scratch_operands = 0 : i64, tpu.core_type = #tpu.core_type<tc>, window_params = [{transform_indices = @transform_0, window_bounds = array<i64: 1, 8, 128>}, {transform_indices = @transform_1, window_bounds = array<i64: 1, 1, 8>}, {transform_indices = @transform_2, window_bounds = array<i64: 1, 1, 20>}, {pipeline_mode = #tpu.pipeline_mode<synchronous>, transform_indices = @transform_3, window_bounds = array<i64: 1, 128>}, {pipeline_mode = #tpu.pipeline_mode<synchronous>, transform_indices = @transform_4, window_bounds = array<i64: 1, 128>}, {pipeline_mode = #tpu.pipeline_mode<synchronous>, transform_indices = @transform_5, window_bounds = array<i64: 2, 128, 128>}, {pipeline_mode = #tpu.pipeline_mode<synchronous>, transform_indices = @transform_6, window_bounds = array<i64: 2, 1, 128>}, {pipeline_mode = #tpu.pipeline_mode<synchronous>, transform_indices = @transform_7, window_bounds = array<i64: 2, 128, 128>}, {pipeline_mode = #tpu.pipeline_mode<synchronous>, transform_indices = @transform_8, window_bounds = array<i64: 2, 1, 128>}, {pipeline_mode = #tpu.pipeline_mode<synchronous>, transform_indices = @transform_9, window_bounds = array<i64: 2, 128, 128>}, {pipeline_mode = #tpu.pipeline_mode<synchronous>, transform_indices = @transform_10, window_bounds = array<i64: 2, 1, 128>}, {pipeline_mode = #tpu.pipeline_mode<synchronous>, transform_indices = @transform_11, window_bounds = array<i64: 2, 128, 128>}, {pipeline_mode = #tpu.pipeline_mode<synchronous>, transform_indices = @transform_12, window_bounds = array<i64: 2, 1, 128>}, {pipeline_mode = #tpu.pipeline_mode<synchronous>, transform_indices = @transform_13, window_bounds = array<i64: 2, 1, 128>}, {pipeline_mode = #tpu.pipeline_mode<synchronous>, transform_indices = @transform_14, window_bounds = array<i64: 2, 1, 128>}, {pipeline_mode = #tpu.pipeline_mode<synchronous>, transform_indices = @transform_15, window_bounds = array<i64: 2, 128, 512>}, {pipeline_mode = #tpu.pipeline_mode<synchronous>, transform_indices = @transform_16, window_bounds = array<i64: 2, 1, 512>}, {pipeline_mode = #tpu.pipeline_mode<synchronous>, transform_indices = @transform_17, window_bounds = array<i64: 2, 512, 128>}, {pipeline_mode = #tpu.pipeline_mode<synchronous>, transform_indices = @transform_18, window_bounds = array<i64: 2, 1, 128>}, {pipeline_mode = #tpu.pipeline_mode<synchronous>, transform_indices = @transform_19, window_bounds = array<i64: 2, 1, 128>}, {pipeline_mode = #tpu.pipeline_mode<synchronous>, transform_indices = @transform_20, window_bounds = array<i64: 2, 1, 128>}, {pipeline_mode = #tpu.pipeline_mode<synchronous>, transform_indices = @transform_21, window_bounds = array<i64: 128, 512>}, {pipeline_mode = #tpu.pipeline_mode<synchronous>, transform_indices = @transform_22, window_bounds = array<i64: 1, 512>}, {pipeline_mode = #tpu.pipeline_mode<synchronous>, transform_indices = @transform_23, window_bounds = array<i64: 1, 512>}, {pipeline_mode = #tpu.pipeline_mode<synchronous>, transform_indices = @transform_24, window_bounds = array<i64: 1, 512>}, {pipeline_mode = #tpu.pipeline_mode<synchronous>, transform_indices = @transform_25, window_bounds = array<i64: 512, 512>}, {pipeline_mode = #tpu.pipeline_mode<synchronous>, transform_indices = @transform_26, window_bounds = array<i64: 1, 512>}, {pipeline_mode = #tpu.pipeline_mode<synchronous>, transform_indices = @transform_27, window_bounds = array<i64: 512, 512>}, {pipeline_mode = #tpu.pipeline_mode<synchronous>, transform_indices = @transform_28, window_bounds = array<i64: 1, 512>}, {pipeline_mode = #tpu.pipeline_mode<synchronous>, transform_indices = @transform_29, window_bounds = array<i64: 20, 256>}, {pipeline_mode = #tpu.pipeline_mode<synchronous>, transform_indices = @transform_30, window_bounds = array<i64: 1, 256>}, {pipeline_mode = #tpu.pipeline_mode<synchronous>, transform_indices = @transform_31, window_bounds = array<i64: 1, 256>}, {pipeline_mode = #tpu.pipeline_mode<synchronous>, transform_indices = @transform_32, window_bounds = array<i64: 1, 256>}, {pipeline_mode = #tpu.pipeline_mode<synchronous>, transform_indices = @transform_33, window_bounds = array<i64: 512, 512>}, {pipeline_mode = #tpu.pipeline_mode<synchronous>, transform_indices = @transform_34, window_bounds = array<i64: 256, 512>}, {pipeline_mode = #tpu.pipeline_mode<synchronous>, transform_indices = @transform_35, window_bounds = array<i64: 1, 512>}, {pipeline_mode = #tpu.pipeline_mode<synchronous>, transform_indices = @transform_36, window_bounds = array<i64: 1, 512>}, {pipeline_mode = #tpu.pipeline_mode<synchronous>, transform_indices = @transform_37, window_bounds = array<i64: 1, 512>}, {pipeline_mode = #tpu.pipeline_mode<synchronous>, transform_indices = @transform_38, window_bounds = array<i64: 512, 512>}, {pipeline_mode = #tpu.pipeline_mode<synchronous>, transform_indices = @transform_39, window_bounds = array<i64: 1, 512>}, {pipeline_mode = #tpu.pipeline_mode<synchronous>, transform_indices = @transform_40, window_bounds = array<i64: 1, 512>}, {pipeline_mode = #tpu.pipeline_mode<synchronous>, transform_indices = @transform_41, window_bounds = array<i64: 1, 512>}, {pipeline_mode = #tpu.pipeline_mode<synchronous>, transform_indices = @transform_42, window_bounds = array<i64: 512, 128>}, {pipeline_mode = #tpu.pipeline_mode<synchronous>, transform_indices = @transform_43, window_bounds = array<i64: 1, 128>}, {transform_indices = @transform_44, window_bounds = array<i64: 1, 1, 128>}]} {
    %c0 = arith.constant 0 : index
    %c0_0 = arith.constant 0 : index
    %c0_1 = arith.constant 0 : index
    %0 = vector.load %arg1[%c0, %c0_0, %c0_1] : memref<1x8x128xf32, #tpu.memory_space<vmem>>, vector<1x8x128xf32>
    %1 = vector.shape_cast %0 : vector<1x8x128xf32> to vector<8x128xf32>
    %c0_2 = arith.constant 0 : index
    %c0_3 = arith.constant 0 : index
    %2 = vector.load %arg4[%c0_2, %c0_3] : memref<1x128xf32, #tpu.memory_space<vmem>>, vector<1x128xf32>
    %c0_4 = arith.constant 0 : index
    %c0_5 = arith.constant 0 : index
    %3 = vector.load %arg5[%c0_4, %c0_5] : memref<1x128xf32, #tpu.memory_space<vmem>>, vector<1x128xf32>
    %cst = arith.constant dense<0.000000e+00> : vector<8xf32>
    %4 = vector.multi_reduction <add>, %1, %cst [1] : vector<8x128xf32> to vector<8xf32>
    %5 = vector.shape_cast %4 : vector<8xf32> to vector<8x1xf32>
    %cst_6 = arith.constant 1.280000e+02 : f32
    %6 = vector.broadcast %cst_6 : f32 to vector<8x1xf32>
    %7 = arith.divf %5, %6 : vector<8x1xf32>
    %8 = vector.broadcast %7 : vector<8x1xf32> to vector<8x128xf32>
    %9 = arith.subf %1, %8 : vector<8x128xf32>
    %10 = arith.mulf %9, %9 : vector<8x128xf32>
    %cst_7 = arith.constant dense<0.000000e+00> : vector<8xf32>
    %11 = vector.multi_reduction <add>, %10, %cst_7 [1] : vector<8x128xf32> to vector<8xf32>
    %12 = vector.shape_cast %11 : vector<8xf32> to vector<8x1xf32>
    %cst_8 = arith.constant 1.280000e+02 : f32
    %13 = vector.broadcast %cst_8 : f32 to vector<8x1xf32>
    %14 = arith.divf %12, %13 : vector<8x1xf32>
    %cst_9 = arith.constant 9.99999996E-13 : f32
    %15 = vector.broadcast %cst_9 : f32 to vector<8x1xf32>
    %16 = arith.addf %14, %15 : vector<8x1xf32>
    %17 = math.rsqrt %16 : vector<8x1xf32>
    %18 = vector.broadcast %17 : vector<8x1xf32> to vector<8x128xf32>
    %19 = arith.mulf %9, %18 : vector<8x128xf32>
    %20 = vector.broadcast %2 : vector<1x128xf32> to vector<8x128xf32>
    %21 = arith.mulf %19, %20 : vector<8x128xf32>
    %22 = vector.broadcast %3 : vector<1x128xf32> to vector<8x128xf32>
    %23 = arith.addf %21, %22 : vector<8x128xf32>
    %c0_10 = arith.constant 0 : index
    %c0_11 = arith.constant 0 : index
    %c0_12 = arith.constant 0 : index
    %24 = vector.load %arg2[%c0_10, %c0_11, %c0_12] : memref<1x1x8xf32, #tpu.memory_space<vmem>>, vector<1x1x8xf32>
    %25 = vector.shape_cast %24 : vector<1x1x8xf32> to vector<1x8xf32>
    %cst_13 = arith.constant 1.000000e+00 : f32
    %26 = vector.broadcast %cst_13 : f32 to vector<1x8xf32>
    %27 = arith.subf %26, %25 : vector<1x8xf32>
    %cst_14 = arith.constant -1.000000e+04 : f32
    %28 = vector.broadcast %cst_14 : f32 to vector<1x8xf32>
    %29 = arith.mulf %27, %28 : vector<1x8xf32>
    %30 = tpu.iota {dimensions = array<i32: 1>} : vector<1x128xi32>
    %c0_i32 = arith.constant 0 : i32
    %31 = vector.broadcast %c0_i32 : i32 to vector<1x128xi32>
    %32 = arith.cmpi sge, %30, %31 : vector<1x128xi32>
    %c32_i32 = arith.constant 32 : i32
    %33 = vector.broadcast %c32_i32 : i32 to vector<1x128xi32>
    %34 = arith.cmpi slt, %30, %33 : vector<1x128xi32>
    %35 = arith.andi %32, %34 : vector<1x128xi1>
    %36 = arith.extui %35 : vector<1x128xi1> to vector<1x128xi32>
    %37 = arith.sitofp %36 : vector<1x128xi32> to vector<1x128xf32>
    %c32_i32_15 = arith.constant 32 : i32
    %38 = vector.broadcast %c32_i32_15 : i32 to vector<1x128xi32>
    %39 = arith.cmpi sge, %30, %38 : vector<1x128xi32>
    %c64_i32 = arith.constant 64 : i32
    %40 = vector.broadcast %c64_i32 : i32 to vector<1x128xi32>
    %41 = arith.cmpi slt, %30, %40 : vector<1x128xi32>
    %42 = arith.andi %39, %41 : vector<1x128xi1>
    %43 = arith.extui %42 : vector<1x128xi1> to vector<1x128xi32>
    %44 = arith.sitofp %43 : vector<1x128xi32> to vector<1x128xf32>
    %c64_i32_16 = arith.constant 64 : i32
    %45 = vector.broadcast %c64_i32_16 : i32 to vector<1x128xi32>
    %46 = arith.cmpi sge, %30, %45 : vector<1x128xi32>
    %c96_i32 = arith.constant 96 : i32
    %47 = vector.broadcast %c96_i32 : i32 to vector<1x128xi32>
    %48 = arith.cmpi slt, %30, %47 : vector<1x128xi32>
    %49 = arith.andi %46, %48 : vector<1x128xi1>
    %50 = arith.extui %49 : vector<1x128xi1> to vector<1x128xi32>
    %51 = arith.sitofp %50 : vector<1x128xi32> to vector<1x128xf32>
    %c96_i32_17 = arith.constant 96 : i32
    %52 = vector.broadcast %c96_i32_17 : i32 to vector<1x128xi32>
    %53 = arith.cmpi sge, %30, %52 : vector<1x128xi32>
    %c128_i32 = arith.constant 128 : i32
    %54 = vector.broadcast %c128_i32 : i32 to vector<1x128xi32>
    %55 = arith.cmpi slt, %30, %54 : vector<1x128xi32>
    %56 = arith.andi %53, %55 : vector<1x128xi1>
    %57 = arith.extui %56 : vector<1x128xi1> to vector<1x128xi32>
    %58 = arith.sitofp %57 : vector<1x128xi32> to vector<1x128xf32>
    %c0_18 = arith.constant 0 : index
    %c0_19 = arith.constant 0 : index
    %c0_20 = arith.constant 0 : index
    %59 = vector.load %arg6[%c0_18, %c0_19, %c0_20] : memref<2x128x128xbf16, #tpu.memory_space<vmem>>, vector<1x128x128xbf16>
    %60 = vector.shape_cast %59 : vector<1x128x128xbf16> to vector<128x128xbf16>
    %61 = arith.truncf %23 : vector<8x128xf32> to vector<8x128xbf16>
    %cst_21 = arith.constant dense<0.000000e+00> : vector<8x128xf32>
    %62 = tpu.matmul %61, %60, %cst_21 {dimension_numbers = #tpu.dot_dimension_numbers<[1], [0], [0], [1], [0, 0, 1, 1], [], []>} : vector<8x128xbf16>, vector<128x128xbf16>, vector<8x128xf32> -> vector<8x128xf32>
    %c0_22 = arith.constant 0 : index
    %c0_23 = arith.constant 0 : index
    %c0_24 = arith.constant 0 : index
    %63 = vector.load %arg7[%c0_22, %c0_23, %c0_24] : memref<2x1x128xf32, #tpu.memory_space<vmem>>, vector<1x1x128xf32>
    %64 = vector.shape_cast %63 : vector<1x1x128xf32> to vector<1x128xf32>
    %65 = vector.broadcast %64 : vector<1x128xf32> to vector<8x128xf32>
    %66 = arith.addf %62, %65 : vector<8x128xf32>
    %c0_25 = arith.constant 0 : index
    %c0_26 = arith.constant 0 : index
    %c0_27 = arith.constant 0 : index
    %67 = vector.load %arg8[%c0_25, %c0_26, %c0_27] : memref<2x128x128xbf16, #tpu.memory_space<vmem>>, vector<1x128x128xbf16>
    %68 = vector.shape_cast %67 : vector<1x128x128xbf16> to vector<128x128xbf16>
    %69 = arith.truncf %23 : vector<8x128xf32> to vector<8x128xbf16>
    %cst_28 = arith.constant dense<0.000000e+00> : vector<8x128xf32>
    %70 = tpu.matmul %69, %68, %cst_28 {dimension_numbers = #tpu.dot_dimension_numbers<[1], [0], [0], [1], [0, 0, 1, 1], [], []>} : vector<8x128xbf16>, vector<128x128xbf16>, vector<8x128xf32> -> vector<8x128xf32>
    %c0_29 = arith.constant 0 : index
    %c0_30 = arith.constant 0 : index
    %c0_31 = arith.constant 0 : index
    %71 = vector.load %arg9[%c0_29, %c0_30, %c0_31] : memref<2x1x128xf32, #tpu.memory_space<vmem>>, vector<1x1x128xf32>
    %72 = vector.shape_cast %71 : vector<1x1x128xf32> to vector<1x128xf32>
    %73 = vector.broadcast %72 : vector<1x128xf32> to vector<8x128xf32>
    %74 = arith.addf %70, %73 : vector<8x128xf32>
    %c0_32 = arith.constant 0 : index
    %c0_33 = arith.constant 0 : index
    %c0_34 = arith.constant 0 : index
    %75 = vector.load %arg10[%c0_32, %c0_33, %c0_34] : memref<2x128x128xbf16, #tpu.memory_space<vmem>>, vector<1x128x128xbf16>
    %76 = vector.shape_cast %75 : vector<1x128x128xbf16> to vector<128x128xbf16>
    %77 = arith.truncf %23 : vector<8x128xf32> to vector<8x128xbf16>
    %cst_35 = arith.constant dense<0.000000e+00> : vector<8x128xf32>
    %78 = tpu.matmul %77, %76, %cst_35 {dimension_numbers = #tpu.dot_dimension_numbers<[1], [0], [0], [1], [0, 0, 1, 1], [], []>} : vector<8x128xbf16>, vector<128x128xbf16>, vector<8x128xf32> -> vector<8x128xf32>
    %c0_36 = arith.constant 0 : index
    %c0_37 = arith.constant 0 : index
    %c0_38 = arith.constant 0 : index
    %79 = vector.load %arg11[%c0_36, %c0_37, %c0_38] : memref<2x1x128xf32, #tpu.memory_space<vmem>>, vector<1x1x128xf32>
    %80 = vector.shape_cast %79 : vector<1x1x128xf32> to vector<1x128xf32>
    %81 = vector.broadcast %80 : vector<1x128xf32> to vector<8x128xf32>
    %82 = arith.addf %78, %81 : vector<8x128xf32>
    %83 = tpu.transpose %74, [1, 0] : vector<8x128xf32> -> vector<128x8xf32>
    %cst_39 = arith.constant 0.000000e+00 : f32
    %84 = vector.broadcast %cst_39 : f32 to vector<8x128xf32>
    %85 = vector.broadcast %37 : vector<1x128xf32> to vector<8x128xf32>
    %86 = arith.mulf %66, %85 : vector<8x128xf32>
    %cst_40 = arith.constant dense<0.000000e+00> : vector<8x8xf32>
    %87 = tpu.matmul %86, %83, %cst_40 {dimension_numbers = #tpu.dot_dimension_numbers<[1], [0], [0], [1], [0, 0, 1, 1], [], []>} : vector<8x128xf32>, vector<128x8xf32>, vector<8x8xf32> -> vector<8x8xf32>
    %cst_41 = arith.constant 0.176776692 : f32
    %88 = vector.broadcast %cst_41 : f32 to vector<8x8xf32>
    %89 = arith.mulf %87, %88 : vector<8x8xf32>
    %90 = vector.broadcast %29 : vector<1x8xf32> to vector<8x8xf32>
    %91 = arith.addf %89, %90 : vector<8x8xf32>
    %cst_42 = arith.constant dense<0xFF800000> : vector<8xf32>
    %92 = vector.multi_reduction <maximumf>, %91, %cst_42 [1] : vector<8x8xf32> to vector<8xf32>
    %93 = vector.shape_cast %92 : vector<8xf32> to vector<8x1xf32>
    %94 = vector.broadcast %93 : vector<8x1xf32> to vector<8x8xf32>
    %95 = arith.subf %91, %94 : vector<8x8xf32>
    %96 = math.exp %95 : vector<8x8xf32>
    %cst_43 = arith.constant dense<0.000000e+00> : vector<8xf32>
    %97 = vector.multi_reduction <add>, %96, %cst_43 [1] : vector<8x8xf32> to vector<8xf32>
    %98 = vector.shape_cast %97 : vector<8xf32> to vector<8x1xf32>
    %99 = tpu.reciprocal %98 {approx = true} : vector<8x1xf32> -> vector<8x1xf32>
    %100 = vector.broadcast %99 : vector<8x1xf32> to vector<8x8xf32>
    %101 = arith.mulf %96, %100 : vector<8x8xf32>
    %102 = vector.broadcast %37 : vector<1x128xf32> to vector<8x128xf32>
    %103 = arith.mulf %82, %102 : vector<8x128xf32>
    %cst_44 = arith.constant dense<0.000000e+00> : vector<8x128xf32>
    %104 = tpu.matmul %101, %103, %cst_44 {dimension_numbers = #tpu.dot_dimension_numbers<[1], [0], [0], [1], [0, 0, 1, 1], [], []>} : vector<8x8xf32>, vector<8x128xf32>, vector<8x128xf32> -> vector<8x128xf32>
    %105 = arith.addf %84, %104 : vector<8x128xf32>
    %106 = vector.broadcast %44 : vector<1x128xf32> to vector<8x128xf32>
    %107 = arith.mulf %66, %106 : vector<8x128xf32>
    %cst_45 = arith.constant dense<0.000000e+00> : vector<8x8xf32>
    %108 = tpu.matmul %107, %83, %cst_45 {dimension_numbers = #tpu.dot_dimension_numbers<[1], [0], [0], [1], [0, 0, 1, 1], [], []>} : vector<8x128xf32>, vector<128x8xf32>, vector<8x8xf32> -> vector<8x8xf32>
    %cst_46 = arith.constant 0.176776692 : f32
    %109 = vector.broadcast %cst_46 : f32 to vector<8x8xf32>
    %110 = arith.mulf %108, %109 : vector<8x8xf32>
    %111 = vector.broadcast %29 : vector<1x8xf32> to vector<8x8xf32>
    %112 = arith.addf %110, %111 : vector<8x8xf32>
    %cst_47 = arith.constant dense<0xFF800000> : vector<8xf32>
    %113 = vector.multi_reduction <maximumf>, %112, %cst_47 [1] : vector<8x8xf32> to vector<8xf32>
    %114 = vector.shape_cast %113 : vector<8xf32> to vector<8x1xf32>
    %115 = vector.broadcast %114 : vector<8x1xf32> to vector<8x8xf32>
    %116 = arith.subf %112, %115 : vector<8x8xf32>
    %117 = math.exp %116 : vector<8x8xf32>
    %cst_48 = arith.constant dense<0.000000e+00> : vector<8xf32>
    %118 = vector.multi_reduction <add>, %117, %cst_48 [1] : vector<8x8xf32> to vector<8xf32>
    %119 = vector.shape_cast %118 : vector<8xf32> to vector<8x1xf32>
    %120 = tpu.reciprocal %119 {approx = true} : vector<8x1xf32> -> vector<8x1xf32>
    %121 = vector.broadcast %120 : vector<8x1xf32> to vector<8x8xf32>
    %122 = arith.mulf %117, %121 : vector<8x8xf32>
    %123 = vector.broadcast %44 : vector<1x128xf32> to vector<8x128xf32>
    %124 = arith.mulf %82, %123 : vector<8x128xf32>
    %cst_49 = arith.constant dense<0.000000e+00> : vector<8x128xf32>
    %125 = tpu.matmul %122, %124, %cst_49 {dimension_numbers = #tpu.dot_dimension_numbers<[1], [0], [0], [1], [0, 0, 1, 1], [], []>} : vector<8x8xf32>, vector<8x128xf32>, vector<8x128xf32> -> vector<8x128xf32>
    %126 = arith.addf %105, %125 : vector<8x128xf32>
    %127 = vector.broadcast %51 : vector<1x128xf32> to vector<8x128xf32>
    %128 = arith.mulf %66, %127 : vector<8x128xf32>
    %cst_50 = arith.constant dense<0.000000e+00> : vector<8x8xf32>
    %129 = tpu.matmul %128, %83, %cst_50 {dimension_numbers = #tpu.dot_dimension_numbers<[1], [0], [0], [1], [0, 0, 1, 1], [], []>} : vector<8x128xf32>, vector<128x8xf32>, vector<8x8xf32> -> vector<8x8xf32>
    %cst_51 = arith.constant 0.176776692 : f32
    %130 = vector.broadcast %cst_51 : f32 to vector<8x8xf32>
    %131 = arith.mulf %129, %130 : vector<8x8xf32>
    %132 = vector.broadcast %29 : vector<1x8xf32> to vector<8x8xf32>
    %133 = arith.addf %131, %132 : vector<8x8xf32>
    %cst_52 = arith.constant dense<0xFF800000> : vector<8xf32>
    %134 = vector.multi_reduction <maximumf>, %133, %cst_52 [1] : vector<8x8xf32> to vector<8xf32>
    %135 = vector.shape_cast %134 : vector<8xf32> to vector<8x1xf32>
    %136 = vector.broadcast %135 : vector<8x1xf32> to vector<8x8xf32>
    %137 = arith.subf %133, %136 : vector<8x8xf32>
    %138 = math.exp %137 : vector<8x8xf32>
    %cst_53 = arith.constant dense<0.000000e+00> : vector<8xf32>
    %139 = vector.multi_reduction <add>, %138, %cst_53 [1] : vector<8x8xf32> to vector<8xf32>
    %140 = vector.shape_cast %139 : vector<8xf32> to vector<8x1xf32>
    %141 = tpu.reciprocal %140 {approx = true} : vector<8x1xf32> -> vector<8x1xf32>
    %142 = vector.broadcast %141 : vector<8x1xf32> to vector<8x8xf32>
    %143 = arith.mulf %138, %142 : vector<8x8xf32>
    %144 = vector.broadcast %51 : vector<1x128xf32> to vector<8x128xf32>
    %145 = arith.mulf %82, %144 : vector<8x128xf32>
    %cst_54 = arith.constant dense<0.000000e+00> : vector<8x128xf32>
    %146 = tpu.matmul %143, %145, %cst_54 {dimension_numbers = #tpu.dot_dimension_numbers<[1], [0], [0], [1], [0, 0, 1, 1], [], []>} : vector<8x8xf32>, vector<8x128xf32>, vector<8x128xf32> -> vector<8x128xf32>
    %147 = arith.addf %126, %146 : vector<8x128xf32>
    %148 = vector.broadcast %58 : vector<1x128xf32> to vector<8x128xf32>
    %149 = arith.mulf %66, %148 : vector<8x128xf32>
    %cst_55 = arith.constant dense<0.000000e+00> : vector<8x8xf32>
    %150 = tpu.matmul %149, %83, %cst_55 {dimension_numbers = #tpu.dot_dimension_numbers<[1], [0], [0], [1], [0, 0, 1, 1], [], []>} : vector<8x128xf32>, vector<128x8xf32>, vector<8x8xf32> -> vector<8x8xf32>
    %cst_56 = arith.constant 0.176776692 : f32
    %151 = vector.broadcast %cst_56 : f32 to vector<8x8xf32>
    %152 = arith.mulf %150, %151 : vector<8x8xf32>
    %153 = vector.broadcast %29 : vector<1x8xf32> to vector<8x8xf32>
    %154 = arith.addf %152, %153 : vector<8x8xf32>
    %cst_57 = arith.constant dense<0xFF800000> : vector<8xf32>
    %155 = vector.multi_reduction <maximumf>, %154, %cst_57 [1] : vector<8x8xf32> to vector<8xf32>
    %156 = vector.shape_cast %155 : vector<8xf32> to vector<8x1xf32>
    %157 = vector.broadcast %156 : vector<8x1xf32> to vector<8x8xf32>
    %158 = arith.subf %154, %157 : vector<8x8xf32>
    %159 = math.exp %158 : vector<8x8xf32>
    %cst_58 = arith.constant dense<0.000000e+00> : vector<8xf32>
    %160 = vector.multi_reduction <add>, %159, %cst_58 [1] : vector<8x8xf32> to vector<8xf32>
    %161 = vector.shape_cast %160 : vector<8xf32> to vector<8x1xf32>
    %162 = tpu.reciprocal %161 {approx = true} : vector<8x1xf32> -> vector<8x1xf32>
    %163 = vector.broadcast %162 : vector<8x1xf32> to vector<8x8xf32>
    %164 = arith.mulf %159, %163 : vector<8x8xf32>
    %165 = vector.broadcast %58 : vector<1x128xf32> to vector<8x128xf32>
    %166 = arith.mulf %82, %165 : vector<8x128xf32>
    %cst_59 = arith.constant dense<0.000000e+00> : vector<8x128xf32>
    %167 = tpu.matmul %164, %166, %cst_59 {dimension_numbers = #tpu.dot_dimension_numbers<[1], [0], [0], [1], [0, 0, 1, 1], [], []>} : vector<8x8xf32>, vector<8x128xf32>, vector<8x128xf32> -> vector<8x128xf32>
    %168 = arith.addf %147, %167 : vector<8x128xf32>
    %c0_60 = arith.constant 0 : index
    %c0_61 = arith.constant 0 : index
    %c0_62 = arith.constant 0 : index
    %169 = vector.load %arg12[%c0_60, %c0_61, %c0_62] : memref<2x128x128xbf16, #tpu.memory_space<vmem>>, vector<1x128x128xbf16>
    %170 = vector.shape_cast %169 : vector<1x128x128xbf16> to vector<128x128xbf16>
    %171 = arith.truncf %168 : vector<8x128xf32> to vector<8x128xbf16>
    %cst_63 = arith.constant dense<0.000000e+00> : vector<8x128xf32>
    %172 = tpu.matmul %171, %170, %cst_63 {dimension_numbers = #tpu.dot_dimension_numbers<[1], [0], [0], [1], [0, 0, 1, 1], [], []>} : vector<8x128xbf16>, vector<128x128xbf16>, vector<8x128xf32> -> vector<8x128xf32>
    %c0_64 = arith.constant 0 : index
    %c0_65 = arith.constant 0 : index
    %c0_66 = arith.constant 0 : index
    %173 = vector.load %arg13[%c0_64, %c0_65, %c0_66] : memref<2x1x128xf32, #tpu.memory_space<vmem>>, vector<1x1x128xf32>
    %174 = vector.shape_cast %173 : vector<1x1x128xf32> to vector<1x128xf32>
    %175 = vector.broadcast %174 : vector<1x128xf32> to vector<8x128xf32>
    %176 = arith.addf %172, %175 : vector<8x128xf32>
    %177 = arith.addf %176, %23 : vector<8x128xf32>
    %c0_67 = arith.constant 0 : index
    %c0_68 = arith.constant 0 : index
    %c0_69 = arith.constant 0 : index
    %178 = vector.load %arg14[%c0_67, %c0_68, %c0_69] : memref<2x1x128xf32, #tpu.memory_space<vmem>>, vector<1x1x128xf32>
    %179 = vector.shape_cast %178 : vector<1x1x128xf32> to vector<1x128xf32>
    %c0_70 = arith.constant 0 : index
    %c0_71 = arith.constant 0 : index
    %c0_72 = arith.constant 0 : index
    %180 = vector.load %arg15[%c0_70, %c0_71, %c0_72] : memref<2x1x128xf32, #tpu.memory_space<vmem>>, vector<1x1x128xf32>
    %181 = vector.shape_cast %180 : vector<1x1x128xf32> to vector<1x128xf32>
    %cst_73 = arith.constant dense<0.000000e+00> : vector<8xf32>
    %182 = vector.multi_reduction <add>, %177, %cst_73 [1] : vector<8x128xf32> to vector<8xf32>
    %183 = vector.shape_cast %182 : vector<8xf32> to vector<8x1xf32>
    %cst_74 = arith.constant 1.280000e+02 : f32
    %184 = vector.broadcast %cst_74 : f32 to vector<8x1xf32>
    %185 = arith.divf %183, %184 : vector<8x1xf32>
    %186 = vector.broadcast %185 : vector<8x1xf32> to vector<8x128xf32>
    %187 = arith.subf %177, %186 : vector<8x128xf32>
    %188 = arith.mulf %187, %187 : vector<8x128xf32>
    %cst_75 = arith.constant dense<0.000000e+00> : vector<8xf32>
    %189 = vector.multi_reduction <add>, %188, %cst_75 [1] : vector<8x128xf32> to vector<8xf32>
    %190 = vector.shape_cast %189 : vector<8xf32> to vector<8x1xf32>
    %cst_76 = arith.constant 1.280000e+02 : f32
    %191 = vector.broadcast %cst_76 : f32 to vector<8x1xf32>
    %192 = arith.divf %190, %191 : vector<8x1xf32>
    %cst_77 = arith.constant 9.99999996E-13 : f32
    %193 = vector.broadcast %cst_77 : f32 to vector<8x1xf32>
    %194 = arith.addf %192, %193 : vector<8x1xf32>
    %195 = math.rsqrt %194 : vector<8x1xf32>
    %196 = vector.broadcast %195 : vector<8x1xf32> to vector<8x128xf32>
    %197 = arith.mulf %187, %196 : vector<8x128xf32>
    %198 = vector.broadcast %179 : vector<1x128xf32> to vector<8x128xf32>
    %199 = arith.mulf %197, %198 : vector<8x128xf32>
    %200 = vector.broadcast %181 : vector<1x128xf32> to vector<8x128xf32>
    %201 = arith.addf %199, %200 : vector<8x128xf32>
    %c0_78 = arith.constant 0 : index
    %c0_79 = arith.constant 0 : index
    %c0_80 = arith.constant 0 : index
    %202 = vector.load %arg16[%c0_78, %c0_79, %c0_80] : memref<2x128x512xbf16, #tpu.memory_space<vmem>>, vector<1x128x512xbf16>
    %203 = vector.shape_cast %202 : vector<1x128x512xbf16> to vector<128x512xbf16>
    %204 = arith.truncf %201 : vector<8x128xf32> to vector<8x128xbf16>
    %cst_81 = arith.constant dense<0.000000e+00> : vector<8x512xf32>
    %205 = tpu.matmul %204, %203, %cst_81 {dimension_numbers = #tpu.dot_dimension_numbers<[1], [0], [0], [1], [0, 0, 1, 1], [], []>} : vector<8x128xbf16>, vector<128x512xbf16>, vector<8x512xf32> -> vector<8x512xf32>
    %c0_82 = arith.constant 0 : index
    %c0_83 = arith.constant 0 : index
    %c0_84 = arith.constant 0 : index
    %206 = vector.load %arg17[%c0_82, %c0_83, %c0_84] : memref<2x1x512xf32, #tpu.memory_space<vmem>>, vector<1x1x512xf32>
    %207 = vector.shape_cast %206 : vector<1x1x512xf32> to vector<1x512xf32>
    %208 = vector.broadcast %207 : vector<1x512xf32> to vector<8x512xf32>
    %209 = arith.addf %205, %208 : vector<8x512xf32>
    %210 = arith.mulf %209, %209 : vector<8x512xf32>
    %211 = arith.mulf %209, %210 : vector<8x512xf32>
    %cst_85 = arith.constant 4.471500e-02 : f32
    %212 = vector.broadcast %cst_85 : f32 to vector<8x512xf32>
    %213 = arith.mulf %212, %211 : vector<8x512xf32>
    %214 = arith.addf %209, %213 : vector<8x512xf32>
    %cst_86 = arith.constant 0.797884583 : f32
    %215 = vector.broadcast %cst_86 : f32 to vector<8x512xf32>
    %216 = arith.mulf %215, %214 : vector<8x512xf32>
    %217 = math.tanh %216 : vector<8x512xf32>
    %cst_87 = arith.constant 1.000000e+00 : f32
    %218 = vector.broadcast %cst_87 : f32 to vector<8x512xf32>
    %219 = arith.addf %218, %217 : vector<8x512xf32>
    %cst_88 = arith.constant 5.000000e-01 : f32
    %220 = vector.broadcast %cst_88 : f32 to vector<8x512xf32>
    %221 = arith.mulf %220, %219 : vector<8x512xf32>
    %222 = arith.mulf %209, %221 : vector<8x512xf32>
    %c0_89 = arith.constant 0 : index
    %c0_90 = arith.constant 0 : index
    %c0_91 = arith.constant 0 : index
    %223 = vector.load %arg18[%c0_89, %c0_90, %c0_91] : memref<2x512x128xbf16, #tpu.memory_space<vmem>>, vector<1x512x128xbf16>
    %224 = vector.shape_cast %223 : vector<1x512x128xbf16> to vector<512x128xbf16>
    %225 = arith.truncf %222 : vector<8x512xf32> to vector<8x512xbf16>
    %cst_92 = arith.constant dense<0.000000e+00> : vector<8x128xf32>
    %226 = tpu.matmul %225, %224, %cst_92 {dimension_numbers = #tpu.dot_dimension_numbers<[1], [0], [0], [1], [0, 0, 1, 1], [], []>} : vector<8x512xbf16>, vector<512x128xbf16>, vector<8x128xf32> -> vector<8x128xf32>
    %c0_93 = arith.constant 0 : index
    %c0_94 = arith.constant 0 : index
    %c0_95 = arith.constant 0 : index
    %227 = vector.load %arg19[%c0_93, %c0_94, %c0_95] : memref<2x1x128xf32, #tpu.memory_space<vmem>>, vector<1x1x128xf32>
    %228 = vector.shape_cast %227 : vector<1x1x128xf32> to vector<1x128xf32>
    %229 = vector.broadcast %228 : vector<1x128xf32> to vector<8x128xf32>
    %230 = arith.addf %226, %229 : vector<8x128xf32>
    %231 = arith.addf %230, %201 : vector<8x128xf32>
    %c0_96 = arith.constant 0 : index
    %c0_97 = arith.constant 0 : index
    %c0_98 = arith.constant 0 : index
    %232 = vector.load %arg20[%c0_96, %c0_97, %c0_98] : memref<2x1x128xf32, #tpu.memory_space<vmem>>, vector<1x1x128xf32>
    %233 = vector.shape_cast %232 : vector<1x1x128xf32> to vector<1x128xf32>
    %c0_99 = arith.constant 0 : index
    %c0_100 = arith.constant 0 : index
    %c0_101 = arith.constant 0 : index
    %234 = vector.load %arg21[%c0_99, %c0_100, %c0_101] : memref<2x1x128xf32, #tpu.memory_space<vmem>>, vector<1x1x128xf32>
    %235 = vector.shape_cast %234 : vector<1x1x128xf32> to vector<1x128xf32>
    %cst_102 = arith.constant dense<0.000000e+00> : vector<8xf32>
    %236 = vector.multi_reduction <add>, %231, %cst_102 [1] : vector<8x128xf32> to vector<8xf32>
    %237 = vector.shape_cast %236 : vector<8xf32> to vector<8x1xf32>
    %cst_103 = arith.constant 1.280000e+02 : f32
    %238 = vector.broadcast %cst_103 : f32 to vector<8x1xf32>
    %239 = arith.divf %237, %238 : vector<8x1xf32>
    %240 = vector.broadcast %239 : vector<8x1xf32> to vector<8x128xf32>
    %241 = arith.subf %231, %240 : vector<8x128xf32>
    %242 = arith.mulf %241, %241 : vector<8x128xf32>
    %cst_104 = arith.constant dense<0.000000e+00> : vector<8xf32>
    %243 = vector.multi_reduction <add>, %242, %cst_104 [1] : vector<8x128xf32> to vector<8xf32>
    %244 = vector.shape_cast %243 : vector<8xf32> to vector<8x1xf32>
    %cst_105 = arith.constant 1.280000e+02 : f32
    %245 = vector.broadcast %cst_105 : f32 to vector<8x1xf32>
    %246 = arith.divf %244, %245 : vector<8x1xf32>
    %cst_106 = arith.constant 9.99999996E-13 : f32
    %247 = vector.broadcast %cst_106 : f32 to vector<8x1xf32>
    %248 = arith.addf %246, %247 : vector<8x1xf32>
    %249 = math.rsqrt %248 : vector<8x1xf32>
    %250 = vector.broadcast %249 : vector<8x1xf32> to vector<8x128xf32>
    %251 = arith.mulf %241, %250 : vector<8x128xf32>
    %252 = vector.broadcast %233 : vector<1x128xf32> to vector<8x128xf32>
    %253 = arith.mulf %251, %252 : vector<8x128xf32>
    %254 = vector.broadcast %235 : vector<1x128xf32> to vector<8x128xf32>
    %255 = arith.addf %253, %254 : vector<8x128xf32>
    %c1 = arith.constant 1 : index
    %c0_107 = arith.constant 0 : index
    %c0_108 = arith.constant 0 : index
    %256 = vector.load %arg6[%c1, %c0_107, %c0_108] : memref<2x128x128xbf16, #tpu.memory_space<vmem>>, vector<1x128x128xbf16>
    %257 = vector.shape_cast %256 : vector<1x128x128xbf16> to vector<128x128xbf16>
    %258 = arith.truncf %255 : vector<8x128xf32> to vector<8x128xbf16>
    %cst_109 = arith.constant dense<0.000000e+00> : vector<8x128xf32>
    %259 = tpu.matmul %258, %257, %cst_109 {dimension_numbers = #tpu.dot_dimension_numbers<[1], [0], [0], [1], [0, 0, 1, 1], [], []>} : vector<8x128xbf16>, vector<128x128xbf16>, vector<8x128xf32> -> vector<8x128xf32>
    %c1_110 = arith.constant 1 : index
    %c0_111 = arith.constant 0 : index
    %c0_112 = arith.constant 0 : index
    %260 = vector.load %arg7[%c1_110, %c0_111, %c0_112] : memref<2x1x128xf32, #tpu.memory_space<vmem>>, vector<1x1x128xf32>
    %261 = vector.shape_cast %260 : vector<1x1x128xf32> to vector<1x128xf32>
    %262 = vector.broadcast %261 : vector<1x128xf32> to vector<8x128xf32>
    %263 = arith.addf %259, %262 : vector<8x128xf32>
    %c1_113 = arith.constant 1 : index
    %c0_114 = arith.constant 0 : index
    %c0_115 = arith.constant 0 : index
    %264 = vector.load %arg8[%c1_113, %c0_114, %c0_115] : memref<2x128x128xbf16, #tpu.memory_space<vmem>>, vector<1x128x128xbf16>
    %265 = vector.shape_cast %264 : vector<1x128x128xbf16> to vector<128x128xbf16>
    %266 = arith.truncf %255 : vector<8x128xf32> to vector<8x128xbf16>
    %cst_116 = arith.constant dense<0.000000e+00> : vector<8x128xf32>
    %267 = tpu.matmul %266, %265, %cst_116 {dimension_numbers = #tpu.dot_dimension_numbers<[1], [0], [0], [1], [0, 0, 1, 1], [], []>} : vector<8x128xbf16>, vector<128x128xbf16>, vector<8x128xf32> -> vector<8x128xf32>
    %c1_117 = arith.constant 1 : index
    %c0_118 = arith.constant 0 : index
    %c0_119 = arith.constant 0 : index
    %268 = vector.load %arg9[%c1_117, %c0_118, %c0_119] : memref<2x1x128xf32, #tpu.memory_space<vmem>>, vector<1x1x128xf32>
    %269 = vector.shape_cast %268 : vector<1x1x128xf32> to vector<1x128xf32>
    %270 = vector.broadcast %269 : vector<1x128xf32> to vector<8x128xf32>
    %271 = arith.addf %267, %270 : vector<8x128xf32>
    %c1_120 = arith.constant 1 : index
    %c0_121 = arith.constant 0 : index
    %c0_122 = arith.constant 0 : index
    %272 = vector.load %arg10[%c1_120, %c0_121, %c0_122] : memref<2x128x128xbf16, #tpu.memory_space<vmem>>, vector<1x128x128xbf16>
    %273 = vector.shape_cast %272 : vector<1x128x128xbf16> to vector<128x128xbf16>
    %274 = arith.truncf %255 : vector<8x128xf32> to vector<8x128xbf16>
    %cst_123 = arith.constant dense<0.000000e+00> : vector<8x128xf32>
    %275 = tpu.matmul %274, %273, %cst_123 {dimension_numbers = #tpu.dot_dimension_numbers<[1], [0], [0], [1], [0, 0, 1, 1], [], []>} : vector<8x128xbf16>, vector<128x128xbf16>, vector<8x128xf32> -> vector<8x128xf32>
    %c1_124 = arith.constant 1 : index
    %c0_125 = arith.constant 0 : index
    %c0_126 = arith.constant 0 : index
    %276 = vector.load %arg11[%c1_124, %c0_125, %c0_126] : memref<2x1x128xf32, #tpu.memory_space<vmem>>, vector<1x1x128xf32>
    %277 = vector.shape_cast %276 : vector<1x1x128xf32> to vector<1x128xf32>
    %278 = vector.broadcast %277 : vector<1x128xf32> to vector<8x128xf32>
    %279 = arith.addf %275, %278 : vector<8x128xf32>
    %280 = tpu.transpose %271, [1, 0] : vector<8x128xf32> -> vector<128x8xf32>
    %cst_127 = arith.constant 0.000000e+00 : f32
    %281 = vector.broadcast %cst_127 : f32 to vector<8x128xf32>
    %282 = vector.broadcast %37 : vector<1x128xf32> to vector<8x128xf32>
    %283 = arith.mulf %263, %282 : vector<8x128xf32>
    %cst_128 = arith.constant dense<0.000000e+00> : vector<8x8xf32>
    %284 = tpu.matmul %283, %280, %cst_128 {dimension_numbers = #tpu.dot_dimension_numbers<[1], [0], [0], [1], [0, 0, 1, 1], [], []>} : vector<8x128xf32>, vector<128x8xf32>, vector<8x8xf32> -> vector<8x8xf32>
    %cst_129 = arith.constant 0.176776692 : f32
    %285 = vector.broadcast %cst_129 : f32 to vector<8x8xf32>
    %286 = arith.mulf %284, %285 : vector<8x8xf32>
    %287 = vector.broadcast %29 : vector<1x8xf32> to vector<8x8xf32>
    %288 = arith.addf %286, %287 : vector<8x8xf32>
    %cst_130 = arith.constant dense<0xFF800000> : vector<8xf32>
    %289 = vector.multi_reduction <maximumf>, %288, %cst_130 [1] : vector<8x8xf32> to vector<8xf32>
    %290 = vector.shape_cast %289 : vector<8xf32> to vector<8x1xf32>
    %291 = vector.broadcast %290 : vector<8x1xf32> to vector<8x8xf32>
    %292 = arith.subf %288, %291 : vector<8x8xf32>
    %293 = math.exp %292 : vector<8x8xf32>
    %cst_131 = arith.constant dense<0.000000e+00> : vector<8xf32>
    %294 = vector.multi_reduction <add>, %293, %cst_131 [1] : vector<8x8xf32> to vector<8xf32>
    %295 = vector.shape_cast %294 : vector<8xf32> to vector<8x1xf32>
    %296 = tpu.reciprocal %295 {approx = true} : vector<8x1xf32> -> vector<8x1xf32>
    %297 = vector.broadcast %296 : vector<8x1xf32> to vector<8x8xf32>
    %298 = arith.mulf %293, %297 : vector<8x8xf32>
    %299 = vector.broadcast %37 : vector<1x128xf32> to vector<8x128xf32>
    %300 = arith.mulf %279, %299 : vector<8x128xf32>
    %cst_132 = arith.constant dense<0.000000e+00> : vector<8x128xf32>
    %301 = tpu.matmul %298, %300, %cst_132 {dimension_numbers = #tpu.dot_dimension_numbers<[1], [0], [0], [1], [0, 0, 1, 1], [], []>} : vector<8x8xf32>, vector<8x128xf32>, vector<8x128xf32> -> vector<8x128xf32>
    %302 = arith.addf %281, %301 : vector<8x128xf32>
    %303 = vector.broadcast %44 : vector<1x128xf32> to vector<8x128xf32>
    %304 = arith.mulf %263, %303 : vector<8x128xf32>
    %cst_133 = arith.constant dense<0.000000e+00> : vector<8x8xf32>
    %305 = tpu.matmul %304, %280, %cst_133 {dimension_numbers = #tpu.dot_dimension_numbers<[1], [0], [0], [1], [0, 0, 1, 1], [], []>} : vector<8x128xf32>, vector<128x8xf32>, vector<8x8xf32> -> vector<8x8xf32>
    %cst_134 = arith.constant 0.176776692 : f32
    %306 = vector.broadcast %cst_134 : f32 to vector<8x8xf32>
    %307 = arith.mulf %305, %306 : vector<8x8xf32>
    %308 = vector.broadcast %29 : vector<1x8xf32> to vector<8x8xf32>
    %309 = arith.addf %307, %308 : vector<8x8xf32>
    %cst_135 = arith.constant dense<0xFF800000> : vector<8xf32>
    %310 = vector.multi_reduction <maximumf>, %309, %cst_135 [1] : vector<8x8xf32> to vector<8xf32>
    %311 = vector.shape_cast %310 : vector<8xf32> to vector<8x1xf32>
    %312 = vector.broadcast %311 : vector<8x1xf32> to vector<8x8xf32>
    %313 = arith.subf %309, %312 : vector<8x8xf32>
    %314 = math.exp %313 : vector<8x8xf32>
    %cst_136 = arith.constant dense<0.000000e+00> : vector<8xf32>
    %315 = vector.multi_reduction <add>, %314, %cst_136 [1] : vector<8x8xf32> to vector<8xf32>
    %316 = vector.shape_cast %315 : vector<8xf32> to vector<8x1xf32>
    %317 = tpu.reciprocal %316 {approx = true} : vector<8x1xf32> -> vector<8x1xf32>
    %318 = vector.broadcast %317 : vector<8x1xf32> to vector<8x8xf32>
    %319 = arith.mulf %314, %318 : vector<8x8xf32>
    %320 = vector.broadcast %44 : vector<1x128xf32> to vector<8x128xf32>
    %321 = arith.mulf %279, %320 : vector<8x128xf32>
    %cst_137 = arith.constant dense<0.000000e+00> : vector<8x128xf32>
    %322 = tpu.matmul %319, %321, %cst_137 {dimension_numbers = #tpu.dot_dimension_numbers<[1], [0], [0], [1], [0, 0, 1, 1], [], []>} : vector<8x8xf32>, vector<8x128xf32>, vector<8x128xf32> -> vector<8x128xf32>
    %323 = arith.addf %302, %322 : vector<8x128xf32>
    %324 = vector.broadcast %51 : vector<1x128xf32> to vector<8x128xf32>
    %325 = arith.mulf %263, %324 : vector<8x128xf32>
    %cst_138 = arith.constant dense<0.000000e+00> : vector<8x8xf32>
    %326 = tpu.matmul %325, %280, %cst_138 {dimension_numbers = #tpu.dot_dimension_numbers<[1], [0], [0], [1], [0, 0, 1, 1], [], []>} : vector<8x128xf32>, vector<128x8xf32>, vector<8x8xf32> -> vector<8x8xf32>
    %cst_139 = arith.constant 0.176776692 : f32
    %327 = vector.broadcast %cst_139 : f32 to vector<8x8xf32>
    %328 = arith.mulf %326, %327 : vector<8x8xf32>
    %329 = vector.broadcast %29 : vector<1x8xf32> to vector<8x8xf32>
    %330 = arith.addf %328, %329 : vector<8x8xf32>
    %cst_140 = arith.constant dense<0xFF800000> : vector<8xf32>
    %331 = vector.multi_reduction <maximumf>, %330, %cst_140 [1] : vector<8x8xf32> to vector<8xf32>
    %332 = vector.shape_cast %331 : vector<8xf32> to vector<8x1xf32>
    %333 = vector.broadcast %332 : vector<8x1xf32> to vector<8x8xf32>
    %334 = arith.subf %330, %333 : vector<8x8xf32>
    %335 = math.exp %334 : vector<8x8xf32>
    %cst_141 = arith.constant dense<0.000000e+00> : vector<8xf32>
    %336 = vector.multi_reduction <add>, %335, %cst_141 [1] : vector<8x8xf32> to vector<8xf32>
    %337 = vector.shape_cast %336 : vector<8xf32> to vector<8x1xf32>
    %338 = tpu.reciprocal %337 {approx = true} : vector<8x1xf32> -> vector<8x1xf32>
    %339 = vector.broadcast %338 : vector<8x1xf32> to vector<8x8xf32>
    %340 = arith.mulf %335, %339 : vector<8x8xf32>
    %341 = vector.broadcast %51 : vector<1x128xf32> to vector<8x128xf32>
    %342 = arith.mulf %279, %341 : vector<8x128xf32>
    %cst_142 = arith.constant dense<0.000000e+00> : vector<8x128xf32>
    %343 = tpu.matmul %340, %342, %cst_142 {dimension_numbers = #tpu.dot_dimension_numbers<[1], [0], [0], [1], [0, 0, 1, 1], [], []>} : vector<8x8xf32>, vector<8x128xf32>, vector<8x128xf32> -> vector<8x128xf32>
    %344 = arith.addf %323, %343 : vector<8x128xf32>
    %345 = vector.broadcast %58 : vector<1x128xf32> to vector<8x128xf32>
    %346 = arith.mulf %263, %345 : vector<8x128xf32>
    %cst_143 = arith.constant dense<0.000000e+00> : vector<8x8xf32>
    %347 = tpu.matmul %346, %280, %cst_143 {dimension_numbers = #tpu.dot_dimension_numbers<[1], [0], [0], [1], [0, 0, 1, 1], [], []>} : vector<8x128xf32>, vector<128x8xf32>, vector<8x8xf32> -> vector<8x8xf32>
    %cst_144 = arith.constant 0.176776692 : f32
    %348 = vector.broadcast %cst_144 : f32 to vector<8x8xf32>
    %349 = arith.mulf %347, %348 : vector<8x8xf32>
    %350 = vector.broadcast %29 : vector<1x8xf32> to vector<8x8xf32>
    %351 = arith.addf %349, %350 : vector<8x8xf32>
    %cst_145 = arith.constant dense<0xFF800000> : vector<8xf32>
    %352 = vector.multi_reduction <maximumf>, %351, %cst_145 [1] : vector<8x8xf32> to vector<8xf32>
    %353 = vector.shape_cast %352 : vector<8xf32> to vector<8x1xf32>
    %354 = vector.broadcast %353 : vector<8x1xf32> to vector<8x8xf32>
    %355 = arith.subf %351, %354 : vector<8x8xf32>
    %356 = math.exp %355 : vector<8x8xf32>
    %cst_146 = arith.constant dense<0.000000e+00> : vector<8xf32>
    %357 = vector.multi_reduction <add>, %356, %cst_146 [1] : vector<8x8xf32> to vector<8xf32>
    %358 = vector.shape_cast %357 : vector<8xf32> to vector<8x1xf32>
    %359 = tpu.reciprocal %358 {approx = true} : vector<8x1xf32> -> vector<8x1xf32>
    %360 = vector.broadcast %359 : vector<8x1xf32> to vector<8x8xf32>
    %361 = arith.mulf %356, %360 : vector<8x8xf32>
    %362 = vector.broadcast %58 : vector<1x128xf32> to vector<8x128xf32>
    %363 = arith.mulf %279, %362 : vector<8x128xf32>
    %cst_147 = arith.constant dense<0.000000e+00> : vector<8x128xf32>
    %364 = tpu.matmul %361, %363, %cst_147 {dimension_numbers = #tpu.dot_dimension_numbers<[1], [0], [0], [1], [0, 0, 1, 1], [], []>} : vector<8x8xf32>, vector<8x128xf32>, vector<8x128xf32> -> vector<8x128xf32>
    %365 = arith.addf %344, %364 : vector<8x128xf32>
    %c1_148 = arith.constant 1 : index
    %c0_149 = arith.constant 0 : index
    %c0_150 = arith.constant 0 : index
    %366 = vector.load %arg12[%c1_148, %c0_149, %c0_150] : memref<2x128x128xbf16, #tpu.memory_space<vmem>>, vector<1x128x128xbf16>
    %367 = vector.shape_cast %366 : vector<1x128x128xbf16> to vector<128x128xbf16>
    %368 = arith.truncf %365 : vector<8x128xf32> to vector<8x128xbf16>
    %cst_151 = arith.constant dense<0.000000e+00> : vector<8x128xf32>
    %369 = tpu.matmul %368, %367, %cst_151 {dimension_numbers = #tpu.dot_dimension_numbers<[1], [0], [0], [1], [0, 0, 1, 1], [], []>} : vector<8x128xbf16>, vector<128x128xbf16>, vector<8x128xf32> -> vector<8x128xf32>
    %c1_152 = arith.constant 1 : index
    %c0_153 = arith.constant 0 : index
    %c0_154 = arith.constant 0 : index
    %370 = vector.load %arg13[%c1_152, %c0_153, %c0_154] : memref<2x1x128xf32, #tpu.memory_space<vmem>>, vector<1x1x128xf32>
    %371 = vector.shape_cast %370 : vector<1x1x128xf32> to vector<1x128xf32>
    %372 = vector.broadcast %371 : vector<1x128xf32> to vector<8x128xf32>
    %373 = arith.addf %369, %372 : vector<8x128xf32>
    %374 = arith.addf %373, %255 : vector<8x128xf32>
    %c1_155 = arith.constant 1 : index
    %c0_156 = arith.constant 0 : index
    %c0_157 = arith.constant 0 : index
    %375 = vector.load %arg14[%c1_155, %c0_156, %c0_157] : memref<2x1x128xf32, #tpu.memory_space<vmem>>, vector<1x1x128xf32>
    %376 = vector.shape_cast %375 : vector<1x1x128xf32> to vector<1x128xf32>
    %c1_158 = arith.constant 1 : index
    %c0_159 = arith.constant 0 : index
    %c0_160 = arith.constant 0 : index
    %377 = vector.load %arg15[%c1_158, %c0_159, %c0_160] : memref<2x1x128xf32, #tpu.memory_space<vmem>>, vector<1x1x128xf32>
    %378 = vector.shape_cast %377 : vector<1x1x128xf32> to vector<1x128xf32>
    %cst_161 = arith.constant dense<0.000000e+00> : vector<8xf32>
    %379 = vector.multi_reduction <add>, %374, %cst_161 [1] : vector<8x128xf32> to vector<8xf32>
    %380 = vector.shape_cast %379 : vector<8xf32> to vector<8x1xf32>
    %cst_162 = arith.constant 1.280000e+02 : f32
    %381 = vector.broadcast %cst_162 : f32 to vector<8x1xf32>
    %382 = arith.divf %380, %381 : vector<8x1xf32>
    %383 = vector.broadcast %382 : vector<8x1xf32> to vector<8x128xf32>
    %384 = arith.subf %374, %383 : vector<8x128xf32>
    %385 = arith.mulf %384, %384 : vector<8x128xf32>
    %cst_163 = arith.constant dense<0.000000e+00> : vector<8xf32>
    %386 = vector.multi_reduction <add>, %385, %cst_163 [1] : vector<8x128xf32> to vector<8xf32>
    %387 = vector.shape_cast %386 : vector<8xf32> to vector<8x1xf32>
    %cst_164 = arith.constant 1.280000e+02 : f32
    %388 = vector.broadcast %cst_164 : f32 to vector<8x1xf32>
    %389 = arith.divf %387, %388 : vector<8x1xf32>
    %cst_165 = arith.constant 9.99999996E-13 : f32
    %390 = vector.broadcast %cst_165 : f32 to vector<8x1xf32>
    %391 = arith.addf %389, %390 : vector<8x1xf32>
    %392 = math.rsqrt %391 : vector<8x1xf32>
    %393 = vector.broadcast %392 : vector<8x1xf32> to vector<8x128xf32>
    %394 = arith.mulf %384, %393 : vector<8x128xf32>
    %395 = vector.broadcast %376 : vector<1x128xf32> to vector<8x128xf32>
    %396 = arith.mulf %394, %395 : vector<8x128xf32>
    %397 = vector.broadcast %378 : vector<1x128xf32> to vector<8x128xf32>
    %398 = arith.addf %396, %397 : vector<8x128xf32>
    %c1_166 = arith.constant 1 : index
    %c0_167 = arith.constant 0 : index
    %c0_168 = arith.constant 0 : index
    %399 = vector.load %arg16[%c1_166, %c0_167, %c0_168] : memref<2x128x512xbf16, #tpu.memory_space<vmem>>, vector<1x128x512xbf16>
    %400 = vector.shape_cast %399 : vector<1x128x512xbf16> to vector<128x512xbf16>
    %401 = arith.truncf %398 : vector<8x128xf32> to vector<8x128xbf16>
    %cst_169 = arith.constant dense<0.000000e+00> : vector<8x512xf32>
    %402 = tpu.matmul %401, %400, %cst_169 {dimension_numbers = #tpu.dot_dimension_numbers<[1], [0], [0], [1], [0, 0, 1, 1], [], []>} : vector<8x128xbf16>, vector<128x512xbf16>, vector<8x512xf32> -> vector<8x512xf32>
    %c1_170 = arith.constant 1 : index
    %c0_171 = arith.constant 0 : index
    %c0_172 = arith.constant 0 : index
    %403 = vector.load %arg17[%c1_170, %c0_171, %c0_172] : memref<2x1x512xf32, #tpu.memory_space<vmem>>, vector<1x1x512xf32>
    %404 = vector.shape_cast %403 : vector<1x1x512xf32> to vector<1x512xf32>
    %405 = vector.broadcast %404 : vector<1x512xf32> to vector<8x512xf32>
    %406 = arith.addf %402, %405 : vector<8x512xf32>
    %407 = arith.mulf %406, %406 : vector<8x512xf32>
    %408 = arith.mulf %406, %407 : vector<8x512xf32>
    %cst_173 = arith.constant 4.471500e-02 : f32
    %409 = vector.broadcast %cst_173 : f32 to vector<8x512xf32>
    %410 = arith.mulf %409, %408 : vector<8x512xf32>
    %411 = arith.addf %406, %410 : vector<8x512xf32>
    %cst_174 = arith.constant 0.797884583 : f32
    %412 = vector.broadcast %cst_174 : f32 to vector<8x512xf32>
    %413 = arith.mulf %412, %411 : vector<8x512xf32>
    %414 = math.tanh %413 : vector<8x512xf32>
    %cst_175 = arith.constant 1.000000e+00 : f32
    %415 = vector.broadcast %cst_175 : f32 to vector<8x512xf32>
    %416 = arith.addf %415, %414 : vector<8x512xf32>
    %cst_176 = arith.constant 5.000000e-01 : f32
    %417 = vector.broadcast %cst_176 : f32 to vector<8x512xf32>
    %418 = arith.mulf %417, %416 : vector<8x512xf32>
    %419 = arith.mulf %406, %418 : vector<8x512xf32>
    %c1_177 = arith.constant 1 : index
    %c0_178 = arith.constant 0 : index
    %c0_179 = arith.constant 0 : index
    %420 = vector.load %arg18[%c1_177, %c0_178, %c0_179] : memref<2x512x128xbf16, #tpu.memory_space<vmem>>, vector<1x512x128xbf16>
    %421 = vector.shape_cast %420 : vector<1x512x128xbf16> to vector<512x128xbf16>
    %422 = arith.truncf %419 : vector<8x512xf32> to vector<8x512xbf16>
    %cst_180 = arith.constant dense<0.000000e+00> : vector<8x128xf32>
    %423 = tpu.matmul %422, %421, %cst_180 {dimension_numbers = #tpu.dot_dimension_numbers<[1], [0], [0], [1], [0, 0, 1, 1], [], []>} : vector<8x512xbf16>, vector<512x128xbf16>, vector<8x128xf32> -> vector<8x128xf32>
    %c1_181 = arith.constant 1 : index
    %c0_182 = arith.constant 0 : index
    %c0_183 = arith.constant 0 : index
    %424 = vector.load %arg19[%c1_181, %c0_182, %c0_183] : memref<2x1x128xf32, #tpu.memory_space<vmem>>, vector<1x1x128xf32>
    %425 = vector.shape_cast %424 : vector<1x1x128xf32> to vector<1x128xf32>
    %426 = vector.broadcast %425 : vector<1x128xf32> to vector<8x128xf32>
    %427 = arith.addf %423, %426 : vector<8x128xf32>
    %428 = arith.addf %427, %398 : vector<8x128xf32>
    %c1_184 = arith.constant 1 : index
    %c0_185 = arith.constant 0 : index
    %c0_186 = arith.constant 0 : index
    %429 = vector.load %arg20[%c1_184, %c0_185, %c0_186] : memref<2x1x128xf32, #tpu.memory_space<vmem>>, vector<1x1x128xf32>
    %430 = vector.shape_cast %429 : vector<1x1x128xf32> to vector<1x128xf32>
    %c1_187 = arith.constant 1 : index
    %c0_188 = arith.constant 0 : index
    %c0_189 = arith.constant 0 : index
    %431 = vector.load %arg21[%c1_187, %c0_188, %c0_189] : memref<2x1x128xf32, #tpu.memory_space<vmem>>, vector<1x1x128xf32>
    %432 = vector.shape_cast %431 : vector<1x1x128xf32> to vector<1x128xf32>
    %cst_190 = arith.constant dense<0.000000e+00> : vector<8xf32>
    %433 = vector.multi_reduction <add>, %428, %cst_190 [1] : vector<8x128xf32> to vector<8xf32>
    %434 = vector.shape_cast %433 : vector<8xf32> to vector<8x1xf32>
    %cst_191 = arith.constant 1.280000e+02 : f32
    %435 = vector.broadcast %cst_191 : f32 to vector<8x1xf32>
    %436 = arith.divf %434, %435 : vector<8x1xf32>
    %437 = vector.broadcast %436 : vector<8x1xf32> to vector<8x128xf32>
    %438 = arith.subf %428, %437 : vector<8x128xf32>
    %439 = arith.mulf %438, %438 : vector<8x128xf32>
    %cst_192 = arith.constant dense<0.000000e+00> : vector<8xf32>
    %440 = vector.multi_reduction <add>, %439, %cst_192 [1] : vector<8x128xf32> to vector<8xf32>
    %441 = vector.shape_cast %440 : vector<8xf32> to vector<8x1xf32>
    %cst_193 = arith.constant 1.280000e+02 : f32
    %442 = vector.broadcast %cst_193 : f32 to vector<8x1xf32>
    %443 = arith.divf %441, %442 : vector<8x1xf32>
    %cst_194 = arith.constant 9.99999996E-13 : f32
    %444 = vector.broadcast %cst_194 : f32 to vector<8x1xf32>
    %445 = arith.addf %443, %444 : vector<8x1xf32>
    %446 = math.rsqrt %445 : vector<8x1xf32>
    %447 = vector.broadcast %446 : vector<8x1xf32> to vector<8x128xf32>
    %448 = arith.mulf %438, %447 : vector<8x128xf32>
    %449 = vector.broadcast %430 : vector<1x128xf32> to vector<8x128xf32>
    %450 = arith.mulf %448, %449 : vector<8x128xf32>
    %451 = vector.broadcast %432 : vector<1x128xf32> to vector<8x128xf32>
    %452 = arith.addf %450, %451 : vector<8x128xf32>
    %453 = vector.extract_strided_slice %452 {offsets = [0, 0], sizes = [1, 128], strides = [1, 1]} : vector<8x128xf32> to vector<1x128xf32>
    %c0_195 = arith.constant 0 : index
    %c0_196 = arith.constant 0 : index
    %454 = vector.load %arg22[%c0_195, %c0_196] : memref<128x512xbf16, #tpu.memory_space<vmem>>, vector<128x512xbf16>
    %455 = arith.truncf %453 : vector<1x128xf32> to vector<1x128xbf16>
    %cst_197 = arith.constant dense<0.000000e+00> : vector<1x512xf32>
    %456 = tpu.matmul %455, %454, %cst_197 {dimension_numbers = #tpu.dot_dimension_numbers<[1], [0], [0], [1], [0, 0, 1, 1], [], []>} : vector<1x128xbf16>, vector<128x512xbf16>, vector<1x512xf32> -> vector<1x512xf32>
    %c0_198 = arith.constant 0 : index
    %c0_199 = arith.constant 0 : index
    %457 = vector.load %arg23[%c0_198, %c0_199] : memref<1x512xf32, #tpu.memory_space<vmem>>, vector<1x512xf32>
    %458 = arith.addf %456, %457 : vector<1x512xf32>
    %c0_200 = arith.constant 0 : index
    %c0_201 = arith.constant 0 : index
    %459 = vector.load %arg24[%c0_200, %c0_201] : memref<1x512xf32, #tpu.memory_space<vmem>>, vector<1x512xf32>
    %c0_202 = arith.constant 0 : index
    %c0_203 = arith.constant 0 : index
    %460 = vector.load %arg25[%c0_202, %c0_203] : memref<1x512xf32, #tpu.memory_space<vmem>>, vector<1x512xf32>
    %cst_204 = arith.constant dense<0.000000e+00> : vector<1xf32>
    %461 = vector.multi_reduction <add>, %458, %cst_204 [1] : vector<1x512xf32> to vector<1xf32>
    %462 = vector.shape_cast %461 : vector<1xf32> to vector<1x1xf32>
    %cst_205 = arith.constant 5.120000e+02 : f32
    %463 = vector.broadcast %cst_205 : f32 to vector<1x1xf32>
    %464 = arith.divf %462, %463 : vector<1x1xf32>
    %465 = vector.broadcast %464 : vector<1x1xf32> to vector<1x512xf32>
    %466 = arith.subf %458, %465 : vector<1x512xf32>
    %467 = arith.mulf %466, %466 : vector<1x512xf32>
    %cst_206 = arith.constant dense<0.000000e+00> : vector<1xf32>
    %468 = vector.multi_reduction <add>, %467, %cst_206 [1] : vector<1x512xf32> to vector<1xf32>
    %469 = vector.shape_cast %468 : vector<1xf32> to vector<1x1xf32>
    %cst_207 = arith.constant 5.120000e+02 : f32
    %470 = vector.broadcast %cst_207 : f32 to vector<1x1xf32>
    %471 = arith.divf %469, %470 : vector<1x1xf32>
    %cst_208 = arith.constant 9.99999974E-6 : f32
    %472 = vector.broadcast %cst_208 : f32 to vector<1x1xf32>
    %473 = arith.addf %471, %472 : vector<1x1xf32>
    %474 = math.rsqrt %473 : vector<1x1xf32>
    %475 = vector.broadcast %474 : vector<1x1xf32> to vector<1x512xf32>
    %476 = arith.mulf %466, %475 : vector<1x512xf32>
    %477 = arith.mulf %476, %459 : vector<1x512xf32>
    %478 = arith.addf %477, %460 : vector<1x512xf32>
    %cst_209 = arith.constant 0.000000e+00 : f32
    %479 = vector.broadcast %cst_209 : f32 to vector<1x512xf32>
    %480 = arith.maximumf %478, %479 : vector<1x512xf32>
    %c0_210 = arith.constant 0 : index
    %c0_211 = arith.constant 0 : index
    %481 = vector.load %arg26[%c0_210, %c0_211] : memref<512x512xbf16, #tpu.memory_space<vmem>>, vector<512x512xbf16>
    %482 = arith.truncf %480 : vector<1x512xf32> to vector<1x512xbf16>
    %cst_212 = arith.constant dense<0.000000e+00> : vector<1x512xf32>
    %483 = tpu.matmul %482, %481, %cst_212 {dimension_numbers = #tpu.dot_dimension_numbers<[1], [0], [0], [1], [0, 0, 1, 1], [], []>} : vector<1x512xbf16>, vector<512x512xbf16>, vector<1x512xf32> -> vector<1x512xf32>
    %c0_213 = arith.constant 0 : index
    %c0_214 = arith.constant 0 : index
    %484 = vector.load %arg27[%c0_213, %c0_214] : memref<1x512xf32, #tpu.memory_space<vmem>>, vector<1x512xf32>
    %485 = arith.addf %483, %484 : vector<1x512xf32>
    %c0_215 = arith.constant 0 : index
    %c0_216 = arith.constant 0 : index
    %486 = vector.load %arg28[%c0_215, %c0_216] : memref<512x512xbf16, #tpu.memory_space<vmem>>, vector<512x512xbf16>
    %487 = arith.truncf %485 : vector<1x512xf32> to vector<1x512xbf16>
    %cst_217 = arith.constant dense<0.000000e+00> : vector<1x512xf32>
    %488 = tpu.matmul %487, %486, %cst_217 {dimension_numbers = #tpu.dot_dimension_numbers<[1], [0], [0], [1], [0, 0, 1, 1], [], []>} : vector<1x512xbf16>, vector<512x512xbf16>, vector<1x512xf32> -> vector<1x512xf32>
    %c0_218 = arith.constant 0 : index
    %c0_219 = arith.constant 0 : index
    %489 = vector.load %arg29[%c0_218, %c0_219] : memref<1x512xf32, #tpu.memory_space<vmem>>, vector<1x512xf32>
    %490 = arith.addf %488, %489 : vector<1x512xf32>
    %c0_220 = arith.constant 0 : index
    %c0_221 = arith.constant 0 : index
    %c0_222 = arith.constant 0 : index
    %491 = vector.load %arg3[%c0_220, %c0_221, %c0_222] : memref<1x1x20xf32, #tpu.memory_space<vmem>>, vector<1x1x20xf32>
    %492 = vector.shape_cast %491 : vector<1x1x20xf32> to vector<1x20xf32>
    %c0_223 = arith.constant 0 : index
    %c0_224 = arith.constant 0 : index
    %493 = vector.load %arg30[%c0_223, %c0_224] : memref<20x256xbf16, #tpu.memory_space<vmem>>, vector<20x256xbf16>
    %494 = arith.truncf %492 : vector<1x20xf32> to vector<1x20xbf16>
    %cst_225 = arith.constant dense<0.000000e+00> : vector<1x256xf32>
    %495 = tpu.matmul %494, %493, %cst_225 {dimension_numbers = #tpu.dot_dimension_numbers<[1], [0], [0], [1], [0, 0, 1, 1], [], []>} : vector<1x20xbf16>, vector<20x256xbf16>, vector<1x256xf32> -> vector<1x256xf32>
    %c0_226 = arith.constant 0 : index
    %c0_227 = arith.constant 0 : index
    %496 = vector.load %arg31[%c0_226, %c0_227] : memref<1x256xf32, #tpu.memory_space<vmem>>, vector<1x256xf32>
    %497 = arith.addf %495, %496 : vector<1x256xf32>
    %c0_228 = arith.constant 0 : index
    %c0_229 = arith.constant 0 : index
    %498 = vector.load %arg32[%c0_228, %c0_229] : memref<1x256xf32, #tpu.memory_space<vmem>>, vector<1x256xf32>
    %499 = arith.mulf %497, %498 : vector<1x256xf32>
    %c0_230 = arith.constant 0 : index
    %c0_231 = arith.constant 0 : index
    %500 = vector.load %arg33[%c0_230, %c0_231] : memref<1x256xf32, #tpu.memory_space<vmem>>, vector<1x256xf32>
    %501 = arith.addf %499, %500 : vector<1x256xf32>
    %cst_232 = arith.constant 0.000000e+00 : f32
    %502 = vector.broadcast %cst_232 : f32 to vector<1x256xf32>
    %503 = arith.maximumf %501, %502 : vector<1x256xf32>
    %c0_233 = arith.constant 0 : index
    %c0_234 = arith.constant 0 : index
    %504 = vector.load %arg34[%c0_233, %c0_234] : memref<512x512xbf16, #tpu.memory_space<vmem>>, vector<512x512xbf16>
    %505 = arith.truncf %490 : vector<1x512xf32> to vector<1x512xbf16>
    %cst_235 = arith.constant dense<0.000000e+00> : vector<1x512xf32>
    %506 = tpu.matmul %505, %504, %cst_235 {dimension_numbers = #tpu.dot_dimension_numbers<[1], [0], [0], [1], [0, 0, 1, 1], [], []>} : vector<1x512xbf16>, vector<512x512xbf16>, vector<1x512xf32> -> vector<1x512xf32>
    %c0_236 = arith.constant 0 : index
    %c0_237 = arith.constant 0 : index
    %507 = vector.load %arg35[%c0_236, %c0_237] : memref<256x512xbf16, #tpu.memory_space<vmem>>, vector<256x512xbf16>
    %508 = arith.truncf %503 : vector<1x256xf32> to vector<1x256xbf16>
    %cst_238 = arith.constant dense<0.000000e+00> : vector<1x512xf32>
    %509 = tpu.matmul %508, %507, %cst_238 {dimension_numbers = #tpu.dot_dimension_numbers<[1], [0], [0], [1], [0, 0, 1, 1], [], []>} : vector<1x256xbf16>, vector<256x512xbf16>, vector<1x512xf32> -> vector<1x512xf32>
    %510 = arith.addf %506, %509 : vector<1x512xf32>
    %c0_239 = arith.constant 0 : index
    %c0_240 = arith.constant 0 : index
    %511 = vector.load %arg36[%c0_239, %c0_240] : memref<1x512xf32, #tpu.memory_space<vmem>>, vector<1x512xf32>
    %512 = arith.addf %510, %511 : vector<1x512xf32>
    %c0_241 = arith.constant 0 : index
    %c0_242 = arith.constant 0 : index
    %513 = vector.load %arg37[%c0_241, %c0_242] : memref<1x512xf32, #tpu.memory_space<vmem>>, vector<1x512xf32>
    %c0_243 = arith.constant 0 : index
    %c0_244 = arith.constant 0 : index
    %514 = vector.load %arg38[%c0_243, %c0_244] : memref<1x512xf32, #tpu.memory_space<vmem>>, vector<1x512xf32>
    %cst_245 = arith.constant dense<0.000000e+00> : vector<1xf32>
    %515 = vector.multi_reduction <add>, %512, %cst_245 [1] : vector<1x512xf32> to vector<1xf32>
    %516 = vector.shape_cast %515 : vector<1xf32> to vector<1x1xf32>
    %cst_246 = arith.constant 5.120000e+02 : f32
    %517 = vector.broadcast %cst_246 : f32 to vector<1x1xf32>
    %518 = arith.divf %516, %517 : vector<1x1xf32>
    %519 = vector.broadcast %518 : vector<1x1xf32> to vector<1x512xf32>
    %520 = arith.subf %512, %519 : vector<1x512xf32>
    %521 = arith.mulf %520, %520 : vector<1x512xf32>
    %cst_247 = arith.constant dense<0.000000e+00> : vector<1xf32>
    %522 = vector.multi_reduction <add>, %521, %cst_247 [1] : vector<1x512xf32> to vector<1xf32>
    %523 = vector.shape_cast %522 : vector<1xf32> to vector<1x1xf32>
    %cst_248 = arith.constant 5.120000e+02 : f32
    %524 = vector.broadcast %cst_248 : f32 to vector<1x1xf32>
    %525 = arith.divf %523, %524 : vector<1x1xf32>
    %cst_249 = arith.constant 9.99999974E-6 : f32
    %526 = vector.broadcast %cst_249 : f32 to vector<1x1xf32>
    %527 = arith.addf %525, %526 : vector<1x1xf32>
    %528 = math.rsqrt %527 : vector<1x1xf32>
    %529 = vector.broadcast %528 : vector<1x1xf32> to vector<1x512xf32>
    %530 = arith.mulf %520, %529 : vector<1x512xf32>
    %531 = arith.mulf %530, %513 : vector<1x512xf32>
    %532 = arith.addf %531, %514 : vector<1x512xf32>
    %cst_250 = arith.constant 0.000000e+00 : f32
    %533 = vector.broadcast %cst_250 : f32 to vector<1x512xf32>
    %534 = arith.maximumf %532, %533 : vector<1x512xf32>
    %c0_251 = arith.constant 0 : index
    %c0_252 = arith.constant 0 : index
    %535 = vector.load %arg39[%c0_251, %c0_252] : memref<512x512xbf16, #tpu.memory_space<vmem>>, vector<512x512xbf16>
    %536 = arith.truncf %534 : vector<1x512xf32> to vector<1x512xbf16>
    %cst_253 = arith.constant dense<0.000000e+00> : vector<1x512xf32>
    %537 = tpu.matmul %536, %535, %cst_253 {dimension_numbers = #tpu.dot_dimension_numbers<[1], [0], [0], [1], [0, 0, 1, 1], [], []>} : vector<1x512xbf16>, vector<512x512xbf16>, vector<1x512xf32> -> vector<1x512xf32>
    %c0_254 = arith.constant 0 : index
    %c0_255 = arith.constant 0 : index
    %538 = vector.load %arg40[%c0_254, %c0_255] : memref<1x512xf32, #tpu.memory_space<vmem>>, vector<1x512xf32>
    %539 = arith.addf %537, %538 : vector<1x512xf32>
    %c0_256 = arith.constant 0 : index
    %c0_257 = arith.constant 0 : index
    %540 = vector.load %arg41[%c0_256, %c0_257] : memref<1x512xf32, #tpu.memory_space<vmem>>, vector<1x512xf32>
    %541 = arith.mulf %539, %540 : vector<1x512xf32>
    %c0_258 = arith.constant 0 : index
    %c0_259 = arith.constant 0 : index
    %542 = vector.load %arg42[%c0_258, %c0_259] : memref<1x512xf32, #tpu.memory_space<vmem>>, vector<1x512xf32>
    %543 = arith.addf %541, %542 : vector<1x512xf32>
    %cst_260 = arith.constant 0.000000e+00 : f32
    %544 = vector.broadcast %cst_260 : f32 to vector<1x512xf32>
    %545 = arith.maximumf %543, %544 : vector<1x512xf32>
    %c0_261 = arith.constant 0 : index
    %c0_262 = arith.constant 0 : index
    %546 = vector.load %arg43[%c0_261, %c0_262] : memref<512x128xbf16, #tpu.memory_space<vmem>>, vector<512x128xbf16>
    %547 = arith.truncf %545 : vector<1x512xf32> to vector<1x512xbf16>
    %cst_263 = arith.constant dense<0.000000e+00> : vector<1x128xf32>
    %548 = tpu.matmul %547, %546, %cst_263 {dimension_numbers = #tpu.dot_dimension_numbers<[1], [0], [0], [1], [0, 0, 1, 1], [], []>} : vector<1x512xbf16>, vector<512x128xbf16>, vector<1x128xf32> -> vector<1x128xf32>
    %c0_264 = arith.constant 0 : index
    %c0_265 = arith.constant 0 : index
    %549 = vector.load %arg44[%c0_264, %c0_265] : memref<1x128xf32, #tpu.memory_space<vmem>>, vector<1x128xf32>
    %550 = arith.addf %548, %549 : vector<1x128xf32>
    %551 = tpu.iota {dimensions = array<i32: 1>} : vector<1x128xi32>
    %c2_i32 = arith.constant 2 : i32
    %552 = vector.broadcast %c2_i32 : i32 to vector<1x128xi32>
    %553 = arith.cmpi eq, %551, %552 : vector<1x128xi32>
    %554 = math.tanh %550 : vector<1x128xf32>
    %555 = arith.select %553, %554, %550 : vector<1x128xi1>, vector<1x128xf32>
    %c0_266 = arith.constant 0 : index
    %c0_267 = arith.constant 0 : index
    %c0_268 = arith.constant 0 : index
    %556 = vector.load %arg45[%c0_266, %c0_267, %c0_268] : memref<1x1x128xf32, #tpu.memory_space<vmem>>, vector<1x1x128xf32>
    %557 = vector.shape_cast %556 : vector<1x1x128xf32> to vector<1x128xf32>
    %558 = vector.shape_cast %555 : vector<1x128xf32> to vector<1x1x128xf32>
    tpu.vector_store %arg45[%c0_266, %c0_267, %c0_268], %558 {strides = array<i32>} : memref<1x1x128xf32, #tpu.memory_space<vmem>>, vector<1x1x128xf32>,
    return
  }
  func.func @transform_0(%arg0: i32) -> (i32, i32, i32) {
    %c0_i32 = arith.constant 0 : i32
    %c0_i32_0 = arith.constant 0 : i32
    %c0_i32_1 = arith.constant 0 : i32
    return %arg0, %c0_i32, %c0_i32_0 : i32, i32, i32
  }
  func.func @transform_1(%arg0: i32) -> (i32, i32, i32) {
    %c0_i32 = arith.constant 0 : i32
    %c0_i32_0 = arith.constant 0 : i32
    %c0_i32_1 = arith.constant 0 : i32
    return %arg0, %c0_i32, %c0_i32_0 : i32, i32, i32
  }
  func.func @transform_2(%arg0: i32) -> (i32, i32, i32) {
    %c0_i32 = arith.constant 0 : i32
    %c0_i32_0 = arith.constant 0 : i32
    %c0_i32_1 = arith.constant 0 : i32
    return %arg0, %c0_i32, %c0_i32_0 : i32, i32, i32
  }
  func.func @transform_3(%arg0: i32) -> (i32, i32) {
    %c0_i32 = arith.constant 0 : i32
    %c0_i32_0 = arith.constant 0 : i32
    %c0_i32_1 = arith.constant 0 : i32
    return %c0_i32, %c0_i32_0 : i32, i32
  }
  func.func @transform_4(%arg0: i32) -> (i32, i32) {
    %c0_i32 = arith.constant 0 : i32
    %c0_i32_0 = arith.constant 0 : i32
    %c0_i32_1 = arith.constant 0 : i32
    return %c0_i32, %c0_i32_0 : i32, i32
  }
  func.func @transform_5(%arg0: i32) -> (i32, i32, i32) {
    %c0_i32 = arith.constant 0 : i32
    %c0_i32_0 = arith.constant 0 : i32
    %c0_i32_1 = arith.constant 0 : i32
    %c0_i32_2 = arith.constant 0 : i32
    return %c0_i32, %c0_i32_0, %c0_i32_1 : i32, i32, i32
  }
  func.func @transform_6(%arg0: i32) -> (i32, i32, i32) {
    %c0_i32 = arith.constant 0 : i32
    %c0_i32_0 = arith.constant 0 : i32
    %c0_i32_1 = arith.constant 0 : i32
    %c0_i32_2 = arith.constant 0 : i32
    return %c0_i32, %c0_i32_0, %c0_i32_1 : i32, i32, i32
  }
  func.func @transform_7(%arg0: i32) -> (i32, i32, i32) {
    %c0_i32 = arith.constant 0 : i32
    %c0_i32_0 = arith.constant 0 : i32
    %c0_i32_1 = arith.constant 0 : i32
    %c0_i32_2 = arith.constant 0 : i32
    return %c0_i32, %c0_i32_0, %c0_i32_1 : i32, i32, i32
  }
  func.func @transform_8(%arg0: i32) -> (i32, i32, i32) {
    %c0_i32 = arith.constant 0 : i32
    %c0_i32_0 = arith.constant 0 : i32
    %c0_i32_1 = arith.constant 0 : i32
    %c0_i32_2 = arith.constant 0 : i32
    return %c0_i32, %c0_i32_0, %c0_i32_1 : i32, i32, i32
  }
  func.func @transform_9(%arg0: i32) -> (i32, i32, i32) {
    %c0_i32 = arith.constant 0 : i32
    %c0_i32_0 = arith.constant 0 : i32
    %c0_i32_1 = arith.constant 0 : i32
    %c0_i32_2 = arith.constant 0 : i32
    return %c0_i32, %c0_i32_0, %c0_i32_1 : i32, i32, i32
  }
  func.func @transform_10(%arg0: i32) -> (i32, i32, i32) {
    %c0_i32 = arith.constant 0 : i32
    %c0_i32_0 = arith.constant 0 : i32
    %c0_i32_1 = arith.constant 0 : i32
    %c0_i32_2 = arith.constant 0 : i32
    return %c0_i32, %c0_i32_0, %c0_i32_1 : i32, i32, i32
  }
  func.func @transform_11(%arg0: i32) -> (i32, i32, i32) {
    %c0_i32 = arith.constant 0 : i32
    %c0_i32_0 = arith.constant 0 : i32
    %c0_i32_1 = arith.constant 0 : i32
    %c0_i32_2 = arith.constant 0 : i32
    return %c0_i32, %c0_i32_0, %c0_i32_1 : i32, i32, i32
  }
  func.func @transform_12(%arg0: i32) -> (i32, i32, i32) {
    %c0_i32 = arith.constant 0 : i32
    %c0_i32_0 = arith.constant 0 : i32
    %c0_i32_1 = arith.constant 0 : i32
    %c0_i32_2 = arith.constant 0 : i32
    return %c0_i32, %c0_i32_0, %c0_i32_1 : i32, i32, i32
  }
  func.func @transform_13(%arg0: i32) -> (i32, i32, i32) {
    %c0_i32 = arith.constant 0 : i32
    %c0_i32_0 = arith.constant 0 : i32
    %c0_i32_1 = arith.constant 0 : i32
    %c0_i32_2 = arith.constant 0 : i32
    return %c0_i32, %c0_i32_0, %c0_i32_1 : i32, i32, i32
  }
  func.func @transform_14(%arg0: i32) -> (i32, i32, i32) {
    %c0_i32 = arith.constant 0 : i32
    %c0_i32_0 = arith.constant 0 : i32
    %c0_i32_1 = arith.constant 0 : i32
    %c0_i32_2 = arith.constant 0 : i32
    return %c0_i32, %c0_i32_0, %c0_i32_1 : i32, i32, i32
  }
  func.func @transform_15(%arg0: i32) -> (i32, i32, i32) {
    %c0_i32 = arith.constant 0 : i32
    %c0_i32_0 = arith.constant 0 : i32
    %c0_i32_1 = arith.constant 0 : i32
    %c0_i32_2 = arith.constant 0 : i32
    return %c0_i32, %c0_i32_0, %c0_i32_1 : i32, i32, i32
  }
  func.func @transform_16(%arg0: i32) -> (i32, i32, i32) {
    %c0_i32 = arith.constant 0 : i32
    %c0_i32_0 = arith.constant 0 : i32
    %c0_i32_1 = arith.constant 0 : i32
    %c0_i32_2 = arith.constant 0 : i32
    return %c0_i32, %c0_i32_0, %c0_i32_1 : i32, i32, i32
  }
  func.func @transform_17(%arg0: i32) -> (i32, i32, i32) {
    %c0_i32 = arith.constant 0 : i32
    %c0_i32_0 = arith.constant 0 : i32
    %c0_i32_1 = arith.constant 0 : i32
    %c0_i32_2 = arith.constant 0 : i32
    return %c0_i32, %c0_i32_0, %c0_i32_1 : i32, i32, i32
  }
  func.func @transform_18(%arg0: i32) -> (i32, i32, i32) {
    %c0_i32 = arith.constant 0 : i32
    %c0_i32_0 = arith.constant 0 : i32
    %c0_i32_1 = arith.constant 0 : i32
    %c0_i32_2 = arith.constant 0 : i32
    return %c0_i32, %c0_i32_0, %c0_i32_1 : i32, i32, i32
  }
  func.func @transform_19(%arg0: i32) -> (i32, i32, i32) {
    %c0_i32 = arith.constant 0 : i32
    %c0_i32_0 = arith.constant 0 : i32
    %c0_i32_1 = arith.constant 0 : i32
    %c0_i32_2 = arith.constant 0 : i32
    return %c0_i32, %c0_i32_0, %c0_i32_1 : i32, i32, i32
  }
  func.func @transform_20(%arg0: i32) -> (i32, i32, i32) {
    %c0_i32 = arith.constant 0 : i32
    %c0_i32_0 = arith.constant 0 : i32
    %c0_i32_1 = arith.constant 0 : i32
    %c0_i32_2 = arith.constant 0 : i32
    return %c0_i32, %c0_i32_0, %c0_i32_1 : i32, i32, i32
  }
  func.func @transform_21(%arg0: i32) -> (i32, i32) {
    %c0_i32 = arith.constant 0 : i32
    %c0_i32_0 = arith.constant 0 : i32
    %c0_i32_1 = arith.constant 0 : i32
    return %c0_i32, %c0_i32_0 : i32, i32
  }
  func.func @transform_22(%arg0: i32) -> (i32, i32) {
    %c0_i32 = arith.constant 0 : i32
    %c0_i32_0 = arith.constant 0 : i32
    %c0_i32_1 = arith.constant 0 : i32
    return %c0_i32, %c0_i32_0 : i32, i32
  }
  func.func @transform_23(%arg0: i32) -> (i32, i32) {
    %c0_i32 = arith.constant 0 : i32
    %c0_i32_0 = arith.constant 0 : i32
    %c0_i32_1 = arith.constant 0 : i32
    return %c0_i32, %c0_i32_0 : i32, i32
  }
  func.func @transform_24(%arg0: i32) -> (i32, i32) {
    %c0_i32 = arith.constant 0 : i32
    %c0_i32_0 = arith.constant 0 : i32
    %c0_i32_1 = arith.constant 0 : i32
    return %c0_i32, %c0_i32_0 : i32, i32
  }
  func.func @transform_25(%arg0: i32) -> (i32, i32) {
    %c0_i32 = arith.constant 0 : i32
    %c0_i32_0 = arith.constant 0 : i32
    %c0_i32_1 = arith.constant 0 : i32
    return %c0_i32, %c0_i32_0 : i32, i32
  }
  func.func @transform_26(%arg0: i32) -> (i32, i32) {
    %c0_i32 = arith.constant 0 : i32
    %c0_i32_0 = arith.constant 0 : i32
    %c0_i32_1 = arith.constant 0 : i32
    return %c0_i32, %c0_i32_0 : i32, i32
  }
  func.func @transform_27(%arg0: i32) -> (i32, i32) {
    %c0_i32 = arith.constant 0 : i32
    %c0_i32_0 = arith.constant 0 : i32
    %c0_i32_1 = arith.constant 0 : i32
    return %c0_i32, %c0_i32_0 : i32, i32
  }
  func.func @transform_28(%arg0: i32) -> (i32, i32) {
    %c0_i32 = arith.constant 0 : i32
    %c0_i32_0 = arith.constant 0 : i32
    %c0_i32_1 = arith.constant 0 : i32
    return %c0_i32, %c0_i32_0 : i32, i32
  }
  func.func @transform_29(%arg0: i32) -> (i32, i32) {
    %c0_i32 = arith.constant 0 : i32
    %c0_i32_0 = arith.constant 0 : i32
    %c0_i32_1 = arith.constant 0 : i32
    return %c0_i32, %c0_i32_0 : i32, i32
  }
  func.func @transform_30(%arg0: i32) -> (i32, i32) {
    %c0_i32 = arith.constant 0 : i32
    %c0_i32_0 = arith.constant 0 : i32
    %c0_i32_1 = arith.constant 0 : i32
    return %c0_i32, %c0_i32_0 : i32, i32
  }
  func.func @transform_31(%arg0: i32) -> (i32, i32) {
    %c0_i32 = arith.constant 0 : i32
    %c0_i32_0 = arith.constant 0 : i32
    %c0_i32_1 = arith.constant 0 : i32
    return %c0_i32, %c0_i32_0 : i32, i32
  }
  func.func @transform_32(%arg0: i32) -> (i32, i32) {
    %c0_i32 = arith.constant 0 : i32
    %c0_i32_0 = arith.constant 0 : i32
    %c0_i32_1 = arith.constant 0 : i32
    return %c0_i32, %c0_i32_0 : i32, i32
  }
  func.func @transform_33(%arg0: i32) -> (i32, i32) {
    %c0_i32 = arith.constant 0 : i32
    %c0_i32_0 = arith.constant 0 : i32
    %c0_i32_1 = arith.constant 0 : i32
    return %c0_i32, %c0_i32_0 : i32, i32
  }
  func.func @transform_34(%arg0: i32) -> (i32, i32) {
    %c0_i32 = arith.constant 0 : i32
    %c0_i32_0 = arith.constant 0 : i32
    %c0_i32_1 = arith.constant 0 : i32
    return %c0_i32, %c0_i32_0 : i32, i32
  }
  func.func @transform_35(%arg0: i32) -> (i32, i32) {
    %c0_i32 = arith.constant 0 : i32
    %c0_i32_0 = arith.constant 0 : i32
    %c0_i32_1 = arith.constant 0 : i32
    return %c0_i32, %c0_i32_0 : i32, i32
  }
  func.func @transform_36(%arg0: i32) -> (i32, i32) {
    %c0_i32 = arith.constant 0 : i32
    %c0_i32_0 = arith.constant 0 : i32
    %c0_i32_1 = arith.constant 0 : i32
    return %c0_i32, %c0_i32_0 : i32, i32
  }
  func.func @transform_37(%arg0: i32) -> (i32, i32) {
    %c0_i32 = arith.constant 0 : i32
    %c0_i32_0 = arith.constant 0 : i32
    %c0_i32_1 = arith.constant 0 : i32
    return %c0_i32, %c0_i32_0 : i32, i32
  }
  func.func @transform_38(%arg0: i32) -> (i32, i32) {
    %c0_i32 = arith.constant 0 : i32
    %c0_i32_0 = arith.constant 0 : i32
    %c0_i32_1 = arith.constant 0 : i32
    return %c0_i32, %c0_i32_0 : i32, i32
  }
  func.func @transform_39(%arg0: i32) -> (i32, i32) {
    %c0_i32 = arith.constant 0 : i32
    %c0_i32_0 = arith.constant 0 : i32
    %c0_i32_1 = arith.constant 0 : i32
    return %c0_i32, %c0_i32_0 : i32, i32
  }
  func.func @transform_40(%arg0: i32) -> (i32, i32) {
    %c0_i32 = arith.constant 0 : i32
    %c0_i32_0 = arith.constant 0 : i32
    %c0_i32_1 = arith.constant 0 : i32
    return %c0_i32, %c0_i32_0 : i32, i32
  }
  func.func @transform_41(%arg0: i32) -> (i32, i32) {
    %c0_i32 = arith.constant 0 : i32
    %c0_i32_0 = arith.constant 0 : i32
    %c0_i32_1 = arith.constant 0 : i32
    return %c0_i32, %c0_i32_0 : i32, i32
  }
  func.func @transform_42(%arg0: i32) -> (i32, i32) {
    %c0_i32 = arith.constant 0 : i32
    %c0_i32_0 = arith.constant 0 : i32
    %c0_i32_1 = arith.constant 0 : i32
    return %c0_i32, %c0_i32_0 : i32, i32
  }
  func.func @transform_43(%arg0: i32) -> (i32, i32) {
    %c0_i32 = arith.constant 0 : i32
    %c0_i32_0 = arith.constant 0 : i32
    %c0_i32_1 = arith.constant 0 : i32
    return %c0_i32, %c0_i32_0 : i32, i32
  }
  func.func @transform_44(%arg0: i32) -> (i32, i32, i32) {
    %c0_i32 = arith.constant 0 : i32
    %c0_i32_0 = arith.constant 0 : i32
    %c0_i32_1 = arith.constant 0 : i32
    return %arg0, %c0_i32, %c0_i32_0 : i32, i32, i32
  }
}

</mosaic_0001>

<bundles_post_ra>
// kernel: text_only_depression_forward.1
= control target key start
LH: loop header
LB: loop body
LE: loop exit
PB: predicated region body
PF: predicated region fallthrough
CT: control target
= control target key end

     0   :  { %s14579_s6 = smov 1   ;;  %s14580_s10 = smov 2   ;;  %s15604_s0 = inlined_call_operand.smem [shape: u32[45], index: -1, kind: input, shape index: {}] }
   0x1   :  { %s14651_s5 = sld [smem:[%s15604_s0]]   ;;  %s14581_s14 = smov 3  }
   0x2   :  { %s14656_s9 = sld [smem:[%s15604_s0 + %s14579_s6]]   ;;  %s14582_s18 = smov 4  }
   0x3   :  { %s14661_s13 = sld [smem:[%s15604_s0 + %s14580_s10]]   ;;  %s14583_s22 = smov 5  }
   0x4   :  { %s14666_s17 = sld [smem:[%s15604_s0 + %s14581_s14]]   ;;  %s14584_s26 = smov 6  }
   0x5   :  { %s14671_s21 = sld [smem:[%s15604_s0 + %s14582_s18]]   ;;  %s14585_s30 = smov 7  }
   0x6   :  { %s14676_s25 = sld [smem:[%s15604_s0 + %s14583_s22]]   ;;  %s14586_s4 = smov 8  }
   0x7   :  { %s14681_s29 = sld [smem:[%s15604_s0 + %s14584_s26]]   ;;  %s14587_s10 = smov 9  }
   0x8   :  { %15626 = sst [smem:[#allocation29_spill]] %s14656_s9  ;;  %s14588_s15 = smov 10  }
   0x9   :  { %15627 = sst [smem:[#allocation30_spill]] %s14661_s13  ;;  %s14589_s20 = smov 11  }
   0xa   :  { %s14686_s3 = sld [smem:[%s15604_s0 + %s14585_s30]]   ;;  %s14590_s26 = smov 12  }
   0xb   :  { %15628 = sst [smem:[#allocation31_spill]] %s14671_s21  ;;  %s14591_s1 = smov 13  }
   0xc   :  { %s14691_s8 = sld [smem:[%s15604_s0 + %s14586_s4]]   ;;  %s14592_s7 = smov 14  }
   0xd   :  { %15629 = sst [smem:[#allocation32_spill]] %s14681_s29  ;;  %s14594_s22 = smov 16  }
   0xe   :  { %s14696_s14 = sld [smem:[%s15604_s0 + %s14587_s10]]   ;;  %s14595_s28 = smov 17  }
   0xf   :  { %s14701_s19 = sld [smem:[%s15604_s0 + %s14588_s15]]   ;;  %s14593_s15 = smov 15  }
  0x10   :  { %s14706_s24 = sld [smem:[%s15604_s0 + %s14589_s20]]  }
  0x11   :  { %s14711_s30 = sld [smem:[%s15604_s0 + %s14590_s26]]  }
  0x12   :  { %15630 = sst [smem:[#allocation33_spill]] %s14691_s8 }
  0x13   :  { %s14716_s6 = sld [smem:[%s15604_s0 + %s14591_s1]]  }
  0x14   :  { %15631 = sst [smem:[#allocation34_spill]] %s14696_s14 }
  0x15   :  { %15632 = sst [smem:[#allocation35_spill]] %s14701_s19 }
  0x16   :  { %s14721_s12 = sld [smem:[%s15604_s0 + %s14592_s7]]   ;;  %s14596_s7 = smov 18  }
  0x17   :  { %15633 = sst [smem:[#allocation36_spill]] %s14711_s30 }
  0x18   :  { %s14726_s20 = sld [smem:[%s15604_s0 + %s14593_s15]]   ;;  %s14597_s15 = smov 19  }
  0x19   :  { %15634 = sst [smem:[#allocation37_spill]] %s14716_s6 }
  0x1a   :  { %s14731_s27 = sld [smem:[%s15604_s0 + %s14594_s22]]   ;;  %s14598_s22 = smov 20  }
  0x1b   :  { %s14736_s4 = sld [smem:[%s15604_s0 + %s14595_s28]]   ;;  %s14599_s28 = smov 21  }
  0x1c   :  { %15635 = sst [smem:[#allocation38_spill]] %s14721_s12 }
  0x1d   :  { %s14741_s13 = sld [smem:[%s15604_s0 + %s14596_s7]]   ;;  %s14600_s7 = smov 22  }
  0x1e   :  { %15636 = sst [smem:[#allocation39_spill]] %s14726_s20 }
  0x1f   :  { %s14746_s12 = sld [smem:[%s15604_s0 + %s14597_s15]]   ;;  %s14601_s15 = smov 23  }
  0x20   :  { %15637 = sst [smem:[#allocation40_spill]] %s14731_s27 }
  0x21   :  { %s14751_s27 = sld [smem:[%s15604_s0 + %s14598_s22]]   ;;  %s14602_s22 = smov 24  }
  0x22   :  { %s14756_s6 = sld [smem:[%s15604_s0 + %s14599_s28]]   ;;  %s14603_s28 = smov 25  }
  0x23   :  { %15638 = sst [smem:[#allocation41_spill]] %s14741_s13 }
  0x24   :  { %s14761_s13 = sld [smem:[%s15604_s0 + %s14600_s7]]   ;;  %s14604_s7 = smov 26  }
  0x25   :  { %15639 = sst [smem:[#allocation42_spill]] %s14746_s12 }
  0x26   :  { %s14766_s12 = sld [smem:[%s15604_s0 + %s14601_s15]]   ;;  %s14605_s15 = smov 27  }
  0x27   :  { %15640 = sst [smem:[#allocation43_spill]] %s14751_s27 }
  0x28   :  { %s14771_s27 = sld [smem:[%s15604_s0 + %s14602_s22]]   ;;  %s14606_s22 = smov 28  }
  0x29   :  { %s14776_s30 = sld [smem:[%s15604_s0 + %s14603_s28]]   ;;  %s14607_s28 = smov 29  }
  0x2a   :  { %15641 = sst [smem:[#allocation44_spill]] %s14761_s13 }
  0x2b   :  { %s14781_s13 = sld [smem:[%s15604_s0 + %s14604_s7]]   ;;  %s14608_s7 = smov 30  }
  0x2c   :  { %15642 = sst [smem:[#allocation45_spill]] %s14766_s12 }
  0x2d   :  { %s14786_s12 = sld [smem:[%s15604_s0 + %s14605_s15]]   ;;  %s14609_s15 = smov 31  }
  0x2e   :  { %15643 = sst [smem:[#allocation46_spill]] %s14771_s27 }
  0x2f   :  { %s14791_s27 = sld [smem:[%s15604_s0 + %s14606_s22]]   ;;  %s14610_s22 = smov 32  }
  0x30   :  { %s14796_s9 = sld [smem:[%s15604_s0 + %s14607_s28]]   ;;  %s14611_s28 = smov 33  }
  0x31   :  { %15644 = sst [smem:[#allocation47_spill]] %s14781_s13 }
  0x32   :  { %s14801_s13 = sld [smem:[%s15604_s0 + %s14608_s7]]   ;;  %s14612_s7 = smov 34  }
  0x33   :  { %s14806_s19 = sld [smem:[%s15604_s0 + %s14609_s15]]   ;;  %s14613_s15 = smov 35  }
  0x35   :  { %15645 = sst [smem:[#allocation48_spill]] %s14791_s27 }
  0x36   :  { %15646 = sst [smem:[#allocation49_spill]] %s14796_s9 }
  0x37   :  { %s14811_s27 = sld [smem:[%s15604_s0 + %s14610_s22]]   ;;  %s14614_s22 = smov 36  }
  0x38   :  { %15647 = sst [smem:[#allocation50_spill]] %s14801_s13 }
  0x39   :  { %15648 = sst [smem:[#allocation51_spill]] %s14806_s19 }
  0x3a   :  { %s14816_s9 = sld [smem:[%s15604_s0 + %s14611_s28]]   ;;  %s14615_s28 = smov 37  }
  0x3b   :  { %s14821_s13 = sld [smem:[%s15604_s0 + %s14612_s7]]   ;;  %s14616_s7 = smov 38  }
  0x3c   :  { %s14826_s19 = sld [smem:[%s15604_s0 + %s14613_s15]]   ;;  %s14617_s15 = smov 39  }
  0x3d   :  { %15649 = sst [smem:[#allocation52_spill]] %s14811_s27 }
  0x3e   :  { %s14831_s27 = sld [smem:[%s15604_s0 + %s14614_s22]]   ;;  %s14618_s22 = smov 40  }
  0x3f   :  { %s14836_s8 = sld [smem:[%s15604_s0 + %s14615_s28]]   ;;  %s14619_s28 = smov 41  }
  0x40   :  { %s14841_s29 = sld [smem:[%s15604_s0 + %s14616_s7]]   ;;  %s14620_s7 = smov 42  }
  0x41   :  { %s14861_s21 = sld [smem:[%s15604_s0 + %s14620_s7]]  }
  0x42   :  { %15650 = sst [smem:[#allocation53_spill]] %s14826_s19 }
  0x43   :  { %s14846_s19 = sld [smem:[%s15604_s0 + %s14617_s15]]   ;;  %s14621_s15 = smov 43  }
  0x44   :  { %15651 = sst [smem:[#allocation54_spill]] %s14831_s27 }
  0x45   :  { %15652 = sst [smem:[#allocation55_spill]] %s14836_s8 }
  0x46   :  { %s14851_s27 = sld [smem:[%s15604_s0 + %s14618_s22]]   ;;  %s14622_s22 = smov 44  }
  0x47   :  { %s14856_s8 = sld [smem:[%s15604_s0 + %s14619_s28]]  }
  0x49   :  { %15653 = sst [smem:[#allocation56_spill]] %s14846_s19 }
  0x4a   :  { %s14866_s19 = sld [smem:[%s15604_s0 + %s14621_s15]]  }
  0x4c   :  { %15654 = sst [smem:[#allocation57_spill]] %s14851_s27 }
  0x4d   :  { %s14871_s27 = sld [smem:[%s15604_s0 + %s14622_s22]]  }
  0x53   :  { %15655 = sst [smem:[#allocation58_spill]] %s14871_s27 }
  0x54   :  { %94 = vsyncpa [#allocation3], 0 }
  0x55   :  { %95 = vsyncpa [#allocation5], 0 }
  0x56   :  { %96 = vsyncpa [#allocation8], 0 }
  0x57   :  { %97 = vsyncpa [#allocation11], 0 }
  0x58   :  { %98 = vsyncpa [#allocation14], 0 }
  0x59   :  { %99 = vsyncpa [#allocation17], 0 }
  0x5a   :  { %100 = vsyncpa [#allocation20], 0  ;;  %s14873_s28 = smov 0  }
  0x5b LB: > { %s15656_s20 = sld [smem:[#allocation39_spill]]  ;;  %s14879_s0 = sadd.s32 4294967295, %s14577_s28   ;;  %s14577_s28 = sphi %s14873_s28, %s106_s28  }
  0x5c   : > { %s15657_s14 = sld [smem:[#allocation34_spill]]  ;;  %p9633_p0 = scmp.ge.s32.totalorder %s14577_s28, 1 }
  0x5d   : > { %15658 = sst [smem:[#allocation59_spill]] %s14577_s28  ;;  %p1076_p1 = scmp.lt.s32.totalorder %s14577_s28, 3 }
  0x5e   : > { %p13967_p2 = scmp.eq.s32.totalorder %s14879_s0, 0  ;;  %s14623_s10 = smov [#allocation4]  }
  0x5f   : > { %p14885_p3 = pnand %p9633_p0, %p1076_p1  ;;  %s1118_s11 = sshll.u32 %s14623_s10, 4  ;;  %s1119_s11 = int_to_ptr.vmem [resolvable:$true] %s1118_s11 }
  0x60   : > { %s14624_s16 = smov [#allocation7]  }
  0x61   : > { %s1156_s7 = sshll.u32 %s15656_s20, 4  ;;  %p13927_p4 = pneg %p14885_p3  ;;  %s14894_s7 = int_to_ptr.hbm [resolvable:$true] %s1156_s7 }
  0x62   : > { %s1116_s1 = sshll.u32 %s15657_s14, 4  ;;  %s14902_s18 = sshll.u32 %s14624_s16, 4  ;;  %s14889_s1 = int_to_ptr.hbm [resolvable:$true] %s1116_s1 }
  0x63   : > { %p14898_p5 = pnand %p13967_p2, %p13927_p4  ;;  %15661 = sst [smem:[#allocation60_spill]] %s14902_s18 }
  0x64   : > { %s14153_s22 = sshra.s32 %s14889_s1, 4  ;;  %s14160_s10 = scalar_lea.hbm %s15657_s14, 128  ;;  %s14154_s22 = int_to_ptr.hbm [resolvable:$true] %s14153_s22 }
  0x65   : > { %s14155_s23 = scalar_lea.hbm %s14154_s22, 128  ;;  %p14908_p7 = pneg %p14898_p5 }
  0x66   : > { %p14156_p6 = scmp.ne.s32.totalorder %s14154_s22, %s14155_s23  ;;  %p14161_p10 = scmp.lt.s32.totalorder %s14154_s22, %s15657_s14 }
  0x67   : > { %p14162_p11 = scmp.lt.s32.totalorder %s14160_s10, %s14155_s23 }
  0x68   : > { %p14158_p8 = pnand %p14908_p7, %p14156_p6 }
  0x69   : > { %p14163_p12 = por %p14162_p11, %p14161_p10 }
  0x6a   : > { %p14159_p9 = pneg %p14158_p8 }
  0x6c   : > { %p14164_p13 = pnand %p14163_p12, %p14159_p9 }
  0x6e   : > { %14167 = shalt.err (!%p14164_p13)
}
  0x6f   : > { %s15619_s16 = smov 64   ;;  %s15621_s18 = smov 4  }
  0x70   : > { %13933 = dma.hbm_to_vmem [thread:$0]  (!%p14898_p5), %s14889_s1, 2048, %s1119_s11, [#allocation5], %s15619_s16, %s15619_s16, %s15621_s18  }
  0x71   : > { %s1196_s28 = sshll.u32 %s14756_s6, 4  ;;  %s14183_s22 = sshra.s32 %s14894_s7, 4  ;;  %s14184_s22 = int_to_ptr.hbm [resolvable:$true] %s14183_s22  ;;  %s1197_s28 = int_to_ptr.hbm [resolvable:$true] %s1196_s28 }
  0x72   : > { %s14185_s23 = scalar_lea.hbm %s14184_s22, 512  ;;  %s14190_s10 = scalar_lea.hbm %s15656_s20, 512 }
  0x73   : > { %p14186_p0 = scmp.ne.s32.totalorder %s14184_s22, %s14185_s23  ;;  %p14191_p6 = scmp.lt.s32.totalorder %s14184_s22, %s15656_s20 }
  0x74   : > { %p14192_p8 = scmp.lt.s32.totalorder %s14190_s10, %s14185_s23 }
  0x75   : > { %p14188_p1 = pnand %p14186_p0, %p14908_p7 }
  0x76   : > { %p14193_p9 = por %p14192_p8, %p14191_p6 }
  0x77   : > { %p14189_p4 = pneg %p14188_p1 }
  0x79   : > { %p14194_p10 = pnand %p14193_p9, %p14189_p4 }
  0x7b   : > { %14197 = shalt.err (!%p14194_p10)
}
  0x7c   : > { %s15624_s14 = smov 256   ;;  %s15663_s27 = sld [smem:[#allocation60_spill]] }
  0x7d   : > { %s14628_s1 = smov 16   ;;  %s14629_s22 = smov [#allocation10]  }
  0x7e   : > { %s1198_s23 = sshll.u32 %s14629_s22, 4  ;;  %s1236_s10 = sshll.u32 %s14786_s12, 4  ;;  %s1199_s23 = int_to_ptr.vmem [resolvable:$true] %s1198_s23  ;;  %s14937_s10 = int_to_ptr.hbm [resolvable:$true] %s1236_s10 }
  0x7f   : > { %s14213_s16 = sshra.s32 %s1197_s28, 4  ;;  %s14220_s20 = scalar_lea.hbm %s14756_s6, 256  ;;  %s14214_s16 = int_to_ptr.hbm [resolvable:$true] %s14213_s16 }
  0x80   : > { %s14215_s18 = scalar_lea.hbm %s14214_s16, 256  ;;  %p14221_p0 = scmp.lt.s32.totalorder %s14214_s16, %s14756_s6 }
  0x81   : > { %p14216_p11 = scmp.ne.s32.totalorder %s14214_s16, %s14215_s18  ;;  %p14222_p1 = scmp.lt.s32.totalorder %s14220_s20, %s14215_s18 }
  0x82   : > { %s15664_s11 = int_to_ptr.vmem [resolvable:$true] %s15663_s27 }
  0x83   : > { %13939 = dma.hbm_to_vmem [thread:$0]  (!%p14898_p5), %s14894_s7, 8192, %s15664_s11, [#allocation8], %s15624_s14, %s15624_s14, %s14628_s1  }
  0x84   : > { %p14218_p12 = pnand %p14216_p11, %p14908_p7  ;;  %p14223_p4 = por %p14222_p1, %p14221_p0 }
  0x86   : > { %p14219_p13 = pneg %p14218_p12 }
  0x88   : > { %p14224_p6 = pnand %p14223_p4, %p14219_p13 }
  0x8a   : > { %14227 = shalt.err (!%p14224_p6)
}
  0x8b   : > { %13945 = dma.hbm_to_vmem [thread:$0]  (!%p14898_p5), %s1197_s28, 4096, %s1199_s23, [#allocation11], %s15624_s14, %s15624_s14, %s14628_s1  }
  0x8c   : > { %s1279_s27 = sshll.u32 %s14821_s13, 4  ;;  %s14630_s7 = smov [#allocation13]   ;;  %s14949_s27 = int_to_ptr.hbm [resolvable:$true] %s1279_s27 }
  0x8d   : > { %s1238_s11 = sshll.u32 %s14630_s7, 4  ;;  %s14243_s20 = sshra.s32 %s14937_s10, 4  ;;  %s1239_s11 = int_to_ptr.vmem [resolvable:$true] %s1238_s11  ;;  %s14244_s20 = int_to_ptr.hbm [resolvable:$true] %s14243_s20 }
  0x8e   : > { %s14245_s18 = scalar_lea.hbm %s14244_s20, 1024  ;;  %s14250_s16 = scalar_lea.hbm %s14786_s12, 1024 }
  0x8f   : > { %p14246_p8 = scmp.ne.s32.totalorder %s14244_s20, %s14245_s18  ;;  %p14251_p11 = scmp.lt.s32.totalorder %s14244_s20, %s14786_s12 }
  0x90   : > { %p14252_p12 = scmp.lt.s32.totalorder %s14250_s16, %s14245_s18 }
  0x91   : > { %p14248_p9 = pnand %p14246_p8, %p14908_p7 }
  0x92   : > { %p14253_p13 = por %p14252_p12, %p14251_p11 }
  0x93   : > { %p14249_p10 = pneg %p14248_p9 }
  0x95   : > { %p14254_p0 = pnand %p14253_p13, %p14249_p10 }
  0x97   : > { %14257 = shalt.err (!%p14254_p0)
}
  0x98   : > { %13951 = dma.hbm_to_vmem [thread:$0]  (!%p14898_p5), %s14937_s10, 16384, %s1239_s11, [#allocation14], %s15624_s14, %s15624_s14, %s14628_s1  }
  0x99   : > { %s14631_s28 = smov [#allocation16]   ;;  %s1325_s23 = sshll.u32 %s14861_s21, 4  ;;  %s14963_s23 = int_to_ptr.hbm [resolvable:$true] %s1325_s23 }
  0x9a   : > { %s1281_s22 = sshll.u32 %s14631_s28, 4  ;;  %s14273_s7 = sshra.s32 %s14949_s27, 4  ;;  %s1282_s22 = int_to_ptr.vmem [resolvable:$true] %s1281_s22  ;;  %s14274_s7 = int_to_ptr.hbm [resolvable:$true] %s14273_s7 }
  0x9b   : > { %s14275_s20 = scalar_lea.hbm %s14274_s7, 512  ;;  %s14280_s18 = scalar_lea.hbm %s14821_s13, 512 }
  0x9c   : > { %p14276_p1 = scmp.ne.s32.totalorder %s14274_s7, %s14275_s20  ;;  %p14281_p8 = scmp.lt.s32.totalorder %s14274_s7, %s14821_s13 }
  0x9d   : > { %p14282_p9 = scmp.lt.s32.totalorder %s14280_s18, %s14275_s20 }
  0x9e   : > { %p14278_p4 = pnand %p14276_p1, %p14908_p7 }
  0x9f   : > { %p14283_p10 = por %p14282_p9, %p14281_p8 }
  0xa0   : > { %p14279_p6 = pneg %p14278_p4 }
  0xa2   : > { %p14284_p11 = pnand %p14283_p10, %p14279_p6 }
  0xa4   : > { %14287 = shalt.err (!%p14284_p11)
}
  0xa5   : > { %13957 = dma.hbm_to_vmem [thread:$0]  (!%p14898_p5), %s14949_s27, 8192, %s1282_s22, [#allocation17], %s15624_s14, %s15624_s14, %s14628_s1  }
  0xa6   : > { %s1099_s10 = sshll.u32 %s14686_s3, 4  ;;  %s14632_s11 = smov [#allocation19]   ;;  %s14977_s10 = int_to_ptr.hbm [resolvable:$true] %s1099_s10 }
  0xa7   : > { %s1327_s16 = sshll.u32 %s14632_s11, 4  ;;  %s14303_s28 = sshra.s32 %s14963_s23, 4  ;;  %s1328_s16 = int_to_ptr.vmem [resolvable:$true] %s1327_s16  ;;  %s14304_s28 = int_to_ptr.hbm [resolvable:$true] %s14303_s28 }
  0xa8   : > { %s14305_s7 = scalar_lea.hbm %s14304_s28, 256  ;;  %s14310_s20 = scalar_lea.hbm %s14861_s21, 256 }
  0xa9   : > { %p14306_p12 = scmp.ne.s32.totalorder %s14304_s28, %s14305_s7  ;;  %p14311_p1 = scmp.lt.s32.totalorder %s14304_s28, %s14861_s21 }
  0xaa   : > { %p14312_p4 = scmp.lt.s32.totalorder %s14310_s20, %s14305_s7 }
  0xab   : > { %p14308_p13 = pnand %p14306_p12, %p14908_p7 }
  0xac   : > { %p14313_p6 = por %p14312_p4, %p14311_p1 }
  0xad   : > { %p14309_p0 = pneg %p14308_p13 }
  0xaf   : > { %p14314_p8 = pnand %p14313_p6, %p14309_p0 }
  0xb1   : > { %14317 = shalt.err (!%p14314_p8)
}
  0xb2   : > { %s15665_s27 = smov 4   ;;  %s15666_s22 = smov 64  }
  0xb3   : > { %13963 = dma.hbm_to_vmem [thread:$0]  (!%p14898_p5), %s14963_s23, 4096, %s1328_s16, [#allocation20], %s15666_s22, %s15666_s22, %s15665_s27  }
  0xb4   : > { %s14633_s18 = smov [#allocation2]   ;;  %s1133_s14 = sshll.u32 %s14706_s24, 4  ;;  %s14991_s14 = int_to_ptr.hbm [resolvable:$true] %s1133_s14 }
  0xb5   : > { %s1101_s11 = sshll.u32 %s14633_s18, 4  ;;  %s14333_s28 = sshra.s32 %s14977_s10, 4  ;;  %s1102_s11 = int_to_ptr.vmem [resolvable:$true] %s1101_s11  ;;  %s14334_s28 = int_to_ptr.hbm [resolvable:$true] %s14333_s28 }
  0xb6   : > { %s14335_s7 = scalar_lea.hbm %s14334_s28, 128  ;;  %s14340_s20 = scalar_lea.hbm %s14686_s3, 128 }
  0xb7   : > { %p14336_p9 = scmp.ne.s32.totalorder %s14334_s28, %s14335_s7  ;;  %p14341_p12 = scmp.lt.s32.totalorder %s14334_s28, %s14686_s3 }
  0xb8   : > { %p14342_p13 = scmp.lt.s32.totalorder %s14340_s20, %s14335_s7 }
  0xb9   : > { %p14338_p10 = pnand %p14336_p9, %p14908_p7 }
  0xba   : > { %p14343_p0 = por %p14342_p13, %p14341_p12 }
  0xbb   : > { %p14339_p11 = pneg %p14338_p10 }
  0xbd   : > { %p14344_p1 = pnand %p14343_p0, %p14339_p11 }
  0xbf   : > { %14347 = shalt.err (!%p14344_p1)
}
  0xc0   : > { %13930 = dma.hbm_to_vmem [thread:$0]  (!%p14898_p5), %s14977_s10, 2048, %s1102_s11, [#allocation3], %s15666_s22, %s15666_s22, %s15665_s27  }
  0xc1   : > { %s1173_s23 = sshll.u32 %s14736_s4, 4  ;;  %s14634_s16 = smov [#allocation6]   ;;  %s15005_s23 = int_to_ptr.hbm [resolvable:$true] %s1173_s23 }
  0xc2   : > { %s1135_s18 = sshll.u32 %s14634_s16, 4  ;;  %s14363_s28 = sshra.s32 %s14991_s14, 4  ;;  %s1136_s18 = int_to_ptr.vmem [resolvable:$true] %s1135_s18  ;;  %s14364_s28 = int_to_ptr.hbm [resolvable:$true] %s14363_s28 }
  0xc3   : > { %s14365_s7 = scalar_lea.hbm %s14364_s28, 128  ;;  %s14370_s20 = scalar_lea.hbm %s14706_s24, 128 }
  0xc4   : > { %p14366_p4 = scmp.ne.s32.totalorder %s14364_s28, %s14365_s7  ;;  %p14371_p9 = scmp.lt.s32.totalorder %s14364_s28, %s14706_s24 }
  0xc5   : > { %p14372_p10 = scmp.lt.s32.totalorder %s14370_s20, %s14365_s7 }
  0xc6   : > { %p14368_p6 = pnand %p14366_p4, %p14908_p7 }
  0xc7   : > { %p14373_p11 = por %p14372_p10, %p14371_p9 }
  0xc8   : > { %p14369_p8 = pneg %p14368_p6 }
  0xca   : > { %p14374_p12 = pnand %p14373_p11, %p14369_p8 }
  0xcc   : > { %14377 = shalt.err (!%p14374_p12)
}
  0xcd   : > { %13936 = dma.hbm_to_vmem [thread:$0]  (!%p14898_p5), %s14991_s14, 2048, %s1136_s18, [#allocation5], %s15666_s22, %s15666_s22, %s15665_s27  }
  0xce   : > { %s14635_s10 = smov [#allocation9]   ;;  %s1219_s16 = sshll.u32 %s14776_s30, 4  ;;  %s15019_s16 = int_to_ptr.hbm [resolvable:$true] %s1219_s16 }
  0xcf   : > { %s1175_s11 = sshll.u32 %s14635_s10, 4  ;;  %s14393_s28 = sshra.s32 %s15005_s23, 4  ;;  %s1176_s11 = int_to_ptr.vmem [resolvable:$true] %s1175_s11  ;;  %s14394_s28 = int_to_ptr.hbm [resolvable:$true] %s14393_s28 }
  0xd0   : > { %s14395_s7 = scalar_lea.hbm %s14394_s28, 512  ;;  %s14400_s20 = scalar_lea.hbm %s14736_s4, 512 }
  0xd1   : > { %p14396_p13 = scmp.ne.s32.totalorder %s14394_s28, %s14395_s7  ;;  %p14401_p4 = scmp.lt.s32.totalorder %s14394_s28, %s14736_s4 }
  0xd2   : > { %p14402_p6 = scmp.lt.s32.totalorder %s14400_s20, %s14395_s7 }
  0xd3   : > { %p14398_p0 = pnand %p14396_p13, %p14908_p7 }
  0xd4   : > { %p14403_p8 = por %p14402_p6, %p14401_p4 }
  0xd5   : > { %p14399_p1 = pneg %p14398_p0 }
  0xd7   : > { %p14404_p9 = pnand %p14403_p8, %p14399_p1 }
  0xd9   : > { %14407 = shalt.err (!%p14404_p9)
}
  0xda   : > { %13942 = dma.hbm_to_vmem [thread:$0]  (!%p14898_p5), %s15005_s23, 8192, %s1176_s11, [#allocation8], %s15666_s22, %s15666_s22, %s15665_s27  }
  0xdb   : > { %s1265_s14 = sshll.u32 %s14816_s9, 4  ;;  %s14636_s18 = smov [#allocation12]   ;;  %s15033_s14 = int_to_ptr.hbm [resolvable:$true] %s1265_s14 }
  0xdc   : > { %s1221_s10 = sshll.u32 %s14636_s18, 4  ;;  %s14423_s28 = sshra.s32 %s15019_s16, 4  ;;  %s1222_s10 = int_to_ptr.vmem [resolvable:$true] %s1221_s10  ;;  %s14424_s28 = int_to_ptr.hbm [resolvable:$true] %s14423_s28 }
  0xdd   : > { %s14425_s7 = scalar_lea.hbm %s14424_s28, 1024  ;;  %s14430_s20 = scalar_lea.hbm %s14776_s30, 1024 }
  0xde   : > { %p14426_p10 = scmp.ne.s32.totalorder %s14424_s28, %s14425_s7  ;;  %p14431_p13 = scmp.lt.s32.totalorder %s14424_s28, %s14776_s30 }
  0xdf   : > { %p14432_p0 = scmp.lt.s32.totalorder %s14430_s20, %s14425_s7 }
  0xe0   : > { %p14428_p11 = pnand %p14426_p10, %p14908_p7 }
  0xe1   : > { %p14433_p1 = por %p14432_p0, %p14431_p13 }
  0xe2   : > { %p14429_p12 = pneg %p14428_p11 }
  0xe4   : > { %p14434_p4 = pnand %p14433_p1, %p14429_p12 }
  0xe6   : > { %14437 = shalt.err (!%p14434_p4)
}
  0xe7   : > { %s15667_s27 = smov 256   ;;  %s14637_s22 = smov [#allocation15]  }
  0xe8   : > { %13948 = dma.hbm_to_vmem [thread:$0]  (!%p14898_p5), %s15019_s16, 16384, %s1222_s10, [#allocation11], %s15667_s27, %s15667_s27, %s14628_s1  }
  0xe9   : > { %s1267_s23 = sshll.u32 %s14637_s22, 4  ;;  %s1302_s11 = sshll.u32 %s14841_s29, 4  ;;  %s1268_s23 = int_to_ptr.vmem [resolvable:$true] %s1267_s23  ;;  %s15047_s11 = int_to_ptr.hbm [resolvable:$true] %s1302_s11 }
  0xea   : > { %s14453_s18 = sshra.s32 %s15033_s14, 4  ;;  %s14460_s7 = scalar_lea.hbm %s14816_s9, 1024  ;;  %s14454_s18 = int_to_ptr.hbm [resolvable:$true] %s14453_s18 }
  0xeb   : > { %s14455_s28 = scalar_lea.hbm %s14454_s18, 1024  ;;  %p14461_p10 = scmp.lt.s32.totalorder %s14454_s18, %s14816_s9 }
  0xec   : > { %p14456_p6 = scmp.ne.s32.totalorder %s14454_s18, %s14455_s28  ;;  %p14462_p11 = scmp.lt.s32.totalorder %s14460_s7, %s14455_s28 }
  0xee   : > { %p14458_p8 = pnand %p14456_p6, %p14908_p7  ;;  %p14463_p12 = por %p14462_p11, %p14461_p10 }
  0xf0   : > { %p14459_p9 = pneg %p14458_p8 }
  0xf2   : > { %p14464_p13 = pnand %p14463_p12, %p14459_p9 }
  0xf4   : > { %14467 = shalt.err (!%p14464_p13)
}
  0xf5   : > { %13954 = dma.hbm_to_vmem [thread:$0]  (!%p14898_p5), %s15033_s14, 16384, %s1268_s23, [#allocation14], %s15667_s27, %s15667_s27, %s14628_s1  }
  0xf6   : > { %s1340_s16 = sshll.u32 %s14866_s19, 4  ;;  %s14638_s10 = smov [#allocation18]   ;;  %s15061_s16 = int_to_ptr.hbm [resolvable:$true] %s1340_s16 }
  0xf7   : > { %s1304_s20 = sshll.u32 %s14638_s10, 4  ;;  %s14483_s22 = sshra.s32 %s15047_s11, 4  ;;  %s1305_s20 = int_to_ptr.vmem [resolvable:$true] %s1304_s20  ;;  %s14484_s22 = int_to_ptr.hbm [resolvable:$true] %s14483_s22 }
  0xf8   : > { %s14485_s18 = scalar_lea.hbm %s14484_s22, 1024  ;;  %s14490_s28 = scalar_lea.hbm %s14841_s29, 1024 }
  0xf9   : > { %p14486_p0 = scmp.ne.s32.totalorder %s14484_s22, %s14485_s18  ;;  %p14491_p6 = scmp.lt.s32.totalorder %s14484_s22, %s14841_s29 }
  0xfa   : > { %p14492_p8 = scmp.lt.s32.totalorder %s14490_s28, %s14485_s18 }
  0xfb   : > { %p14488_p1 = pnand %p14486_p0, %p14908_p7 }
  0xfc   : > { %p14493_p9 = por %p14492_p8, %p14491_p6 }
  0xfd   : > { %p14489_p4 = pneg %p14488_p1 }
  0xff   : > { %p14494_p10 = pnand %p14493_p9, %p14489_p4 }
 0x101   : > { %14497 = shalt.err (!%p14494_p10)
}
 0x102   : > { %13960 = dma.hbm_to_vmem [thread:$0]  (!%p14898_p5), %s15047_s11, 16384, %s1305_s20, [#allocation17], %s15667_s27, %s15667_s27, %s14628_s1  }
 0x103   : > { %s14639_s14 = smov [#allocation21]   ;;  %s14513_s7 = sshra.s32 %s15061_s16, 4  ;;  %s14514_s7 = int_to_ptr.hbm [resolvable:$true] %s14513_s7 }
 0x104   : > { %s1342_s23 = sshll.u32 %s14639_s14, 4  ;;  %s14515_s10 = scalar_lea.hbm %s14514_s7, 1  ;;  %s1343_s23 = int_to_ptr.vmem [resolvable:$true] %s1342_s23 }
 0x105   : > { %p14516_p11 = scmp.ne.s32.totalorder %s14514_s7, %s14515_s10  ;;  %s14520_s22 = scalar_lea.hbm %s14866_s19, 1 }
 0x106   : > { %p14521_p0 = scmp.lt.s32.totalorder %s14514_s7, %s14866_s19  ;;  %p14522_p1 = scmp.lt.s32.totalorder %s14520_s22, %s14515_s10 }
 0x107   : > { %p14518_p12 = pnand %p14516_p11, %p14908_p7 }
 0x108   : > { %p14523_p4 = por %p14522_p1, %p14521_p0 }
 0x109   : > { %p14519_p13 = pneg %p14518_p12 }
 0x10b   : > { %p14524_p6 = pnand %p14523_p4, %p14519_p13 }
 0x10d   : > { %14527 = shalt.err (!%p14524_p6)
}
 0x10e   : > { %13966 = dma.hbm_to_vmem [thread:$0]  (!%p14898_p5), %s15061_s16, 16, %s1343_s23, [#allocation20]  }
 0x10f   : > { %1374 = sbr.rel (%p14885_p3) target bundleno = 6334 (0x18be), region = 196 }
 0x114   : > { %14548 = dma.done.wait (%p13967_p2), [#allocation3], 2048  }
 0x115   : > { %14550 = vsyncadd (%p13967_p2), [#allocation3], 4294965248 }
 0x116   : > { %14552 = dma.done.wait (%p13967_p2), [#allocation5], 4096  }
 0x117   : > { %14554 = vsyncadd (%p13967_p2), [#allocation5], 4294963200 }
 0x118   : > { %14556 = dma.done.wait (%p13967_p2), [#allocation8], 16384  }
 0x119   : > { %14558 = vsyncadd (%p13967_p2), [#allocation8], 4294950912 }
 0x11a   : > { %14560 = dma.done.wait (%p13967_p2), [#allocation11], 20480  }
 0x11b   : > { %14562 = vsyncadd (%p13967_p2), [#allocation11], 4294946816 }
 0x11c   : > { %14564 = dma.done.wait (%p13967_p2), [#allocation14], 32768  }
 0x11d   : > { %14566 = vsyncadd (%p13967_p2), [#allocation14], 4294934528 }
 0x11e   : > { %14568 = dma.done.wait (%p13967_p2), [#allocation17], 24576  }
 0x11f   : > { %14570 = vsyncadd (%p13967_p2), [#allocation17], 4294942720 }
 0x120   : > { %14572 = dma.done.wait (%p13967_p2), [#allocation20], 4112  }
 0x121   : > { %14574 = vsyncadd (%p13967_p2), [#allocation20], 4294963184  ;;  %p1544_p3 = scmp.lt.s32.totalorder %s14879_s0, 1  ;;  %v14640_v1 = vmov 128.0   ;;  %v13048_v2 = vld [vmem:[%s14676_s25 + $0x38] sm:$0xff]  ;;  %v13047_v15 = vld [vmem:[%s14676_s25 + $0x30] sm:$0xff]  ;;  %v1599_v52 = vlaneseq }
 0x122   : > { %14085 = vrcp.f32 %v14640_v1  ;;  %v13056_v3 = vld [vmem:[#allocation2 + $0x38] sm:$0xff]  ;;  %1690 = vmatpush.bf16.msra.mxu0 %v13048_v2  ;;  %v13055_v16 = vld [vmem:[#allocation2 + $0x30] sm:$0xff]  ;;  %v13046_v18 = vld [vmem:[%s14676_s25 + $0x28] sm:$0xff]  ;;  %s15668_s26 = sld [smem:[#allocation31_spill]]  ;;  %v14641_v58 = vmov 0.0   ;;  %vm1891_vm9 = vcmask 64512  }
 0x123   : > { %s15700_s0 = smov (!%p1544_p3, %s14879_s0), 1  ;;  %v13064_v4 = vld [vmem:[#allocation4 + $0x38] sm:$0xff]  ;;  %1771 = vmatpush.bf16.msra.mxu1 %v13056_v3  ;;  %v13063_v17 = vld [vmem:[#allocation4 + $0x30] sm:$0xff]  ;;  %v13054_v19 = vld [vmem:[#allocation2 + $0x28] sm:$0xff]  ;;  %s15669_s1 = sld [smem:[#allocation32_spill]]  ;;  %v15136_v53 = vand.u32 127, %v1599_v52 }
 0x124   : > { %s9662_s2 = sshll.u32 %s15700_s0, 3  ;;  %1852 = vmatpush.bf16.msra.mxu2 %v13064_v4  ;;  %v13062_v20 = vld [vmem:[#allocation4 + $0x28] sm:$0xff]  ;;  %v13045_v21 = vld [vmem:[%s14676_s25 + $0x20] sm:$0xff]  ;;  %v13044_v24 = vld [vmem:[%s14676_s25 + $0x18] sm:$0xff]  ;;  %s15670_s27 = sld [smem:[#allocation33_spill]] }
 0x125   : > { %s1547_s15 = scalar_lea.vmem %s14651_s5, %s9662_s2  ;;  %v13053_v22 = vld [vmem:[#allocation2 + $0x20] sm:$0xff]  ;;  %v13052_v25 = vld [vmem:[#allocation2 + $0x18] sm:$0xff]  ;;  %v13043_v27 = vld [vmem:[%s14676_s25 + $0x10] sm:$0xff]  ;;  %vm1602_vm4 = vcmp.lt.s32.totalorder %v15136_v53, 32  ;;  %s15671_s11 = sld [smem:[#allocation35_spill]]  ;;  %vm1616_vm5 = vcmp.ge.s32.totalorder %v15136_v53, 96 }
 0x126   : > { %v1558_v0 = vld [vmem:[%s1547_s15] sm:$0xff]  ;;  %1691 = vmatpush.bf16.msra.mxu0 %v13047_v15  ;;  %v13060_v26 = vld [vmem:[#allocation4 + $0x18] sm:$0xff]  ;;  %v13051_v28 = vld [vmem:[#allocation2 + $0x10] sm:$0xff]  ;;  %v15143_v59 = vsel %vm1602_vm4, 1.0, %v14641_v58  ;;  %v15146_v60 = vsel %vm1616_vm5, 1.0, %v14641_v58  ;;  %vm1606_vm6 = vcmp.ge.s32.totalorder %v15136_v53, 32 }
 0x127   : > { %1561 = vadd.xlane.f32.xlu0 %v1558_v0  ;;  %1772 = vmatpush.bf16.msra.mxu1 %v13055_v16  ;;  %v13061_v23 = vld [vmem:[#allocation4 + $0x20] sm:$0xff]  ;;  %v13059_v29 = vld [vmem:[#allocation4 + $0x10] sm:$0xff]  ;;  %v13042_v30 = vld [vmem:[%s14676_s25 + $0x8] sm:$0xff]  ;;  %vm1607_vm7 = vcmp.lt.s32.totalorder %v15136_v53, 64  ;;  %s15672_s16 = sld [smem:[#allocation29_spill]]  ;;  %vm1611_vm10 = vcmp.ge.s32.totalorder %v15136_v53, 64 }
 0x128   : > { %v14086_v5 = vpop.eup %14085  ;;  %1853 = vmatpush.bf16.msra.mxu2 %v13063_v17  ;;  %v13050_v31 = vld [vmem:[#allocation2 + $0x8] sm:$0xff]  ;;  %v13041_v33 = vld [vmem:[%s14676_s25] sm:$0xff]  ;;  %vm1608_vm8 = vmand %vm1606_vm6, %vm1607_vm7  ;;  %vm1612_vm11 = vcmp.lt.s32.totalorder %v15136_v53, 96  ;;  %s15673_s18 = sld [smem:[#allocation36_spill]] }
 0x129   : > { %v1564_v6 = vmul.f32 128.0, %v14086_v5  ;;  %vm1568_vm0 = vweird.f32 %v14086_v5  ;;  %v13058_v32 = vld [vmem:[#allocation4 + $0x8] sm:$0xff]  ;;  %v13049_v34 = vld [vmem:[#allocation2] sm:$0xff]  ;;  %vm1613_vm12 = vmand %vm1611_vm10, %vm1612_vm11  ;;  %s15674_s28 = sld [smem:[#allocation37_spill]] }
 0x12a   : > { %1692 = vmatpush.bf16.msra.mxu0 %v13046_v18  ;;  %v13057_v35 = vld [vmem:[#allocation4] sm:$0xff]  ;;  %s15676_s23 = sld [smem:[#allocation38_spill]] }
 0x12b   : > { %v1565_v7 = vsub.f32 1.0, %v1564_v6  ;;  %1773 = vmatpush.bf16.msra.mxu1 %v13054_v19  ;;  %v14065_v45 = vld [vmem:[%s14666_s17] ss:$0 sm:$0xff]  ;;  %v15163_v6 = vsel %vm1608_vm8, 1.0, %v14641_v58  ;;  %s15677_s7 = sld [smem:[#allocation40_spill]] }
 0x12c   : > { %1854 = vmatpush.bf16.msra.mxu2 %v13062_v20  ;;  %v14066_v48 = vld [vmem:[%s15668_s26] ss:$0 sm:$0xff]  ;;  %s15678_s10 = sld [smem:[#allocation41_spill]] }
 0x12d   : > { %v1566_v8 = vmul.f32 %v14086_v5, %v1565_v7  ;;  %v14067_v54 = vld [vmem:[%s15669_s1] ss:$0 sm:$0xff]  ;;  %s1550_s20 = scalar_lea.vmem %s15672_s16, %s15700_s0  ;;  %s15679_s22 = sld [smem:[#allocation42_spill]] }
 0x12e   : > { %1693 = vmatpush.bf16.msra.mxu0 %v13045_v21  ;;  %v14068_v55 = vld [vmem:[%s15670_s27] ss:$0 sm:$0xff]  ;;  %s15680_s2 = sld [smem:[#allocation43_spill]] }
 0x12f   : > { %v1567_v9 = vadd.f32 %v14086_v5, %v1566_v8  ;;  %1774 = vmatpush.bf16.msra.mxu1 %v13053_v22  ;;  %v14069_v1 = vld [vmem:[%s15671_s11] ss:$0 sm:$0xff]  ;;  %s15675_s14 = smov %s15674_s28  ;;  %s15681_s15 = sld [smem:[#allocation44_spill]] }
 0x130   : > { %1855 = vmatpush.bf16.msra.mxu2 %v13061_v23  ;;  %s15682_s26 = sld [smem:[#allocation45_spill]] }
 0x131   : > { %v15119_v10 = vsel %vm1568_vm0, %v14086_v5, %v1567_v9  ;;  %s15683_s16 = sld [smem:[#allocation46_spill]] }
 0x132   : > { %1694 = vmatpush.bf16.msra.mxu0 %v13044_v24 }
 0x133   : > { %1775 = vmatpush.bf16.msra.mxu1 %v13052_v25 }
 0x134   : > { %1856 = vmatpush.bf16.msra.mxu2 %v13060_v26 }
 0x136   : > { %1695 = vmatpush.bf16.msra.mxu0 %v13043_v27 }
 0x137   : > { %1776 = vmatpush.bf16.msra.mxu1 %v13051_v28 }
 0x138   : > { %1857 = vmatpush.bf16.msra.mxu2 %v13059_v29 }
 0x13a   : > { %1696 = vmatpush.bf16.msra.mxu0 %v13042_v30 }
 0x13b   : > { %1777 = vmatpush.bf16.msra.mxu1 %v13050_v31 }
 0x13c   : > { %1858 = vmatpush.bf16.msra.mxu2 %v13058_v32 }
 0x13e   : > { %1697 = vmatpush.bf16.msra.mxu0 %v13041_v33 }
 0x13f   : > { %1778 = vmatpush.bf16.msra.mxu1 %v13049_v34 }
 0x140   : > { %1859 = vmatpush.bf16.msra.mxu2 %v13057_v35 }
 0x19a   : > { %v1562_v11 = vpop.xlane.xlu0 %1561 }
 0x19b   : > { %v1570_v12 = vmul.f32 %v15119_v10, %v1562_v11 }
 0x19d   : > { %v1571_v13 = vsub.f32 %v1558_v0, %v1570_v12 }
 0x19f   : > { %v1572_v14 = vmul.f32 %v1571_v13, %v1571_v13 }
 0x1a1   : > { %1573 = vadd.xlane.f32.xlu0 %v1572_v14 }
 0x214   : > { %v1574_v36 = vpop.xlane.xlu0 %1573 }
 0x215   : > { %v1575_v37 = vmul.f32 %v1574_v36, %v15119_v10 }
 0x217   : > { %v1576_v38 = vadd.f32 1e-12, %v1575_v37 }
 0x219   : > { %14087 = vrsqrt.f32 %v1576_v38  ;;  %vm1583_vm2 = vweird.f32 %v1576_v38 }
 0x21f   : > { %v14088_v39 = vpop.eup %14087 }
 0x220   : > { %v1578_v40 = vmul.f32 %v14088_v39, %v1576_v38  ;;  %vm1584_vm1 = vweird.f32 %v14088_v39 }
 0x221   : > { %vm1585_vm3 = vmor %vm1583_vm2, %vm1584_vm1 }
 0x222   : > { %v1579_v41 = vmul.f32 %v14088_v39, %v1578_v40 }
 0x224   : > { %v1580_v42 = vmul.f32 0.5, %v1579_v41 }
 0x226   : > { %v1581_v43 = vsub.f32 1.5, %v1580_v42 }
 0x228   : > { %v1582_v44 = vmul.f32 %v14088_v39, %v1581_v43 }
 0x22a   : > { %v1586_v46 = vsel %vm1585_vm3, %v14088_v39, %v1582_v44 }
 0x22b   : > { %v1587_v47 = vmul.f32 %v1586_v46, %v1571_v13  ;;  %v1596_v13 = vld [vmem:[%s1550_s20] sm:$0x1]  ;;  %s15684_s20 = sld [smem:[#allocation47_spill]] }
 0x22c   : > { %v1597_v15 = vsub.f32 1.0, %v1596_v13  ;;  %v13068_v13 = vld [vmem:[#allocation6 + $0x18] sm:$0xff] }
 0x22d   : > { %v1591_v49 = vmul.f32 %v14065_v45, %v1587_v47  ;;  %v15187_v45 = vsel %vm1613_vm12, 1.0, %v14641_v58 }
 0x22e   : > { %v1598_v16 = vmul.f32 -10000.0, %v1597_v15  ;;  %v13067_v15 = vld [vmem:[#allocation6 + $0x10] sm:$0xff] }
 0x22f   : > { %v15132_v50 = vadd.f32 %v14066_v48, %v1591_v49 }
 0x230   : > { %v15172_v18 = vperm.slane %v1598_v16, 0 }
 0x231   : > { %v1637_v51 = vpack.c.bf16 %v15132_v50, %v15132_v50 }
 0x233   : > { %1698 = vmatmul.bf16.vlgmr.msra.gmra.mxu0 %v1637_v51  ;;  %1779 = vmatmul.bf16.vlgmr.msra.gmra.mxu1 %v1637_v51 }
 0x234   : > { %1860 = vmatmul.bf16.vlgmr.msra.gmra.mxu2 %v1637_v51 }
 0x2b0   : > { %v1699_v56 = vpop.f32.mrf.mxu0  ;;  %v1780_v57 = vpop.f32.mrf.mxu1 }
 0x2b1   : > { %v15148_v61 = vadd.f32 %v14067_v54, %v1699_v56  ;;  %v15150_v62 = vadd.f32 %v14068_v55, %v1780_v57 }
 0x2b3   : > { %1881 = vmatpush.xpose.msra.mxu3 %v15150_v62  ;;  %2060 = vmatpush.xpose.msrb.mxu0 %v15150_v62  ;;  %v1865_v63 = vmul.f32 %v15143_v59, %v15148_v61  ;;  %v2044_v0 = vmul.f32 %v15146_v60, %v15148_v61  ;;  %v1904_v9 = vmul.f32 %v15163_v6, %v15148_v61 }
 0x2b4   : > { %v1985_v47 = vmul.f32 %v15187_v45, %v15148_v61 }
 0x2b6   : > { %1882 = vmatmul.f32.vlgmr.msra.gmra.mxu3 %v1865_v63  ;;  %2061 = vmatmul.f32.vlgmr.msrb.gmra.mxu0 %v2044_v0 }
 0x2b7   : > { %1920 = vmatpush.xpose.msrb.mxu3 %v15150_v62  ;;  %v1861_v2 = vpop.f32.mrf.mxu2 }
 0x2b8   : > { %v1862_v3 = vadd.f32 %v14069_v1, %v1861_v2  ;;  %v1701_v4 = vpop.f32.mrf.mxu0  ;;  %v1782_v5 = vpop.f32.mrf.mxu1 }
 0x2ba   : > { %v1938_v7 = vmul.f32 %v15163_v6, %v1862_v3  ;;  %v2078_v8 = vmul.f32 %v15146_v60, %v1862_v3  ;;  %v1903_v11 = vmul.f32 %v15143_v59, %v1862_v3  ;;  %v2019_v46 = vmul.f32 %v15187_v45, %v1862_v3 }
 0x2bc   : > { %1957 = vmatpush.msra.mxu3 %v1938_v7  ;;  %2097 = vmatpush.msra.mxu0 %v2078_v8  ;;  %v13072_v8 = vld [vmem:[#allocation6 + $0x38] sm:$0xff] }
 0x2bd   : > { %2172 = vmatpush.bf16.msrb.mxu2 %v13072_v8 }
 0x2be   : > { %1921 = vmatmul.f32.vlgmr.msrb.gmra.mxu3 %v1904_v9  ;;  %v13071_v9 = vld [vmem:[#allocation6 + $0x30] sm:$0xff] }
 0x2bf   : > { %v1863_v12 = vpop.f32.mrf.mxu2  ;;  %1980 = vmatpush.msrb.mxu3 %v1903_v11  ;;  %v13070_v11 = vld [vmem:[#allocation6 + $0x28] sm:$0xff] }
 0x2c0   : > { %v13069_v12 = vld [vmem:[#allocation6 + $0x20] sm:$0xff] }
 0x2c1   : > { %2173 = vmatpush.bf16.msrb.mxu2 %v13071_v9 }
 0x2c5   : > { %2174 = vmatpush.bf16.msrb.mxu2 %v13070_v11  ;;  %v13094_v11 = vld [vmem:[#allocation7 + $0xac] sm:$0xf] }
 0x2c9   : > { %2175 = vmatpush.bf16.msrb.mxu2 %v13069_v12  ;;  %v9891_v12 = vld [vmem:[#allocation7 + $0xb8] sm:$0xf0] }
 0x2cd   : > { %2176 = vmatpush.bf16.msrb.mxu2 %v13068_v13  ;;  %v9894_v13 = vor.u32 %v13094_v11, %v9891_v12  ;;  %v9809_v12 = vld [vmem:[#allocation7 + $0x8] sm:$0xf] }
 0x2d1   : > { %2177 = vmatpush.bf16.msrb.mxu2 %v13067_v15  ;;  %v13091_v15 = vld [vmem:[#allocation7 + $0x8c] sm:$0xf0] }
 0x333   : > { %v2062_v24 = vpop.f32.mrf.mxu0 }
 0x334   : > { %v2065_v25 = vmul.f32 0.17677669, %v2062_v24 }
 0x336   : > { %v2066_v27 = vadd.f32 %v2065_v25, %v15172_v18 }
 0x338   : > { %v2067_v28 = vsel %vm1891_vm9, %v2066_v27, -inf }
 0x339   : > { %v1883_v14 = vpop.f32.mrf.mxu3 }
 0x33a   : > { %v1886_v21 = vmul.f32 0.17677669, %v1883_v14 }
 0x33c   : > { %v1890_v23 = vadd.f32 %v15172_v18, %v1886_v21 }
 0x33e   : > { %v1892_v26 = vsel %vm1891_vm9, %v1890_v23, -inf }
 0x341   : > { %v1922_v17 = vpop.f32.mrf.mxu3 }
 0x342   : > { %v1925_v19 = vmul.f32 0.17677669, %v1922_v17 }
 0x344   : > { %v1926_v20 = vadd.f32 %v1925_v19, %v15172_v18  ;;  %v13066_v19 = vld [vmem:[#allocation6 + $0x8] sm:$0xff] }
 0x345   : > { %2178 = vmatpush.bf16.msrb.mxu2 %v13066_v19  ;;  %v9867_v19 = vld [vmem:[#allocation7 + $0x90] sm:$0xf0] }
 0x346   : > { %v1927_v22 = vsel %vm1891_vm9, %v1926_v20, -inf }
 0x347   : > { %1928 = vmax.xlane.f32.xlu1 %v1927_v22 }
 0x34f   : > { %1893 = vmax.xlane.f32.xlu1 %v1892_v26 }
 0x357   : > { %2068 = vmax.xlane.f32.xlu1 %v2067_v28 }
 0x3ba   : > { %v1929_v29 = vpop.xlane.xlu1 %1928 }
 0x3bb   : > { %v1930_v30 = vsub.f32 %v1926_v20, %v1929_v29  ;;  %v13065_v20 = vld [vmem:[#allocation6] sm:$0xff] }
 0x3bc   : > { %2179 = vmatpush.bf16.msrb.mxu2 %v13065_v20  ;;  %v9873_v20 = vld [vmem:[#allocation7 + $0x88] sm:$0xf] }
 0x3bd   : > { %v1931_v31 = vmul.f32 1.442695, %v1930_v30 }
 0x3bf   : > { %14089 = vpow2.f32 %v1931_v31 }
 0x3c2   : > { %v1894_v32 = vpop.xlane.xlu1 %1893 }
 0x3c3   : > { %v1895_v33 = vsub.f32 %v1890_v23, %v1894_v32  ;;  %v9913_v32 = vld [vmem:[#allocation7 + $0xe0] sm:$0xf] }
 0x3c5   : > { %v14090_v34 = vpop.eup %14089  ;;  %v1896_v35 = vmul.f32 1.442695, %v1895_v33  ;;  %v13103_v33 = vld [vmem:[#allocation7 + $0xec] sm:$0xf0] }
 0x3c6   : > { %v1933_v36 = vsel %vm1891_vm9, %v14090_v34, 0.0 }
 0x3c7   : > { %14091 = vpow2.f32 %v1896_v35  ;;  %1934 = vadd.xlane.f32.xlu2 %v1933_v36  ;;  %v9914_v35 = vor.u32 %v13103_v33, %v9913_v32  ;;  %v9915_v36 = vld [vmem:[#allocation7 + $0xf0] sm:$0xf0]  ;;  %v9857_v32 = vld [vmem:[#allocation7 + $0x68] sm:$0xf]  ;;  %v13088_v33 = vld [vmem:[#allocation7 + $0x74] sm:$0xf0] }
 0x3ca   : > { %v2069_v51 = vpop.xlane.xlu1 %2068 }
 0x3cb   : > { %v2070_v52 = vsub.f32 %v2066_v27, %v2069_v51  ;;  %v14070_v27 = vld [vmem:[%s15673_s18] ss:$0 sm:$0xff]  ;;  %v13097_v51 = vld [vmem:[#allocation7 + $0xc4] sm:$0xf] }
 0x3cd   : > { %v14092_v37 = vpop.eup %14091  ;;  %v2071_v54 = vmul.f32 1.442695, %v2070_v52 }
 0x3ce   : > { %v1898_v38 = vsel %vm1891_vm9, %v14092_v37, 0.0 }
 0x3cf   : > { %1899 = vadd.xlane.f32.xlu2 %v1898_v38  ;;  %v13104_v38 = vld [vmem:[#allocation7 + $0xf4] sm:$0xf0] }
 0x43a   : > { %v1935_v39 = vpop.xlane.xlu2 %1934 }
 0x43b   : > { %14093 = vrcp.f32 %v1935_v39 }
 0x441   : > { %v14094_v40 = vpop.eup %14093 }
 0x442   : > { %v1937_v41 = vmul.f32 %v14094_v40, %v14090_v34  ;;  %v1900_v42 = vpop.xlane.xlu2 %1899  ;;  %v13101_v34 = vld [vmem:[#allocation7 + $0xe4] sm:$0xf] }
 0x443   : > { %14095 = vrcp.f32 %v1900_v42  ;;  %v9918_v39 = vor.u32 %v13101_v34, %v9915_v36  ;;  %v9923_v42 = vld [vmem:[#allocation7 + $0xf8] sm:$0xf0]  ;;  %v13086_v36 = vld [vmem:[#allocation7 + $0x6c] sm:$0xf] }
 0x444   : > { %9763 = vmatmul.msk.f32.vlgmr.msra.gmra.mxu3 %vm1891_vm9, %v1937_v41  ;;  %14097 = vpow2.f32 %v2071_v54  ;;  %v13102_v41 = vld [vmem:[#allocation7 + $0xec] sm:$0xf]  ;;  %v9899_v54 = vld [vmem:[#allocation7 + $0xd0] sm:$0xf0] }
 0x445   : > { %2001 = vmatpush.xpose.msra.mxu3 %v15150_v62  ;;  %2432 = vmatpush.bf16.msrb.mxu0 %v9918_v39  ;;  %v9833_v39 = vld [vmem:[#allocation7 + $0x40] sm:$0xf] }
 0x449   : > { %v14096_v43 = vpop.eup %14095 }
 0x44a   : > { %v1902_v44 = vmul.f32 %v14096_v43, %v14092_v37  ;;  %v14098_v62 = vpop.eup %14097  ;;  %v9921_v37 = vld [vmem:[#allocation7 + $0xe8] sm:$0xf]  ;;  %v9926_v43 = vor.u32 %v13102_v41, %v9923_v42  ;;  %v13081_v41 = vld [vmem:[#allocation7 + $0x44] sm:$0xf] }
 0x44b   : > { %v2073_v63 = vsel %vm1891_vm9, %v14098_v62, 0.0  ;;  %v9922_v40 = vor.u32 %v13104_v38, %v9921_v37  ;;  %v9859_v37 = vld [vmem:[#allocation7 + $0x78] sm:$0xf0] }
 0x44c   : > { %9764 = vmatmul.msk.f32.vlgmr.msrb.gmra.mxu3 %vm1891_vm9, %v1902_v44  ;;  %2458 = vmatpush.bf16.msra.mxu2 %v9926_v43  ;;  %v9862_v38 = vor.u32 %v13086_v36, %v9859_v37  ;;  %v9835_v43 = vld [vmem:[#allocation7 + $0x50] sm:$0xf0] }
 0x44d   : > { %2038 = vmatpush.msrb.mxu3 %v2019_v46  ;;  %2445 = vmatpush.bf16.msrb.mxu1 %v9922_v40  ;;  %v13083_v40 = vld [vmem:[#allocation7 + $0x4c] sm:$0xf0] }
 0x44e   : > { %v9834_v42 = vor.u32 %v13083_v40, %v9833_v39  ;;  %v13119_v37 = vld [vmem:[#allocation9 + $0x70] sm:$0xff]  ;;  %v13112_v39 = vld [vmem:[#allocation9 + $0x38] sm:$0xff] }
 0x44f   : > { %v13136_v40 = vld [vmem:[#allocation9 + $0xf8] sm:$0xff] }
 0x454   : > { %2002 = vmatmul.f32.vlgmr.msra.gmra.mxu3 %v1985_v47 }
 0x455   : > { %2419 = vmatpush.bf16.msra.mxu3 %v9914_v35  ;;  %v9858_v35 = vor.u32 %v13088_v33, %v9857_v32  ;;  %v14072_v33 = vld [vmem:[%s15676_s23] ss:$0 sm:$0xff] }
 0x4c7   : > { %v1959_v48 = vpop.f32.mrf.mxu3 }
 0x4cf   : > { %v1982_v49 = vpop.f32.mrf.mxu3 }
 0x4d0   : > { %v1983_v21 = vadd.f32 %v1982_v49, %v1959_v48  ;;  %v9897_v48 = vld [vmem:[#allocation7 + $0xc0] sm:$0xf]  ;;  %v13099_v49 = vld [vmem:[#allocation7 + $0xcc] sm:$0xf0] }
 0x4d1   : > { %v9898_v52 = vor.u32 %v13099_v49, %v9897_v48  ;;  %v13082_v49 = vld [vmem:[#allocation7 + $0x4c] sm:$0xf] }
 0x4d3   : > { %2420 = vmatpush.bf16.msra.mxu3 %v9898_v52 }
 0x4d7   : > { %v2003_v55 = vpop.f32.mrf.mxu3 }
 0x4d8   : > { %v2006_v56 = vmul.f32 0.17677669, %v2003_v55  ;;  %v9905_v55 = vld [vmem:[#allocation7 + $0xc8] sm:$0xf] }
 0x4da   : > { %v2007_v57 = vadd.f32 %v2006_v56, %v15172_v18  ;;  %v13100_v56 = vld [vmem:[#allocation7 + $0xd4] sm:$0xf0] }
 0x4dc   : > { %v2008_v58 = vsel %vm1891_vm9, %v2007_v57, -inf }
 0x4dd   : > { %2009 = vmax.xlane.f32.xlu0 %v2008_v58  ;;  %v9906_v58 = vor.u32 %v13100_v56, %v9905_v55  ;;  %v13079_v55 = vld [vmem:[#allocation7 + $0x2c] sm:$0xf0]  ;;  %v13077_v56 = vld [vmem:[#allocation7 + $0x24] sm:$0xf] }
 0x4df   : > { %2446 = vmatpush.bf16.msrb.mxu1 %v9906_v58  ;;  %v9819_v58 = vld [vmem:[#allocation7 + $0x30] sm:$0xf0] }
 0x4e5   : > { %2074 = vadd.xlane.f32.xlu0 %v2073_v63  ;;  %v9907_v63 = vld [vmem:[#allocation7 + $0xd8] sm:$0xf0] }
 0x550   : > { %v2010_v0 = vpop.xlane.xlu0 %2009 }
 0x551   : > { %v2011_v61 = vsub.f32 %v2007_v57, %v2010_v0  ;;  %v9902_v57 = vor.u32 %v13097_v51, %v9899_v54  ;;  %v9843_v51 = vld [vmem:[#allocation7 + $0x58] sm:$0xf0]  ;;  %v9817_v54 = vld [vmem:[#allocation7 + $0x20] sm:$0xf] }
 0x552   : > { %v9846_v52 = vor.u32 %v13082_v49, %v9843_v51  ;;  %v13116_v49 = vld [vmem:[#allocation9 + $0x58] sm:$0xff] }
 0x553   : > { %v2012_v1 = vmul.f32 1.442695, %v2011_v61  ;;  %2433 = vmatpush.bf16.msrb.mxu0 %v9902_v57  ;;  %v9881_v61 = vld [vmem:[#allocation7 + $0xa0] sm:$0xf]  ;;  %v9818_v57 = vor.u32 %v13079_v55, %v9817_v54  ;;  %v13124_v51 = vld [vmem:[#allocation9 + $0x98] sm:$0xff]  ;;  %v13115_v55 = vld [vmem:[#allocation9 + $0x50] sm:$0xff] }
 0x554   : > { %v13133_v54 = vld [vmem:[#allocation9 + $0xe0] sm:$0xff] }
 0x555   : > { %14099 = vpow2.f32 %v2012_v1  ;;  %v13095_v1 = vld [vmem:[#allocation7 + $0xac] sm:$0xf0] }
 0x558   : > { %v2075_v2 = vpop.xlane.xlu0 %2074 }
 0x559   : > { %14101 = vrcp.f32 %v2075_v2  ;;  %v13093_v2 = vld [vmem:[#allocation7 + $0xa4] sm:$0xf] }
 0x55b   : > { %v14100_v3 = vpop.eup %14099 }
 0x55c   : > { %v2014_v4 = vsel %vm1891_vm9, %v14100_v3, 0.0 }
 0x55d   : > { %2015 = vadd.xlane.f32.xlu2 %v2014_v4  ;;  %v9883_v4 = vld [vmem:[#allocation7 + $0xb0] sm:$0xf0] }
 0x55e   : > { %v9886_v8 = vor.u32 %v13093_v2, %v9883_v4  ;;  %v9827_v2 = vld [vmem:[#allocation7 + $0x38] sm:$0xf0] }
 0x55f   : > { %v14102_v5 = vpop.eup %14101 }
 0x560   : > { %v2077_v7 = vmul.f32 %v14102_v5, %v14098_v62  ;;  %v13098_v62 = vld [vmem:[#allocation7 + $0xcc] sm:$0xf]  ;;  %v9889_v5 = vld [vmem:[#allocation7 + $0xa8] sm:$0xf]  ;;  %2434 = vmatpush.bf16.msrb.mxu0 %v9886_v8  ;;  %v9803_v8 = vld [vmem:[#allocation7 + $0x10] sm:$0xf0] }
 0x561   : > { %v9910_v0 = vor.u32 %v13098_v62, %v9907_v63  ;;  %v9825_v62 = vld [vmem:[#allocation7 + $0x28] sm:$0xf]  ;;  %v13080_v63 = vld [vmem:[#allocation7 + $0x34] sm:$0xf0] }
 0x562   : > { %9766 = vmatmul.msk.f32.vlgmr.msra.gmra.mxu0 %vm1891_vm9, %v2077_v7  ;;  %v13096_v7 = vld [vmem:[#allocation7 + $0xb4] sm:$0xf0] }
 0x563   : > { %2459 = vmatpush.bf16.msra.mxu2 %v9910_v0  ;;  %v9890_v9 = vor.u32 %v13096_v7, %v9889_v5  ;;  %v9822_v0 = vor.u32 %v13077_v56, %v9819_v58  ;;  %v13075_v5 = vld [vmem:[#allocation7 + $0xc] sm:$0xf0]  ;;  %v13073_v7 = vld [vmem:[#allocation7 + $0x4] sm:$0xf]  ;;  %v13132_v58 = vld [vmem:[#allocation9 + $0xd8] sm:$0xff] }
 0x564   : > { %v9806_v11 = vor.u32 %v13073_v7, %v9803_v8  ;;  %v13123_v56 = vld [vmem:[#allocation9 + $0x90] sm:$0xff]  ;;  %v13105_v8 = vld [vmem:[#allocation9] sm:$0xff] }
 0x565   : > { %2447 = vmatpush.bf16.msrb.mxu1 %v9890_v9 }
 0x567   : > { %2460 = vmatpush.bf16.msra.mxu2 %v9894_v13  ;;  %v13076_v13 = vld [vmem:[#allocation7 + $0x14] sm:$0xf0] }
 0x5d0   : > { %v2016_v14 = vpop.xlane.xlu2 %2015 }
 0x5d1   : > { %14103 = vrcp.f32 %v2016_v14  ;;  %v9865_v14 = vld [vmem:[#allocation7 + $0x80] sm:$0xf] }
 0x5d7   : > { %v14104_v16 = vpop.eup %14103 }
 0x5d8   : > { %v2018_v17 = vmul.f32 %v14104_v16, %v14100_v3  ;;  %v9882_v3 = vor.u32 %v13095_v1, %v9881_v61  ;;  %v13089_v16 = vld [vmem:[#allocation7 + $0x84] sm:$0xf]  ;;  %v9826_v61 = vor.u32 %v13080_v63, %v9825_v62  ;;  %v13078_v1 = vld [vmem:[#allocation7 + $0x2c] sm:$0xf] }
 0x5d9   : > { %v9830_v4 = vor.u32 %v13078_v1, %v9827_v2  ;;  %v13114_v62 = vld [vmem:[#allocation9 + $0x48] sm:$0xff]  ;;  %v13113_v1 = vld [vmem:[#allocation9 + $0x40] sm:$0xff] }
 0x5da   : > { %9765 = vmatmul.msk.f32.vlgmr.msrb.gmra.mxu3 %vm1891_vm9, %v2018_v17  ;;  %v9866_v17 = vor.u32 %v13091_v15, %v9865_v14  ;;  %v13074_v14 = vld [vmem:[#allocation7 + $0xc] sm:$0xf]  ;;  %v9810_v15 = vor.u32 %v13076_v13, %v9809_v12  ;;  %v13121_v2 = vld [vmem:[#allocation9 + $0x80] sm:$0xff] }
 0x5db   : > { %2421 = vmatpush.bf16.msra.mxu3 %v9882_v3  ;;  %v9801_v3 = vld [vmem:[#allocation7] sm:$0xf]  ;;  %v13122_v63 = vld [vmem:[#allocation9 + $0x88] sm:$0xff] }
 0x5dc   : > { %v9802_v9 = vor.u32 %v13075_v5, %v9801_v3  ;;  %v13106_v3 = vld [vmem:[#allocation9 + $0x8] sm:$0xff]  ;;  %v2249_v5 = vld [vmem:[%s15677_s7] sm:$0xf] }
 0x5dd   : > { %v2252_v7 = vperm.slane %v2249_v5, 1 }
 0x5df   : > { %v2099_v24 = vpop.f32.mrf.mxu0  ;;  %2422 = vmatpush.bf16.msra.mxu3 %v9866_v17 }
 0x65d   : > { %v2040_v22 = vpop.f32.mrf.mxu3 }
 0x65e   : > { %v2043_v23 = vadd.f32 %v2040_v22, %v1983_v21  ;;  %v13092_v21 = vld [vmem:[#allocation7 + $0x94] sm:$0xf0]  ;;  %v9870_v22 = vor.u32 %v13089_v16, %v9867_v19  ;;  %v9811_v16 = vld [vmem:[#allocation7 + $0x18] sm:$0xf0] }
 0x65f   : > { %v9814_v17 = vor.u32 %v13074_v14, %v9811_v16 }
 0x660   : > { %v2102_v25 = vadd.f32 %v2099_v24, %v2043_v23  ;;  %v9874_v23 = vor.u32 %v13092_v21, %v9873_v20  ;;  %v13090_v24 = vld [vmem:[#allocation7 + $0x8c] sm:$0xf]  ;;  %2435 = vmatpush.bf16.msrb.mxu0 %v9870_v22  ;;  %v13120_v20 = vld [vmem:[#allocation9 + $0x78] sm:$0xff] }
 0x661   : > { %v13128_v21 = vld [vmem:[#allocation9 + $0xb8] sm:$0xff] }
 0x662   : > { %v2119_v26 = vpack.c.bf16 %v2102_v25, %v2102_v25  ;;  %v9875_v25 = vld [vmem:[#allocation7 + $0x98] sm:$0xf0]  ;;  %2448 = vmatpush.bf16.msrb.mxu1 %v9874_v23 }
 0x664   : > { %2180 = vmatmul.bf16.vlgmr.msrb.gmra.mxu2 %v2119_v26  ;;  %v9878_v26 = vor.u32 %v13090_v24, %v9875_v25 }
 0x666   : > { %2461 = vmatpush.bf16.msra.mxu2 %v9878_v26  ;;  %2449 = vmatpush.bf16.msrb.mxu1 %v9858_v35 }
 0x66a   : > { %2462 = vmatpush.bf16.msra.mxu2 %v9862_v38  ;;  %v13127_v38 = vld [vmem:[#allocation9 + $0xb0] sm:$0xff] }
 0x66e   : > { %2463 = vmatpush.bf16.msra.mxu2 %v9846_v52  ;;  %v13109_v52 = vld [vmem:[#allocation9 + $0x20] sm:$0xff] }
 0x672   : > { %2464 = vmatpush.bf16.msra.mxu2 %v9830_v4  ;;  %v13130_v4 = vld [vmem:[#allocation9 + $0xc8] sm:$0xff] }
 0x676   : > { %2465 = vmatpush.bf16.msra.mxu2 %v9814_v17  ;;  %v2251_v17 = vperm.slane %v2249_v5, 0 }
 0x67a   : > { %2810 = vmatpush.bf16.msrb.mxu2 %v13136_v40 }
 0x6e7   : > { %v2181_v28 = vpop.f32.mrf.mxu2 }
 0x6e8   : > { %v2182_v29 = vadd.f32 %v14070_v27, %v2181_v28  ;;  %v9849_v27 = vld [vmem:[#allocation7 + $0x60] sm:$0xf]  ;;  %v13087_v28 = vld [vmem:[#allocation7 + $0x6c] sm:$0xf0] }
 0x6ea   : > { %v2185_v30 = vadd.f32 %v2182_v29, %v15132_v50  ;;  %v13085_v29 = vld [vmem:[#allocation7 + $0x64] sm:$0xf] }
 0x6ec   : > { %2188 = vadd.xlane.f32.xlu1 %v2185_v30 }
 0x6ef   : > { %v2183_v31 = vpop.f32.mrf.mxu2 }
 0x6f0   : > { %v9851_v31 = vld [vmem:[#allocation7 + $0x70] sm:$0xf0] }
 0x6f1   : > { %v9854_v34 = vor.u32 %v13085_v29, %v9851_v31 }
 0x6f3   : > { %2436 = vmatpush.bf16.msrb.mxu0 %v9854_v34 }
 0x75f   : > { %v2189_v44 = vpop.xlane.xlu1 %2188 }
 0x760   : > { %v2190_v50 = vmul.f32 %v2189_v44, %v15119_v10  ;;  %v9841_v44 = vld [vmem:[#allocation7 + $0x48] sm:$0xf] }
 0x762   : > { %v15202_v46 = vsub.f32 %v2185_v30, %v2190_v50  ;;  %v9850_v30 = vor.u32 %v13087_v28, %v9849_v27  ;;  %v13084_v50 = vld [vmem:[#allocation7 + $0x54] sm:$0xf0] }
 0x763   : > { %v9842_v48 = vor.u32 %v13084_v50, %v9841_v44  ;;  %v13117_v44 = vld [vmem:[#allocation9 + $0x60] sm:$0xff] }
 0x764   : > { %v2192_v47 = vmul.f32 %v15202_v46, %v15202_v46  ;;  %2423 = vmatpush.bf16.msra.mxu3 %v9850_v30  ;;  %v14071_v30 = vld [vmem:[%s15674_s28] ss:$0 sm:$0xff]  ;;  %s15685_s28 = sld [smem:[#allocation49_spill]] }
 0x765   : > { %2450 = vmatpush.bf16.msrb.mxu1 %v9842_v48  ;;  %v13125_v50 = vld [vmem:[#allocation9 + $0xa0] sm:$0xff]  ;;  %v13134_v48 = vld [vmem:[#allocation9 + $0xe8] sm:$0xff] }
 0x766   : > { %2193 = vadd.xlane.f32.xlu2 %v2192_v47  ;;  %v9838_v47 = vor.u32 %v13081_v41, %v9835_v43  ;;  %v13126_v41 = vld [vmem:[#allocation9 + $0xa8] sm:$0xff]  ;;  %v13135_v43 = vld [vmem:[#allocation9 + $0xf0] sm:$0xff] }
 0x767   : > { %2811 = vmatpush.bf16.msrb.mxu2 %v13135_v43 }
 0x768   : > { %2424 = vmatpush.bf16.msra.mxu3 %v9834_v42  ;;  %2437 = vmatpush.bf16.msrb.mxu0 %v9838_v47  ;;  %v13111_v42 = vld [vmem:[#allocation9 + $0x30] sm:$0xff]  ;;  %v13110_v47 = vld [vmem:[#allocation9 + $0x28] sm:$0xff] }
 0x769   : > { %2451 = vmatpush.bf16.msrb.mxu1 %v9826_v61  ;;  %v13131_v61 = vld [vmem:[#allocation9 + $0xd0] sm:$0xff] }
 0x76b   : > { %2812 = vmatpush.bf16.msrb.mxu2 %v13134_v48 }
 0x76c   : > { %2425 = vmatpush.bf16.msra.mxu3 %v9818_v57  ;;  %2438 = vmatpush.bf16.msrb.mxu0 %v9822_v0  ;;  %v13108_v57 = vld [vmem:[#allocation9 + $0x18] sm:$0xff]  ;;  %v13107_v0 = vld [vmem:[#allocation9 + $0x10] sm:$0xff] }
 0x76d   : > { %2452 = vmatpush.bf16.msrb.mxu1 %v9810_v15 }
 0x76f   : > { %2813 = vmatpush.bf16.msrb.mxu2 %v13133_v54 }
 0x770   : > { %2426 = vmatpush.bf16.msra.mxu3 %v9802_v9  ;;  %2439 = vmatpush.bf16.msrb.mxu0 %v9806_v11  ;;  %v13129_v9 = vld [vmem:[#allocation9 + $0xc0] sm:$0xff]  ;;  %v2253_v11 = vperm.slane %v2249_v5, 2 }
 0x771   : > { %2797 = vmatpush.bf16.msra.mxu1 %v13128_v21 }
 0x773   : > { %2814 = vmatpush.bf16.msrb.mxu2 %v13132_v58 }
 0x774   : > { %2784 = vmatpush.bf16.msra.mxu0 %v13120_v20  ;;  %2771 = vmatpush.bf16.msrb.mxu3 %v13112_v39  ;;  %v2254_v20 = vperm.slane %v2249_v5, 3 }
 0x775   : > { %2798 = vmatpush.bf16.msra.mxu1 %v13127_v38 }
 0x777   : > { %2815 = vmatpush.bf16.msrb.mxu2 %v13131_v61 }
 0x778   : > { %2785 = vmatpush.bf16.msra.mxu0 %v13119_v37  ;;  %2772 = vmatpush.bf16.msrb.mxu3 %v13111_v42 }
 0x779   : > { %2799 = vmatpush.bf16.msra.mxu1 %v13126_v41 }
 0x77b   : > { %2816 = vmatpush.bf16.msrb.mxu2 %v13130_v4 }
 0x77c   : > { %2773 = vmatpush.bf16.msrb.mxu3 %v13110_v47 }
 0x77d   : > { %2800 = vmatpush.bf16.msra.mxu1 %v13125_v50 }
 0x77f   : > { %2817 = vmatpush.bf16.msrb.mxu2 %v13129_v9 }
 0x780   : > { %2774 = vmatpush.bf16.msrb.mxu3 %v13109_v52 }
 0x781   : > { %2801 = vmatpush.bf16.msra.mxu1 %v13124_v51 }
 0x784   : > { %2775 = vmatpush.bf16.msrb.mxu3 %v13108_v57 }
 0x785   : > { %2802 = vmatpush.bf16.msra.mxu1 %v13123_v56 }
 0x788   : > { %2776 = vmatpush.bf16.msrb.mxu3 %v13107_v0 }
 0x789   : > { %2803 = vmatpush.bf16.msra.mxu1 %v13122_v63 }
 0x78c   : > { %2777 = vmatpush.bf16.msrb.mxu3 %v13106_v3 }
 0x78d   : > { %2804 = vmatpush.bf16.msra.mxu1 %v13121_v2 }
 0x790   : > { %2778 = vmatpush.bf16.msrb.mxu3 %v13105_v8 }
 0x7d9   : > { %v2194_v19 = vpop.xlane.xlu2 %2193 }
 0x7da   : > { %v2195_v22 = vmul.f32 %v2194_v19, %v15119_v10 }
 0x7dc   : > { %v2196_v23 = vadd.f32 1e-12, %v2195_v22 }
 0x7de   : > { %14105 = vrsqrt.f32 %v2196_v23  ;;  %vm2203_vm14 = vweird.f32 %v2196_v23 }
 0x7e4   : > { %v14106_v24 = vpop.eup %14105 }
 0x7e5   : > { %v2198_v25 = vmul.f32 %v14106_v24, %v2196_v23  ;;  %vm2204_vm13 = vweird.f32 %v14106_v24 }
 0x7e6   : > { %vm2205_vm15 = vmor %vm2203_vm14, %vm2204_vm13  ;;  %vm6447_vm14 = vcmask 1041408  }
 0x7e7   : > { %v2199_v26 = vmul.f32 %v14106_v24, %v2198_v25 }
 0x7e9   : > { %v2200_v27 = vmul.f32 0.5, %v2199_v26 }
 0x7eb   : > { %v2201_v28 = vsub.f32 1.5, %v2200_v27 }
 0x7ed   : > { %v2202_v29 = vmul.f32 %v14106_v24, %v2201_v28 }
 0x7ef   : > { %v2206_v31 = vsel %vm2205_vm15, %v14106_v24, %v2202_v29  ;;  %vm6443_vm15 = vcmask 162816  }
 0x7f0   : > { %v2207_v32 = vmul.f32 %v2206_v31, %v15202_v46  ;;  %v13118_v46 = vld [vmem:[#allocation9 + $0x68] sm:$0xff] }
 0x7f1   : > { %2786 = vmatpush.bf16.msra.mxu0 %v13118_v46 }
 0x7f2   : > { %v2211_v34 = vmul.f32 %v14071_v30, %v2207_v32 }
 0x7f4   : > { %v15210_v35 = vadd.f32 %v14072_v33, %v2211_v34 }
 0x7f5   : > { %2787 = vmatpush.bf16.msra.mxu0 %v13117_v44 }
 0x7f6   : > { %v2248_v36 = vpack.c.bf16 %v15210_v35, %v15210_v35 }
 0x7f8   : > { %2427 = vmatmul.bf16.vlgmr.msra.gmra.mxu3 %v2248_v36  ;;  %2440 = vmatmul.bf16.vlgmr.msrb.gmra.mxu0 %v2248_v36 }
 0x7f9   : > { %2453 = vmatmul.bf16.vlgmr.msrb.gmra.mxu1 %v2248_v36  ;;  %2466 = vmatmul.bf16.vlgmr.msra.gmra.mxu2 %v2248_v36 }
 0x7fa   : > { %2788 = vmatpush.bf16.msra.mxu0 %v13116_v49 }
 0x7fe   : > { %2789 = vmatpush.bf16.msra.mxu0 %v13115_v55 }
 0x802   : > { %2790 = vmatpush.bf16.msra.mxu0 %v13114_v62 }
 0x806   : > { %2791 = vmatpush.bf16.msra.mxu0 %v13113_v1 }
 0x875   : > { %v2441_v12 = vpop.f32.mrf.mxu0 }
 0x876   : > { %v2442_v13 = vadd.f32 %v2441_v12, %v2252_v7  ;;  %v2454_v14 = vpop.f32.mrf.mxu1 }
 0x877   : > { %v2455_v15 = vadd.f32 %v2454_v14, %v2253_v11  ;;  %v14073_v14 = vld [vmem:[%s15678_s10] ss:$0 sm:$0xff] }
 0x878   : > { %v2472_v16 = vmul.f32 %v2442_v13, %v2442_v13 }
 0x879   : > { %v2473_v19 = vmul.f32 %v2455_v15, %v2455_v15 }
 0x87a   : > { %v2476_v21 = vmul.f32 %v2472_v16, %v2442_v13 }
 0x87b   : > { %v2477_v22 = vmul.f32 %v2473_v19, %v2455_v15  ;;  %v2428_v23 = vpop.f32.mrf.mxu3 }
 0x87c   : > { %v2480_v24 = vmul.f32 0.044715, %v2476_v21  ;;  %v2429_v25 = vadd.f32 %v2428_v23, %v2251_v17  ;;  %v2467_v26 = vpop.f32.mrf.mxu2 }
 0x87d   : > { %v2481_v27 = vmul.f32 0.044715, %v2477_v22  ;;  %v2468_v28 = vadd.f32 %v2467_v26, %v2254_v20  ;;  %v2443_v29 = vpop.f32.mrf.mxu0  ;;  %v13152_v26 = vld [vmem:[#allocation2 + $0x78] sm:$0xff] }
 0x87e   : > { %v2484_v30 = vadd.f32 %v2480_v24, %v2442_v13  ;;  %v2471_v31 = vmul.f32 %v2429_v25, %v2429_v25  ;;  %v2456_v32 = vpop.f32.mrf.mxu1  ;;  %3008 = vmatpush.bf16.msrb.mxu0 %v13152_v26 }
 0x87f   : > { %v2485_v33 = vadd.f32 %v2481_v27, %v2455_v15  ;;  %v2474_v34 = vmul.f32 %v2468_v28, %v2468_v28  ;;  %v13160_v27 = vld [vmem:[#allocation4 + $0x78] sm:$0xff]  ;;  %v13143_v32 = vld [vmem:[%s14676_s25 + $0x70] sm:$0xff] }
 0x880   : > { %v2488_v36 = vmul.f32 0.7978846, %v2484_v30  ;;  %v2475_v37 = vmul.f32 %v2471_v31, %v2429_v25  ;;  %3091 = vmatpush.bf16.msrb.mxu1 %v13160_v27 }
 0x881   : > { %v2489_v38 = vmul.f32 0.7978846, %v2485_v33  ;;  %v2478_v39 = vmul.f32 %v2474_v34, %v2468_v28  ;;  %v13151_v33 = vld [vmem:[#allocation2 + $0x70] sm:$0xff] }
 0x882   : > { %14107 = vtanh.f32 %v2488_v36  ;;  %v2479_v40 = vmul.f32 0.044715, %v2475_v37  ;;  %v13159_v34 = vld [vmem:[#allocation4 + $0x70] sm:$0xff]  ;;  %3009 = vmatpush.bf16.msrb.mxu0 %v13151_v33  ;;  %v13150_v36 = vld [vmem:[#allocation2 + $0x68] sm:$0xff] }
 0x883   : > { %14109 = vtanh.f32 %v2489_v38  ;;  %v2482_v46 = vmul.f32 0.044715, %v2478_v39  ;;  %v2430_v41 = vpop.f32.mrf.mxu3  ;;  %v13158_v37 = vld [vmem:[#allocation4 + $0x68] sm:$0xff]  ;;  %v13141_v38 = vld [vmem:[%s14676_s25 + $0x60] sm:$0xff] }
 0x884   : > { %v2483_v42 = vadd.f32 %v2479_v40, %v2429_v25  ;;  %v2469_v43 = vpop.f32.mrf.mxu2  ;;  %3092 = vmatpush.bf16.msrb.mxu1 %v13159_v34  ;;  %v13149_v39 = vld [vmem:[#allocation2 + $0x60] sm:$0xff]  ;;  %v13148_v41 = vld [vmem:[#allocation2 + $0x58] sm:$0xff] }
 0x885   : > { %v2486_v44 = vadd.f32 %v2482_v46, %v2468_v28  ;;  %v13157_v40 = vld [vmem:[#allocation4 + $0x60] sm:$0xff]  ;;  %v13140_v46 = vld [vmem:[%s14676_s25 + $0x58] sm:$0xff]  ;;  %v13139_v43 = vld [vmem:[%s14676_s25 + $0x50] sm:$0xff] }
 0x886   : > { %v2487_v50 = vmul.f32 0.7978846, %v2483_v42  ;;  %3010 = vmatpush.bf16.msrb.mxu0 %v13150_v36  ;;  %v13156_v42 = vld [vmem:[#allocation4 + $0x58] sm:$0xff] }
 0x887   : > { %v2490_v47 = vmul.f32 0.7978846, %v2486_v44  ;;  %v13147_v44 = vld [vmem:[#allocation2 + $0x50] sm:$0xff] }
 0x888   : > { %v14108_v48 = vpop.eup %14107  ;;  %14111 = vtanh.f32 %v2487_v50  ;;  %3093 = vmatpush.bf16.msrb.mxu1 %v13158_v37  ;;  %v13155_v50 = vld [vmem:[#allocation4 + $0x50] sm:$0xff] }
 0x889   : > { %v14110_v49 = vpop.eup %14109  ;;  %14113 = vtanh.f32 %v2490_v47  ;;  %v2496_v51 = vadd.f32 1.0, %v14108_v48  ;;  %v13138_v47 = vld [vmem:[%s14676_s25 + $0x48] sm:$0xff] }
 0x88a   : > { %v2497_v52 = vadd.f32 1.0, %v14110_v49  ;;  %3011 = vmatpush.bf16.msrb.mxu0 %v13149_v39  ;;  %v13146_v48 = vld [vmem:[#allocation2 + $0x48] sm:$0xff] }
 0x88b   : > { %v2500_v54 = vmul.f32 0.5, %v2496_v51  ;;  %v13154_v49 = vld [vmem:[#allocation4 + $0x48] sm:$0xff]  ;;  %v13137_v51 = vld [vmem:[%s14676_s25 + $0x40] sm:$0xff] }
 0x88c   : > { %v2501_v55 = vmul.f32 0.5, %v2497_v52  ;;  %3094 = vmatpush.bf16.msrb.mxu1 %v13157_v40  ;;  %v13145_v52 = vld [vmem:[#allocation2 + $0x40] sm:$0xff] }
 0x88d   : > { %v2504_v56 = vmul.f32 %v2500_v54, %v2442_v13  ;;  %v13153_v54 = vld [vmem:[#allocation4 + $0x40] sm:$0xff] }
 0x88e   : > { %v14112_v57 = vpop.eup %14111  ;;  %v2505_v58 = vmul.f32 %v2501_v55, %v2455_v15  ;;  %3012 = vmatpush.bf16.msrb.mxu0 %v13148_v41 }
 0x88f   : > { %v14114_v62 = vpop.eup %14113  ;;  %v2572_v63 = vpack.c.bf16 %v2504_v56, %v2504_v56  ;;  %v2495_v0 = vadd.f32 1.0, %v14112_v57 }
 0x890   : > { %v2573_v61 = vpack.c.bf16 %v2505_v58, %v2505_v58  ;;  %v2498_v1 = vadd.f32 1.0, %v14114_v62  ;;  %3095 = vmatpush.bf16.msrb.mxu1 %v13156_v42 }
 0x891   : > { %2792 = vmatmul.bf16.vlgmr.msra.gmra.mxu0 %v2572_v63  ;;  %v2499_v2 = vmul.f32 0.5, %v2495_v0 }
 0x892   : > { %2805 = vmatmul.bf16.vlgmr.msra.gmra.mxu1 %v2573_v61  ;;  %v2502_v3 = vmul.f32 0.5, %v2498_v1  ;;  %3013 = vmatpush.bf16.msrb.mxu0 %v13147_v44 }
 0x893   : > { %v2503_v4 = vmul.f32 %v2499_v2, %v2429_v25  ;;  %v13144_v25 = vld [vmem:[%s14676_s25 + $0x78] sm:$0xff]  ;;  %v14074_v2 = vld [vmem:[%s15679_s22] ss:$0 sm:$0xff] }
 0x894   : > { %v2506_v5 = vmul.f32 %v2502_v3, %v2468_v28  ;;  %2925 = vmatpush.bf16.msra.mxu3 %v13144_v25  ;;  %3096 = vmatpush.bf16.msrb.mxu1 %v13155_v50 }
 0x895   : > { %v2571_v7 = vpack.c.bf16 %v2503_v4, %v2503_v4 }
 0x896   : > { %v2574_v8 = vpack.c.bf16 %v2506_v5, %v2506_v5  ;;  %3014 = vmatpush.bf16.msrb.mxu0 %v13146_v48  ;;  %v14075_v5 = vld [vmem:[%s15680_s2] ss:$0 sm:$0xff] }
 0x897   : > { %2779 = vmatmul.bf16.vlgmr.msrb.gmra.mxu3 %v2571_v7 }
 0x898   : > { %2818 = vmatmul.bf16.vlgmr.msrb.gmra.mxu2 %v2574_v8  ;;  %2926 = vmatpush.bf16.msra.mxu3 %v13143_v32 }
 0x899   : > { %3097 = vmatpush.bf16.msrb.mxu1 %v13154_v49 }
 0x89a   : > { %3015 = vmatpush.bf16.msrb.mxu0 %v13145_v52 }
 0x89d   : > { %3098 = vmatpush.bf16.msrb.mxu1 %v13153_v54 }
 0x90e   : > { %v2793_v9 = vpop.f32.mrf.mxu0 }
 0x90f   : > { %v2806_v11 = vpop.f32.mrf.mxu1 }
 0x916   : > { %v2795_v12 = vpop.f32.mrf.mxu0 }
 0x917   : > { %v2808_v13 = vpop.f32.mrf.mxu1  ;;  %v14077_v12 = vld [vmem:[%s15671_s11 + $0x1] ss:$0 sm:$0xff] }
 0x91a   : > { %v2780_v15 = vpop.f32.mrf.mxu3 }
 0x91b   : > { %v2781_v16 = vadd.f32 %v14073_v14, %v2780_v15  ;;  %v2819_v17 = vpop.f32.mrf.mxu2 }
 0x91d   : > { %v2794_v19 = vadd.f32 %v2793_v9, %v2781_v16 }
 0x91f   : > { %v2807_v20 = vadd.f32 %v2806_v11, %v2794_v19  ;;  %v14076_v11 = vld [vmem:[%s15670_s27 + $0x1] ss:$0 sm:$0xff] }
 0x921   : > { %v2820_v21 = vadd.f32 %v2819_v17, %v2807_v20  ;;  %v14078_v17 = vld [vmem:[%s15669_s1 + $0x1] ss:$0 sm:$0xff] }
 0x922   : > { %v2782_v22 = vpop.f32.mrf.mxu3 }
 0x923   : > { %v2821_v23 = vpop.f32.mrf.mxu2  ;;  %v2823_v24 = vadd.f32 %v2820_v21, %v15210_v35  ;;  %v13142_v35 = vld [vmem:[%s14676_s25 + $0x68] sm:$0xff] }
 0x924   : > { %2927 = vmatpush.bf16.msra.mxu3 %v13142_v35 }
 0x925   : > { %2826 = vadd.xlane.f32.xlu0 %v2823_v24 }
 0x928   : > { %2928 = vmatpush.bf16.msra.mxu3 %v13141_v38 }
 0x92c   : > { %2929 = vmatpush.bf16.msra.mxu3 %v13140_v46 }
 0x930   : > { %2930 = vmatpush.bf16.msra.mxu3 %v13139_v43 }
 0x934   : > { %2931 = vmatpush.bf16.msra.mxu3 %v13138_v47 }
 0x938   : > { %2932 = vmatpush.bf16.msra.mxu3 %v13137_v51 }
 0x998   : > { %v2827_v28 = vpop.xlane.xlu0 %2826 }
 0x999   : > { %v2828_v29 = vmul.f32 %v2827_v28, %v15119_v10 }
 0x99b   : > { %v2829_v30 = vsub.f32 %v2823_v24, %v2828_v29 }
 0x99d   : > { %v2830_v31 = vmul.f32 %v2829_v30, %v2829_v30 }
 0x99f   : > { %2831 = vadd.xlane.f32.xlu1 %v2830_v31 }
 0xa12   : > { %v2832_v55 = vpop.xlane.xlu1 %2831 }
 0xa13   : > { %v2833_v56 = vmul.f32 %v2832_v55, %v15119_v10 }
 0xa15   : > { %v2834_v57 = vadd.f32 1e-12, %v2833_v56 }
 0xa17   : > { %14115 = vrsqrt.f32 %v2834_v57  ;;  %vm2841_vm1 = vweird.f32 %v2834_v57 }
 0xa1d   : > { %v14116_v58 = vpop.eup %14115 }
 0xa1e   : > { %v2836_v62 = vmul.f32 %v14116_v58, %v2834_v57  ;;  %vm2842_vm0 = vweird.f32 %v14116_v58 }
 0xa1f   : > { %vm2843_vm2 = vmor %vm2841_vm1, %vm2842_vm0 }
 0xa20   : > { %v2837_v63 = vmul.f32 %v14116_v58, %v2836_v62 }
 0xa22   : > { %v2838_v0 = vmul.f32 0.5, %v2837_v63 }
 0xa24   : > { %v2839_v61 = vsub.f32 1.5, %v2838_v0 }
 0xa26   : > { %v2840_v1 = vmul.f32 %v14116_v58, %v2839_v61 }
 0xa28   : > { %v2844_v3 = vsel %vm2843_vm2, %v14116_v58, %v2840_v1 }
 0xa29   : > { %v2845_v4 = vmul.f32 %v2844_v3, %v2829_v30 }
 0xa2b   : > { %v2849_v7 = vmul.f32 %v14074_v2, %v2845_v4 }
 0xa2d   : > { %v15229_v8 = vadd.f32 %v14075_v5, %v2849_v7 }
 0xa2f   : > { %v2871_v9 = vpack.c.bf16 %v15229_v8, %v15229_v8 }
 0xa31   : > { %2933 = vmatmul.bf16.vlgmr.msra.gmra.mxu3 %v2871_v9  ;;  %3016 = vmatmul.bf16.vlgmr.msrb.gmra.mxu0 %v2871_v9 }
 0xa32   : > { %3099 = vmatmul.bf16.vlgmr.msrb.gmra.mxu1 %v2871_v9 }
 0xaae   : > { %v3017_v13 = vpop.f32.mrf.mxu0 }
 0xaaf   : > { %v3018_v14 = vadd.f32 %v14076_v11, %v3017_v13  ;;  %v3100_v15 = vpop.f32.mrf.mxu1 }
 0xab0   : > { %v3101_v16 = vadd.f32 %v14077_v12, %v3100_v15 }
 0xab1   : > { %3120 = vmatpush.xpose.msra.mxu2 %v3018_v14  ;;  %3236 = vmatpush.xpose.msra.mxu1 %v3018_v14 }
 0xab2   : > { %v3173_v19 = vmul.f32 %v15163_v6, %v3101_v16  ;;  %v3138_v20 = vmul.f32 %v15143_v59, %v3101_v16  ;;  %v3313_v21 = vmul.f32 %v15146_v60, %v3101_v16  ;;  %v3254_v28 = vmul.f32 %v15187_v45, %v3101_v16 }
 0xab4   : > { %3192 = vmatpush.msrb.mxu3 %v3173_v19  ;;  %3215 = vmatpush.msra.mxu0 %v3138_v20  ;;  %v2934_v22 = vpop.f32.mrf.mxu3  ;;  %v13167_v19 = vld [vmem:[#allocation6 + $0x70] sm:$0xff]  ;;  %v13166_v20 = vld [vmem:[#allocation6 + $0x68] sm:$0xff] }
 0xab5   : > { %3155 = vmatpush.xpose.msrb.mxu2 %v3018_v14  ;;  %v15239_v23 = vadd.f32 %v14078_v17, %v2934_v22  ;;  %v13163_v22 = vld [vmem:[#allocation6 + $0x50] sm:$0xff] }
 0xab6   : > { %3295 = vmatpush.xpose.msra.mxu3 %v3018_v14  ;;  %3332 = vmatpush.msrb.mxu0 %v3313_v21  ;;  %v3019_v24 = vpop.f32.mrf.mxu0  ;;  %v13165_v21 = vld [vmem:[#allocation6 + $0x60] sm:$0xff] }
 0xab7   : > { %v3102_v25 = vpop.f32.mrf.mxu1  ;;  %v3104_v26 = vmul.f32 %v15143_v59, %v15239_v23  ;;  %v3220_v27 = vmul.f32 %v15187_v45, %v15239_v23  ;;  %v3139_v30 = vmul.f32 %v15163_v6, %v15239_v23  ;;  %v3279_v4 = vmul.f32 %v15146_v60, %v15239_v23  ;;  %v13168_v60 = vld [vmem:[#allocation6 + $0x78] sm:$0xff]  ;;  %v13162_v24 = vld [vmem:[#allocation6 + $0x48] sm:$0xff] }
 0xab8   : > { %3409 = vmatpush.bf16.msrb.mxu1 %v13168_v60 }
 0xab9   : > { %3121 = vmatmul.f32.vlgmr.msra.gmra.mxu2 %v3104_v26  ;;  %3237 = vmatmul.f32.vlgmr.msra.gmra.mxu1 %v3220_v27  ;;  %v13161_v27 = vld [vmem:[#allocation6 + $0x40] sm:$0xff] }
 0xaba   : > { %3273 = vmatpush.msra.mxu2 %v3254_v28 }
 0xabc   : > { %v2936_v29 = vpop.f32.mrf.mxu3  ;;  %3410 = vmatpush.bf16.msrb.mxu1 %v13167_v19  ;;  %v10276_v19 = vld [vmem:[#allocation7 + $0x180] sm:$0xf] }
 0xac0   : > { %3411 = vmatpush.bf16.msrb.mxu1 %v13166_v20  ;;  %v13187_v20 = vld [vmem:[#allocation7 + $0x18c] sm:$0xf0] }
 0xac1   : > { %3156 = vmatmul.f32.vlgmr.msrb.gmra.mxu2 %v3139_v30 }
 0xac4   : > { %3412 = vmatpush.bf16.msrb.mxu1 %v13165_v21  ;;  %v13185_v21 = vld [vmem:[#allocation7 + $0x184] sm:$0xf] }
 0xb36   : > { %v3238_v36 = vpop.f32.mrf.mxu1 }
 0xb37   : > { %v3241_v37 = vmul.f32 0.17677669, %v3238_v36 }
 0xb39   : > { %v3242_v39 = vadd.f32 %v3241_v37, %v15172_v18 }
 0xb3b   : > { %v3243_v6 = vsel %vm1891_vm9, %v3242_v39, -inf }
 0xb3c   : > { %v3122_v31 = vpop.f32.mrf.mxu2 }
 0xb3d   : > { %v3125_v32 = vmul.f32 0.17677669, %v3122_v31 }
 0xb3f   : > { %v3126_v33 = vadd.f32 %v3125_v32, %v15172_v18 }
 0xb41   : > { %v3127_v34 = vsel %vm1891_vm9, %v3126_v33, -inf }
 0xb42   : > { %3128 = vmax.xlane.f32.xlu1 %v3127_v34 }
 0xb44   : > { %v3157_v59 = vpop.f32.mrf.mxu2 }
 0xb45   : > { %v3160_v35 = vmul.f32 0.17677669, %v3157_v59  ;;  %v14079_v59 = vld [vmem:[%s15673_s18 + $0x1] ss:$0 sm:$0xff] }
 0xb47   : > { %v3161_v45 = vadd.f32 %v3160_v35, %v15172_v18 }
 0xb49   : > { %v3162_v38 = vsel %vm1891_vm9, %v3161_v45, -inf }
 0xb4a   : > { %3163 = vmax.xlane.f32.xlu2 %v3162_v38  ;;  %v10324_v38 = vld [vmem:[#allocation7 + $0x1e0] sm:$0xf] }
 0xb52   : > { %3244 = vmax.xlane.f32.xlu2 %v3243_v6  ;;  %v13197_v6 = vld [vmem:[#allocation7 + $0x1e4] sm:$0xf] }
 0xbb5   : > { %v3129_v40 = vpop.xlane.xlu1 %3128 }
 0xbb6   : > { %v3130_v46 = vsub.f32 %v3126_v33, %v3129_v40 }
 0xbb8   : > { %v3131_v41 = vmul.f32 1.442695, %v3130_v46  ;;  %v10326_v46 = vld [vmem:[#allocation7 + $0x1f0] sm:$0xf0] }
 0xbba   : > { %14117 = vpow2.f32 %v3131_v41  ;;  %v10332_v41 = vld [vmem:[#allocation7 + $0x1e8] sm:$0xf] }
 0xbbd   : > { %v3164_v42 = vpop.xlane.xlu2 %3163 }
 0xbbe   : > { %v3165_v43 = vsub.f32 %v3161_v45, %v3164_v42  ;;  %v13200_v42 = vld [vmem:[#allocation7 + $0x1f4] sm:$0xf0] }
 0xbc0   : > { %v14118_v44 = vpop.eup %14117  ;;  %v3166_v50 = vmul.f32 1.442695, %v3165_v43  ;;  %v10329_v43 = vor.u32 %v13197_v6, %v10326_v46  ;;  %v10244_v6 = vld [vmem:[#allocation7 + $0x140] sm:$0xf]  ;;  %v13177_v46 = vld [vmem:[#allocation7 + $0x144] sm:$0xf] }
 0xbc1   : > { %v3133_v47 = vsel %vm1891_vm9, %v14118_v44, 0.0 }
 0xbc2   : > { %14119 = vpow2.f32 %v3166_v50  ;;  %3134 = vadd.xlane.f32.xlu1 %v3133_v47  ;;  %v13198_v50 = vld [vmem:[#allocation7 + $0x1ec] sm:$0xf]  ;;  %v10334_v47 = vld [vmem:[#allocation7 + $0x1f8] sm:$0xf0] }
 0xbc5   : > { %v3245_v48 = vpop.xlane.xlu2 %3244 }
 0xbc6   : > { %v3246_v49 = vsub.f32 %v3242_v39, %v3245_v48  ;;  %v13199_v39 = vld [vmem:[#allocation7 + $0x1ec] sm:$0xf0]  ;;  %v10337_v48 = vor.u32 %v13198_v50, %v10334_v47 }
 0xbc7   : > { %v10325_v40 = vor.u32 %v13199_v39, %v10324_v38  ;;  %v10270_v38 = vld [vmem:[#allocation7 + $0x178] sm:$0xf0] }
 0xbc8   : > { %v14120_v51 = vpop.eup %14119  ;;  %v3247_v52 = vmul.f32 1.442695, %v3246_v49 }
 0xbc9   : > { %v3168_v54 = vsel %vm1891_vm9, %v14120_v51, 0.0  ;;  %3660 = vmatpush.bf16.msrb.mxu2 %v10325_v40  ;;  %v13179_v40 = vld [vmem:[#allocation7 + $0x14c] sm:$0xf0] }
 0xbca   : > { %14121 = vpow2.f32 %v3247_v52  ;;  %3169 = vadd.xlane.f32.xlu0 %v3168_v54  ;;  %v10308_v54 = vld [vmem:[#allocation7 + $0x1c0] sm:$0xf] }
 0xbd0   : > { %v14122_v55 = vpop.eup %14121 }
 0xbd1   : > { %v3249_v56 = vsel %vm1891_vm9, %v14122_v55, 0.0 }
 0xbd2   : > { %3250 = vadd.xlane.f32.xlu2 %v3249_v56  ;;  %v13193_v56 = vld [vmem:[#allocation7 + $0x1c4] sm:$0xf] }
 0xc35   : > { %v3135_v57 = vpop.xlane.xlu1 %3134 }
 0xc36   : > { %14123 = vrcp.f32 %v3135_v57 }
 0xc3c   : > { %v14124_v58 = vpop.eup %14123 }
 0xc3d   : > { %v3137_v62 = vmul.f32 %v14124_v58, %v14118_v44  ;;  %v3170_v63 = vpop.xlane.xlu0 %3169  ;;  %v10333_v44 = vor.u32 %v13200_v42, %v10332_v41  ;;  %v10310_v58 = vld [vmem:[#allocation7 + $0x1d0] sm:$0xf0]  ;;  %v10245_v41 = vor.u32 %v13179_v40, %v10244_v6  ;;  %v13221_v6 = vld [vmem:[#allocation9 + $0x1a0] sm:$0xff] }
 0xc3e   : > { %14125 = vrcp.f32 %v3170_v63  ;;  %v13196_v63 = vld [vmem:[#allocation7 + $0x1d4] sm:$0xf0]  ;;  %v10246_v42 = vld [vmem:[#allocation7 + $0x150] sm:$0xf0]  ;;  %v13229_v40 = vld [vmem:[#allocation9 + $0x1e0] sm:$0xff] }
 0xc3f   : > { %10171 = vmatmul.msk.f32.vlgmr.msra.gmra.mxu0 %vm1891_vm9, %v3137_v62  ;;  %v10316_v62 = vld [vmem:[#allocation7 + $0x1c8] sm:$0xf]  ;;  %v10249_v50 = vor.u32 %v13177_v46, %v10246_v42  ;;  %v13220_v42 = vld [vmem:[#allocation9 + $0x198] sm:$0xff] }
 0xc40   : > { %3686 = vmatpush.bf16.msra.mxu0 %v10333_v44  ;;  %v13180_v44 = vld [vmem:[#allocation7 + $0x154] sm:$0xf0]  ;;  %v13206_v46 = vld [vmem:[#allocation9 + $0x128] sm:$0xff] }
 0xc44   : > { %v14126_v0 = vpop.eup %14125 }
 0xc45   : > { %v3172_v61 = vmul.f32 %v14126_v0, %v14120_v51  ;;  %v3251_v1 = vpop.xlane.xlu2 %3250  ;;  %v10313_v0 = vor.u32 %v13193_v56, %v10310_v58  ;;  %v10236_v58 = vld [vmem:[#allocation7 + $0x128] sm:$0xf] }
 0xc46   : > { %14127 = vrcp.f32 %v3251_v1  ;;  %v13194_v1 = vld [vmem:[#allocation7 + $0x1cc] sm:$0xf] }
 0xc47   : > { %10170 = vmatmul.msk.f32.vlgmr.msrb.gmra.mxu3 %vm1891_vm9, %v3172_v61  ;;  %v10317_v61 = vor.u32 %v13196_v63, %v10316_v62  ;;  %v13176_v62 = vld [vmem:[#allocation7 + $0x134] sm:$0xf0] }
 0xc48   : > { %3673 = vmatpush.bf16.msrb.mxu3 %v10329_v43  ;;  %v10252_v43 = vld [vmem:[#allocation7 + $0x148] sm:$0xf] }
 0xc49   : > { %3687 = vmatpush.bf16.msra.mxu0 %v10317_v61  ;;  %v10253_v47 = vor.u32 %v13180_v44, %v10252_v43  ;;  %v13174_v61 = vld [vmem:[#allocation7 + $0x12c] sm:$0xf]  ;;  %v13228_v43 = vld [vmem:[#allocation9 + $0x1d8] sm:$0xff]  ;;  %v13205_v44 = vld [vmem:[#allocation9 + $0x120] sm:$0xff] }
 0xc4c   : > { %v14128_v2 = vpop.eup %14127  ;;  %3674 = vmatpush.bf16.msrb.mxu3 %v10313_v0  ;;  %v10237_v0 = vor.u32 %v13176_v62, %v10236_v58  ;;  %v13225_v58 = vld [vmem:[#allocation9 + $0x1c0] sm:$0xff]  ;;  %v13202_v62 = vld [vmem:[#allocation9 + $0x108] sm:$0xff] }
 0xc4d   : > { %v3253_v3 = vmul.f32 %v14128_v2, %v14122_v55  ;;  %v13195_v55 = vld [vmem:[#allocation7 + $0x1cc] sm:$0xf0]  ;;  %v10318_v2 = vld [vmem:[#allocation7 + $0x1d8] sm:$0xf0] }
 0xc4e   : > { %v10309_v57 = vor.u32 %v13195_v55, %v10308_v54  ;;  %v13175_v54 = vld [vmem:[#allocation7 + $0x12c] sm:$0xf0]  ;;  %v13173_v55 = vld [vmem:[#allocation7 + $0x124] sm:$0xf] }
 0xc4f   : > { %10172 = vmatmul.msk.f32.vlgmr.msra.gmra.mxu2 %vm1891_vm9, %v3253_v3  ;;  %3296 = vmatmul.f32.vlgmr.msra.gmra.mxu3 %v3279_v4  ;;  %v10321_v3 = vor.u32 %v13194_v1, %v10318_v2  ;;  %v10292_v4 = vld [vmem:[#allocation7 + $0x1a0] sm:$0xf]  ;;  %v10238_v1 = vld [vmem:[#allocation7 + $0x138] sm:$0xf0] }
 0xc50   : > { %3661 = vmatpush.bf16.msrb.mxu2 %v10309_v57  ;;  %v10230_v57 = vld [vmem:[#allocation7 + $0x130] sm:$0xf0]  ;;  %v10212_v2 = vld [vmem:[#allocation7 + $0x100] sm:$0xf] }
 0xc51   : > { %v10233_v63 = vor.u32 %v13173_v55, %v10230_v57  ;;  %v13203_v55 = vld [vmem:[#allocation9 + $0x110] sm:$0xff]  ;;  %v13217_v57 = vld [vmem:[#allocation9 + $0x180] sm:$0xff] }
 0xcbc   : > { %v3217_v28 = vpop.f32.mrf.mxu0 }
 0xcca   : > { %v3194_v5 = vpop.f32.mrf.mxu3 }
 0xccb   : > { %v3218_v30 = vadd.f32 %v3217_v28, %v3194_v5  ;;  %v13191_v5 = vld [vmem:[#allocation7 + $0x1ac] sm:$0xf0]  ;;  %v10286_v28 = vld [vmem:[#allocation7 + $0x198] sm:$0xf0] }
 0xcd2   : > { %v3297_v7 = vpop.f32.mrf.mxu3  ;;  %v3275_v29 = vpop.f32.mrf.mxu2 }
 0xcd3   : > { %v3300_v9 = vmul.f32 0.17677669, %v3297_v7  ;;  %v3278_v31 = vadd.f32 %v3275_v29, %v3218_v30  ;;  %v13189_v7 = vld [vmem:[#allocation7 + $0x1a4] sm:$0xf]  ;;  %v10260_v30 = vld [vmem:[#allocation7 + $0x160] sm:$0xf] }
 0xcd5   : > { %v3301_v11 = vadd.f32 %v3300_v9, %v15172_v18  ;;  %v13164_v18 = vld [vmem:[#allocation6 + $0x58] sm:$0xff]  ;;  %v10293_v9 = vor.u32 %v13191_v5, %v10292_v4  ;;  %v13171_v4 = vld [vmem:[#allocation7 + $0x10c] sm:$0xf0]  ;;  %v13169_v5 = vld [vmem:[#allocation7 + $0x104] sm:$0xf] }
 0xcd6   : > { %3413 = vmatpush.bf16.msrb.mxu1 %v13164_v18  ;;  %v10277_v18 = vor.u32 %v13187_v20, %v10276_v19  ;;  %v13224_v19 = vld [vmem:[#allocation9 + $0x1b8] sm:$0xff] }
 0xcd7   : > { %v3302_v12 = vsel %vm1891_vm9, %v3301_v11, -inf  ;;  %3662 = vmatpush.bf16.msrb.mxu2 %v10293_v9  ;;  %v10213_v9 = vor.u32 %v13171_v4, %v10212_v2  ;;  %v13232_v20 = vld [vmem:[#allocation9 + $0x1f8] sm:$0xff]  ;;  %v13201_v2 = vld [vmem:[#allocation9 + $0x100] sm:$0xff] }
 0xcd8   : > { %3303 = vmax.xlane.f32.xlu0 %v3302_v12  ;;  %v10300_v12 = vld [vmem:[#allocation7 + $0x1a8] sm:$0xf] }
 0xcda   : > { %3414 = vmatpush.bf16.msrb.mxu1 %v13163_v22  ;;  %v10278_v22 = vld [vmem:[#allocation7 + $0x190] sm:$0xf0] }
 0xcdb   : > { %3663 = vmatpush.bf16.msrb.mxu2 %v10277_v18 }
 0xcde   : > { %3415 = vmatpush.bf16.msrb.mxu1 %v13162_v24  ;;  %v13188_v24 = vld [vmem:[#allocation7 + $0x194] sm:$0xf0] }
 0xce2   : > { %3416 = vmatpush.bf16.msrb.mxu1 %v13161_v27  ;;  %v13186_v27 = vld [vmem:[#allocation7 + $0x18c] sm:$0xf] }
 0xce3   : > { %v10289_v29 = vor.u32 %v13186_v27, %v10286_v28  ;;  %v14080_v28 = vld [vmem:[%s15675_s14 + $0x1] ss:$0 sm:$0xff] }
 0xce6   : > { %3699 = vmatpush.bf16.msra.mxu1 %v10337_v48  ;;  %v13178_v48 = vld [vmem:[#allocation7 + $0x14c] sm:$0xf] }
 0xcea   : > { %3700 = vmatpush.bf16.msra.mxu1 %v10321_v3  ;;  %v10241_v3 = vor.u32 %v13174_v61, %v10238_v1 }
 0xd4b   : > { %v3304_v13 = vpop.xlane.xlu0 %3303 }
 0xd4c   : > { %v3305_v14 = vsub.f32 %v3301_v11, %v3304_v13  ;;  %v10294_v11 = vld [vmem:[#allocation7 + $0x1b0] sm:$0xf0]  ;;  %v13192_v13 = vld [vmem:[#allocation7 + $0x1b4] sm:$0xf0] }
 0xd4e   : > { %v3306_v15 = vmul.f32 1.442695, %v3305_v14  ;;  %v10297_v14 = vor.u32 %v13189_v7, %v10294_v11  ;;  %v10214_v7 = vld [vmem:[#allocation7 + $0x110] sm:$0xf0] }
 0xd4f   : > { %v10217_v11 = vor.u32 %v13169_v5, %v10214_v7 }
 0xd50   : > { %14129 = vpow2.f32 %v3306_v15  ;;  %v10301_v15 = vor.u32 %v13192_v13, %v10300_v12  ;;  %3675 = vmatpush.bf16.msrb.mxu3 %v10297_v14  ;;  %v10220_v12 = vld [vmem:[#allocation7 + $0x108] sm:$0xf]  ;;  %v13172_v13 = vld [vmem:[#allocation7 + $0x114] sm:$0xf0]  ;;  %v13170_v14 = vld [vmem:[#allocation7 + $0x10c] sm:$0xf] }
 0xd52   : > { %3688 = vmatpush.bf16.msra.mxu0 %v10301_v15  ;;  %v10221_v15 = vor.u32 %v13172_v13, %v10220_v12 }
 0xd56   : > { %v14130_v16 = vpop.eup %14129 }
 0xd57   : > { %v3308_v17 = vsel %vm1891_vm9, %v14130_v16, 0.0 }
 0xd58   : > { %3309 = vadd.xlane.f32.xlu0 %v3308_v17  ;;  %v10302_v17 = vld [vmem:[#allocation7 + $0x1b8] sm:$0xf0] }
 0xdcb   : > { %v3310_v23 = vpop.xlane.xlu0 %3309 }
 0xdcc   : > { %14131 = vrcp.f32 %v3310_v23  ;;  %v10284_v23 = vld [vmem:[#allocation7 + $0x188] sm:$0xf] }
 0xdd2   : > { %v14132_v25 = vpop.eup %14131 }
 0xdd3   : > { %v3312_v26 = vmul.f32 %v14132_v25, %v14130_v16  ;;  %v13190_v16 = vld [vmem:[#allocation7 + $0x1ac] sm:$0xf]  ;;  %v10281_v25 = vor.u32 %v13185_v21, %v10278_v22 }
 0xdd4   : > { %v10305_v60 = vor.u32 %v13190_v16, %v10302_v17  ;;  %v10222_v16 = vld [vmem:[#allocation7 + $0x118] sm:$0xf0] }
 0xdd5   : > { %10173 = vmatmul.msk.f32.vlgmr.msrb.gmra.mxu0 %vm1891_vm9, %v3312_v26  ;;  %v10285_v26 = vor.u32 %v13188_v24, %v10284_v23  ;;  %3676 = vmatpush.bf16.msrb.mxu3 %v10281_v25  ;;  %v10225_v17 = vor.u32 %v13170_v14, %v10222_v16  ;;  %vm4356_vm9 = vcmask 1040384  }
 0xdd6   : > { %3701 = vmatpush.bf16.msra.mxu1 %v10305_v60 }
 0xdd7   : > { %3689 = vmatpush.bf16.msra.mxu0 %v10285_v26 }
 0xdda   : > { %3702 = vmatpush.bf16.msra.mxu1 %v10289_v29 }
 0xe52   : > { %v3334_v32 = vpop.f32.mrf.mxu0 }
 0xe53   : > { %v3337_v33 = vadd.f32 %v3334_v32, %v3278_v31  ;;  %v13183_v31 = vld [vmem:[#allocation7 + $0x16c] sm:$0xf0]  ;;  %v13181_v32 = vld [vmem:[#allocation7 + $0x164] sm:$0xf] }
 0xe55   : > { %v3355_v34 = vpack.c.bf16 %v3337_v33, %v3337_v33  ;;  %v10261_v33 = vor.u32 %v13183_v31, %v10260_v30  ;;  %v14081_v31 = vld [vmem:[%s15676_s23 + $0x1] ss:$0 sm:$0xff] }
 0xe57   : > { %3417 = vmatmul.bf16.vlgmr.msrb.gmra.mxu1 %v3355_v34  ;;  %v10262_v34 = vld [vmem:[#allocation7 + $0x170] sm:$0xf0]  ;;  %3664 = vmatpush.bf16.msrb.mxu2 %v10261_v33 }
 0xe5b   : > { %3665 = vmatpush.bf16.msrb.mxu2 %v10245_v41  ;;  %v13214_v41 = vld [vmem:[#allocation9 + $0x168] sm:$0xff] }
 0xed4   : > { %v3418_v35 = vpop.f32.mrf.mxu1 }
 0xed5   : > { %v3419_v36 = vadd.f32 %v14079_v59, %v3418_v35  ;;  %v10268_v59 = vld [vmem:[#allocation7 + $0x168] sm:$0xf]  ;;  %v13184_v35 = vld [vmem:[#allocation7 + $0x174] sm:$0xf0] }
 0xed7   : > { %v3422_v45 = vadd.f32 %v3419_v36, %v15229_v8  ;;  %v10265_v36 = vor.u32 %v13181_v32, %v10262_v34 }
 0xed9   : > { %3427 = vadd.xlane.f32.xlu1 %v3422_v45  ;;  %3677 = vmatpush.bf16.msrb.mxu3 %v10265_v36  ;;  %v13208_v36 = vld [vmem:[#allocation9 + $0x138] sm:$0xff] }
 0xedc   : > { %v3420_v37 = vpop.f32.mrf.mxu1 }
 0xedd   : > { %v13182_v37 = vld [vmem:[#allocation7 + $0x16c] sm:$0xf]  ;;  %3678 = vmatpush.bf16.msrb.mxu3 %v10249_v50  ;;  %v13213_v50 = vld [vmem:[#allocation9 + $0x160] sm:$0xff] }
 0xede   : > { %v10273_v39 = vor.u32 %v13182_v37, %v10270_v38  ;;  %v13230_v37 = vld [vmem:[#allocation9 + $0x1e8] sm:$0xff]  ;;  %v13207_v38 = vld [vmem:[#allocation9 + $0x130] sm:$0xff] }
 0xee0   : > { %3703 = vmatpush.bf16.msra.mxu1 %v10273_v39  ;;  %v13215_v39 = vld [vmem:[#allocation9 + $0x170] sm:$0xff] }
 0xee1   : > { %3679 = vmatpush.bf16.msrb.mxu3 %v10233_v63  ;;  %v13210_v63 = vld [vmem:[#allocation9 + $0x148] sm:$0xff] }
 0xee5   : > { %3680 = vmatpush.bf16.msrb.mxu3 %v10217_v11 }
 0xf4c   : > { %v3428_v49 = vpop.xlane.xlu1 %3427 }
 0xf4d   : > { %v3429_v8 = vmul.f32 %v3428_v49, %v15119_v10  ;;  %v10254_v49 = vld [vmem:[#allocation7 + $0x158] sm:$0xf0] }
 0xf4f   : > { %v15269_v51 = vsub.f32 %v3422_v45, %v3429_v8  ;;  %v10269_v45 = vor.u32 %v13184_v35, %v10268_v59  ;;  %v10257_v8 = vor.u32 %v13178_v48, %v10254_v49  ;;  %v13223_v59 = vld [vmem:[#allocation9 + $0x1b0] sm:$0xff]  ;;  %v13204_v49 = vld [vmem:[#allocation9 + $0x118] sm:$0xff] }
 0xf50   : > { %v13231_v35 = vld [vmem:[#allocation9 + $0x1f0] sm:$0xff] }
 0xf51   : > { %v3431_v52 = vmul.f32 %v15269_v51, %v15269_v51  ;;  %3690 = vmatpush.bf16.msra.mxu0 %v10269_v45  ;;  %3704 = vmatpush.bf16.msra.mxu1 %v10257_v8  ;;  %v13216_v45 = vld [vmem:[#allocation9 + $0x178] sm:$0xff]  ;;  %v13227_v48 = vld [vmem:[#allocation9 + $0x1d0] sm:$0xff] }
 0xf52   : > { %4027 = vmatpush.bf16.msra.mxu3 %v13216_v45  ;;  %v13212_v8 = vld [vmem:[#allocation9 + $0x158] sm:$0xff] }
 0xf53   : > { %3432 = vadd.xlane.f32.xlu2 %v3431_v52  ;;  %v10228_v52 = vld [vmem:[#allocation7 + $0x120] sm:$0xf] }
 0xf54   : > { %v10229_v56 = vor.u32 %v13175_v54, %v10228_v52  ;;  %v13218_v52 = vld [vmem:[#allocation9 + $0x188] sm:$0xff] }
 0xf55   : > { %3691 = vmatpush.bf16.msra.mxu0 %v10253_v47  ;;  %3705 = vmatpush.bf16.msra.mxu1 %v10241_v3  ;;  %v13219_v47 = vld [vmem:[#allocation9 + $0x190] sm:$0xff]  ;;  %v13226_v54 = vld [vmem:[#allocation9 + $0x1c8] sm:$0xff]  ;;  %v13209_v3 = vld [vmem:[#allocation9 + $0x140] sm:$0xff] }
 0xf56   : > { %3666 = vmatpush.bf16.msrb.mxu2 %v10229_v56  ;;  %4028 = vmatpush.bf16.msra.mxu3 %v13215_v39  ;;  %v13211_v56 = vld [vmem:[#allocation9 + $0x150] sm:$0xff] }
 0xf59   : > { %3692 = vmatpush.bf16.msra.mxu0 %v10237_v0  ;;  %3706 = vmatpush.bf16.msra.mxu1 %v10225_v17  ;;  %v10209_v0 = vld [vmem:[%s15677_s7 + $0x4] sm:$0xf] }
 0xf5a   : > { %3667 = vmatpush.bf16.msrb.mxu2 %v10213_v9  ;;  %4029 = vmatpush.bf16.msra.mxu3 %v13214_v41  ;;  %v3494_v61 = vperm.slane %v10209_v0, 2  ;;  %v3495_v1 = vperm.slane %v10209_v0, 3  ;;  %v3492_v11 = vperm.slane %v10209_v0, 0  ;;  %v3493_v12 = vperm.slane %v10209_v0, 1 }
 0xf5d   : > { %3693 = vmatpush.bf16.msra.mxu0 %v10221_v15  ;;  %4053 = vmatpush.bf16.msrb.mxu1 %v13232_v20 }
 0xf5e   : > { %4014 = vmatpush.bf16.msra.mxu2 %v13208_v36  ;;  %4030 = vmatpush.bf16.msra.mxu3 %v13213_v50 }
 0xf61   : > { %4040 = vmatpush.bf16.msrb.mxu0 %v13224_v19  ;;  %4054 = vmatpush.bf16.msrb.mxu1 %v13231_v35 }
 0xf62   : > { %4015 = vmatpush.bf16.msra.mxu2 %v13207_v38  ;;  %4031 = vmatpush.bf16.msra.mxu3 %v13212_v8 }
 0xf65   : > { %4041 = vmatpush.bf16.msrb.mxu0 %v13223_v59  ;;  %4055 = vmatpush.bf16.msrb.mxu1 %v13230_v37 }
 0xf66   : > { %4016 = vmatpush.bf16.msra.mxu2 %v13206_v46  ;;  %4032 = vmatpush.bf16.msra.mxu3 %v13211_v56 }
 0xf69   : > { %4056 = vmatpush.bf16.msrb.mxu1 %v13229_v40 }
 0xf6a   : > { %4017 = vmatpush.bf16.msra.mxu2 %v13205_v44  ;;  %4033 = vmatpush.bf16.msra.mxu3 %v13210_v63 }
 0xf6d   : > { %4057 = vmatpush.bf16.msrb.mxu1 %v13228_v43 }
 0xf6e   : > { %4018 = vmatpush.bf16.msra.mxu2 %v13204_v49  ;;  %4034 = vmatpush.bf16.msra.mxu3 %v13209_v3 }
 0xf71   : > { %4058 = vmatpush.bf16.msrb.mxu1 %v13227_v48 }
 0xf72   : > { %4019 = vmatpush.bf16.msra.mxu2 %v13203_v55 }
 0xf75   : > { %4059 = vmatpush.bf16.msrb.mxu1 %v13226_v54 }
 0xf76   : > { %4020 = vmatpush.bf16.msra.mxu2 %v13202_v62 }
 0xf79   : > { %4060 = vmatpush.bf16.msrb.mxu1 %v13225_v58 }
 0xf7a   : > { %4021 = vmatpush.bf16.msra.mxu2 %v13201_v2 }
 0xfc6   : > { %v3433_v60 = vpop.xlane.xlu2 %3432 }
 0xfc7   : > { %v3434_v21 = vmul.f32 %v3433_v60, %v15119_v10 }
 0xfc9   : > { %v3435_v18 = vadd.f32 1e-12, %v3434_v21 }
 0xfcb   : > { %14133 = vrsqrt.f32 %v3435_v18  ;;  %vm3442_vm4 = vweird.f32 %v3435_v18 }
 0xfd1   : > { %v14134_v22 = vpop.eup %14133 }
 0xfd2   : > { %v3437_v23 = vmul.f32 %v14134_v22, %v3435_v18  ;;  %vm3443_vm3 = vweird.f32 %v14134_v22 }
 0xfd3   : > { %vm3444_vm5 = vmor %vm3442_vm4, %vm3443_vm3  ;;  %vm9392_vm3 = vcmp.eq.s32.totalorder %v15136_v53, 2 }
 0xfd4   : > { %v3438_v24 = vmul.f32 %v14134_v22, %v3437_v23 }
 0xfd6   : > { %v3439_v25 = vmul.f32 0.5, %v3438_v24 }
 0xfd8   : > { %v3440_v26 = vsub.f32 1.5, %v3439_v25 }
 0xfda   : > { %v3441_v27 = vmul.f32 %v14134_v22, %v3440_v26 }
 0xfdc   : > { %v3445_v29 = vsel %vm3444_vm5, %v14134_v22, %v3441_v27 }
 0xfdd   : > { %v3446_v30 = vmul.f32 %v3445_v29, %v15269_v51  ;;  %v13222_v51 = vld [vmem:[#allocation9 + $0x1a8] sm:$0xff] }
 0xfde   : > { %4042 = vmatpush.bf16.msrb.mxu0 %v13222_v51 }
 0xfdf   : > { %v3450_v32 = vmul.f32 %v14080_v28, %v3446_v30 }
 0xfe1   : > { %v15277_v33 = vadd.f32 %v14081_v31, %v3450_v32 }
 0xfe2   : > { %4043 = vmatpush.bf16.msrb.mxu0 %v13221_v6 }
 0xfe3   : > { %v3488_v34 = vpack.c.bf16 %v15277_v33, %v15277_v33 }
 0xfe5   : > { %3668 = vmatmul.bf16.vlgmr.msrb.gmra.mxu2 %v3488_v34  ;;  %3681 = vmatmul.bf16.vlgmr.msrb.gmra.mxu3 %v3488_v34 }
 0xfe6   : > { %3694 = vmatmul.bf16.vlgmr.msra.gmra.mxu0 %v3488_v34  ;;  %3707 = vmatmul.bf16.vlgmr.msra.gmra.mxu1 %v3488_v34 }
 0xfe7   : > { %4044 = vmatpush.bf16.msrb.mxu0 %v13220_v42 }
 0xfeb   : > { %4045 = vmatpush.bf16.msrb.mxu0 %v13219_v47 }
 0xfef   : > { %4046 = vmatpush.bf16.msrb.mxu0 %v13218_v52 }
 0xff3   : > { %4047 = vmatpush.bf16.msrb.mxu0 %v13217_v57 }
0x1063   : > { %v3695_v4 = vpop.f32.mrf.mxu0  ;;  %v3708_v5 = vpop.f32.mrf.mxu1 }
0x1064   : > { %v3696_v7 = vadd.f32 %v3695_v4, %v3494_v61  ;;  %v3709_v9 = vadd.f32 %v3708_v5, %v3495_v1  ;;  %v14082_v61 = vld [vmem:[%s15678_s10 + $0x1] ss:$0 sm:$0xff] }
0x1066   : > { %v3714_v13 = vmul.f32 %v3696_v7, %v3696_v7  ;;  %v3715_v14 = vmul.f32 %v3709_v9, %v3709_v9 }
0x1068   : > { %v3718_v15 = vmul.f32 %v3714_v13, %v3696_v7  ;;  %v3719_v16 = vmul.f32 %v3715_v14, %v3709_v9  ;;  %v3669_v17 = vpop.f32.mrf.mxu2  ;;  %v3682_v60 = vpop.f32.mrf.mxu3  ;;  %v10583_v14 = vld [vmem:[#allocation10 + $0xe0] sm:$0xf] }
0x1069   : > { %v3670_v19 = vadd.f32 %v3669_v17, %v3492_v11  ;;  %v3683_v20 = vadd.f32 %v3682_v60, %v3493_v12  ;;  %v10585_v60 = vld [vmem:[#allocation10 + $0xf0] sm:$0xf0] }
0x106a   : > { %v3722_v21 = vmul.f32 0.044715, %v3718_v15  ;;  %v3723_v18 = vmul.f32 0.044715, %v3719_v16  ;;  %v13263_v15 = vld [vmem:[#allocation10 + $0xec] sm:$0xf0] }
0x106b   : > { %v3712_v22 = vmul.f32 %v3670_v19, %v3670_v19  ;;  %v3713_v23 = vmul.f32 %v3683_v20, %v3683_v20  ;;  %v3697_v24 = vpop.f32.mrf.mxu0  ;;  %v3710_v25 = vpop.f32.mrf.mxu1  ;;  %v13261_v16 = vld [vmem:[#allocation10 + $0xe4] sm:$0xf]  ;;  %v10584_v17 = vor.u32 %v13263_v15, %v10583_v14  ;;  %v10529_v14 = vld [vmem:[#allocation10 + $0x78] sm:$0xf0] }
0x106c   : > { %v3726_v26 = vadd.f32 %v3722_v21, %v3696_v7  ;;  %v3727_v27 = vadd.f32 %v3723_v18, %v3709_v9  ;;  %v10588_v21 = vor.u32 %v13261_v16, %v10585_v60  ;;  %v10503_v16 = vld [vmem:[#allocation10 + $0x40] sm:$0xf]  ;;  %v13241_v60 = vld [vmem:[#allocation10 + $0x44] sm:$0xf] }
0x106d   : > { %v3716_v28 = vmul.f32 %v3712_v22, %v3670_v19  ;;  %v3717_v29 = vmul.f32 %v3713_v23, %v3683_v20  ;;  %v13262_v22 = vld [vmem:[#allocation10 + $0xec] sm:$0xf]  ;;  %v10593_v23 = vld [vmem:[#allocation10 + $0xf8] sm:$0xf0]  ;;  %4302 = vmatpush.bf16.msrb.mxu2 %v10584_v17  ;;  %v13243_v17 = vld [vmem:[#allocation10 + $0x4c] sm:$0xf0] }
0x106e   : > { %v3730_v30 = vmul.f32 0.7978846, %v3726_v26  ;;  %v3731_v31 = vmul.f32 0.7978846, %v3727_v27  ;;  %v10596_v24 = vor.u32 %v13262_v22, %v10593_v23  ;;  %4315 = vmatpush.bf16.msrb.mxu3 %v10588_v21  ;;  %v10511_v21 = vld [vmem:[#allocation10 + $0x48] sm:$0xf] }
0x106f   : > { %v3720_v32 = vmul.f32 0.044715, %v3716_v28  ;;  %v3721_v34 = vmul.f32 0.044715, %v3717_v29  ;;  %v10567_v28 = vld [vmem:[#allocation10 + $0xc0] sm:$0xf] }
0x1070   : > { %14135 = vtanh.f32 %v3730_v30  ;;  %v3671_v59 = vpop.f32.mrf.mxu2  ;;  %v3684_v35 = vpop.f32.mrf.mxu3  ;;  %4341 = vmatpush.bf16.msra.mxu1 %v10596_v24  ;;  %v13259_v29 = vld [vmem:[#allocation10 + $0xcc] sm:$0xf0]  ;;  %v13257_v30 = vld [vmem:[#allocation10 + $0xc4] sm:$0xf]  ;;  %v13242_v24 = vld [vmem:[#allocation10 + $0x4c] sm:$0xf] }
0x1071   : > { %14137 = vtanh.f32 %v3731_v31  ;;  %v3724_v36 = vadd.f32 %v3720_v32, %v3670_v19  ;;  %v3725_v45 = vadd.f32 %v3721_v34, %v3683_v20  ;;  %v10568_v31 = vor.u32 %v13259_v29, %v10567_v28  ;;  %v10569_v32 = vld [vmem:[#allocation10 + $0xd0] sm:$0xf0]  ;;  %v10575_v34 = vld [vmem:[#allocation10 + $0xc8] sm:$0xf]  ;;  %v13260_v59 = vld [vmem:[#allocation10 + $0xd4] sm:$0xf0] }
0x1072   : > { %v10572_v35 = vor.u32 %v13257_v30, %v10569_v32  ;;  %v13239_v28 = vld [vmem:[#allocation10 + $0x2c] sm:$0xf0]  ;;  %v13237_v29 = vld [vmem:[#allocation10 + $0x24] sm:$0xf]  ;;  %v10495_v32 = vld [vmem:[#allocation10 + $0x28] sm:$0xf] }
0x1073   : > { %v3728_v51 = vmul.f32 0.7978846, %v3724_v36  ;;  %v3729_v37 = vmul.f32 0.7978846, %v3725_v45  ;;  %v10576_v36 = vor.u32 %v13260_v59, %v10575_v34  ;;  %v13258_v45 = vld [vmem:[#allocation10 + $0xcc] sm:$0xf]  ;;  %4303 = vmatpush.bf16.msrb.mxu2 %v10568_v31 }
0x1074   : > { %4316 = vmatpush.bf16.msrb.mxu3 %v10572_v35  ;;  %v10489_v31 = vld [vmem:[#allocation10 + $0x30] sm:$0xf0]  ;;  %v13240_v34 = vld [vmem:[#allocation10 + $0x34] sm:$0xf0] }
0x1075   : > { %14139 = vtanh.f32 %v3728_v51  ;;  %v10577_v51 = vld [vmem:[#allocation10 + $0xd8] sm:$0xf0]  ;;  %v10492_v59 = vor.u32 %v13237_v29, %v10489_v31  ;;  %v10496_v35 = vor.u32 %v13240_v34, %v10495_v32  ;;  %v10711_v32 = vld [vmem:[#allocation12 + $0xe0] sm:$0xf]  ;;  %v13295_v34 = vld [vmem:[#allocation12 + $0xec] sm:$0xf0] }
0x1076   : > { %v14136_v38 = vpop.eup %14135  ;;  %14141 = vtanh.f32 %v3729_v37  ;;  %v10580_v37 = vor.u32 %v13258_v45, %v10577_v51  ;;  %v10497_v45 = vld [vmem:[#allocation10 + $0x38] sm:$0xf0]  ;;  %v10471_v51 = vld [vmem:[#allocation10] sm:$0xf] }
0x1077   : > { %v14138_v39 = vpop.eup %14137  ;;  %v3738_v6 = vadd.f32 1.0, %v14136_v38  ;;  %v10551_v38 = vld [vmem:[#allocation10 + $0xa0] sm:$0xf] }
0x1078   : > { %v3739_v40 = vadd.f32 1.0, %v14138_v39  ;;  %v13255_v39 = vld [vmem:[#allocation10 + $0xac] sm:$0xf0]  ;;  %4342 = vmatpush.bf16.msra.mxu1 %v10580_v37 }
0x1079   : > { %v3742_v46 = vmul.f32 0.5, %v3738_v6  ;;  %v13253_v6 = vld [vmem:[#allocation10 + $0xa4] sm:$0xf] }
0x107a   : > { %v3743_v41 = vmul.f32 0.5, %v3739_v40  ;;  %v10552_v40 = vor.u32 %v13255_v39, %v10551_v38  ;;  %v13235_v38 = vld [vmem:[#allocation10 + $0xc] sm:$0xf0]  ;;  %v13233_v39 = vld [vmem:[#allocation10 + $0x4] sm:$0xf] }
0x107b   : > { %v14140_v42 = vpop.eup %14139  ;;  %v3746_v43 = vmul.f32 %v3742_v46, %v3696_v7  ;;  %v10553_v46 = vld [vmem:[#allocation10 + $0xb0] sm:$0xf0] }
0x107c   : > { %v14142_v44 = vpop.eup %14141  ;;  %v3747_v50 = vmul.f32 %v3743_v41, %v3709_v9  ;;  %v3736_v47 = vadd.f32 1.0, %v14140_v42  ;;  %v10559_v41 = vld [vmem:[#allocation10 + $0xa8] sm:$0xf]  ;;  %v13256_v42 = vld [vmem:[#allocation10 + $0xb4] sm:$0xf0]  ;;  %4304 = vmatpush.bf16.msrb.mxu2 %v10552_v40  ;;  %v10472_v40 = vor.u32 %v13235_v38, %v10471_v51 }
0x107d   : > { %v3815_v48 = vpack.c.bf16 %v3746_v43, %v3746_v43  ;;  %v3737_v49 = vadd.f32 1.0, %v14142_v44  ;;  %v10556_v43 = vor.u32 %v13253_v6, %v10553_v46  ;;  %v10560_v44 = vor.u32 %v13256_v42, %v10559_v41  ;;  %v10473_v6 = vld [vmem:[#allocation10 + $0x10] sm:$0xf0]  ;;  %v10479_v41 = vld [vmem:[#allocation10 + $0x8] sm:$0xf] }
0x107e   : > { %v3816_v8 = vpack.c.bf16 %v3747_v50, %v3747_v50  ;;  %v3740_v52 = vmul.f32 0.5, %v3736_v47  ;;  %v13254_v50 = vld [vmem:[#allocation10 + $0xac] sm:$0xf]  ;;  %v10561_v47 = vld [vmem:[#allocation10 + $0xb8] sm:$0xf0]  ;;  %v10476_v46 = vor.u32 %v13233_v39, %v10473_v6 }
0x107f   : > { %4048 = vmatmul.bf16.vlgmr.msrb.gmra.mxu0 %v3815_v48  ;;  %v3741_v54 = vmul.f32 0.5, %v3737_v49  ;;  %v10564_v48 = vor.u32 %v13254_v50, %v10561_v47  ;;  %4317 = vmatpush.bf16.msrb.mxu3 %v10556_v43  ;;  %v10535_v49 = vld [vmem:[#allocation10 + $0x80] sm:$0xf]  ;;  %v13236_v42 = vld [vmem:[#allocation10 + $0x14] sm:$0xf0] }
0x1080   : > { %4061 = vmatmul.bf16.vlgmr.msrb.gmra.mxu1 %v3816_v8  ;;  %v3744_v55 = vmul.f32 %v3740_v52, %v3670_v19  ;;  %v10591_v19 = vld [vmem:[#allocation10 + $0xe8] sm:$0xf]  ;;  %v13251_v8 = vld [vmem:[#allocation10 + $0x8c] sm:$0xf0]  ;;  %v13249_v52 = vld [vmem:[#allocation10 + $0x84] sm:$0xf] }
0x1081   : > { %v3745_v56 = vmul.f32 %v3741_v54, %v3683_v20  ;;  %v13264_v20 = vld [vmem:[#allocation10 + $0xf4] sm:$0xf0]  ;;  %4343 = vmatpush.bf16.msra.mxu1 %v10564_v48  ;;  %v10536_v54 = vor.u32 %v13251_v8, %v10535_v49  ;;  %v13234_v43 = vld [vmem:[#allocation10 + $0xc] sm:$0xf]  ;;  %v10481_v50 = vld [vmem:[#allocation10 + $0x18] sm:$0xf0] }
0x1082   : > { %v3813_v57 = vpack.c.bf16 %v3744_v55, %v3744_v55  ;;  %v10592_v18 = vor.u32 %v13264_v20, %v10591_v19  ;;  %v10537_v55 = vld [vmem:[#allocation10 + $0x90] sm:$0xf0]  ;;  %v10504_v19 = vor.u32 %v13243_v17, %v10503_v16  ;;  %v10484_v47 = vor.u32 %v13234_v43, %v10481_v50  ;;  %v13359_v51 = vld [vmem:[#allocation12 + $0x2ec] sm:$0xf0]  ;;  %v11095_v39 = vld [vmem:[#allocation12 + $0x3e0] sm:$0xf] }
0x1083   : > { %v3814_v58 = vpack.c.bf16 %v3745_v56, %v3745_v56  ;;  %v10543_v56 = vld [vmem:[#allocation10 + $0x88] sm:$0xf]  ;;  %4305 = vmatpush.bf16.msrb.mxu2 %v10536_v54  ;;  %v10505_v20 = vld [vmem:[#allocation10 + $0x50] sm:$0xf0]  ;;  %v13391_v6 = vld [vmem:[#allocation12 + $0x3ec] sm:$0xf0] }
0x1084   : > { %4022 = vmatmul.bf16.vlgmr.msra.gmra.mxu2 %v3813_v57  ;;  %4328 = vmatpush.bf16.msra.mxu0 %v10592_v18  ;;  %v13252_v57 = vld [vmem:[#allocation10 + $0x94] sm:$0xf0]  ;;  %v10508_v22 = vor.u32 %v13241_v60, %v10505_v20  ;;  %v13323_v43 = vld [vmem:[#allocation12 + $0x1cc] sm:$0xf0] }
0x1085   : > { %4035 = vmatmul.bf16.vlgmr.msra.gmra.mxu3 %v3814_v58  ;;  %v10540_v58 = vor.u32 %v13249_v52, %v10537_v55  ;;  %v13244_v18 = vld [vmem:[#allocation10 + $0x54] sm:$0xf0] }
0x1086   : > { %v10512_v23 = vor.u32 %v13244_v18, %v10511_v21 }
0x1087   : > { %4318 = vmatpush.bf16.msrb.mxu3 %v10540_v58 }
0x1088   : > { %4329 = vmatpush.bf16.msra.mxu0 %v10576_v36  ;;  %v13238_v36 = vld [vmem:[#allocation10 + $0x2c] sm:$0xf] }
0x1089   : > { %v10500_v37 = vor.u32 %v13238_v36, %v10497_v45  ;;  %v13327_v36 = vld [vmem:[#allocation12 + $0x1ec] sm:$0xf0]  ;;  %v10967_v45 = vld [vmem:[#allocation12 + $0x2e0] sm:$0xf] }
0x108a   : > { %v10968_v38 = vor.u32 %v13359_v51, %v10967_v45  ;;  %v10759_v51 = vld [vmem:[#allocation12 + $0x140] sm:$0xf] }
0x108c   : > { %4330 = vmatpush.bf16.msra.mxu0 %v10560_v44  ;;  %v10480_v44 = vor.u32 %v13236_v42, %v10479_v41  ;;  %v13291_v41 = vld [vmem:[#allocation12 + $0xcc] sm:$0xf0]  ;;  %v10823_v42 = vld [vmem:[#allocation12 + $0x1c0] sm:$0xf] }
0x108d   : > { %v10824_v50 = vor.u32 %v13323_v43, %v10823_v42 }
0x10fc   : > { %v4049_v62 = vpop.f32.mrf.mxu0 }
0x10fd   : > { %v4062_v63 = vpop.f32.mrf.mxu1 }
0x1104   : > { %v4051_v0 = vpop.f32.mrf.mxu0 }
0x1105   : > { %v4064_v1 = vpop.f32.mrf.mxu1  ;;  %v10545_v0 = vld [vmem:[#allocation10 + $0x98] sm:$0xf0] }
0x1106   : > { %v10519_v1 = vld [vmem:[#allocation10 + $0x60] sm:$0xf] }
0x1107   : > { %v4023_v2 = vpop.f32.mrf.mxu2 }
0x1108   : > { %v4024_v3 = vadd.f32 %v14082_v61, %v4023_v2  ;;  %v4036_v4 = vpop.f32.mrf.mxu3  ;;  %v13247_v2 = vld [vmem:[#allocation10 + $0x6c] sm:$0xf0] }
0x110a   : > { %v4037_v5 = vadd.f32 %v4036_v4, %v4024_v3  ;;  %v13245_v3 = vld [vmem:[#allocation10 + $0x64] sm:$0xf]  ;;  %v10520_v4 = vor.u32 %v13247_v2, %v10519_v1 }
0x110c   : > { %v4050_v7 = vadd.f32 %v4049_v62, %v4037_v5  ;;  %v10544_v62 = vor.u32 %v13252_v57, %v10543_v56  ;;  %v10521_v5 = vld [vmem:[#allocation10 + $0x70] sm:$0xf0]  ;;  %4306 = vmatpush.bf16.msrb.mxu2 %v10520_v4 }
0x110e   : > { %v4063_v9 = vadd.f32 %v4062_v63, %v4050_v7  ;;  %v13250_v63 = vld [vmem:[#allocation10 + $0x8c] sm:$0xf]  ;;  %4331 = vmatpush.bf16.msra.mxu0 %v10544_v62  ;;  %v10527_v7 = vld [vmem:[#allocation10 + $0x68] sm:$0xf]  ;;  %v14083_v62 = vld [vmem:[%s15679_s22 + $0x1] ss:$0 sm:$0xff] }
0x110f   : > { %v4025_v11 = vpop.f32.mrf.mxu2  ;;  %v10548_v61 = vor.u32 %v13250_v63, %v10545_v0 }
0x1110   : > { %v4038_v12 = vpop.f32.mrf.mxu3  ;;  %v4066_v13 = vadd.f32 %v4063_v9, %v15277_v33  ;;  %v13248_v9 = vld [vmem:[#allocation10 + $0x74] sm:$0xf0]  ;;  %v10524_v11 = vor.u32 %v13245_v3, %v10521_v5  ;;  %4307 = vmatpush.bf16.msrb.mxu2 %v10504_v19  ;;  %v4132_v3 = vld [vmem:[%s15681_s15] sm:$0xf]  ;;  %s15686_s15 = smov %s15685_s28 }
0x1111   : > { %4344 = vmatpush.bf16.msra.mxu1 %v10548_v61  ;;  %v10528_v12 = vor.u32 %v13248_v9, %v10527_v7  ;;  %v14084_v61 = vld [vmem:[%s15680_s2 + $0x1] ss:$0 sm:$0xff]  ;;  %v4296_v7 = vperm.slane %v4132_v3, 2  ;;  %v4294_v9 = vperm.slane %v4132_v3, 0 }
0x1112   : > { %4071 = vadd.xlane.f32.xlu0 %v4066_v13  ;;  %4319 = vmatpush.bf16.msrb.mxu3 %v10524_v11  ;;  %v4295_v11 = vperm.slane %v4132_v3, 1 }
0x1113   : > { %4332 = vmatpush.bf16.msra.mxu0 %v10528_v12  ;;  %v4297_v12 = vperm.slane %v4132_v3, 3 }
0x1116   : > { %4320 = vmatpush.bf16.msrb.mxu3 %v10508_v22 }
0x1117   : > { %4333 = vmatpush.bf16.msra.mxu0 %v10512_v23 }
0x111a   : > { %4321 = vmatpush.bf16.msrb.mxu3 %v10492_v59  ;;  %v10839_v59 = vld [vmem:[#allocation12 + $0x1e0] sm:$0xf] }
0x111b   : > { %4334 = vmatpush.bf16.msra.mxu0 %v10496_v35  ;;  %v10712_v35 = vor.u32 %v13295_v34, %v10711_v32  ;;  %v10631_v34 = vld [vmem:[#allocation12 + $0x40] sm:$0xf] }
0x111e   : > { %4322 = vmatpush.bf16.msrb.mxu3 %v10476_v46  ;;  %v11096_v46 = vor.u32 %v13391_v6, %v11095_v39  ;;  %v13339_v6 = vld [vmem:[#allocation12 + $0x24c] sm:$0xf0] }
0x111f   : > { %4335 = vmatpush.bf16.msra.mxu0 %v10480_v44 }
0x1123   : > { %5245 = vmatpush.bf16.msrb.mxu0 %v10968_v38  ;;  %v10887_v38 = vld [vmem:[#allocation12 + $0x240] sm:$0xf] }
0x1185   : > { %v4072_v25 = vpop.xlane.xlu0 %4071 }
0x1186   : > { %v4073_v33 = vmul.f32 %v4072_v25, %v15119_v10  ;;  %v10513_v25 = vld [vmem:[#allocation10 + $0x58] sm:$0xf0] }
0x1188   : > { %v15285_v26 = vsub.f32 %v4066_v13, %v4073_v33  ;;  %v13246_v13 = vld [vmem:[#allocation10 + $0x6c] sm:$0xf]  ;;  %v10516_v33 = vor.u32 %v13242_v24, %v10513_v25 }
0x1189   : > { %v10532_v15 = vor.u32 %v13246_v13, %v10529_v14 }
0x118a   : > { %v4075_v27 = vmul.f32 %v15285_v26, %v15285_v26 }
0x118b   : > { %4345 = vmatpush.bf16.msra.mxu1 %v10532_v15 }
0x118c   : > { %4076 = vadd.xlane.f32.xlu1 %v4075_v27  ;;  %v10487_v27 = vld [vmem:[#allocation10 + $0x20] sm:$0xf] }
0x118d   : > { %v10488_v30 = vor.u32 %v13239_v28, %v10487_v27  ;;  %v14642_v28 = vmov 512.0  }
0x118f   : > { %4346 = vmatpush.bf16.msra.mxu1 %v10516_v33  ;;  %4308 = vmatpush.bf16.msrb.mxu2 %v10488_v30 }
0x1193   : > { %4347 = vmatpush.bf16.msra.mxu1 %v10500_v37  ;;  %4309 = vmatpush.bf16.msrb.mxu2 %v10472_v40  ;;  %v10840_v37 = vor.u32 %v13327_v36, %v10839_v59  ;;  %v10695_v40 = vld [vmem:[#allocation12 + $0xc0] sm:$0xf]  ;;  %v13275_v59 = vld [vmem:[#allocation12 + $0x4c] sm:$0xf0] }
0x1194   : > { %v10696_v44 = vor.u32 %v13291_v41, %v10695_v40  ;;  %v11015_v40 = vld [vmem:[#allocation12 + $0x340] sm:$0xf]  ;;  %v10632_v43 = vor.u32 %v13275_v59, %v10631_v34  ;;  %v13357_v34 = vld [vmem:[#allocation12 + $0x2e4] sm:$0xf]  ;;  %v10969_v59 = vld [vmem:[#allocation12 + $0x2f0] sm:$0xf0] }
0x1195   : > { %5232 = vmatpush.bf16.msra.mxu3 %v10840_v37  ;;  %v13307_v37 = vld [vmem:[#allocation12 + $0x14c] sm:$0xf0] }
0x1197   : > { %4348 = vmatpush.bf16.msra.mxu1 %v10484_v47  ;;  %5219 = vmatpush.bf16.msra.mxu2 %v10712_v35  ;;  %v10951_v47 = vld [vmem:[#allocation12 + $0x2c0] sm:$0xf] }
0x1199   : > { %5233 = vmatpush.bf16.msra.mxu3 %v10824_v50 }
0x119b   : > { %5258 = vmatpush.bf16.msrb.mxu1 %v11096_v46  ;;  %5220 = vmatpush.bf16.msra.mxu2 %v10696_v44  ;;  %v13371_v46 = vld [vmem:[#allocation12 + $0x34c] sm:$0xf0]  ;;  %v10888_v44 = vor.u32 %v13339_v6, %v10887_v38  ;;  %v10697_v38 = vld [vmem:[#allocation12 + $0xd0] sm:$0xf0] }
0x119c   : > { %v11016_v50 = vor.u32 %v13371_v46, %v11015_v40  ;;  %v13321_v40 = vld [vmem:[#allocation12 + $0x1c4] sm:$0xf]  ;;  %v10825_v46 = vld [vmem:[#allocation12 + $0x1d0] sm:$0xf0] }
0x11ff   : > { %v4077_v48 = vpop.xlane.xlu1 %4076 }
0x1200   : > { %v4078_v49 = vmul.f32 %v4077_v48, %v15119_v10  ;;  %v13355_v48 = vld [vmem:[#allocation12 + $0x2cc] sm:$0xf0] }
0x1202   : > { %v4079_v8 = vadd.f32 1e-12, %v4078_v49  ;;  %v11079_v49 = vld [vmem:[#allocation12 + $0x3c0] sm:$0xf] }
0x1204   : > { %14143 = vrsqrt.f32 %v4079_v8  ;;  %vm4086_vm7 = vweird.f32 %v4079_v8 }
0x1205   : > { %14145 = vrcp.f32 %v14642_v28  ;;  %v13343_v28 = vld [vmem:[#allocation12 + $0x26c] sm:$0xf0] }
0x120a   : > { %v14144_v52 = vpop.eup %14143 }
0x120b   : > { %v4081_v54 = vmul.f32 %v14144_v52, %v4079_v8  ;;  %vm4087_vm6 = vweird.f32 %v14144_v52  ;;  %v15310_v29 = vpop.eup %14145  ;;  %v10952_v8 = vor.u32 %v13355_v48, %v10951_v47  ;;  %v10615_v47 = vld [vmem:[#allocation12 + $0x20] sm:$0xf]  ;;  %v13271_v48 = vld [vmem:[#allocation12 + $0x2c] sm:$0xf0] }
0x120c   : > { %vm4088_vm8 = vmor %vm4086_vm7, %vm4087_vm6  ;;  %v4367_v30 = vmul.f32 512.0, %v15310_v29  ;;  %vm4371_vm10 = vweird.f32 %v15310_v29 }
0x120d   : > { %v4082_v55 = vmul.f32 %v14144_v52, %v4081_v54  ;;  %v10679_v54 = vld [vmem:[#allocation12 + $0xa0] sm:$0xf]  ;;  %5246 = vmatpush.bf16.msrb.mxu0 %v10952_v8 }
0x120e   : > { %v4368_v31 = vsub.f32 1.0, %v4367_v30  ;;  %v11031_v30 = vld [vmem:[#allocation12 + $0x360] sm:$0xf] }
0x120f   : > { %v4083_v56 = vmul.f32 0.5, %v4082_v55  ;;  %v13287_v55 = vld [vmem:[#allocation12 + $0xac] sm:$0xf0] }
0x1211   : > { %v4084_v57 = vsub.f32 1.5, %v4083_v56 }
0x1213   : > { %v4085_v58 = vmul.f32 %v14144_v52, %v4084_v57  ;;  %v10807_v57 = vld [vmem:[#allocation12 + $0x1a0] sm:$0xf] }
0x1215   : > { %v4089_v63 = vsel %vm4088_vm8, %v14144_v52, %v4085_v58  ;;  %v13387_v52 = vld [vmem:[#allocation12 + $0x3cc] sm:$0xf0] }
0x1216   : > { %v4090_v0 = vmul.f32 %v4089_v63, %v15285_v26  ;;  %v11080_v56 = vor.u32 %v13387_v52, %v11079_v49  ;;  %v13319_v58 = vld [vmem:[#allocation12 + $0x1ac] sm:$0xf0]  ;;  %v10680_v63 = vor.u32 %v13287_v55, %v10679_v54  ;;  %v10743_v49 = vld [vmem:[#allocation12 + $0x120] sm:$0xf] }
0x1218   : > { %v4094_v1 = vmul.f32 %v14083_v62, %v4090_v0  ;;  %v10935_v62 = vld [vmem:[#allocation12 + $0x2a0] sm:$0xf]  ;;  %v13351_v0 = vld [vmem:[#allocation12 + $0x2ac] sm:$0xf0]  ;;  %5259 = vmatpush.bf16.msrb.mxu1 %v11080_v56  ;;  %5221 = vmatpush.bf16.msra.mxu2 %v10680_v63 }
0x1219   : > { %v10936_v3 = vor.u32 %v13351_v0, %v10935_v62  ;;  %v13303_v56 = vld [vmem:[#allocation12 + $0x12c] sm:$0xf0]  ;;  %v10999_v62 = vld [vmem:[#allocation12 + $0x320] sm:$0xf] }
0x121a   : > { %v4098_v2 = vadd.f32 %v14084_v61, %v4094_v1  ;;  %v11063_v61 = vld [vmem:[#allocation12 + $0x3a0] sm:$0xf]  ;;  %v13383_v1 = vld [vmem:[#allocation12 + $0x3ac] sm:$0xf0] }
0x121b   : > { %5247 = vmatpush.bf16.msrb.mxu0 %v10936_v3  ;;  %v13367_v63 = vld [vmem:[#allocation12 + $0x32c] sm:$0xf0] }
0x121c   : > { %v4131_v10 = vpack.c.bf16 %v4098_v2, %v4098_v2  ;;  %v4369_v2 = vmul.f32 %v15310_v29, %v4368_v31  ;;  %v13375_v31 = vld [vmem:[#allocation12 + $0x36c] sm:$0xf0]  ;;  %v11000_v3 = vor.u32 %v13367_v63, %v10999_v62  ;;  %v13349_v62 = vld [vmem:[#allocation12 + $0x2a4] sm:$0xf]  ;;  %v10937_v63 = vld [vmem:[#allocation12 + $0x2b0] sm:$0xf0] }
0x121d   : > { %v11032_v39 = vor.u32 %v13375_v31, %v11031_v30  ;;  %v10841_v30 = vld [vmem:[#allocation12 + $0x1f0] sm:$0xf0] }
0x121e   : > { %4310 = vmatmul.bf16.vlgmr.msrb.gmra.mxu2 %v4131_v10  ;;  %4323 = vmatmul.bf16.vlgmr.msrb.gmra.mxu3 %v4131_v10 }
0x121f   : > { %4336 = vmatmul.bf16.vlgmr.msra.gmra.mxu0 %v4131_v10  ;;  %4349 = vmatmul.bf16.vlgmr.msra.gmra.mxu1 %v4131_v10  ;;  %v10808_v10 = vor.u32 %v13319_v58, %v10807_v57  ;;  %v10871_v57 = vld [vmem:[#allocation12 + $0x220] sm:$0xf]  ;;  %v13335_v58 = vld [vmem:[#allocation12 + $0x22c] sm:$0xf0] }
0x1221   : > { %5234 = vmatpush.bf16.msra.mxu3 %v10808_v10 }
0x129c   : > { %v4337_v4 = vpop.f32.mrf.mxu0  ;;  %v4350_v5 = vpop.f32.mrf.mxu1 }
0x129d   : > { %v15294_v15 = vadd.f32 %v4337_v4, %v4296_v7  ;;  %v15300_v17 = vadd.f32 %v4350_v5, %v4297_v12  ;;  %v10663_v4 = vld [vmem:[#allocation12 + $0x80] sm:$0xf]  ;;  %v13283_v5 = vld [vmem:[#allocation12 + $0x8c] sm:$0xf0] }
0x129e   : > { %v10791_v7 = vld [vmem:[#allocation12 + $0x180] sm:$0xf] }
0x129f   : > { %v4360_v22 = vsel %vm4356_vm9, %v15294_v15, 0.0  ;;  %v4362_v24 = vsel %vm4356_vm9, %v15300_v17, 0.0  ;;  %v10919_v12 = vld [vmem:[#allocation12 + $0x280] sm:$0xf] }
0x12a1   : > { %v4311_v13 = vpop.f32.mrf.mxu2  ;;  %v4324_v14 = vpop.f32.mrf.mxu3 }
0x12a2   : > { %v15296_v26 = vadd.f32 %v4311_v13, %v4294_v9  ;;  %v15298_v16 = vadd.f32 %v4324_v14, %v4295_v11  ;;  %v11064_v9 = vor.u32 %v13383_v1, %v11063_v61  ;;  %v13315_v11 = vld [vmem:[#allocation12 + $0x18c] sm:$0xf0]  ;;  %v11047_v14 = vld [vmem:[#allocation12 + $0x380] sm:$0xf]  ;;  %v10872_v61 = vor.u32 %v13335_v58, %v10871_v57  ;;  %v10809_v58 = vld [vmem:[#allocation12 + $0x1b0] sm:$0xf0] }
0x12a3   : > { %v13347_v13 = vld [vmem:[#allocation12 + $0x28c] sm:$0xf0] }
0x12a4   : > { %v4357_v60 = vsel %vm4356_vm9, %v15296_v26, 0.0  ;;  %v4358_v19 = vsel %vm4356_vm9, %v15298_v16, 0.0  ;;  %v4339_v20 = vpop.f32.mrf.mxu0  ;;  %v4352_v21 = vpop.f32.mrf.mxu1  ;;  %5260 = vmatpush.bf16.msrb.mxu1 %v11064_v9 }
0x12a5   : > { %v4359_v18 = vadd.f32 %v4358_v19, %v4357_v60  ;;  %v13379_v60 = vld [vmem:[#allocation12 + $0x38c] sm:$0xf0]  ;;  %v10664_v19 = vor.u32 %v13283_v5, %v10663_v4  ;;  %v4370_v20 = vadd.f32 %v15310_v29, %v4369_v2  ;;  %v10792_v21 = vor.u32 %v13315_v11, %v10791_v7 }
0x12a7   : > { %v4361_v23 = vadd.f32 %v4360_v22, %v4359_v18  ;;  %v10920_v18 = vor.u32 %v13347_v13, %v10919_v12  ;;  %v10647_v22 = vld [vmem:[#allocation12 + $0x60] sm:$0xf]  ;;  %5222 = vmatpush.bf16.msra.mxu2 %v10664_v19  ;;  %v15317_v35 = vsel %vm4371_vm10, %v15310_v29, %v4370_v20  ;;  %5235 = vmatpush.bf16.msra.mxu3 %v10792_v21  ;;  %v13267_v13 = vld [vmem:[#allocation12 + $0xc] sm:$0xf0] }
0x12a8   : > { %v10760_v29 = vor.u32 %v13307_v37, %v10759_v51  ;;  %v10599_v12 = vld [vmem:[#allocation12] sm:$0xf]  ;;  %v13299_v19 = vld [vmem:[#allocation12 + $0x10c] sm:$0xf0]  ;;  %v11097_v51 = vld [vmem:[#allocation12 + $0x3f0] sm:$0xf0] }
0x12a9   : > { %v4313_v25 = vpop.f32.mrf.mxu2  ;;  %v4326_v33 = vpop.f32.mrf.mxu3  ;;  %v4363_v27 = vadd.f32 %v4362_v24, %v4361_v23  ;;  %v13279_v23 = vld [vmem:[#allocation12 + $0x6c] sm:$0xf0]  ;;  %v10775_v24 = vld [vmem:[#allocation12 + $0x160] sm:$0xf]  ;;  %5248 = vmatpush.bf16.msrb.mxu0 %v10920_v18  ;;  %v13289_v37 = vld [vmem:[#allocation12 + $0xc4] sm:$0xf] }
0x12aa   : > { %v11048_v25 = vor.u32 %v13379_v60, %v11047_v14  ;;  %v13311_v33 = vld [vmem:[#allocation12 + $0x16c] sm:$0xf0]  ;;  %v10648_v32 = vor.u32 %v13279_v23, %v10647_v22  ;;  %v10727_v14 = vld [vmem:[#allocation12 + $0x100] sm:$0xf]  ;;  %v10600_v60 = vor.u32 %v13267_v13, %v10599_v12  ;;  %v10700_v6 = vor.u32 %v13289_v37, %v10697_v38  ;;  %v11049_v12 = vld [vmem:[#allocation12 + $0x390] sm:$0xf0] }
0x12ab   : > { %4364 = vadd.xlane.f32.xlu2 %v4363_v27  ;;  %v10903_v27 = vld [vmem:[#allocation12 + $0x260] sm:$0xf]  ;;  %v10776_v36 = vor.u32 %v13311_v33, %v10775_v24  ;;  %v13331_v21 = vld [vmem:[#allocation12 + $0x20c] sm:$0xf0]  ;;  %v10728_v18 = vor.u32 %v13299_v19, %v10727_v14  ;;  %v13277_v14 = vld [vmem:[#allocation12 + $0x64] sm:$0xf] }
0x12ac   : > { %v10904_v45 = vor.u32 %v13343_v28, %v10903_v27  ;;  %5261 = vmatpush.bf16.msrb.mxu1 %v11048_v25  ;;  %5223 = vmatpush.bf16.msra.mxu2 %v10648_v32  ;;  %v10855_v20 = vld [vmem:[#allocation12 + $0x200] sm:$0xf]  ;;  %v13363_v24 = vld [vmem:[#allocation12 + $0x30c] sm:$0xf0]  ;;  %v13293_v25 = vld [vmem:[#allocation12 + $0xe4] sm:$0xf] }
0x12ad   : > { %5236 = vmatpush.bf16.msra.mxu3 %v10776_v36  ;;  %v10856_v22 = vor.u32 %v13331_v21, %v10855_v20  ;;  %v10983_v23 = vld [vmem:[#allocation12 + $0x300] sm:$0xf]  ;;  %v10713_v27 = vld [vmem:[#allocation12 + $0xf0] sm:$0xf0]  ;;  %v13325_v28 = vld [vmem:[#allocation12 + $0x1e4] sm:$0xf] }
0x12ae   : > { %5249 = vmatpush.bf16.msrb.mxu0 %v10904_v45  ;;  %v10984_v33 = vor.u32 %v13363_v24, %v10983_v23  ;;  %v10716_v31 = vor.u32 %v13293_v25, %v10713_v27  ;;  %v10844_v32 = vor.u32 %v13325_v28, %v10841_v30  ;;  %v13389_v36 = vld [vmem:[#allocation12 + $0x3e4] sm:$0xf]  ;;  %v10972_v45 = vor.u32 %v13357_v34, %v10969_v59  ;;  %v10777_v21 = vld [vmem:[#allocation12 + $0x170] sm:$0xf0] }
0x12af   : > { %v13309_v19 = vld [vmem:[#allocation12 + $0x164] sm:$0xf]  ;;  %v10633_v30 = vld [vmem:[#allocation12 + $0x50] sm:$0xf0] }
0x12b0   : > { %5262 = vmatpush.bf16.msrb.mxu1 %v11032_v39  ;;  %5224 = vmatpush.bf16.msra.mxu2 %v10632_v43  ;;  %v11100_v39 = vor.u32 %v13389_v36, %v11097_v51  ;;  %v10953_v43 = vld [vmem:[#allocation12 + $0x2d0] sm:$0xf0]  ;;  %v10780_v23 = vor.u32 %v13309_v19, %v10777_v21  ;;  %v13373_v25 = vld [vmem:[#allocation12 + $0x364] sm:$0xf] }
0x12b1   : > { %5237 = vmatpush.bf16.msra.mxu3 %v10760_v29  ;;  %v13385_v29 = vld [vmem:[#allocation12 + $0x3c4] sm:$0xf]  ;;  %v10889_v59 = vld [vmem:[#allocation12 + $0x250] sm:$0xf0] }
0x12b2   : > { %5250 = vmatpush.bf16.msrb.mxu0 %v10888_v44  ;;  %v11081_v44 = vld [vmem:[#allocation12 + $0x3d0] sm:$0xf0]  ;;  %v13273_v28 = vld [vmem:[#allocation12 + $0x44] sm:$0xf] }
0x12b3   : > { %v13337_v34 = vld [vmem:[#allocation12 + $0x244] sm:$0xf]  ;;  %v10636_v36 = vor.u32 %v13273_v28, %v10633_v30  ;;  %v11017_v37 = vld [vmem:[#allocation12 + $0x350] sm:$0xf0] }
0x12b4   : > { %5263 = vmatpush.bf16.msrb.mxu1 %v11016_v50  ;;  %v13369_v51 = vld [vmem:[#allocation12 + $0x344] sm:$0xf] }
0x12b5   : > { %v13269_v38 = vld [vmem:[#allocation12 + $0x24] sm:$0xf] }
0x12b6   : > { %5251 = vmatpush.bf16.msrb.mxu0 %v10872_v61  ;;  %v13281_v61 = vld [vmem:[#allocation12 + $0x84] sm:$0xf] }
0x12b8   : > { %5264 = vmatpush.bf16.msrb.mxu1 %v11000_v3  ;;  %v10793_v3 = vld [vmem:[#allocation12 + $0x190] sm:$0xf0] }
0x12ba   : > { %5252 = vmatpush.bf16.msrb.mxu0 %v10856_v22  ;;  %v10905_v22 = vld [vmem:[#allocation12 + $0x270] sm:$0xf0] }
0x12bc   : > { %5265 = vmatpush.bf16.msrb.mxu1 %v10984_v33  ;;  %v11033_v33 = vld [vmem:[#allocation12 + $0x370] sm:$0xf0] }
0x12bd   : > { %v11036_v27 = vor.u32 %v13373_v25, %v11033_v33 }
0x12be   : > { %5297 = vmatpush.bf16.msra.mxu0 %v10972_v45 }
0x12c0   : > { %5310 = vmatpush.bf16.msra.mxu1 %v11100_v39  ;;  %v10892_v39 = vor.u32 %v13337_v34, %v10889_v59 }
0x131e   : > { %v4365_v41 = vpop.xlane.xlu2 %4364 }
0x131f   : > { %v4373_v42 = vmul.f32 %v15317_v35, %v4365_v41  ;;  %v13353_v41 = vld [vmem:[#allocation12 + $0x2c4] sm:$0xf] }
0x1320   : > { %v10956_v50 = vor.u32 %v13353_v41, %v10953_v43  ;;  %v11020_v41 = vor.u32 %v13369_v51, %v11017_v37  ;;  %v10873_v43 = vld [vmem:[#allocation12 + $0x230] sm:$0xf0] }
0x1321   : > { %v15321_v8 = vsub.f32 %v15296_v26, %v4373_v42  ;;  %v15324_v52 = vsub.f32 %v15298_v16, %v4373_v42  ;;  %v15327_v54 = vsub.f32 %v15294_v15, %v4373_v42  ;;  %v15330_v55 = vsub.f32 %v15300_v17, %v4373_v42 }
0x1322   : > { %v10616_v15 = vor.u32 %v13271_v48, %v10615_v47  ;;  %v10744_v17 = vor.u32 %v13303_v56, %v10743_v49  ;;  %v10828_v42 = vor.u32 %v13321_v40, %v10825_v46  ;;  %v11084_v47 = vor.u32 %v13385_v29, %v11081_v44  ;;  %v13285_v48 = vld [vmem:[#allocation12 + $0xa4] sm:$0xf]  ;;  %v10681_v49 = vld [vmem:[#allocation12 + $0xb0] sm:$0xf0]  ;;  %5298 = vmatpush.bf16.msra.mxu0 %v10956_v50 }
0x1323   : > { %v4378_v0 = vmul.f32 %v15321_v8, %v15321_v8  ;;  %v4379_v26 = vmul.f32 %v15324_v52, %v15324_v52  ;;  %v4380_v16 = vmul.f32 %v15327_v54, %v15327_v54  ;;  %v4381_v1 = vmul.f32 %v15330_v55, %v15330_v55  ;;  %v13317_v56 = vld [vmem:[#allocation12 + $0x1a4] sm:$0xf]  ;;  %v10745_v46 = vld [vmem:[#allocation12 + $0x130] sm:$0xf0] }
0x1324   : > { %5225 = vmatpush.bf16.msra.mxu2 %v10616_v15  ;;  %5238 = vmatpush.bf16.msra.mxu3 %v10744_v17  ;;  %v10684_v57 = vor.u32 %v13285_v48, %v10681_v49  ;;  %v11065_v15 = vld [vmem:[#allocation12 + $0x3b0] sm:$0xf0]  ;;  %v13301_v40 = vld [vmem:[#allocation12 + $0x124] sm:$0xf] }
0x1325   : > { %v4382_v2 = vsel %vm4356_vm9, %v4378_v0, 0.0  ;;  %v4383_v10 = vsel %vm4356_vm9, %v4379_v26, 0.0  ;;  %v4385_v5 = vsel %vm4356_vm9, %v4380_v16, 0.0  ;;  %v4387_v9 = vsel %vm4356_vm9, %v4381_v1, 0.0  ;;  %v13381_v16 = vld [vmem:[#allocation12 + $0x3a4] sm:$0xf]  ;;  %5311 = vmatpush.bf16.msra.mxu1 %v11084_v47 }
0x1326   : > { %v4384_v4 = vadd.f32 %v4383_v10, %v4382_v2  ;;  %v10812_v0 = vor.u32 %v13317_v56, %v10809_v58  ;;  %v10940_v26 = vor.u32 %v13349_v62, %v10937_v63  ;;  %v11068_v17 = vor.u32 %v13381_v16, %v11065_v15  ;;  %v10665_v1 = vld [vmem:[#allocation12 + $0x90] sm:$0xf0]  ;;  %v13313_v2 = vld [vmem:[#allocation12 + $0x184] sm:$0xf] }
0x1327   : > { %v10668_v10 = vor.u32 %v13281_v61, %v10665_v1  ;;  %v13365_v29 = vld [vmem:[#allocation12 + $0x324] sm:$0xf]  ;;  %v11001_v44 = vld [vmem:[#allocation12 + $0x330] sm:$0xf0]  ;;  %v10748_v47 = vor.u32 %v13301_v40, %v10745_v46  ;;  %v13328_v40 = vld [vmem:[#allocation12 + $0x1f4] sm:$0xf0] }
0x1328   : > { %v4386_v7 = vadd.f32 %v4385_v5, %v4384_v4  ;;  %5226 = vmatpush.bf16.msra.mxu2 %v10600_v60  ;;  %5239 = vmatpush.bf16.msra.mxu3 %v10728_v18  ;;  %v13345_v4 = vld [vmem:[#allocation12 + $0x284] sm:$0xf]  ;;  %v10921_v5 = vld [vmem:[#allocation12 + $0x290] sm:$0xf0]  ;;  %v11004_v62 = vor.u32 %v13365_v29, %v11001_v44  ;;  %v10975_v46 = vld [vmem:[#allocation12 + $0x2e8] sm:$0xf] }
0x1329   : > { %5299 = vmatpush.bf16.msra.mxu0 %v10940_v26  ;;  %5312 = vmatpush.bf16.msra.mxu1 %v11068_v17  ;;  %v10649_v60 = vld [vmem:[#allocation12 + $0x70] sm:$0xf0]  ;;  %v13341_v18 = vld [vmem:[#allocation12 + $0x264] sm:$0xf] }
0x132a   : > { %v4388_v11 = vadd.f32 %v4387_v9, %v4386_v7  ;;  %v10796_v7 = vor.u32 %v13313_v2, %v10793_v3  ;;  %v10924_v9 = vor.u32 %v13345_v4, %v10921_v5  ;;  %v10652_v20 = vor.u32 %v13277_v14, %v10649_v60  ;;  %v13265_v48 = vld [vmem:[#allocation12 + $0x4] sm:$0xf]  ;;  %v10601_v56 = vld [vmem:[#allocation12 + $0x10] sm:$0xf0] }
0x132b   : > { %v10908_v24 = vor.u32 %v13341_v18, %v10905_v22  ;;  %v10729_v58 = vld [vmem:[#allocation12 + $0x110] sm:$0xf0]  ;;  %v13329_v63 = vld [vmem:[#allocation12 + $0x204] sm:$0xf]  ;;  %v10604_v17 = vor.u32 %v13265_v48, %v10601_v56  ;;  %v10703_v56 = vld [vmem:[#allocation12 + $0xc8] sm:$0xf] }
0x132c   : > { %4389 = vadd.xlane.f32.xlu0 %v4388_v11  ;;  %5271 = vmatpush.bf16.msrb.mxu2 %v10716_v31  ;;  %v13377_v11 = vld [vmem:[#allocation12 + $0x384] sm:$0xf]  ;;  %v10985_v16 = vld [vmem:[#allocation12 + $0x310] sm:$0xf0] }
0x132d   : > { %5284 = vmatpush.bf16.msrb.mxu3 %v10844_v32  ;;  %v11052_v13 = vor.u32 %v13377_v11, %v11049_v12  ;;  %5300 = vmatpush.bf16.msra.mxu0 %v10924_v9  ;;  %v13305_v31 = vld [vmem:[#allocation12 + $0x144] sm:$0xf]  ;;  %v10761_v32 = vld [vmem:[#allocation12 + $0x150] sm:$0xf0]  ;;  %v4354_v11 = vld [vmem:[%s15682_s26] sm:$0xf] }
0x132e   : > { %v10764_v45 = vor.u32 %v13305_v31, %v10761_v32  ;;  %v13361_v26 = vld [vmem:[#allocation12 + $0x304] sm:$0xf]  ;;  %v4408_v60 = vperm.slane %v4354_v11, 0  ;;  %v4410_v21 = vperm.slane %v4354_v11, 2  ;;  %v4411_v18 = vperm.slane %v4354_v11, 3  ;;  %s15687_s26 = sld [smem:[#allocation30_spill]] }
0x132f   : > { %5313 = vmatpush.bf16.msra.mxu1 %v11052_v13  ;;  %v4355_v13 = vld [vmem:[%s15683_s16] sm:$0xf] }
0x1330   : > { %5272 = vmatpush.bf16.msrb.mxu2 %v10700_v6  ;;  %v10617_v6 = vld [vmem:[#allocation12 + $0x30] sm:$0xf0]  ;;  %v4421_v19 = vperm.slane %v4355_v13, 0  ;;  %v4424_v25 = vperm.slane %v4355_v13, 3 }
0x1331   : > { %5285 = vmatpush.bf16.msrb.mxu3 %v10828_v42  ;;  %5301 = vmatpush.bf16.msra.mxu0 %v10908_v24  ;;  %v13333_v42 = vld [vmem:[#allocation12 + $0x224] sm:$0xf]  ;;  %v10620_v50 = vor.u32 %v13269_v38, %v10617_v6  ;;  %v4423_v24 = vperm.slane %v4355_v13, 2  ;;  %v10847_v6 = vld [vmem:[#allocation12 + $0x1e8] sm:$0xf] }
0x1332   : > { %v10876_v49 = vor.u32 %v13333_v42, %v10873_v43  ;;  %v10848_v44 = vor.u32 %v13328_v40, %v10847_v6 }
0x1333   : > { %5314 = vmatpush.bf16.msra.mxu1 %v11036_v27 }
0x1334   : > { %5273 = vmatpush.bf16.msrb.mxu2 %v10684_v57  ;;  %v13297_v57 = vld [vmem:[#allocation12 + $0x104] sm:$0xf]  ;;  %s1553_s16 = scalar_lea.vmem %s15687_s26, %s15700_s0  ;;  %s15690_s26 = sld [smem:[#allocation51_spill]] }
0x1335   : > { %5286 = vmatpush.bf16.msrb.mxu3 %v10812_v0  ;;  %5302 = vmatpush.bf16.msra.mxu0 %v10892_v39  ;;  %v10857_v0 = vld [vmem:[#allocation12 + $0x210] sm:$0xf0]  ;;  %v10732_v61 = vor.u32 %v13297_v57, %v10729_v58  ;;  %v13296_v39 = vld [vmem:[#allocation12 + $0xf4] sm:$0xf0] }
0x1336   : > { %v10860_v2 = vor.u32 %v13329_v63, %v10857_v0  ;;  %v13292_v57 = vld [vmem:[#allocation12 + $0xd4] sm:$0xf0]  ;;  %v10831_v63 = vld [vmem:[#allocation12 + $0x1c8] sm:$0xf] }
0x1337   : > { %5315 = vmatpush.bf16.msra.mxu1 %v11020_v41  ;;  %v11103_v41 = vld [vmem:[#allocation12 + $0x3e8] sm:$0xf]  ;;  %v13324_v0 = vld [vmem:[#allocation12 + $0x1d4] sm:$0xf0] }
0x1338   : > { %5274 = vmatpush.bf16.msrb.mxu2 %v10668_v10  ;;  %v10988_v10 = vor.u32 %v13361_v26, %v10985_v16  ;;  %v10959_v26 = vld [vmem:[#allocation12 + $0x2c8] sm:$0xf]  ;;  %v13356_v16 = vld [vmem:[#allocation12 + $0x2d4] sm:$0xf0] }
0x1339   : > { %5287 = vmatpush.bf16.msrb.mxu3 %v10796_v7  ;;  %5303 = vmatpush.bf16.msra.mxu0 %v10876_v49 }
0x133b   : > { %5316 = vmatpush.bf16.msra.mxu1 %v11004_v62 }
0x133c   : > { %5275 = vmatpush.bf16.msrb.mxu2 %v10652_v20  ;;  %v4409_v20 = vperm.slane %v4354_v11, 1  ;;  %v13352_v11 = vld [vmem:[#allocation12 + $0x2b4] sm:$0xf0] }
0x133d   : > { %5288 = vmatpush.bf16.msrb.mxu3 %v10780_v23  ;;  %5304 = vmatpush.bf16.msra.mxu0 %v10860_v2  ;;  %v4422_v23 = vperm.slane %v4355_v13, 1  ;;  %v10687_v2 = vld [vmem:[#allocation12 + $0xa8] sm:$0xf]  ;;  %v13384_v13 = vld [vmem:[#allocation12 + $0x3b4] sm:$0xf0] }
0x133f   : > { %5317 = vmatpush.bf16.msra.mxu1 %v10988_v10  ;;  %v13288_v10 = vld [vmem:[#allocation12 + $0xb4] sm:$0xf0] }
0x1340   : > { %5276 = vmatpush.bf16.msrb.mxu2 %v10636_v36  ;;  %v10719_v36 = vld [vmem:[#allocation12 + $0xe8] sm:$0xf] }
0x1341   : > { %5289 = vmatpush.bf16.msrb.mxu3 %v10764_v45  ;;  %v10720_v29 = vor.u32 %v13296_v39, %v10719_v36  ;;  %v10783_v36 = vld [vmem:[#allocation12 + $0x168] sm:$0xf]  ;;  %v13376_v39 = vld [vmem:[#allocation12 + $0x374] sm:$0xf0] }
0x1344   : > { %5277 = vmatpush.bf16.msrb.mxu2 %v10620_v50 }
0x1345   : > { %5290 = vmatpush.bf16.msrb.mxu3 %v10748_v47 }
0x1348   : > { %5278 = vmatpush.bf16.msrb.mxu2 %v10604_v17  ;;  %v13388_v17 = vld [vmem:[#allocation12 + $0x3d4] sm:$0xf0] }
0x1349   : > { %5291 = vmatpush.bf16.msrb.mxu3 %v10732_v61  ;;  %v10704_v61 = vor.u32 %v13292_v57, %v10703_v56 }
0x139f   : > { %v4390_v15 = vpop.xlane.xlu0 %4389 }
0x13a0   : > { %v4391_v1 = vmul.f32 %v4390_v15, %v15317_v35  ;;  %v11087_v15 = vld [vmem:[#allocation12 + $0x3c8] sm:$0xf] }
0x13a2   : > { %v4392_v3 = vadd.f32 1e-05, %v4391_v1  ;;  %v10832_v1 = vor.u32 %v13324_v0, %v10831_v63 }
0x13a4   : > { %14147 = vrsqrt.f32 %v4392_v3  ;;  %vm4399_vm12 = vweird.f32 %v4392_v3 }
0x13aa   : > { %v14148_v4 = vpop.eup %14147 }
0x13ab   : > { %v4394_v5 = vmul.f32 %v14148_v4, %v4392_v3  ;;  %vm4400_vm11 = vweird.f32 %v14148_v4  ;;  %v10960_v3 = vor.u32 %v13356_v16, %v10959_v26  ;;  %v10751_v26 = vld [vmem:[#allocation12 + $0x128] sm:$0xf]  ;;  %v13304_v16 = vld [vmem:[#allocation12 + $0x134] sm:$0xf0] }
0x13ac   : > { %vm4401_vm13 = vmor %vm4399_vm12, %vm4400_vm11 }
0x13ad   : > { %v4395_v7 = vmul.f32 %v14148_v4, %v4394_v5  ;;  %v10815_v5 = vld [vmem:[#allocation12 + $0x1a8] sm:$0xf] }
0x13af   : > { %v4396_v9 = vmul.f32 0.5, %v4395_v7  ;;  %v13320_v7 = vld [vmem:[#allocation12 + $0x1b4] sm:$0xf0] }
0x13b1   : > { %v4397_v12 = vsub.f32 1.5, %v4396_v9  ;;  %v10943_v9 = vld [vmem:[#allocation12 + $0x2a8] sm:$0xf] }
0x13b3   : > { %v4398_v14 = vmul.f32 %v14148_v4, %v4397_v12  ;;  %v11071_v12 = vld [vmem:[#allocation12 + $0x3a8] sm:$0xf] }
0x13b5   : > { %v4402_v22 = vsel %vm4401_vm13, %v14148_v4, %v4398_v14  ;;  %v11088_v4 = vor.u32 %v13388_v17, %v11087_v15  ;;  %v10688_v14 = vor.u32 %v13288_v10, %v10687_v2  ;;  %v10879_v15 = vld [vmem:[#allocation12 + $0x228] sm:$0xf]  ;;  %v13336_v17 = vld [vmem:[#allocation12 + $0x234] sm:$0xf0] }
0x13b6   : > { %v4403_v33 = vmul.f32 %v4402_v22, %v15321_v8  ;;  %v4404_v27 = vmul.f32 %v4402_v22, %v15324_v52  ;;  %v4405_v28 = vmul.f32 %v4402_v22, %v15327_v54  ;;  %v4406_v30 = vmul.f32 %v4402_v22, %v15330_v55  ;;  %v13360_v8 = vld [vmem:[#allocation12 + $0x2f4] sm:$0xf0]  ;;  %v10799_v22 = vld [vmem:[#allocation12 + $0x188] sm:$0xf] }
0x13b7   : > { %v13392_v55 = vld [vmem:[#allocation12 + $0x3f4] sm:$0xf0]  ;;  %v10976_v58 = vor.u32 %v13360_v8, %v10975_v46  ;;  %v10639_v46 = vld [vmem:[#allocation12 + $0x48] sm:$0xf] }
0x13b8   : > { %v4416_v31 = vmul.f32 %v4408_v60, %v4403_v33  ;;  %v4417_v32 = vmul.f32 %v4409_v20, %v4404_v27  ;;  %v4418_v34 = vmul.f32 %v4410_v21, %v4405_v28  ;;  %v4419_v59 = vmul.f32 %v4411_v18, %v4406_v30  ;;  %v13284_v20 = vld [vmem:[#allocation12 + $0x94] sm:$0xf0]  ;;  %v11055_v33 = vld [vmem:[#allocation12 + $0x388] sm:$0xf] }
0x13b9   : > { %v11104_v62 = vor.u32 %v13392_v55, %v11103_v41  ;;  %v10816_v60 = vor.u32 %v13320_v7, %v10815_v5  ;;  %v10944_v21 = vor.u32 %v13352_v11, %v10943_v9  ;;  %v11072_v18 = vor.u32 %v13384_v13, %v11071_v12  ;;  %v13380_v27 = vld [vmem:[#allocation12 + $0x394] sm:$0xf0]  ;;  %v10607_v2 = vld [vmem:[#allocation12 + $0x8] sm:$0xf] }
0x13ba   : > { %v4429_v45 = vadd.f32 %v4421_v19, %v4416_v31  ;;  %v4430_v51 = vadd.f32 %v4422_v23, %v4417_v32  ;;  %v4431_v37 = vadd.f32 %v4423_v24, %v4418_v34  ;;  %v4432_v38 = vadd.f32 %v4424_v25, %v4419_v59  ;;  %v10671_v19 = vld [vmem:[#allocation12 + $0x88] sm:$0xf]  ;;  %v13316_v23 = vld [vmem:[#allocation12 + $0x194] sm:$0xf0] }
0x13bb   : > { %v10927_v24 = vld [vmem:[#allocation12 + $0x288] sm:$0xf]  ;;  %v13348_v25 = vld [vmem:[#allocation12 + $0x294] sm:$0xf0]  ;;  %v10672_v28 = vor.u32 %v13284_v20, %v10671_v19  ;;  %v10800_v30 = vor.u32 %v13316_v23, %v10799_v22  ;;  %v11056_v59 = vor.u32 %v13380_v27, %v11055_v33  ;;  %v10880_v9 = vor.u32 %v13336_v17, %v10879_v15  ;;  %v13294_v19 = vld [vmem:[#allocation12 + $0xec] sm:$0xf] }
0x13bc   : > { %v4433_v52 = vmax.f32 %v4429_v45, 0.0  ;;  %v4434_v42 = vmax.f32 %v4430_v51, 0.0  ;;  %v4435_v54 = vmax.f32 %v4431_v37, 0.0  ;;  %v4436_v43 = vmax.f32 %v4432_v38, 0.0  ;;  %v10655_v31 = vld [vmem:[#allocation12 + $0x68] sm:$0xf] }
0x13bd   : > { %v13280_v32 = vld [vmem:[#allocation12 + $0x74] sm:$0xf0]  ;;  %v10928_v34 = vor.u32 %v13348_v25, %v10927_v24  ;;  %v10911_v51 = vld [vmem:[#allocation12 + $0x268] sm:$0xf]  ;;  %v10721_v20 = vld [vmem:[#allocation12 + $0xf8] sm:$0xf0] }
0x13be   : > { %v15351_v50 = vpack.c.bf16 %v4433_v52, %v4433_v52  ;;  %v15353_v47 = vpack.c.bf16 %v4434_v42, %v4434_v42  ;;  %v15355_v48 = vpack.c.bf16 %v4435_v54, %v4435_v54  ;;  %v15357_v49 = vpack.c.bf16 %v4436_v43, %v4436_v43  ;;  %v13312_v45 = vld [vmem:[#allocation12 + $0x174] sm:$0xf0]  ;;  %v11039_v38 = vld [vmem:[#allocation12 + $0x368] sm:$0xf]  ;;  %v13358_v22 = vld [vmem:[#allocation12 + $0x2ec] sm:$0xf] }
0x13bf   : > { %v13344_v37 = vld [vmem:[#allocation12 + $0x274] sm:$0xf0]  ;;  %v10656_v6 = vor.u32 %v13280_v32, %v10655_v31  ;;  %v10784_v40 = vor.u32 %v13312_v45, %v10783_v36  ;;  %v11040_v52 = vor.u32 %v13376_v39, %v11039_v38  ;;  %v10767_v42 = vld [vmem:[#allocation12 + $0x148] sm:$0xf]  ;;  %v10977_v25 = vld [vmem:[#allocation12 + $0x2f8] sm:$0xf0]  ;;  %v10724_v31 = vor.u32 %v13294_v19, %v10721_v20 }
0x13c0   : > { %5227 = vmatmul.bf16.vlgmr.msra.gmra.mxu2 %v15351_v50  ;;  %5240 = vmatmul.bf16.vlgmr.msra.gmra.mxu3 %v15353_v47  ;;  %v13276_v8 = vld [vmem:[#allocation12 + $0x54] sm:$0xf0]  ;;  %v10912_v41 = vor.u32 %v13344_v37, %v10911_v51  ;;  %v10895_v43 = vld [vmem:[#allocation12 + $0x248] sm:$0xf]  ;;  %v13390_v33 = vld [vmem:[#allocation12 + $0x3ec] sm:$0xf]  ;;  %v10980_v36 = vor.u32 %v13358_v22, %v10977_v25 }
0x13c1   : > { %5253 = vmatmul.bf16.vlgmr.msrb.gmra.mxu0 %v15355_v48  ;;  %5266 = vmatmul.bf16.vlgmr.msrb.gmra.mxu1 %v15357_v49  ;;  %v13308_v54 = vld [vmem:[#allocation12 + $0x154] sm:$0xf0]  ;;  %v10640_v56 = vor.u32 %v13276_v8, %v10639_v46  ;;  %v10735_v5 = vld [vmem:[#allocation12 + $0x108] sm:$0xf]  ;;  %v11105_v27 = vld [vmem:[#allocation12 + $0x3f8] sm:$0xf0] }
0x13c2   : > { %5323 = vmatpush.bf16.msra.mxu2 %v10720_v29  ;;  %5336 = vmatpush.bf16.msra.mxu3 %v10848_v44  ;;  %v13340_v55 = vld [vmem:[#allocation12 + $0x254] sm:$0xf0]  ;;  %v11023_v29 = vld [vmem:[#allocation12 + $0x348] sm:$0xf]  ;;  %v10768_v57 = vor.u32 %v13308_v54, %v10767_v42  ;;  %v11108_v45 = vor.u32 %v13390_v33, %v11105_v27  ;;  %v13322_v51 = vld [vmem:[#allocation12 + $0x1cc] sm:$0xf] }
0x13c3   : > { %5349 = vmatpush.bf16.msrb.mxu0 %v10976_v58  ;;  %5362 = vmatpush.bf16.msrb.mxu1 %v11104_v62  ;;  %v13372_v44 = vld [vmem:[#allocation12 + $0x354] sm:$0xf0]  ;;  %v10623_v58 = vld [vmem:[#allocation12 + $0x28] sm:$0xf]  ;;  %v10896_v63 = vor.u32 %v13340_v55, %v10895_v43  ;;  %v10833_v37 = vld [vmem:[#allocation12 + $0x1d8] sm:$0xf0] }
0x13c4   : > { %v13272_v62 = vld [vmem:[#allocation12 + $0x34] sm:$0xf0]  ;;  %v11024_v0 = vor.u32 %v13372_v44, %v11023_v29  ;;  %v10863_v12 = vld [vmem:[#allocation12 + $0x208] sm:$0xf]  ;;  %v13354_v38 = vld [vmem:[#allocation12 + $0x2cc] sm:$0xf]  ;;  %v10836_v8 = vor.u32 %v13322_v51, %v10833_v37 }
0x13c5   : > { %v10624_v10 = vor.u32 %v13272_v62, %v10623_v58  ;;  %v13300_v7 = vld [vmem:[#allocation12 + $0x114] sm:$0xf0]  ;;  %v10961_v39 = vld [vmem:[#allocation12 + $0x2d8] sm:$0xf0]  ;;  %v13318_v43 = vld [vmem:[#allocation12 + $0x1ac] sm:$0xf] }
0x13c6   : > { %5324 = vmatpush.bf16.msra.mxu2 %v10704_v61  ;;  %5337 = vmatpush.bf16.msra.mxu3 %v10832_v1  ;;  %v11007_v61 = vld [vmem:[#allocation12 + $0x328] sm:$0xf]  ;;  %v13368_v1 = vld [vmem:[#allocation12 + $0x334] sm:$0xf0]  ;;  %v10736_v24 = vor.u32 %v13300_v7, %v10735_v5  ;;  %v10964_v42 = vor.u32 %v13354_v38, %v10961_v39  ;;  %v10817_v55 = vld [vmem:[#allocation12 + $0x1b8] sm:$0xf0] }
0x13c7   : > { %5350 = vmatpush.bf16.msrb.mxu0 %v10960_v3  ;;  %5363 = vmatpush.bf16.msrb.mxu1 %v11088_v4  ;;  %v10752_v3 = vor.u32 %v13304_v16, %v10751_v26  ;;  %v13268_v4 = vld [vmem:[#allocation12 + $0x14] sm:$0xf0]  ;;  %v11008_v11 = vor.u32 %v13368_v1, %v11007_v61  ;;  %v13350_v29 = vld [vmem:[#allocation12 + $0x2ac] sm:$0xf]  ;;  %v10945_v44 = vld [vmem:[#allocation12 + $0x2b8] sm:$0xf0]  ;;  %v10820_v62 = vor.u32 %v13318_v43, %v10817_v55 }
0x13c8   : > { %v13332_v13 = vld [vmem:[#allocation12 + $0x214] sm:$0xf0]  ;;  %v10608_v23 = vor.u32 %v13268_v4, %v10607_v2  ;;  %v10948_v26 = vor.u32 %v13350_v29, %v10945_v44  ;;  %v13314_v15 = vld [vmem:[#allocation12 + $0x18c] sm:$0xf]  ;;  %v10801_v17 = vld [vmem:[#allocation12 + $0x198] sm:$0xf0] }
0x13c9   : > { %v13346_v61 = vld [vmem:[#allocation12 + $0x28c] sm:$0xf]  ;;  %v10929_v1 = vld [vmem:[#allocation12 + $0x298] sm:$0xf0]  ;;  %v10804_v4 = vor.u32 %v13314_v15, %v10801_v17 }
0x13ca   : > { %5325 = vmatpush.bf16.msra.mxu2 %v10688_v14  ;;  %5338 = vmatpush.bf16.msra.mxu3 %v10816_v60  ;;  %v10991_v14 = vld [vmem:[#allocation12 + $0x308] sm:$0xf]  ;;  %v13364_v60 = vld [vmem:[#allocation12 + $0x314] sm:$0xf0]  ;;  %v13378_v2 = vld [vmem:[#allocation12 + $0x38c] sm:$0xf] }
0x13cb   : > { %5351 = vmatpush.bf16.msrb.mxu0 %v10944_v21  ;;  %5364 = vmatpush.bf16.msrb.mxu1 %v11072_v18  ;;  %v13326_v21 = vld [vmem:[#allocation12 + $0x1ec] sm:$0xf]  ;;  %v10849_v18 = vld [vmem:[#allocation12 + $0x1f8] sm:$0xf0] }
0x13cc   : > { %v10852_v32 = vor.u32 %v13326_v21, %v10849_v18  ;;  %v13278_v5 = vld [vmem:[#allocation12 + $0x6c] sm:$0xf]  ;;  %v10657_v7 = vld [vmem:[#allocation12 + $0x78] sm:$0xf0] }
0x13cd   : > { %v13374_v19 = vld [vmem:[#allocation12 + $0x36c] sm:$0xf]  ;;  %v11041_v20 = vld [vmem:[#allocation12 + $0x378] sm:$0xf0]  ;;  %v10660_v21 = vor.u32 %v13278_v5, %v10657_v7  ;;  %v11335_v5 = vld [vmem:[#allocation13 + $0x1c0] sm:$0xf] }
0x13ce   : > { %5326 = vmatpush.bf16.msra.mxu2 %v10672_v28  ;;  %5339 = vmatpush.bf16.msra.mxu3 %v10800_v30  ;;  %v10864_v28 = vor.u32 %v13332_v13, %v10863_v12  ;;  %v10992_v30 = vor.u32 %v13364_v60, %v10991_v14  ;;  %v13310_v12 = vld [vmem:[#allocation12 + $0x16c] sm:$0xf]  ;;  %v10785_v13 = vld [vmem:[#allocation12 + $0x178] sm:$0xf0]  ;;  %v11044_v25 = vor.u32 %v13374_v19, %v11041_v20  ;;  %v13451_v7 = vld [vmem:[#allocation13 + $0x1cc] sm:$0xf0] }
0x13cf   : > { %5352 = vmatpush.bf16.msrb.mxu0 %v10928_v34  ;;  %5365 = vmatpush.bf16.msrb.mxu1 %v11056_v59  ;;  %v13290_v34 = vld [vmem:[#allocation12 + $0xcc] sm:$0xf]  ;;  %v10705_v59 = vld [vmem:[#allocation12 + $0xd8] sm:$0xf0]  ;;  %v10788_v18 = vor.u32 %v13310_v12, %v10785_v13  ;;  %v11336_v19 = vor.u32 %v13451_v7, %v11335_v5  ;;  %v11319_v20 = vld [vmem:[#allocation13 + $0x1a0] sm:$0xf] }
0x13d0   : > { %5279 = vmatmul.bf16.vlgmr.msrb.gmra.mxu2 %v15351_v50  ;;  %5292 = vmatmul.bf16.vlgmr.msrb.gmra.mxu3 %v15353_v47  ;;  %v10708_v46 = vor.u32 %v13290_v34, %v10705_v59  ;;  %v13342_v14 = vld [vmem:[#allocation12 + $0x26c] sm:$0xf]  ;;  %v10913_v60 = vld [vmem:[#allocation12 + $0x278] sm:$0xf0]  ;;  %v13453_v7 = vld [vmem:[#allocation13 + $0x1e4] sm:$0xf] }
0x13d1   : > { %5305 = vmatmul.bf16.vlgmr.msra.gmra.mxu0 %v15355_v48  ;;  %5318 = vmatmul.bf16.vlgmr.msra.gmra.mxu1 %v15357_v49  ;;  %v13274_v22 = vld [vmem:[#allocation12 + $0x4c] sm:$0xf]  ;;  %v10769_v27 = vld [vmem:[#allocation12 + $0x158] sm:$0xf0] }
0x13d2   : > { %5327 = vmatpush.bf16.msra.mxu2 %v10656_v6  ;;  %5340 = vmatpush.bf16.msra.mxu3 %v10784_v40  ;;  %v13386_v6 = vld [vmem:[#allocation12 + $0x3cc] sm:$0xf]  ;;  %v11089_v40 = vld [vmem:[#allocation12 + $0x3d8] sm:$0xf0] }
0x13d3   : > { %5353 = vmatpush.bf16.msrb.mxu0 %v10912_v41  ;;  %5366 = vmatpush.bf16.msrb.mxu1 %v11040_v52  ;;  %v13286_v41 = vld [vmem:[#allocation12 + $0xac] sm:$0xf]  ;;  %v10689_v52 = vld [vmem:[#allocation12 + $0xb8] sm:$0xf0]  ;;  %v11092_v54 = vor.u32 %v13386_v6, %v11089_v40 }
0x13d4   : > { %v10692_v58 = vor.u32 %v13286_v41, %v10689_v52  ;;  %v13306_v33 = vld [vmem:[#allocation12 + $0x14c] sm:$0xf]  ;;  %v10753_v39 = vld [vmem:[#allocation12 + $0x138] sm:$0xf0] }
0x13d5   : > { %v10772_v59 = vor.u32 %v13306_v33, %v10769_v27  ;;  %v13302_v38 = vld [vmem:[#allocation12 + $0x12c] sm:$0xf]  ;;  %v10881_v40 = vld [vmem:[#allocation12 + $0x238] sm:$0xf0]  ;;  %v13411_v33 = vld [vmem:[#allocation13 + $0x8c] sm:$0xf0] }
0x13d6   : > { %5328 = vmatpush.bf16.msra.mxu2 %v10640_v56  ;;  %5341 = vmatpush.bf16.msra.mxu3 %v10768_v57  ;;  %v13382_v56 = vld [vmem:[#allocation12 + $0x3ac] sm:$0xf]  ;;  %v11073_v57 = vld [vmem:[#allocation12 + $0x3b8] sm:$0xf0]  ;;  %v10756_v52 = vor.u32 %v13302_v38, %v10753_v39  ;;  %v13403_v38 = vld [vmem:[#allocation13 + $0x4c] sm:$0xf0] }
0x13d7   : > { %5354 = vmatpush.bf16.msrb.mxu0 %v10896_v63  ;;  %5367 = vmatpush.bf16.msrb.mxu1 %v11024_v0  ;;  %v13282_v63 = vld [vmem:[#allocation12 + $0x8c] sm:$0xf]  ;;  %v10673_v0 = vld [vmem:[#allocation12 + $0x98] sm:$0xf0]  ;;  %v11076_v16 = vor.u32 %v13382_v56, %v11073_v57  ;;  %v11271_v39 = vld [vmem:[#allocation13 + $0x140] sm:$0xf] }
0x13d8   : > { %v13334_v6 = vld [vmem:[#allocation12 + $0x22c] sm:$0xf]  ;;  %v10737_v44 = vld [vmem:[#allocation12 + $0x118] sm:$0xf0] }
0x13d9   : > { %v13298_v43 = vld [vmem:[#allocation12 + $0x10c] sm:$0xf]  ;;  %v10884_v55 = vor.u32 %v13334_v6, %v10881_v40  ;;  %v10865_v57 = vld [vmem:[#allocation12 + $0x218] sm:$0xf0]  ;;  %v13435_v6 = vld [vmem:[#allocation13 + $0x14c] sm:$0xf0] }
0x13da   : > { %5329 = vmatpush.bf16.msra.mxu2 %v10624_v10  ;;  %5342 = vmatpush.bf16.msra.mxu3 %v10752_v3  ;;  %v11057_v10 = vld [vmem:[#allocation12 + $0x398] sm:$0xf0]  ;;  %v10676_v3 = vor.u32 %v13282_v63, %v10673_v0  ;;  %v13330_v56 = vld [vmem:[#allocation12 + $0x20c] sm:$0xf]  ;;  %v11223_v63 = vld [vmem:[#allocation13 + $0xe0] sm:$0xf]  ;;  %v10740_v17 = vor.u32 %v13298_v43, %v10737_v44 }
0x13db   : > { %5355 = vmatpush.bf16.msrb.mxu0 %v10880_v9  ;;  %5368 = vmatpush.bf16.msrb.mxu1 %v11008_v11  ;;  %v10932_v9 = vor.u32 %v13346_v61, %v10929_v1  ;;  %v11060_v11 = vor.u32 %v13378_v2, %v11057_v10  ;;  %v13423_v0 = vld [vmem:[#allocation13 + $0xec] sm:$0xf0]  ;;  %v10868_v61 = vor.u32 %v13330_v56, %v10865_v57  ;;  %v11207_v10 = vld [vmem:[#allocation13 + $0xc0] sm:$0xf]  ;;  %v13421_v44 = vld [vmem:[#allocation13 + $0xe4] sm:$0xf] }
0x13dc   : > { %v11224_v2 = vor.u32 %v13423_v0, %v11223_v63  ;;  %v11225_v56 = vld [vmem:[#allocation13 + $0xf0] sm:$0xf0] }
0x13dd   : > { %v11209_v63 = vld [vmem:[#allocation13 + $0xd0] sm:$0xf0] }
0x13de   : > { %5330 = vmatpush.bf16.msra.mxu2 %v10608_v23  ;;  %5343 = vmatpush.bf16.msra.mxu3 %v10736_v24  ;;  %v10641_v23 = vld [vmem:[#allocation12 + $0x58] sm:$0xf0]  ;;  %v10916_v24 = vor.u32 %v13342_v14, %v10913_v60  ;;  %v11191_v14 = vld [vmem:[#allocation13 + $0xa0] sm:$0xf]  ;;  %v13415_v60 = vld [vmem:[#allocation13 + $0xac] sm:$0xf0] }
0x13df   : > { %5356 = vmatpush.bf16.msrb.mxu0 %v10864_v28  ;;  %5369 = vmatpush.bf16.msrb.mxu1 %v10992_v30  ;;  %v13338_v28 = vld [vmem:[#allocation12 + $0x24c] sm:$0xf]  ;;  %v10897_v30 = vld [vmem:[#allocation12 + $0x258] sm:$0xf0]  ;;  %v10644_v34 = vor.u32 %v13274_v22, %v10641_v23  ;;  %v13483_v22 = vld [vmem:[#allocation13 + $0x2cc] sm:$0xf0] }
0x13e0   : > { %v10900_v51 = vor.u32 %v13338_v28, %v10897_v30  ;;  %v11303_v28 = vld [vmem:[#allocation13 + $0x180] sm:$0xf] }
0x13e1   : > { %5331 = vmatmul.bf16.vlgmr.msra.gmra.mxu2 %v15351_v50  ;;  %5344 = vmatmul.bf16.vlgmr.msra.gmra.mxu3 %v15353_v47  ;;  %v11447_v30 = vld [vmem:[#allocation13 + $0x2a0] sm:$0xf] }
0x13e2   : > { %5375 = vmatpush.bf16.msrb.mxu2 %v10724_v31  ;;  %5388 = vmatpush.bf16.msrb.mxu3 %v10852_v32  ;;  %v13370_v31 = vld [vmem:[#allocation12 + $0x34c] sm:$0xf]  ;;  %v11025_v32 = vld [vmem:[#allocation12 + $0x358] sm:$0xf0] }
0x13e3   : > { %5401 = vmatpush.bf16.msra.mxu0 %v10980_v36  ;;  %5414 = vmatpush.bf16.msra.mxu1 %v11108_v45  ;;  %v13270_v36 = vld [vmem:[#allocation12 + $0x2c] sm:$0xf]  ;;  %v10625_v45 = vld [vmem:[#allocation12 + $0x38] sm:$0xf0]  ;;  %v11028_v37 = vor.u32 %v13370_v31, %v11025_v32 }
0x13e4   : > { %5357 = vmatmul.bf16.vlgmr.msrb.gmra.mxu0 %v15355_v48  ;;  %5370 = vmatmul.bf16.vlgmr.msrb.gmra.mxu1 %v15357_v49  ;;  %v10628_v41 = vor.u32 %v13270_v36, %v10625_v45  ;;  %v13439_v36 = vld [vmem:[#allocation13 + $0x16c] sm:$0xf0] }
0x13e6   : > { %5376 = vmatpush.bf16.msrb.mxu2 %v10708_v46  ;;  %5389 = vmatpush.bf16.msrb.mxu3 %v10836_v8  ;;  %v13366_v46 = vld [vmem:[#allocation12 + $0x32c] sm:$0xf]  ;;  %v11009_v8 = vld [vmem:[#allocation12 + $0x338] sm:$0xf0] }
0x13e7   : > { %5402 = vmatpush.bf16.msra.mxu0 %v10964_v42  ;;  %5415 = vmatpush.bf16.msra.mxu1 %v11092_v54  ;;  %v13266_v42 = vld [vmem:[#allocation12 + $0xc] sm:$0xf]  ;;  %v10609_v54 = vld [vmem:[#allocation12 + $0x18] sm:$0xf0]  ;;  %v11012_v29 = vor.u32 %v13366_v46, %v11009_v8  ;;  %v11127_v46 = vld [vmem:[#allocation13 + $0x20] sm:$0xf]  ;;  %v11272_v8 = vor.u32 %v13435_v6, %v11271_v39 }
0x13e8   : > { %v10612_v15 = vor.u32 %v13266_v42, %v10609_v54  ;;  %v13431_v42 = vld [vmem:[#allocation13 + $0x12c] sm:$0xf0]  ;;  %v11367_v6 = vld [vmem:[#allocation13 + $0x200] sm:$0xf] }
0x13ea   : > { %5377 = vmatpush.bf16.msrb.mxu2 %v10692_v58  ;;  %5390 = vmatpush.bf16.msrb.mxu3 %v10820_v62  ;;  %v13362_v58 = vld [vmem:[#allocation12 + $0x30c] sm:$0xf]  ;;  %v10993_v62 = vld [vmem:[#allocation12 + $0x318] sm:$0xf0] }
0x13eb   : > { %5403 = vmatpush.bf16.msra.mxu0 %v10948_v26  ;;  %5416 = vmatpush.bf16.msra.mxu1 %v11076_v16  ;;  %v11351_v26 = vld [vmem:[#allocation13 + $0x1e0] sm:$0xf]  ;;  %v13455_v16 = vld [vmem:[#allocation13 + $0x1ec] sm:$0xf0]  ;;  %v10996_v1 = vor.u32 %v13362_v58, %v10993_v62  ;;  %v11228_v58 = vor.u32 %v13421_v44, %v11225_v56  ;;  %v13417_v62 = vld [vmem:[#allocation13 + $0xc4] sm:$0xf] }
0x13ec   : > { %v11212_v0 = vor.u32 %v13417_v62, %v11209_v63  ;;  %v13433_v63 = vld [vmem:[#allocation13 + $0x144] sm:$0xf] }
0x13ee   : > { %5378 = vmatpush.bf16.msrb.mxu2 %v10676_v3  ;;  %5391 = vmatpush.bf16.msrb.mxu3 %v10804_v4  ;;  %v11352_v3 = vor.u32 %v13455_v16, %v11351_v26  ;;  %v13419_v4 = vld [vmem:[#allocation13 + $0xcc] sm:$0xf0]  ;;  %v13413_v26 = vld [vmem:[#allocation13 + $0xa4] sm:$0xf]  ;;  %v11193_v16 = vld [vmem:[#allocation13 + $0xb0] sm:$0xf0] }
0x13ef   : > { %5404 = vmatpush.bf16.msra.mxu0 %v10932_v9  ;;  %5417 = vmatpush.bf16.msra.mxu1 %v11060_v11  ;;  %v11479_v9 = vld [vmem:[#allocation13 + $0x2e0] sm:$0xf]  ;;  %v13487_v11 = vld [vmem:[#allocation13 + $0x2ec] sm:$0xf0]  ;;  %v11208_v13 = vor.u32 %v13419_v4, %v11207_v10  ;;  %v13409_v10 = vld [vmem:[#allocation13 + $0x84] sm:$0xf] }
0x13f0   : > { %v11480_v12 = vor.u32 %v13487_v11, %v11479_v9  ;;  %v11353_v9 = vld [vmem:[#allocation13 + $0x1f0] sm:$0xf0] }
0x13f1   : > { %v11356_v11 = vor.u32 %v13453_v7, %v11353_v9  ;;  %v11449_v7 = vld [vmem:[#allocation13 + $0x2b0] sm:$0xf0] }
0x13f2   : > { %5379 = vmatpush.bf16.msrb.mxu2 %v10660_v21  ;;  %5392 = vmatpush.bf16.msrb.mxu3 %v10788_v18  ;;  %v13447_v21 = vld [vmem:[#allocation13 + $0x1ac] sm:$0xf0]  ;;  %v11463_v18 = vld [vmem:[#allocation13 + $0x2c0] sm:$0xf] }
0x13f3   : > { %5405 = vmatpush.bf16.msra.mxu0 %v10916_v24  ;;  %5418 = vmatpush.bf16.msra.mxu1 %v11044_v25  ;;  %v11464_v23 = vor.u32 %v13483_v22, %v11463_v18  ;;  %v11192_v24 = vor.u32 %v13415_v60, %v11191_v14  ;;  %v11175_v25 = vld [vmem:[#allocation13 + $0x80] sm:$0xf]  ;;  %v11320_v27 = vor.u32 %v13447_v21, %v11319_v20  ;;  %v11161_v14 = vld [vmem:[#allocation13 + $0x70] sm:$0xf0]  ;;  %v13449_v21 = vld [vmem:[#allocation13 + $0x1c4] sm:$0xf] }
0x13f4   : > { %v11176_v32 = vor.u32 %v13411_v33, %v11175_v25  ;;  %v11415_v60 = vld [vmem:[#allocation13 + $0x260] sm:$0xf]  ;;  %v11337_v22 = vld [vmem:[#allocation13 + $0x1d0] sm:$0xf0] }
0x13f5   : > { %v11340_v25 = vor.u32 %v13449_v21, %v11337_v22  ;;  %v11399_v33 = vld [vmem:[#allocation13 + $0x240] sm:$0xf]  ;;  %v11241_v21 = vld [vmem:[#allocation13 + $0x110] sm:$0xf0] }
0x13f6   : > { %5380 = vmatpush.bf16.msrb.mxu2 %v10644_v34  ;;  %5393 = vmatpush.bf16.msrb.mxu3 %v10772_v59  ;;  %v13407_v34 = vld [vmem:[#allocation13 + $0x6c] sm:$0xf0]  ;;  %v11287_v59 = vld [vmem:[#allocation13 + $0x160] sm:$0xf] }
0x13f7   : > { %5406 = vmatpush.bf16.msra.mxu0 %v10900_v51  ;;  %5419 = vmatpush.bf16.msra.mxu1 %v11028_v37  ;;  %v11143_v51 = vld [vmem:[#allocation13 + $0x40] sm:$0xf]  ;;  %v11288_v37 = vor.u32 %v13439_v36, %v11287_v59  ;;  %v13441_v36 = vld [vmem:[#allocation13 + $0x184] sm:$0xf] }
0x13f8   : > { %v11144_v40 = vor.u32 %v13403_v38, %v11143_v51  ;;  %v13393_v51 = vld [vmem:[#allocation13 + $0x4] sm:$0xf]  ;;  %v11305_v38 = vld [vmem:[#allocation13 + $0x190] sm:$0xf0] }
0x13f9   : > { %v11308_v39 = vor.u32 %v13441_v36, %v11305_v38  ;;  %v11401_v38 = vld [vmem:[#allocation13 + $0x250] sm:$0xf0] }
0x13fa   : > { %5381 = vmatpush.bf16.msrb.mxu2 %v10628_v41  ;;  %5394 = vmatpush.bf16.msrb.mxu3 %v10756_v52  ;;  %v13399_v41 = vld [vmem:[#allocation13 + $0x2c] sm:$0xf0]  ;;  %v11255_v52 = vld [vmem:[#allocation13 + $0x120] sm:$0xf] }
0x13fb   : > { %5407 = vmatpush.bf16.msra.mxu0 %v10884_v55  ;;  %5420 = vmatpush.bf16.msra.mxu1 %v11012_v29  ;;  %v11128_v54 = vor.u32 %v13399_v41, %v11127_v46  ;;  %v11256_v43 = vor.u32 %v13431_v42, %v11255_v52  ;;  %v11111_v55 = vld [vmem:[#allocation13] sm:$0xf]  ;;  %v13395_v29 = vld [vmem:[#allocation13 + $0xc] sm:$0xf0]  ;;  %v13437_v52 = vld [vmem:[#allocation13 + $0x164] sm:$0xf] }
0x13fc   : > { %v11112_v57 = vor.u32 %v13395_v29, %v11111_v55  ;;  %v11607_v46 = vld [vmem:[#allocation13 + $0x3e0] sm:$0xf]  ;;  %v13519_v41 = vld [vmem:[#allocation13 + $0x3ec] sm:$0xf0]  ;;  %v11289_v42 = vld [vmem:[#allocation13 + $0x170] sm:$0xf0] }
0x13fd   : > { %v13485_v55 = vld [vmem:[#allocation13 + $0x2e4] sm:$0xf]  ;;  %v11481_v29 = vld [vmem:[#allocation13 + $0x2f0] sm:$0xf0] }
0x13fe   : > { %5382 = vmatpush.bf16.msrb.mxu2 %v10612_v15  ;;  %5395 = vmatpush.bf16.msrb.mxu3 %v10740_v17  ;;  %v11239_v15 = vld [vmem:[#allocation13 + $0x100] sm:$0xf]  ;;  %v11196_v17 = vor.u32 %v13413_v26, %v11193_v16  ;;  %v11484_v56 = vor.u32 %v13485_v55, %v11481_v29  ;;  %v13481_v26 = vld [vmem:[#allocation13 + $0x2c4] sm:$0xf] }
0x13ff   : > { %5408 = vmatpush.bf16.msra.mxu0 %v10868_v61  ;;  %5421 = vmatpush.bf16.msra.mxu1 %v10996_v1  ;;  %v13427_v61 = vld [vmem:[#allocation13 + $0x10c] sm:$0xf0]  ;;  %v11431_v1 = vld [vmem:[#allocation13 + $0x280] sm:$0xf] }
0x1400   : > { %v11240_v4 = vor.u32 %v13427_v61, %v11239_v15  ;;  %v11465_v15 = vld [vmem:[#allocation13 + $0x2d0] sm:$0xf0]  ;;  %v11575_v61 = vld [vmem:[#allocation13 + $0x3a0] sm:$0xf] }
0x1401   : > { %5383 = vmatmul.bf16.vlgmr.msrb.gmra.mxu2 %v15351_v50  ;;  %5396 = vmatmul.bf16.vlgmr.msrb.gmra.mxu3 %v15353_v47  ;;  %v13443_v50 = vld [vmem:[#allocation13 + $0x18c] sm:$0xf0] }
0x1402   : > { %6209 = vmatpush.bf16.msra.mxu2 %v11224_v2  ;;  %6222 = vmatpush.bf16.msra.mxu3 %v11352_v3  ;;  %v13479_v47 = vld [vmem:[#allocation13 + $0x2ac] sm:$0xf0]  ;;  %v11177_v3 = vld [vmem:[#allocation13 + $0x90] sm:$0xf0] }
0x1403   : > { %5409 = vmatmul.bf16.vlgmr.msra.gmra.mxu0 %v15355_v48  ;;  %5422 = vmatmul.bf16.vlgmr.msra.gmra.mxu1 %v15357_v49  ;;  %v11448_v31 = vor.u32 %v13479_v47, %v11447_v30  ;;  %v11159_v48 = vld [vmem:[#allocation13 + $0x60] sm:$0xf]  ;;  %v11304_v49 = vor.u32 %v13443_v50, %v11303_v28  ;;  %v13475_v2 = vld [vmem:[#allocation13 + $0x28c] sm:$0xf0]  ;;  %v13445_v50 = vld [vmem:[#allocation13 + $0x1a4] sm:$0xf] }
0x1404   : > { %6235 = vmatpush.bf16.msrb.mxu0 %v11480_v12  ;;  %v11160_v45 = vor.u32 %v13407_v34, %v11159_v48  ;;  %v11432_v5 = vor.u32 %v13475_v2, %v11431_v1  ;;  %v11180_v12 = vor.u32 %v13409_v10, %v11177_v3  ;;  %v13397_v47 = vld [vmem:[#allocation13 + $0x24] sm:$0xf]  ;;  %v13463_v34 = vld [vmem:[#allocation13 + $0x22c] sm:$0xf0]  ;;  %v11257_v3 = vld [vmem:[#allocation13 + $0x130] sm:$0xf0] }
0x1405   : > { %v13511_v1 = vld [vmem:[#allocation13 + $0x3ac] sm:$0xf0]  ;;  %v13429_v10 = vld [vmem:[#allocation13 + $0x124] sm:$0xf] }
0x1406   : > { %6210 = vmatpush.bf16.msra.mxu2 %v11208_v13  ;;  %6223 = vmatpush.bf16.msra.mxu3 %v11336_v19  ;;  %v13405_v13 = vld [vmem:[#allocation13 + $0x64] sm:$0xf]  ;;  %v13471_v19 = vld [vmem:[#allocation13 + $0x26c] sm:$0xf0]  ;;  %v11576_v2 = vor.u32 %v13511_v1, %v11575_v61  ;;  %v11369_v61 = vld [vmem:[#allocation13 + $0x210] sm:$0xf0] }
0x1407   : > { %v11416_v20 = vor.u32 %v13471_v19, %v11415_v60  ;;  %v11164_v18 = vor.u32 %v13405_v13, %v11161_v14  ;;  %v15376_v13 = vld [vmem:[%s15684_s20] sm:$0xf]  ;;  %v13517_v1 = vld [vmem:[#allocation13 + $0x3e4] sm:$0xf]  ;;  %s15688_s20 = sld [smem:[#allocation48_spill]] }
0x1408   : > { %6236 = vmatpush.bf16.msrb.mxu0 %v11464_v23  ;;  %v13401_v23 = vld [vmem:[#allocation13 + $0x44] sm:$0xf] }
0x140a   : > { %6211 = vmatpush.bf16.msra.mxu2 %v11192_v24  ;;  %6224 = vmatpush.bf16.msra.mxu3 %v11320_v27  ;;  %v11145_v24 = vld [vmem:[#allocation13 + $0x50] sm:$0xf0]  ;;  %v13467_v27 = vld [vmem:[#allocation13 + $0x24c] sm:$0xf0] }
0x140b   : > { %v11400_v28 = vor.u32 %v13467_v27, %v11399_v33  ;;  %v11148_v30 = vor.u32 %v13401_v23, %v11145_v24  ;;  %v11433_v23 = vld [vmem:[#allocation13 + $0x290] sm:$0xf0]  ;;  %v5211_v24 = vperm.slane %v15376_v13, 0  ;;  %v11543_v33 = vld [vmem:[#allocation13 + $0x360] sm:$0xf] }
0x140c   : > { %6237 = vmatpush.bf16.msrb.mxu0 %v11448_v31  ;;  %v11321_v31 = vld [vmem:[#allocation13 + $0x1b0] sm:$0xf0]  ;;  %v13503_v27 = vld [vmem:[#allocation13 + $0x36c] sm:$0xf0] }
0x140d   : > { %v11324_v48 = vor.u32 %v13445_v50, %v11321_v31  ;;  %v11417_v50 = vld [vmem:[#allocation13 + $0x270] sm:$0xf0] }
0x140e   : > { %6212 = vmatpush.bf16.msra.mxu2 %v11176_v32  ;;  %6225 = vmatpush.bf16.msra.mxu3 %v11304_v49  ;;  %v11129_v32 = vld [vmem:[#allocation13 + $0x30] sm:$0xf0]  ;;  %v11383_v49 = vld [vmem:[#allocation13 + $0x220] sm:$0xf] }
0x140f   : > { %v11384_v59 = vor.u32 %v13463_v34, %v11383_v49  ;;  %v11527_v49 = vld [vmem:[#allocation13 + $0x340] sm:$0xf]  ;;  %v13499_v34 = vld [vmem:[#allocation13 + $0x34c] sm:$0xf0] }
0x1410   : > { %6238 = vmatpush.bf16.msrb.mxu0 %v11432_v5  ;;  %v11260_v5 = vor.u32 %v13429_v10, %v11257_v3  ;;  %v11609_v3 = vld [vmem:[#allocation13 + $0x3f0] sm:$0xf0] }
0x1412   : > { %6213 = vmatpush.bf16.msra.mxu2 %v11160_v45  ;;  %6226 = vmatpush.bf16.msra.mxu3 %v11288_v37  ;;  %v11132_v45 = vor.u32 %v13397_v47, %v11129_v32  ;;  %v11113_v37 = vld [vmem:[#allocation13 + $0x10] sm:$0xf0] }
0x1413   : > { %v11116_v44 = vor.u32 %v13393_v51, %v11113_v37  ;;  %v11528_v51 = vor.u32 %v13499_v34, %v11527_v49  ;;  %v13465_v37 = vld [vmem:[#allocation13 + $0x244] sm:$0xf] }
0x1414   : > { %6239 = vmatpush.bf16.msrb.mxu0 %v11416_v20  ;;  %v13425_v20 = vld [vmem:[#allocation13 + $0x104] sm:$0xf] }
0x1415   : > { %v11244_v22 = vor.u32 %v13425_v20, %v11241_v21  ;;  %v13505_v34 = vld [vmem:[#allocation13 + $0x384] sm:$0xf] }
0x1416   : > { %6214 = vmatpush.bf16.msra.mxu2 %v11144_v40  ;;  %6227 = vmatpush.bf16.msra.mxu3 %v11272_v8  ;;  %v13459_v40 = vld [vmem:[#allocation13 + $0x20c] sm:$0xf0] }
0x1417   : > { %v11368_v8 = vor.u32 %v13459_v40, %v11367_v6  ;;  %v11231_v40 = vld [vmem:[#allocation13 + $0xe8] sm:$0xf] }
0x1418   : > { %6240 = vmatpush.bf16.msrb.mxu0 %v11400_v28  ;;  %v13469_v28 = vld [vmem:[#allocation13 + $0x264] sm:$0xf] }
0x1419   : > { %v11420_v47 = vor.u32 %v13469_v28, %v11417_v50 }
0x141a   : > { %6215 = vmatpush.bf16.msra.mxu2 %v11128_v54  ;;  %6228 = vmatpush.bf16.msra.mxu3 %v11256_v43  ;;  %v11608_v54 = vor.u32 %v13519_v41, %v11607_v46  ;;  %v11292_v43 = vor.u32 %v13437_v52, %v11289_v42  ;;  %v13424_v46 = vld [vmem:[#allocation13 + $0xf4] sm:$0xf0]  ;;  %v13495_v41 = vld [vmem:[#allocation13 + $0x32c] sm:$0xf0] }
0x141c   : > { %6241 = vmatpush.bf16.msrb.mxu0 %v11384_v59  ;;  %6248 = vmatpush.bf16.msrb.mxu1 %v11608_v54  ;;  %v13461_v54 = vld [vmem:[#allocation13 + $0x224] sm:$0xf] }
0x141e   : > { %6216 = vmatpush.bf16.msra.mxu2 %v11112_v57  ;;  %6229 = vmatpush.bf16.msra.mxu3 %v11240_v4  ;;  %v11591_v57 = vld [vmem:[#allocation13 + $0x3c0] sm:$0xf]  ;;  %v13477_v4 = vld [vmem:[#allocation13 + $0x2a4] sm:$0xf] }
0x141f   : > { %v11452_v9 = vor.u32 %v13477_v4, %v11449_v7  ;;  %v5212_v4 = vperm.slane %v15376_v13, 1  ;;  %v13416_v7 = vld [vmem:[#allocation13 + $0xb4] sm:$0xf0] }
0x1420   : > { %6242 = vmatpush.bf16.msrb.mxu0 %v11368_v8  ;;  %v11511_v8 = vld [vmem:[#allocation13 + $0x320] sm:$0xf] }
0x1421   : > { %v11512_v42 = vor.u32 %v13495_v41, %v11511_v8  ;;  %v13501_v41 = vld [vmem:[#allocation13 + $0x364] sm:$0xf] }
0x1422   : > { %6261 = vmatpush.bf16.msrb.mxu2 %v11228_v58  ;;  %6274 = vmatpush.bf16.msrb.mxu3 %v11356_v11  ;;  %v13515_v58 = vld [vmem:[#allocation13 + $0x3cc] sm:$0xf0]  ;;  %v11559_v11 = vld [vmem:[#allocation13 + $0x380] sm:$0xf] }
0x1423   : > { %v11592_v62 = vor.u32 %v13515_v58, %v11591_v57  ;;  %v11215_v58 = vld [vmem:[#allocation13 + $0xc8] sm:$0xf] }
0x1424   : > { %6287 = vmatpush.bf16.msra.mxu0 %v11484_v56 }
0x1425   : > { %6249 = vmatpush.bf16.msrb.mxu1 %v11592_v62  ;;  %v13420_v62 = vld [vmem:[#allocation13 + $0xd4] sm:$0xf0] }
0x1426   : > { %6262 = vmatpush.bf16.msrb.mxu2 %v11212_v0  ;;  %6275 = vmatpush.bf16.msrb.mxu3 %v11340_v25  ;;  %v11273_v0 = vld [vmem:[#allocation13 + $0x150] sm:$0xf0] }
0x1427   : > { %v11276_v16 = vor.u32 %v13433_v63, %v11273_v0  ;;  %v11495_v63 = vld [vmem:[#allocation13 + $0x300] sm:$0xf]  ;;  %v13491_v0 = vld [vmem:[#allocation13 + $0x30c] sm:$0xf0] }
0x1429   : > { %6250 = vmatpush.bf16.msrb.mxu1 %v11576_v2  ;;  %v11216_v2 = vor.u32 %v13420_v62, %v11215_v58  ;;  %v13448_v58 = vld [vmem:[#allocation13 + $0x1b4] sm:$0xf0] }
0x142a   : > { %6263 = vmatpush.bf16.msrb.mxu2 %v11196_v17  ;;  %6276 = vmatpush.bf16.msrb.mxu3 %v11324_v48  ;;  %v11468_v17 = vor.u32 %v13481_v26, %v11465_v15  ;;  %v11496_v15 = vor.u32 %v13491_v0, %v11495_v63  ;;  %v5213_v63 = vperm.slane %v15376_v13, 2  ;;  %v13497_v0 = vld [vmem:[#allocation13 + $0x344] sm:$0xf] }
0x142c   : > { %6288 = vmatpush.bf16.msra.mxu0 %v11468_v17  ;;  %v13457_v17 = vld [vmem:[#allocation13 + $0x204] sm:$0xf] }
0x142d   : > { %v11372_v10 = vor.u32 %v13457_v17, %v11369_v61  ;;  %v11119_v17 = vld [vmem:[#allocation13 + $0x8] sm:$0xf]  ;;  %v13396_v61 = vld [vmem:[#allocation13 + $0x14] sm:$0xf0] }
0x142e   : > { %6264 = vmatpush.bf16.msrb.mxu2 %v11180_v12  ;;  %6277 = vmatpush.bf16.msrb.mxu3 %v11308_v39  ;;  %v13507_v12 = vld [vmem:[#allocation13 + $0x38c] sm:$0xf0]  ;;  %v11404_v39 = vor.u32 %v13465_v37, %v11401_v38  ;;  %v11151_v38 = vld [vmem:[#allocation13 + $0x48] sm:$0xf] }
0x142f   : > { %v11560_v14 = vor.u32 %v13507_v12, %v11559_v11  ;;  %v13513_v11 = vld [vmem:[#allocation13 + $0x3c4] sm:$0xf]  ;;  %v11593_v12 = vld [vmem:[#allocation13 + $0x3d0] sm:$0xf0] }
0x1430   : > { %6289 = vmatpush.bf16.msra.mxu0 %v11452_v9  ;;  %v11612_v9 = vor.u32 %v13517_v1, %v11609_v3  ;;  %v11311_v1 = vld [vmem:[#allocation13 + $0x188] sm:$0xf] }
0x1431   : > { %6251 = vmatpush.bf16.msrb.mxu1 %v11560_v14  ;;  %v11596_v14 = vor.u32 %v13513_v11, %v11593_v12  ;;  %v13493_v11 = vld [vmem:[#allocation13 + $0x324] sm:$0xf]  ;;  %v11513_v12 = vld [vmem:[#allocation13 + $0x330] sm:$0xf0] }
0x1432   : > { %6265 = vmatpush.bf16.msrb.mxu2 %v11164_v18  ;;  %6278 = vmatpush.bf16.msrb.mxu3 %v11292_v43  ;;  %v13473_v18 = vld [vmem:[#allocation13 + $0x284] sm:$0xf]  ;;  %v11385_v43 = vld [vmem:[#allocation13 + $0x230] sm:$0xf0] }
0x1433   : > { %v11436_v25 = vor.u32 %v13473_v18, %v11433_v23  ;;  %v11388_v56 = vor.u32 %v13461_v54, %v11385_v43  ;;  %v11183_v18 = vld [vmem:[#allocation13 + $0x88] sm:$0xf]  ;;  %v13509_v23 = vld [vmem:[#allocation13 + $0x3a4] sm:$0xf] }
0x1434   : > { %v11135_v43 = vld [vmem:[#allocation13 + $0x28] sm:$0xf] }
0x1435   : > { %6290 = vmatpush.bf16.msra.mxu0 %v11436_v25 }
0x1436   : > { %6266 = vmatpush.bf16.msrb.mxu2 %v11148_v30  ;;  %6279 = vmatpush.bf16.msrb.mxu3 %v11276_v16  ;;  %v11544_v30 = vor.u32 %v13503_v27, %v11543_v33 }
0x1438   : > { %6252 = vmatpush.bf16.msrb.mxu1 %v11544_v30  ;;  %v11167_v30 = vld [vmem:[#allocation13 + $0x68] sm:$0xf] }
0x1439   : > { %6291 = vmatpush.bf16.msra.mxu0 %v11420_v47 }
0x143a   : > { %6267 = vmatpush.bf16.msrb.mxu2 %v11132_v45  ;;  %6280 = vmatpush.bf16.msrb.mxu3 %v11260_v5  ;;  %v11199_v5 = vld [vmem:[#allocation13 + $0xa8] sm:$0xf] }
0x143b   : > { %v11200_v20 = vor.u32 %v13416_v7, %v11199_v5  ;;  %v13422_v5 = vld [vmem:[#allocation13 + $0xec] sm:$0xf]  ;;  %v11233_v7 = vld [vmem:[#allocation13 + $0xf8] sm:$0xf0] }
0x143c   : > { %6253 = vmatpush.bf16.msrb.mxu1 %v11528_v51 }
0x143d   : > { %6292 = vmatpush.bf16.msra.mxu0 %v11404_v39 }
0x143e   : > { %6268 = vmatpush.bf16.msrb.mxu2 %v11116_v44  ;;  %v5254_v60 = vpop.f32.mrf.mxu0  ;;  %v5267_v19 = vpop.f32.mrf.mxu1  ;;  %6281 = vmatpush.bf16.msrb.mxu3 %v11244_v22  ;;  %v11232_v44 = vor.u32 %v13424_v46, %v11231_v40  ;;  %v13412_v22 = vld [vmem:[#allocation13 + $0x94] sm:$0xf0]  ;;  %v11343_v40 = vld [vmem:[#allocation13 + $0x1c8] sm:$0xf] }
0x143f   : > { %v11184_v50 = vor.u32 %v13412_v22, %v11183_v18  ;;  %v13452_v46 = vld [vmem:[#allocation13 + $0x1d4] sm:$0xf0]  ;;  %v11236_v18 = vor.u32 %v13422_v5, %v11233_v7  ;;  %v11295_v22 = vld [vmem:[#allocation13 + $0x168] sm:$0xf]  ;;  %v13402_v7 = vld [vmem:[#allocation13 + $0x4c] sm:$0xf] }
0x1440   : > { %6254 = vmatpush.bf16.msrb.mxu1 %v11512_v42  ;;  %v11344_v54 = vor.u32 %v13452_v46, %v11343_v40  ;;  %v11471_v40 = vld [vmem:[#allocation13 + $0x2c8] sm:$0xf]  ;;  %v13484_v46 = vld [vmem:[#allocation13 + $0x2d4] sm:$0xf0] }
0x1441   : > { %6293 = vmatpush.bf16.msra.mxu0 %v11388_v56  ;;  %v11327_v56 = vld [vmem:[#allocation13 + $0x1a8] sm:$0xf] }
0x1442   : > { %v11423_v5 = vld [vmem:[#allocation13 + $0x268] sm:$0xf] }
0x1443   : > { %v5228_v31 = vpop.f32.mrf.mxu2  ;;  %v5241_v32 = vpop.f32.mrf.mxu3 }
0x1444   : > { %v5229_v48 = vadd.f32 %v5228_v31, %v5211_v24  ;;  %6255 = vmatpush.bf16.msrb.mxu1 %v11496_v15  ;;  %v11577_v24 = vld [vmem:[#allocation13 + $0x3b0] sm:$0xf0]  ;;  %v13408_v31 = vld [vmem:[#allocation13 + $0x74] sm:$0xf0]  ;;  %v11328_v15 = vor.u32 %v13448_v58, %v11327_v56 }
0x1445   : > { %6294 = vmatpush.bf16.msra.mxu0 %v11372_v10  ;;  %v11580_v28 = vor.u32 %v13509_v23, %v11577_v24  ;;  %v11168_v51 = vor.u32 %v13408_v31, %v11167_v30  ;;  %v13440_v23 = vld [vmem:[#allocation13 + $0x174] sm:$0xf0]  ;;  %v11516_v24 = vor.u32 %v13493_v11, %v11513_v12  ;;  %v13489_v30 = vld [vmem:[#allocation13 + $0x304] sm:$0xf]  ;;  %v13450_v12 = vld [vmem:[#allocation13 + $0x1cc] sm:$0xf] }
0x1446   : > { %v5242_v59 = vadd.f32 %v5241_v32, %v5229_v48  ;;  %v5256_v36 = vpop.f32.mrf.mxu0  ;;  %v5269_v45 = vpop.f32.mrf.mxu1  ;;  %v11359_v32 = vld [vmem:[#allocation13 + $0x1e8] sm:$0xf]  ;;  %v13456_v48 = vld [vmem:[#allocation13 + $0x1f4] sm:$0xf0]  ;;  %v11296_v31 = vor.u32 %v13440_v23, %v11295_v22 }
0x1447   : > { %v11360_v37 = vor.u32 %v13456_v48, %v11359_v32  ;;  %v13472_v11 = vld [vmem:[#allocation13 + $0x274] sm:$0xf0]  ;;  %v11407_v23 = vld [vmem:[#allocation13 + $0x248] sm:$0xf] }
0x1448   : > { %v5255_v6 = vadd.f32 %v5254_v60, %v5242_v59  ;;  %6300 = vmatpush.bf16.msra.mxu1 %v11612_v9  ;;  %v11561_v59 = vld [vmem:[#allocation13 + $0x390] sm:$0xf0] }
0x1449   : > { %v11564_v8 = vor.u32 %v13505_v34, %v11561_v59  ;;  %v13436_v34 = vld [vmem:[#allocation13 + $0x154] sm:$0xf0] }
0x144a   : > { %v5268_v52 = vadd.f32 %v5267_v19, %v5255_v6  ;;  %v13404_v6 = vld [vmem:[#allocation13 + $0x54] sm:$0xf0] }
0x144b   : > { %v5230_v55 = vpop.f32.mrf.mxu2  ;;  %v5243_v29 = vpop.f32.mrf.mxu3  ;;  %v11152_v42 = vor.u32 %v13404_v6, %v11151_v38 }
0x144c   : > { %v15379_v57 = vpack.c.bf16 %v5268_v52, %v5268_v52  ;;  %6301 = vmatpush.bf16.msra.mxu1 %v11596_v14  ;;  %v11545_v52 = vld [vmem:[#allocation13 + $0x370] sm:$0xf0]  ;;  %v11120_v14 = vor.u32 %v13396_v61, %v11119_v17  ;;  %v11361_v17 = vld [vmem:[#allocation13 + $0x1f8] sm:$0xf0]  ;;  %v11439_v61 = vld [vmem:[#allocation13 + $0x288] sm:$0xf] }
0x144d   : > { %v11548_v62 = vor.u32 %v13501_v41, %v11545_v52  ;;  %v11263_v52 = vld [vmem:[#allocation13 + $0x128] sm:$0xf] }
0x144e   : > { %v5306_v26 = vpop.f32.mrf.mxu0  ;;  %v5319_v16 = vpop.f32.mrf.mxu1  ;;  %6217 = vmatmul.bf16.vlgmr.msra.gmra.mxu2 %v15379_v57 }
0x144f   : > { %6313 = vmatpush.bf16.msra.mxu2 %v11232_v44  ;;  %v13400_v44 = vld [vmem:[#allocation13 + $0x34] sm:$0xf0] }
0x1450   : > { %6302 = vmatpush.bf16.msra.mxu1 %v11580_v28 }
0x1453   : > { %6314 = vmatpush.bf16.msra.mxu2 %v11216_v2  ;;  %v5280_v60 = vpop.f32.mrf.mxu2  ;;  %v5293_v19 = vpop.f32.mrf.mxu3  ;;  %v13444_v2 = vld [vmem:[#allocation13 + $0x194] sm:$0xf0] }
0x1454   : > { %v5281_v21 = vadd.f32 %v5280_v60, %v5212_v4  ;;  %6303 = vmatpush.bf16.msra.mxu1 %v11564_v8  ;;  %v11312_v60 = vor.u32 %v13444_v2, %v11311_v1  ;;  %v13476_v1 = vld [vmem:[#allocation13 + $0x294] sm:$0xf0] }
0x1456   : > { %v5294_v25 = vadd.f32 %v5293_v19, %v5281_v21  ;;  %v5308_v33 = vpop.f32.mrf.mxu0  ;;  %v5321_v27 = vpop.f32.mrf.mxu1 }
0x1457   : > { %6315 = vmatpush.bf16.msra.mxu2 %v11200_v20  ;;  %v13418_v33 = vld [vmem:[#allocation13 + $0xcc] sm:$0xf]  ;;  %v11217_v27 = vld [vmem:[#allocation13 + $0xd8] sm:$0xf0] }
0x1458   : > { %v5307_v47 = vadd.f32 %v5306_v26, %v5294_v25  ;;  %v11529_v26 = vld [vmem:[#allocation13 + $0x350] sm:$0xf0]  ;;  %6304 = vmatpush.bf16.msra.mxu1 %v11548_v62  ;;  %v11487_v25 = vld [vmem:[#allocation13 + $0x2e8] sm:$0xf]  ;;  %v11220_v48 = vor.u32 %v13418_v33, %v11217_v27  ;;  %v13468_v33 = vld [vmem:[#allocation13 + $0x254] sm:$0xf0] }
0x1459   : > { %v11532_v10 = vor.u32 %v13497_v0, %v11529_v26  ;;  %v11247_v62 = vld [vmem:[#allocation13 + $0x108] sm:$0xf]  ;;  %v13406_v0 = vld [vmem:[#allocation13 + $0x6c] sm:$0xf] }
0x145a   : > { %v5320_v49 = vadd.f32 %v5319_v16, %v5307_v47  ;;  %v11136_v16 = vor.u32 %v13400_v44, %v11135_v43  ;;  %v11497_v47 = vld [vmem:[#allocation13 + $0x310] sm:$0xf0]  ;;  %v13410_v43 = vld [vmem:[#allocation13 + $0x8c] sm:$0xf]  ;;  %v13480_v44 = vld [vmem:[#allocation13 + $0x2b4] sm:$0xf0] }
0x145b   : > { %6316 = vmatpush.bf16.msra.mxu2 %v11184_v50  ;;  %v5282_v36 = vpop.f32.mrf.mxu2  ;;  %v5295_v45 = vpop.f32.mrf.mxu3  ;;  %v13488_v50 = vld [vmem:[#allocation13 + $0x2f4] sm:$0xf0]  ;;  %v11500_v38 = vor.u32 %v13489_v30, %v11497_v47  ;;  %v13446_v27 = vld [vmem:[#allocation13 + $0x1ac] sm:$0xf] }
0x145c   : > { %v15383_v39 = vpack.c.bf16 %v5320_v49, %v5320_v49  ;;  %6305 = vmatpush.bf16.msra.mxu1 %v11532_v10  ;;  %v11279_v49 = vld [vmem:[#allocation13 + $0x148] sm:$0xf]  ;;  %v11488_v45 = vor.u32 %v13488_v50, %v11487_v25  ;;  %v11137_v25 = vld [vmem:[#allocation13 + $0x38] sm:$0xf0]  ;;  %v5214_v50 = vperm.slane %v15376_v13, 3 }
0x145d   : > { %v11280_v8 = vor.u32 %v13436_v34, %v11279_v49  ;;  %v13394_v49 = vld [vmem:[#allocation13 + $0xc] sm:$0xf]  ;;  %v11121_v34 = vld [vmem:[#allocation13 + $0x18] sm:$0xf0] }
0x145e   : > { %6230 = vmatmul.bf16.vlgmr.msra.gmra.mxu3 %v15383_v39  ;;  %6269 = vmatmul.bf16.vlgmr.msrb.gmra.mxu2 %v15379_v57 }
0x145f   : > { %6317 = vmatpush.bf16.msra.mxu2 %v11168_v51  ;;  %6326 = vmatpush.bf16.msra.mxu3 %v11360_v37  ;;  %v13414_v51 = vld [vmem:[#allocation13 + $0xac] sm:$0xf]  ;;  %v11201_v37 = vld [vmem:[#allocation13 + $0xb8] sm:$0xf0] }
0x1460   : > { %6306 = vmatpush.bf16.msra.mxu1 %v11516_v24  ;;  %v11204_v41 = vor.u32 %v13414_v51, %v11201_v37  ;;  %v13398_v24 = vld [vmem:[#allocation13 + $0x2c] sm:$0xf]  ;;  %v11313_v37 = vld [vmem:[#allocation13 + $0x198] sm:$0xf0] }
0x1461   : > { %v5358_v55 = vpop.f32.mrf.mxu0  ;;  %v5371_v29 = vpop.f32.mrf.mxu1  ;;  %v11140_v47 = vor.u32 %v13398_v24, %v11137_v25  ;;  %v13442_v51 = vld [vmem:[#allocation13 + $0x18c] sm:$0xf]  ;;  %v11265_v24 = vld [vmem:[#allocation13 + $0x138] sm:$0xf0] }
0x1462   : > { %v13478_v25 = vld [vmem:[#allocation13 + $0x2ac] sm:$0xf] }
0x1463   : > { %6318 = vmatpush.bf16.msra.mxu2 %v11152_v42  ;;  %6327 = vmatpush.bf16.msra.mxu3 %v11344_v54  ;;  %v13432_v42 = vld [vmem:[#allocation13 + $0x134] sm:$0xf0]  ;;  %v11472_v54 = vor.u32 %v13484_v46, %v11471_v40  ;;  %v11124_v40 = vor.u32 %v13394_v49, %v11121_v34  ;;  %v13474_v49 = vld [vmem:[#allocation13 + $0x28c] sm:$0xf]  ;;  %v11441_v34 = vld [vmem:[#allocation13 + $0x298] sm:$0xf0] }
0x1464   : > { %v5332_v3 = vpop.f32.mrf.mxu2  ;;  %v5345_v4 = vpop.f32.mrf.mxu3  ;;  %6307 = vmatpush.bf16.msra.mxu1 %v11500_v38  ;;  %v11264_v56 = vor.u32 %v13432_v42, %v11263_v52  ;;  %v11316_v42 = vor.u32 %v13442_v51, %v11313_v37  ;;  %v11444_v51 = vor.u32 %v13474_v49, %v11441_v34  ;;  %v11551_v37 = vld [vmem:[#allocation13 + $0x368] sm:$0xf]  ;;  %v13681_v49 = vld [vmem:[#allocation16 + $0xec] sm:$0xf0]  ;;  %v13679_v34 = vld [vmem:[#allocation16 + $0xe4] sm:$0xf] }
0x1465   : > { %v5333_v9 = vadd.f32 %v5332_v3, %v5213_v63  ;;  %v13428_v63 = vld [vmem:[#allocation13 + $0x114] sm:$0xf0] }
0x1466   : > { %v11248_v2 = vor.u32 %v13428_v63, %v11247_v62  ;;  %v13486_v62 = vld [vmem:[#allocation13 + $0x2ec] sm:$0xf] }
0x1467   : > { %6319 = vmatpush.bf16.msra.mxu2 %v11136_v16  ;;  %6328 = vmatpush.bf16.msra.mxu3 %v11328_v15  ;;  %v5346_v19 = vadd.f32 %v5345_v4, %v5333_v9  ;;  %v11169_v16 = vld [vmem:[#allocation13 + $0x78] sm:$0xf0]  ;;  %v13454_v15 = vld [vmem:[#allocation13 + $0x1ec] sm:$0xf]  ;;  %v11440_v4 = vor.u32 %v13476_v1, %v11439_v61 }
0x1468   : > { %v11172_v10 = vor.u32 %v13406_v0, %v11169_v16  ;;  %v11364_v3 = vor.u32 %v13454_v15, %v11361_v17  ;;  %v11153_v9 = vld [vmem:[#allocation13 + $0x58] sm:$0xf0]  ;;  %v13522_v16 = vld [vmem:[%s15686_s15 + $0x4] sm:$0xf0] }
0x1469   : > { %v5360_v20 = vpop.f32.mrf.mxu0  ;;  %v5373_v21 = vpop.f32.mrf.mxu1  ;;  %v5359_v28 = vadd.f32 %v5358_v55, %v5346_v19  ;;  %v11185_v55 = vld [vmem:[#allocation13 + $0x98] sm:$0xf0]  ;;  %v15394_v19 = vld [vmem:[%s15685_s28 + $0x10] sm:$0x33]  ;;  %s15689_s28 = sld [smem:[#allocation50_spill]] }
0x146a   : > { %v11188_v58 = vor.u32 %v13410_v43, %v11185_v55  ;;  %v6430_v30 = vunpack.c.l.b16 %v15394_v19  ;;  %v13460_v43 = vld [vmem:[#allocation13 + $0x214] sm:$0xf0]  ;;  %v11615_v55 = vld [vmem:[#allocation13 + $0x3e8] sm:$0xf]  ;;  %v11489_v0 = vld [vmem:[#allocation13 + $0x2f8] sm:$0xf0] }
0x146b   : > { %6320 = vmatpush.bf16.msra.mxu2 %v11120_v14  ;;  %6329 = vmatpush.bf16.msra.mxu3 %v11312_v60  ;;  %v5372_v32 = vadd.f32 %v5371_v29, %v5359_v28  ;;  %v11455_v29 = vld [vmem:[#allocation13 + $0x2a8] sm:$0xf]  ;;  %v11345_v14 = vld [vmem:[#allocation13 + $0x1d8] sm:$0xf0]  ;;  %v11156_v60 = vor.u32 %v13402_v7, %v11153_v9  ;;  %v13516_v7 = vld [vmem:[#allocation13 + $0x3d4] sm:$0xf0] }
0x146c   : > { %v5334_v59 = vpop.f32.mrf.mxu2  ;;  %v5347_v36 = vpop.f32.mrf.mxu3  ;;  %v11456_v26 = vor.u32 %v13480_v44, %v11455_v29  ;;  %v11348_v22 = vor.u32 %v13450_v12, %v11345_v14  ;;  %v11329_v28 = vld [vmem:[#allocation13 + $0x1b8] sm:$0xf0]  ;;  %v6434_v13 = vpack.c.b16 %v6430_v30, %v6430_v30  ;;  %v13520_v29 = vld [vmem:[#allocation13 + $0x3f4] sm:$0xf0]  ;;  %v13438_v44 = vld [vmem:[#allocation13 + $0x16c] sm:$0xf] }
0x146d   : > { %v15388_v6 = vpack.c.bf16 %v5372_v32, %v5372_v32  ;;  %v11332_v32 = vor.u32 %v13446_v27, %v11329_v28  ;;  %v13434_v9 = vld [vmem:[#allocation13 + $0x14c] sm:$0xf]  ;;  %v6431_v27 = vunpack.c.h.b16 %v15394_v19  ;;  %v11567_v30 = vld [vmem:[#allocation13 + $0x388] sm:$0xf] }
0x146e   : > { %6282 = vmatmul.bf16.vlgmr.msrb.gmra.mxu3 %v15383_v39  ;;  %6321 = vmatmul.bf16.vlgmr.msra.gmra.mxu2 %v15379_v57  ;;  %v6449_v63 = vsel %vm6447_vm14, %v6434_v13, 0  ;;  %v13482_v14 = vld [vmem:[#allocation13 + $0x2cc] sm:$0xf] }
0x146f   : > { %6365 = vmatpush.bf16.msrb.mxu2 %v11236_v18  ;;  %6330 = vmatpush.bf16.msra.mxu3 %v11296_v31  ;;  %v11424_v18 = vor.u32 %v13472_v11, %v11423_v5  ;;  %v11408_v31 = vor.u32 %v13468_v33, %v11407_v23  ;;  %v11492_v5 = vor.u32 %v13486_v62, %v11489_v0  ;;  %v11281_v11 = vld [vmem:[#allocation13 + $0x158] sm:$0xf0]  ;;  %v13430_v23 = vld [vmem:[#allocation13 + $0x12c] sm:$0xf]  ;;  %v13496_v0 = vld [vmem:[#allocation13 + $0x334] sm:$0xf0] }
0x1470   : > { %6243 = vmatmul.bf16.vlgmr.msrb.gmra.mxu0 %v15388_v6  ;;  %v11457_v33 = vld [vmem:[#allocation13 + $0x2b8] sm:$0xf0] }
0x1471   : > { %6339 = vmatpush.bf16.msrb.mxu0 %v11488_v45  ;;  %v13464_v45 = vld [vmem:[#allocation13 + $0x234] sm:$0xf0] }
0x1473   : > { %6366 = vmatpush.bf16.msrb.mxu2 %v11220_v48  ;;  %6331 = vmatpush.bf16.msra.mxu3 %v11280_v8  ;;  %v11391_v48 = vld [vmem:[#allocation13 + $0x228] sm:$0xf] }
0x1474   : > { %v11392_v52 = vor.u32 %v13464_v45, %v11391_v48  ;;  %v11249_v48 = vld [vmem:[#allocation13 + $0x118] sm:$0xf0] }
0x1475   : > { %6340 = vmatpush.bf16.msrb.mxu0 %v11472_v54  ;;  %v11375_v54 = vld [vmem:[#allocation13 + $0x208] sm:$0xf] }
0x1476   : > { %v11376_v17 = vor.u32 %v13460_v43, %v11375_v54  ;;  %v11535_v43 = vld [vmem:[#allocation13 + $0x348] sm:$0xf] }
0x1477   : > { %6367 = vmatpush.bf16.msrb.mxu2 %v11204_v41  ;;  %6332 = vmatpush.bf16.msra.mxu3 %v11264_v56 }
0x1479   : > { %6341 = vmatpush.bf16.msrb.mxu0 %v11456_v26  ;;  %v11623_v26 = vld [vmem:[%s15686_s15] sm:$0xf] }
0x147a   : > { %v11624_v12 = vor.u32 %v13522_v16, %v11623_v26  ;;  %v13462_v26 = vld [vmem:[#allocation13 + $0x22c] sm:$0xf]  ;;  %v11393_v16 = vld [vmem:[#allocation13 + $0x238] sm:$0xf0] }
0x147b   : > { %6368 = vmatpush.bf16.msrb.mxu2 %v11188_v58  ;;  %6333 = vmatpush.bf16.msra.mxu3 %v11248_v2  ;;  %v11297_v58 = vld [vmem:[#allocation13 + $0x178] sm:$0xf0]  ;;  %v11616_v2 = vor.u32 %v13520_v29, %v11615_v55  ;;  %v13500_v55 = vld [vmem:[#allocation13 + $0x354] sm:$0xf0]  ;;  %v13466_v29 = vld [vmem:[#allocation13 + $0x24c] sm:$0xf] }
0x147d   : > { %6342 = vmatpush.bf16.msrb.mxu0 %v11440_v4 }
0x147e   : > { %6334 = vmatmul.bf16.vlgmr.msra.gmra.mxu3 %v15383_v39 }
0x147f   : > { %6369 = vmatpush.bf16.msrb.mxu2 %v11172_v10  ;;  %6378 = vmatpush.bf16.msrb.mxu3 %v11364_v3  ;;  %v11300_v10 = vor.u32 %v13438_v44, %v11297_v58  ;;  %v11599_v3 = vld [vmem:[#allocation13 + $0x3c8] sm:$0xf]  ;;  %v11409_v44 = vld [vmem:[#allocation13 + $0x258] sm:$0xf0]  ;;  %v11536_v58 = vor.u32 %v13500_v55, %v11535_v43  ;;  %v15422_v43 = vld [vmem:[%s15688_s20] sm:$0xf] }
0x1480   : > { %v5410_v20 = vpop.f32.mrf.mxu0  ;;  %v5423_v21 = vpop.f32.mrf.mxu1  ;;  %6295 = vmatmul.bf16.vlgmr.msra.gmra.mxu0 %v15388_v6  ;;  %v11412_v62 = vor.u32 %v13466_v29, %v11409_v44  ;;  %v11697_v29 = vld [vmem:[#allocation16 + $0x80] sm:$0xf]  ;;  %v13669_v44 = vld [vmem:[#allocation16 + $0x8c] sm:$0xf0]  ;;  %s15692_s20 = sld [smem:[#allocation53_spill]] }
0x1481   : > { %6343 = vmatpush.bf16.msrb.mxu0 %v11424_v18  ;;  %v11583_v18 = vld [vmem:[#allocation13 + $0x3a8] sm:$0xf] }
0x1483   : > { %6370 = vmatpush.bf16.msrb.mxu2 %v11156_v60  ;;  %6379 = vmatpush.bf16.msrb.mxu3 %v11348_v22  ;;  %v11473_v60 = vld [vmem:[#allocation13 + $0x2d8] sm:$0xf0] }
0x1484   : > { %v5384_v59 = vpop.f32.mrf.mxu2  ;;  %v5397_v36 = vpop.f32.mrf.mxu3  ;;  %v11476_v22 = vor.u32 %v13482_v14, %v11473_v60  ;;  %v13510_v60 = vld [vmem:[#allocation13 + $0x3ac] sm:$0xf] }
0x1485   : > { %v5385_v38 = vadd.f32 %v5384_v59, %v5214_v50  ;;  %6344 = vmatpush.bf16.msrb.mxu0 %v11408_v31  ;;  %v11268_v50 = vor.u32 %v13430_v23, %v11265_v24  ;;  %v13508_v31 = vld [vmem:[#allocation13 + $0x394] sm:$0xf0]  ;;  %v6417_v59 = vld [vmem:[%s1553_s16] sm:$0x1]  ;;  %v13502_v23 = vld [vmem:[#allocation13 + $0x36c] sm:$0xf] }
0x1486   : > { %v11568_v45 = vor.u32 %v13508_v31, %v11567_v30  ;;  %v6421_v13 = vpack.c.bf16 %v6417_v59, %v6417_v59  ;;  %v11553_v24 = vld [vmem:[#allocation13 + $0x378] sm:$0xf0]  ;;  %v13490_v31 = vld [vmem:[#allocation13 + $0x30c] sm:$0xf]  ;;  %s15691_s16 = sld [smem:[#allocation52_spill]] }
0x1487   : > { %6371 = vmatpush.bf16.msrb.mxu2 %v11140_v47  ;;  %v5398_v46 = vadd.f32 %v5397_v36, %v5385_v38  ;;  %6380 = vmatpush.bf16.msrb.mxu3 %v11332_v32  ;;  %v11460_v47 = vor.u32 %v13478_v25, %v11457_v33  ;;  %v13426_v32 = vld [vmem:[#allocation13 + $0x10c] sm:$0xf]  ;;  %v6435_v36 = vpack.c.b16 %v6431_v27, %v6431_v27  ;;  %v13504_v38 = vld [vmem:[#allocation13 + $0x374] sm:$0xf0]  ;;  %v11537_v27 = vld [vmem:[#allocation13 + $0x358] sm:$0xf0] }
0x1488   : > { %v5412_v8 = vpop.f32.mrf.mxu0  ;;  %v5425_v41 = vpop.f32.mrf.mxu1  ;;  %v11252_v19 = vor.u32 %v13426_v32, %v11249_v48  ;;  %v11556_v25 = vor.u32 %v13502_v23, %v11553_v24  ;;  %v13498_v33 = vld [vmem:[#allocation13 + $0x34c] sm:$0xf]  ;;  %v11521_v30 = vld [vmem:[#allocation13 + $0x338] sm:$0xf0]  ;;  %v11745_v48 = vld [vmem:[#allocation16 + $0xe0] sm:$0xf] }
0x1489   : > { %v5411_v56 = vadd.f32 %v5410_v20, %v5398_v46  ;;  %6345 = vmatpush.bf16.msrb.mxu0 %v11392_v52  ;;  %v11600_v20 = vor.u32 %v13516_v7, %v11599_v3  ;;  %v11425_v46 = vld [vmem:[#allocation13 + $0x278] sm:$0xf0]  ;;  %v6452_v8 = vsel %vm6447_vm14, %v6435_v36, 0  ;;  %v13521_v41 = vld [vmem:[%s15686_s15 + $0x4] sm:$0xf]  ;;  %v11746_v59 = vor.u32 %v13681_v49, %v11745_v48 }
0x148a   : > { %v11625_v52 = vld [vmem:[%s15686_s15 + $0x8] sm:$0xf0]  ;;  %v11747_v36 = vld [vmem:[#allocation16 + $0xf0] sm:$0xf0] }
0x148b   : > { %6372 = vmatpush.bf16.msrb.mxu2 %v11124_v40  ;;  %v5424_v15 = vadd.f32 %v5423_v21, %v5411_v56  ;;  %6381 = vmatpush.bf16.msrb.mxu3 %v11316_v42  ;;  %v11284_v21 = vor.u32 %v13434_v9, %v11281_v11  ;;  %v13470_v40 = vld [vmem:[#allocation13 + $0x26c] sm:$0xf]  ;;  %v11552_v42 = vor.u32 %v13504_v38, %v11551_v37  ;;  %v13677_v37 = vld [vmem:[#allocation16 + $0xcc] sm:$0xf0]  ;;  %v11667_v23 = vld [vmem:[#allocation16 + $0x50] sm:$0xf0] }
0x148c   : > { %v5386_v61 = vpop.f32.mrf.mxu2  ;;  %v5399_v1 = vpop.f32.mrf.mxu3  ;;  %v11428_v54 = vor.u32 %v13470_v40, %v11425_v46  ;;  %v11628_v56 = vor.u32 %v13521_v41, %v11625_v52  ;;  %v13518_v3 = vld [vmem:[#allocation13 + $0x3ec] sm:$0xf]  ;;  %v11731_v40 = vld [vmem:[#allocation16 + $0xd0] sm:$0xf0]  ;;  %v13673_v41 = vld [vmem:[#allocation16 + $0xac] sm:$0xf0] }
0x148d   : > { %v15403_v4 = vpack.c.bf16 %v5424_v15, %v5424_v15  ;;  %6346 = vmatpush.bf16.msrb.mxu0 %v11376_v17  ;;  %v11396_v17 = vor.u32 %v13462_v26, %v11393_v16  ;;  %v11503_v61 = vld [vmem:[#allocation13 + $0x308] sm:$0xf]  ;;  %v13492_v1 = vld [vmem:[#allocation13 + $0x314] sm:$0xf0]  ;;  %v13514_v11 = vld [vmem:[#allocation13 + $0x3cc] sm:$0xf] }
0x148e   : > { %6373 = vmatmul.bf16.vlgmr.msrb.gmra.mxu2 %v15379_v57  ;;  %v13512_v57 = vld [vmem:[#allocation13 + $0x3b4] sm:$0xf0]  ;;  %v11681_v26 = vld [vmem:[#allocation16 + $0x60] sm:$0xf]  ;;  %v13665_v16 = vld [vmem:[#allocation16 + $0x6c] sm:$0xf0] }
0x148f   : > { %6460 = vmatpush.bf16.msra.mxu2 %v6449_v63  ;;  %6256 = vmatmul.bf16.vlgmr.msrb.gmra.mxu1 %v15403_v4  ;;  %v11584_v28 = vor.u32 %v13512_v57, %v11583_v18  ;;  %v11519_v63 = vld [vmem:[#allocation13 + $0x328] sm:$0xf]  ;;  %v13506_v18 = vld [vmem:[#allocation13 + $0x38c] sm:$0xf]  ;;  %v11651_v48 = vld [vmem:[#allocation16 + $0x30] sm:$0xf0] }
0x1490   : > { %6352 = vmatpush.bf16.msrb.mxu1 %v11616_v2  ;;  %6382 = vmatpush.bf16.msrb.mxu3 %v11300_v10  ;;  %v11520_v15 = vor.u32 %v13496_v0, %v11519_v63  ;;  %v13458_v2 = vld [vmem:[#allocation13 + $0x20c] sm:$0xf]  ;;  %v11377_v10 = vld [vmem:[#allocation13 + $0x218] sm:$0xf0]  ;;  %v6201_v0 = vperm.slane %v15422_v43, 0 }
0x1491   : > { %6391 = vmatpush.bf16.msra.mxu0 %v11492_v5  ;;  %v11617_v5 = vld [vmem:[#allocation13 + $0x3f8] sm:$0xf0]  ;;  %v11380_v7 = vor.u32 %v13458_v2, %v11377_v10  ;;  %v11683_v2 = vld [vmem:[#allocation16 + $0x70] sm:$0xf0] }
0x1492   : > { %6347 = vmatmul.bf16.vlgmr.msrb.gmra.mxu0 %v15388_v6  ;;  %v11620_v9 = vor.u32 %v13518_v3, %v11617_v5 }
0x1493   : > { %6461 = vmatpush.bf16.msra.mxu2 %v11624_v12  ;;  %v11601_v12 = vld [vmem:[#allocation13 + $0x3d8] sm:$0xf0] }
0x1494   : > { %6353 = vmatpush.bf16.msrb.mxu1 %v11600_v20  ;;  %6383 = vmatpush.bf16.msrb.mxu3 %v11284_v21  ;;  %v11604_v14 = vor.u32 %v13514_v11, %v11601_v12  ;;  %v11585_v20 = vld [vmem:[#allocation13 + $0x3b8] sm:$0xf0] }
0x1495   : > { %6392 = vmatpush.bf16.msra.mxu0 %v11476_v22  ;;  %v11588_v21 = vor.u32 %v13510_v60, %v11585_v20  ;;  %v11569_v22 = vld [vmem:[#allocation13 + $0x398] sm:$0xf0]  ;;  %v11665_v60 = vld [vmem:[#allocation16 + $0x40] sm:$0xf]  ;;  %v13661_v20 = vld [vmem:[#allocation16 + $0x4c] sm:$0xf0] }
0x1496   : > { %v11572_v57 = vor.u32 %v13506_v18, %v11569_v22  ;;  %v11666_v18 = vor.u32 %v13661_v20, %v11665_v60  ;;  %v13709_v22 = vld [vmem:[#allocation16 + $0x1cc] sm:$0xf0] }
0x1498   : > { %6354 = vmatpush.bf16.msrb.mxu1 %v11584_v28  ;;  %6384 = vmatpush.bf16.msrb.mxu3 %v11268_v50  ;;  %v11540_v28 = vor.u32 %v13498_v33, %v11537_v27  ;;  %v13494_v50 = vld [vmem:[#allocation13 + $0x32c] sm:$0xf]  ;;  %v13707_v33 = vld [vmem:[#allocation16 + $0x1c4] sm:$0xf]  ;;  %v11859_v27 = vld [vmem:[#allocation16 + $0x1d0] sm:$0xf0] }
0x1499   : > { %6393 = vmatpush.bf16.msra.mxu0 %v11460_v47  ;;  %v11524_v47 = vor.u32 %v13494_v50, %v11521_v30  ;;  %v11649_v50 = vld [vmem:[#allocation16 + $0x20] sm:$0xf]  ;;  %v13657_v30 = vld [vmem:[#allocation16 + $0x2c] sm:$0xf0] }
0x149c   : > { %6355 = vmatpush.bf16.msrb.mxu1 %v11568_v45  ;;  %6385 = vmatpush.bf16.msrb.mxu3 %v11252_v19  ;;  %v11750_v45 = vor.u32 %v13679_v34, %v11747_v36  ;;  %v11843_v36 = vld [vmem:[#allocation16 + $0x1b0] sm:$0xf0] }
0x149d   : > { %6394 = vmatpush.bf16.msra.mxu0 %v11444_v51  ;;  %v11729_v51 = vld [vmem:[#allocation16 + $0xc0] sm:$0xf] }
0x149e   : > { %11629 = vmatmul.msk.bf16.vlgmr.msra.gmra.mxu2 %vm6443_vm15, %v6421_v13  ;;  %v11730_v38 = vor.u32 %v13677_v37, %v11729_v51  ;;  %v6202_v37 = vperm.slane %v15422_v43, 1 }
0x149f   : > { %6308 = vmatmul.bf16.vlgmr.msra.gmra.mxu1 %v15403_v4  ;;  %6386 = vmatmul.bf16.vlgmr.msrb.gmra.mxu3 %v15383_v39  ;;  %v11504_v39 = vor.u32 %v13492_v1, %v11503_v61  ;;  %v13713_v61 = vld [vmem:[#allocation16 + $0x1ec] sm:$0xf0]  ;;  %v13663_v1 = vld [vmem:[#allocation16 + $0x64] sm:$0xf] }
0x14a0   : > { %6473 = vmatpush.bf16.msra.mxu3 %v6452_v8  ;;  %6356 = vmatpush.bf16.msrb.mxu1 %v11552_v42  ;;  %v11713_v8 = vld [vmem:[#allocation16 + $0xa0] sm:$0xf]  ;;  %v11715_v42 = vld [vmem:[#allocation16 + $0xb0] sm:$0xf0]  ;;  %v11686_v5 = vor.u32 %v13663_v1, %v11683_v2  ;;  %v13695_v2 = vld [vmem:[#allocation16 + $0x164] sm:$0xf] }
0x14a1   : > { %6395 = vmatpush.bf16.msra.mxu0 %v11428_v54  ;;  %v11714_v52 = vor.u32 %v13673_v41, %v11713_v8  ;;  %v13701_v8 = vld [vmem:[#allocation16 + $0x18c] sm:$0xf0]  ;;  %v13651_v41 = vld [vmem:[#allocation16 + $0x4] sm:$0xf] }
0x14a4   : > { %6474 = vmatpush.bf16.msra.mxu3 %v11628_v56  ;;  %6357 = vmatpush.bf16.msrb.mxu1 %v11536_v58  ;;  %v13667_v56 = vld [vmem:[#allocation16 + $0x84] sm:$0xf]  ;;  %v11698_v58 = vor.u32 %v13669_v44, %v11697_v29  ;;  %v11827_v29 = vld [vmem:[#allocation16 + $0x190] sm:$0xf0]  ;;  %v11753_v44 = vld [vmem:[#allocation16 + $0xe8] sm:$0xf] }
0x14a5   : > { %6396 = vmatpush.bf16.msra.mxu0 %v11412_v62  ;;  %v11699_v62 = vld [vmem:[#allocation16 + $0x90] sm:$0xf0] }
0x14a6   : > { %v11702_v63 = vor.u32 %v13667_v56, %v11699_v62  ;;  %v13682_v62 = vld [vmem:[#allocation16 + $0xf4] sm:$0xf0] }
0x14a8   : > { %6358 = vmatpush.bf16.msrb.mxu1 %v11520_v15  ;;  %7042 = vmatpush.bf16.msrb.mxu3 %v11750_v45  ;;  %v11873_v15 = vld [vmem:[#allocation16 + $0x1e0] sm:$0xf] }
0x14a9   : > { %6397 = vmatpush.bf16.msra.mxu0 %v11396_v17  ;;  %v11682_v17 = vor.u32 %v13665_v16, %v11681_v26  ;;  %v11874_v3 = vor.u32 %v13713_v61, %v11873_v15  ;;  %v11754_v26 = vor.u32 %v13682_v62, %v11753_v44  ;;  %v11809_v15 = vld [vmem:[#allocation16 + $0x160] sm:$0xf]  ;;  %v11881_v44 = vld [vmem:[#allocation16 + $0x1e8] sm:$0xf]  ;;  %v13664_v62 = vld [vmem:[#allocation16 + $0x6c] sm:$0xf] }
0x14ab   : > { %7029 = vmatpush.bf16.msrb.mxu2 %v11874_v3  ;;  %v11737_v3 = vld [vmem:[#allocation16 + $0xc8] sm:$0xf] }
0x14ac   : > { %6359 = vmatpush.bf16.msrb.mxu1 %v11504_v39  ;;  %v13711_v39 = vld [vmem:[#allocation16 + $0x1e4] sm:$0xf] }
0x14ad   : > { %6398 = vmatpush.bf16.msra.mxu0 %v11380_v7  ;;  %v11875_v7 = vld [vmem:[#allocation16 + $0x1f0] sm:$0xf0] }
0x14ae   : > { %v11878_v12 = vor.u32 %v13711_v39, %v11875_v7 }
0x14af   : > { %6360 = vmatmul.bf16.vlgmr.msrb.gmra.mxu1 %v15403_v4  ;;  %11630 = vmatmul.msk.bf16.vlgmr.msra.gmra.mxu3 %vm6443_vm15, %v6421_v13  ;;  %v13675_v13 = vld [vmem:[#allocation16 + $0xc4] sm:$0xf] }
0x14b0   : > { %6404 = vmatpush.bf16.msra.mxu1 %v11620_v9  ;;  %6399 = vmatmul.bf16.vlgmr.msra.gmra.mxu0 %v15388_v6  ;;  %v11505_v6 = vld [vmem:[#allocation13 + $0x318] sm:$0xf0]  ;;  %v11734_v46 = vor.u32 %v13675_v13, %v11731_v40  ;;  %v13653_v13 = vld [vmem:[#allocation16 + $0xc] sm:$0xf0]  ;;  %v11825_v40 = vld [vmem:[#allocation16 + $0x180] sm:$0xf] }
0x14b1   : > { %v11508_v32 = vor.u32 %v13490_v31, %v11505_v6  ;;  %7016 = vmatpush.bf16.msrb.mxu0 %v11746_v59  ;;  %v11650_v31 = vor.u32 %v13657_v30, %v11649_v50  ;;  %v13705_v6 = vld [vmem:[#allocation16 + $0x1ac] sm:$0xf0]  ;;  %v13703_v59 = vld [vmem:[#allocation16 + $0x1a4] sm:$0xf]  ;;  %v11723_v30 = vld [vmem:[#allocation16 + $0xb8] sm:$0xf0] }
0x14b2   : > { %7043 = vmatpush.bf16.msrb.mxu3 %v11734_v46  ;;  %v11846_v45 = vor.u32 %v13703_v59, %v11843_v36  ;;  %v11705_v59 = vld [vmem:[#allocation16 + $0x88] sm:$0xf]  ;;  %v13670_v36 = vld [vmem:[#allocation16 + $0x94] sm:$0xf0] }
0x14b4   : > { %6405 = vmatpush.bf16.msra.mxu1 %v11604_v14 }
0x14b5   : > { %7017 = vmatpush.bf16.msrb.mxu0 %v11730_v38  ;;  %v11633_v38 = vld [vmem:[#allocation16] sm:$0xf] }
0x14b6   : > { %v11634_v46 = vor.u32 %v13653_v13, %v11633_v38  ;;  %v11707_v38 = vld [vmem:[#allocation16 + $0x98] sm:$0xf0] }
0x14b8   : > { %6406 = vmatpush.bf16.msra.mxu1 %v11588_v21  ;;  %v11857_v21 = vld [vmem:[#allocation16 + $0x1c0] sm:$0xf] }
0x14b9   : > { %7018 = vmatpush.bf16.msrb.mxu0 %v11714_v52  ;;  %v11858_v24 = vor.u32 %v13709_v22, %v11857_v21  ;;  %v13693_v22 = vld [vmem:[#allocation16 + $0x14c] sm:$0xf0] }
0x14bb   : > { %7030 = vmatpush.bf16.msrb.mxu2 %v11858_v24 }
0x14bc   : > { %6407 = vmatpush.bf16.msra.mxu1 %v11572_v57  ;;  %v13659_v57 = vld [vmem:[#allocation16 + $0x44] sm:$0xf] }
0x14bd   : > { %7019 = vmatpush.bf16.msrb.mxu0 %v11698_v58 }
0x14c0   : > { %6408 = vmatpush.bf16.msra.mxu1 %v11556_v25  ;;  %v11670_v25 = vor.u32 %v13659_v57, %v11667_v23  ;;  %v11795_v23 = vld [vmem:[#allocation16 + $0x150] sm:$0xf0] }
0x14c1   : > { %7020 = vmatpush.bf16.msrb.mxu0 %v11682_v17  ;;  %v13697_v17 = vld [vmem:[#allocation16 + $0x16c] sm:$0xf0] }
0x14c2   : > { %v11810_v1 = vor.u32 %v13697_v17, %v11809_v15  ;;  %v11883_v15 = vld [vmem:[#allocation16 + $0x1f8] sm:$0xf0] }
0x14c4   : > { %6409 = vmatpush.bf16.msra.mxu1 %v11540_v28  ;;  %v11862_v28 = vor.u32 %v13707_v33, %v11859_v27  ;;  %v13674_v33 = vld [vmem:[#allocation16 + $0xb4] sm:$0xf0]  ;;  %v13672_v27 = vld [vmem:[#allocation16 + $0xac] sm:$0xf] }
0x14c5   : > { %7021 = vmatpush.bf16.msrb.mxu0 %v11666_v18  ;;  %v11793_v18 = vld [vmem:[#allocation16 + $0x140] sm:$0xf] }
0x14c6   : > { %v11794_v57 = vor.u32 %v13693_v22, %v11793_v18  ;;  %v11657_v22 = vld [vmem:[#allocation16 + $0x28] sm:$0xf] }
0x14c8   : > { %6410 = vmatpush.bf16.msra.mxu1 %v11524_v47  ;;  %v11841_v47 = vld [vmem:[#allocation16 + $0x1a0] sm:$0xf] }
0x14c9   : > { %v11842_v49 = vor.u32 %v13705_v6, %v11841_v47  ;;  %7022 = vmatpush.bf16.msrb.mxu0 %v11650_v31  ;;  %v11726_v47 = vor.u32 %v13672_v27, %v11723_v30  ;;  %v11777_v31 = vld [vmem:[#allocation16 + $0x120] sm:$0xf]  ;;  %v13689_v6 = vld [vmem:[#allocation16 + $0x12c] sm:$0xf0]  ;;  %v11659_v27 = vld [vmem:[#allocation16 + $0x38] sm:$0xf0] }
0x14ca   : > { %v13704_v30 = vld [vmem:[#allocation16 + $0x1ac] sm:$0xf] }
0x14cb   : > { %7031 = vmatpush.bf16.msrb.mxu2 %v11842_v49  ;;  %v11779_v49 = vld [vmem:[#allocation16 + $0x130] sm:$0xf0] }
0x14cc   : > { %6411 = vmatpush.bf16.msra.mxu1 %v11508_v32  ;;  %v13655_v32 = vld [vmem:[#allocation16 + $0x24] sm:$0xf] }
0x14cd   : > { %v11654_v34 = vor.u32 %v13655_v32, %v11651_v48  ;;  %7023 = vmatpush.bf16.msrb.mxu0 %v11634_v46  ;;  %v13687_v32 = vld [vmem:[#allocation16 + $0x124] sm:$0xf]  ;;  %v11778_v48 = vor.u32 %v13689_v6, %v11777_v31  ;;  %v13685_v46 = vld [vmem:[#allocation16 + $0x10c] sm:$0xf0]  ;;  %v11641_v6 = vld [vmem:[#allocation16 + $0x8] sm:$0xf] }
0x14cf   : > { %6412 = vmatmul.bf16.vlgmr.msra.gmra.mxu1 %v15403_v4  ;;  %v13671_v4 = vld [vmem:[#allocation16 + $0xa4] sm:$0xf] }
0x14d0   : > { %v11718_v54 = vor.u32 %v13671_v4, %v11715_v42  ;;  %7055 = vmatpush.bf16.msrb.mxu1 %v11878_v12  ;;  %v11635_v4 = vld [vmem:[#allocation16 + $0x10] sm:$0xf0]  ;;  %v11826_v42 = vor.u32 %v13701_v8, %v11825_v40  ;;  %v13676_v12 = vld [vmem:[#allocation16 + $0xcc] sm:$0xf]  ;;  %v11761_v40 = vld [vmem:[#allocation16 + $0x100] sm:$0xf] }
0x14d1   : > { %v6218_v19 = vpop.f32.mrf.mxu2  ;;  %7068 = vmatpush.bf16.msra.mxu0 %v11754_v26  ;;  %v13683_v8 = vld [vmem:[#allocation16 + $0x104] sm:$0xf]  ;;  %v11691_v26 = vld [vmem:[#allocation16 + $0x78] sm:$0xf0] }
0x14d2   : > { %7044 = vmatpush.bf16.msrb.mxu3 %v11718_v54  ;;  %v6219_v10 = vadd.f32 %v6218_v19, %v6201_v0  ;;  %v11638_v54 = vor.u32 %v13651_v41, %v11635_v4  ;;  %v11755_v0 = vld [vmem:[#allocation16 + $0xf8] sm:$0xf0]  ;;  %7032 = vmatpush.bf16.msrb.mxu2 %v11826_v42  ;;  %v11762_v41 = vor.u32 %v13685_v46, %v11761_v40  ;;  %v11763_v4 = vld [vmem:[#allocation16 + $0x110] sm:$0xf0]  ;;  %v13666_v42 = vld [vmem:[#allocation16 + $0x74] sm:$0xf0] }
0x14d3   : > { %v11694_v17 = vor.u32 %v13664_v62, %v11691_v26  ;;  %v11817_v46 = vld [vmem:[#allocation16 + $0x168] sm:$0xf] }
0x14d4   : > { %7056 = vmatpush.bf16.msrb.mxu1 %v11862_v28 }
0x14d6   : > { %7045 = vmatpush.bf16.msrb.mxu3 %v11702_v63  ;;  %v13680_v63 = vld [vmem:[#allocation16 + $0xec] sm:$0xf]  ;;  %7033 = vmatpush.bf16.msrb.mxu2 %v11810_v1  ;;  %v11673_v1 = vld [vmem:[#allocation16 + $0x48] sm:$0xf] }
0x14d7   : > { %v11758_v16 = vor.u32 %v13680_v63, %v11755_v0 }
0x14d8   : > { %7057 = vmatpush.bf16.msrb.mxu1 %v11846_v45  ;;  %v13668_v45 = vld [vmem:[#allocation16 + $0x8c] sm:$0xf] }
0x14d9   : > { %v6220_v55 = vpop.f32.mrf.mxu2  ;;  %v11710_v13 = vor.u32 %v13668_v45, %v11707_v38  ;;  %v11643_v45 = vld [vmem:[#allocation16 + $0x18] sm:$0xf0]  ;;  %v13700_v38 = vld [vmem:[#allocation16 + $0x18c] sm:$0xf] }
0x14da   : > { %7046 = vmatpush.bf16.msrb.mxu3 %v11686_v5  ;;  %v13699_v55 = vld [vmem:[#allocation16 + $0x184] sm:$0xf]  ;;  %7034 = vmatpush.bf16.msrb.mxu2 %v11794_v57  ;;  %v11849_v57 = vld [vmem:[#allocation16 + $0x1a8] sm:$0xf] }
0x14db   : > { %v11830_v58 = vor.u32 %v13699_v55, %v11827_v29  ;;  %v11766_v55 = vor.u32 %v13683_v8, %v11763_v4  ;;  %v13698_v8 = vld [vmem:[#allocation16 + $0x174] sm:$0xf0] }
0x14dd   : > { %7058 = vmatpush.bf16.msrb.mxu1 %v11830_v58  ;;  %v13714_v58 = vld [vmem:[#allocation16 + $0x1f4] sm:$0xf0] }
0x14de   : > { %7047 = vmatpush.bf16.msrb.mxu3 %v11670_v25  ;;  %v11721_v25 = vld [vmem:[#allocation16 + $0xa8] sm:$0xf]  ;;  %7035 = vmatpush.bf16.msrb.mxu2 %v11778_v48  ;;  %v11882_v0 = vor.u32 %v13714_v58, %v11881_v44  ;;  %v13694_v44 = vld [vmem:[#allocation16 + $0x154] sm:$0xf0]  ;;  %v13692_v58 = vld [vmem:[#allocation16 + $0x14c] sm:$0xf] }
0x14df   : > { %v11722_v50 = vor.u32 %v13674_v33, %v11721_v25  ;;  %v13706_v25 = vld [vmem:[#allocation16 + $0x1b4] sm:$0xf0]  ;;  %v13656_v33 = vld [vmem:[#allocation16 + $0x2c] sm:$0xf]  ;;  %v11833_v48 = vld [vmem:[#allocation16 + $0x188] sm:$0xf] }
0x14e1   : > { %v6231_v9 = vpop.f32.mrf.mxu3  ;;  %v15425_v11 = vpop.f32.mrf.mxu2 }
0x14e2   : > { %v6232_v14 = vadd.f32 %v6231_v9, %v6219_v10  ;;  %7048 = vmatpush.bf16.msrb.mxu3 %v11654_v34  ;;  %v6271_v61 = vadd.f32 %v15425_v11, %v6202_v37  ;;  %v11811_v10 = vld [vmem:[#allocation16 + $0x170] sm:$0xf0]  ;;  %v13678_v9 = vld [vmem:[#allocation16 + $0xd4] sm:$0xf0]  ;;  %v13691_v11 = vld [vmem:[#allocation16 + $0x144] sm:$0xf]  ;;  %v11782_v34 = vor.u32 %v13687_v32, %v11779_v49  ;;  %v11706_v37 = vor.u32 %v13670_v36, %v11705_v59 }
0x14e3   : > { %v11814_v7 = vor.u32 %v13695_v2, %v11811_v10  ;;  %v11738_v20 = vor.u32 %v13678_v9, %v11737_v3  ;;  %v11798_v24 = vor.u32 %v13691_v11, %v11795_v23  ;;  %7036 = vmatpush.bf16.msrb.mxu2 %v11762_v41  ;;  %v13662_v2 = vld [vmem:[#allocation16 + $0x54] sm:$0xf0]  ;;  %v13660_v9 = vld [vmem:[#allocation16 + $0x4c] sm:$0xf] }
0x14e4   : > { %v11674_v3 = vor.u32 %v13662_v2, %v11673_v1  ;;  %v13658_v11 = vld [vmem:[#allocation16 + $0x34] sm:$0xf0]  ;;  %v13652_v36 = vld [vmem:[#allocation16 + $0xc] sm:$0xf] }
0x14e5   : > { %7059 = vmatpush.bf16.msrb.mxu1 %v11814_v7  ;;  %7069 = vmatpush.bf16.msra.mxu0 %v11738_v20  ;;  %v13710_v7 = vld [vmem:[#allocation16 + $0x1d4] sm:$0xf0]  ;;  %v11867_v20 = vld [vmem:[#allocation16 + $0x1d8] sm:$0xf0]  ;;  %v13696_v41 = vld [vmem:[#allocation16 + $0x16c] sm:$0xf] }
0x14e6   : > { %7049 = vmatpush.bf16.msrb.mxu3 %v11638_v54  ;;  %v13654_v32 = vld [vmem:[#allocation16 + $0x14] sm:$0xf0] }
0x14e7   : > { %7081 = vmatpush.bf16.msra.mxu2 %v11882_v0  ;;  %v13702_v59 = vld [vmem:[#allocation16 + $0x194] sm:$0xf0]  ;;  %v11803_v0 = vld [vmem:[#allocation16 + $0x158] sm:$0xf0] }
0x14e9   : > { %v6233_v19 = vpop.f32.mrf.mxu3  ;;  %v6272_v51 = vpop.f32.mrf.mxu2  ;;  %7060 = vmatpush.bf16.msrb.mxu1 %v11798_v24  ;;  %7070 = vmatpush.bf16.msra.mxu0 %v11722_v50  ;;  %v11658_v24 = vor.u32 %v13658_v11, %v11657_v22  ;;  %v11662_v50 = vor.u32 %v13656_v33, %v11659_v27  ;;  %v6480_v22 = vld [vmem:[%s15690_s26] sm:$0x3]  ;;  %s15694_s26 = sld [smem:[#allocation55_spill]] }
0x14ea   : > { %7094 = vmatpush.bf16.msra.mxu3 %v11758_v16  ;;  %v13712_v16 = vld [vmem:[#allocation16 + $0x1ec] sm:$0xf] }
0x14ed   : > { %v6244_v52 = vpop.f32.mrf.mxu0  ;;  %7061 = vmatpush.bf16.msrb.mxu1 %v11782_v34  ;;  %7071 = vmatpush.bf16.msra.mxu0 %v11706_v37  ;;  %v11642_v34 = vor.u32 %v13654_v32, %v11641_v6  ;;  %v11646_v37 = vor.u32 %v13652_v36, %v11643_v45  ;;  %v13553_v6 = vld [vmem:[#allocation15 + $0xec] sm:$0xf0]  ;;  %v12257_v32 = vld [vmem:[#allocation15 + $0x2e0] sm:$0xf] }
0x14ee   : > { %v15428_v56 = vadd.f32 %v6244_v52, %v6232_v14  ;;  %v11739_v14 = vld [vmem:[#allocation16 + $0xd8] sm:$0xf0]  ;;  %v11689_v52 = vld [vmem:[#allocation16 + $0x68] sm:$0xf]  ;;  %v11985_v36 = vld [vmem:[#allocation15 + $0xc0] sm:$0xf] }
0x14ef   : > { %v11742_v21 = vor.u32 %v13676_v12, %v11739_v14  ;;  %v11690_v29 = vor.u32 %v13666_v42, %v11689_v52  ;;  %v11675_v14 = vld [vmem:[#allocation16 + $0x58] sm:$0xf0]  ;;  %v11818_v52 = vor.u32 %v13698_v8, %v11817_v46 }
0x14f0   : > { %v11819_v42 = vld [vmem:[#allocation16 + $0x178] sm:$0xf0] }
0x14f1   : > { %v6283_v5 = vpop.f32.mrf.mxu3  ;;  %v15431_v39 = vpop.f32.mrf.mxu2  ;;  %7095 = vmatpush.bf16.msra.mxu3 %v11742_v21  ;;  %7062 = vmatpush.bf16.msrb.mxu1 %v11766_v55  ;;  %v11678_v21 = vor.u32 %v13660_v9, %v11675_v14  ;;  %v11822_v55 = vor.u32 %v13696_v41, %v11819_v42  ;;  %v6422_v9 = vld [vmem:[%s15689_s28] sm:$0x3]  ;;  %v13686_v14 = vld [vmem:[#allocation16 + $0x114] sm:$0xf0]  ;;  %s15693_s28 = sld [smem:[#allocation54_spill]] }
0x14f2   : > { %v6284_v60 = vadd.f32 %v6283_v5, %v6271_v61  ;;  %v11886_v61 = vor.u32 %v13712_v16, %v11883_v15  ;;  %7072 = vmatpush.bf16.msra.mxu0 %v11690_v29  ;;  %v11865_v5 = vld [vmem:[#allocation16 + $0x1c8] sm:$0xf]  ;;  %v11806_v16 = vor.u32 %v13692_v58, %v11803_v0  ;;  %v6440_v58 = vperm.slane %v6422_v9, 1 }
0x14f3   : > { %v11866_v12 = vor.u32 %v13710_v7, %v11865_v5  ;;  %v11801_v29 = vld [vmem:[#allocation16 + $0x148] sm:$0xf] }
0x14f4   : > { %v11802_v62 = vor.u32 %v13694_v44, %v11801_v29  ;;  %v11785_v15 = vld [vmem:[#allocation16 + $0x128] sm:$0xf]  ;;  %v12225_v29 = vld [vmem:[#allocation15 + $0x2a0] sm:$0xf]  ;;  %v13609_v44 = vld [vmem:[#allocation15 + $0x2ac] sm:$0xf0] }
0x14f5   : > { %v6246_v28 = vpop.f32.mrf.mxu0  ;;  %7096 = vmatpush.bf16.msra.mxu3 %v11726_v47  ;;  %7107 = vmatpush.bf16.msra.mxu1 %v11886_v61  ;;  %v11851_v47 = vld [vmem:[#allocation16 + $0x1b8] sm:$0xf0]  ;;  %v13688_v61 = vld [vmem:[#allocation16 + $0x12c] sm:$0xf] }
0x14f6   : > { %7073 = vmatpush.bf16.msra.mxu0 %v11674_v3  ;;  %7082 = vmatpush.bf16.msra.mxu2 %v11866_v12  ;;  %v11850_v28 = vor.u32 %v13706_v25, %v11849_v57  ;;  %v11854_v31 = vor.u32 %v13704_v30, %v11851_v47  ;;  %v11787_v3 = vld [vmem:[#allocation16 + $0x138] sm:$0xf0]  ;;  %v11769_v12 = vld [vmem:[#allocation16 + $0x108] sm:$0xf]  ;;  %v6439_v57 = vperm.slane %v6422_v9, 0 }
0x14f7   : > { %v11790_v7 = vor.u32 %v13688_v61, %v11787_v3  ;;  %v12001_v47 = vld [vmem:[#allocation15 + $0xe0] sm:$0xf]  ;;  %v13605_v61 = vld [vmem:[#allocation15 + $0x28c] sm:$0xf0] }
0x14f9   : > { %v6285_v19 = vpop.f32.mrf.mxu3  ;;  %v6324_v51 = vpop.f32.mrf.mxu2  ;;  %7097 = vmatpush.bf16.msra.mxu3 %v11710_v13  ;;  %v11835_v13 = vld [vmem:[#allocation16 + $0x198] sm:$0xf0] }
0x14fa   : > { %7074 = vmatpush.bf16.msra.mxu0 %v11658_v24  ;;  %7083 = vmatpush.bf16.msra.mxu2 %v11850_v28  ;;  %v11834_v51 = vor.u32 %v13702_v59, %v11833_v48  ;;  %v11838_v40 = vor.u32 %v13700_v38, %v11835_v13  ;;  %v6482_v24 = vperm.slane %v6480_v22, 0  ;;  %v13617_v48 = vld [vmem:[#allocation15 + $0x2ec] sm:$0xf0]  ;;  %v12241_v38 = vld [vmem:[#allocation15 + $0x2c0] sm:$0xf] }
0x14fb   : > { %v12258_v59 = vor.u32 %v13617_v48, %v12257_v32  ;;  %v13613_v13 = vld [vmem:[#allocation15 + $0x2cc] sm:$0xf0]  ;;  %v6203_v32 = vperm.slane %v15422_v43, 2 }
0x14fc   : > { %v12242_v41 = vor.u32 %v13613_v13, %v12241_v38  ;;  %v13645_v38 = vld [vmem:[#allocation15 + $0x3cc] sm:$0xf0] }
0x14fd   : > { %v6296_v54 = vpop.f32.mrf.mxu0  ;;  %7098 = vmatpush.bf16.msra.mxu3 %v11694_v17  ;;  %v13690_v17 = vld [vmem:[#allocation16 + $0x134] sm:$0xf0] }
0x14fe   : > { %v15433_v63 = vadd.f32 %v6296_v54, %v6284_v60  ;;  %v13708_v60 = vld [vmem:[#allocation16 + $0x1cc] sm:$0xf]  ;;  %7075 = vmatpush.bf16.msra.mxu0 %v11642_v34  ;;  %7084 = vmatpush.bf16.msra.mxu2 %v11834_v51  ;;  %v11786_v2 = vor.u32 %v13690_v17, %v11785_v15  ;;  %v12002_v34 = vor.u32 %v13553_v6, %v12001_v47  ;;  %v13541_v15 = vld [vmem:[#allocation15 + $0x8c] sm:$0xf0]  ;;  %v12209_v17 = vld [vmem:[#allocation15 + $0x280] sm:$0xf] }
0x14ff   : > { %v11870_v18 = vor.u32 %v13708_v60, %v11867_v20  ;;  %v13684_v60 = vld [vmem:[#allocation16 + $0x10c] sm:$0xf]  ;;  %v11770_v20 = vor.u32 %v13686_v14, %v11769_v12  ;;  %v12210_v12 = vor.u32 %v13605_v61, %v12209_v17  ;;  %v11937_v14 = vld [vmem:[#allocation15 + $0x60] sm:$0xf]  ;;  %v13597_v6 = vld [vmem:[#allocation15 + $0x24c] sm:$0xf0] }
0x1500   : > { %v11889_v17 = vld [vmem:[#allocation15] sm:$0xf]  ;;  %v13525_v61 = vld [vmem:[#allocation15 + $0xc] sm:$0xf0] }
0x1501   : > { %v15435_v10 = vpop.f32.mrf.mxu3  ;;  %7099 = vmatpush.bf16.msra.mxu3 %v11678_v21  ;;  %7108 = vmatpush.bf16.msra.mxu1 %v11870_v18  ;;  %v11771_v21 = vld [vmem:[#allocation16 + $0x118] sm:$0xf0] }
0x1502   : > { %7085 = vmatpush.bf16.msra.mxu2 %v11818_v52  ;;  %v11774_v11 = vor.u32 %v13684_v60, %v11771_v21  ;;  %v11969_v52 = vld [vmem:[#allocation15 + $0xa0] sm:$0xf] }
0x1503   : > { %v12193_v21 = vld [vmem:[#allocation15 + $0x260] sm:$0xf] }
0x1505   : > { %v6298_v23 = vpop.f32.mrf.mxu0  ;;  %7100 = vmatpush.bf16.msra.mxu3 %v11662_v50  ;;  %7109 = vmatpush.bf16.msra.mxu1 %v11854_v31 }
0x1506   : > { %7086 = vmatpush.bf16.msra.mxu2 %v11802_v62  ;;  %v15448_v23 = vld [vmem:[%s15691_s16] sm:$0x3]  ;;  %v6483_v62 = vperm.slane %v6480_v22, 1  ;;  %v13601_v22 = vld [vmem:[#allocation15 + $0x26c] sm:$0xf0]  ;;  %s15695_s16 = sld [smem:[#allocation56_spill]] }
0x1507   : > { %v6490_v27 = vperm.slane %v15448_v23, 0  ;;  %v6491_v3 = vperm.slane %v15448_v23, 1  ;;  %v12194_v23 = vor.u32 %v13601_v22, %v12193_v21  ;;  %v13573_v21 = vld [vmem:[#allocation15 + $0x18c] sm:$0xf0]  ;;  %v12337_v22 = vld [vmem:[#allocation15 + $0x380] sm:$0xf] }
0x1509   : > { %v6337_v49 = vpop.f32.mrf.mxu3  ;;  %7101 = vmatpush.bf16.msra.mxu3 %v11646_v37  ;;  %7110 = vmatpush.bf16.msra.mxu1 %v11838_v40  ;;  %v13549_v37 = vld [vmem:[#allocation15 + $0xcc] sm:$0xf0] }
0x150a   : > { %7087 = vmatpush.bf16.msra.mxu2 %v11786_v2  ;;  %v11986_v8 = vor.u32 %v13549_v37, %v11985_v36  ;;  %v12369_v37 = vld [vmem:[#allocation15 + $0x3c0] sm:$0xf] }
0x150c   : > { %v15437_v19 = vpop.f32.mrf.mxu1 }
0x150d   : > { %7111 = vmatpush.bf16.msra.mxu1 %v11822_v55  ;;  %v13545_v55 = vld [vmem:[#allocation15 + $0xac] sm:$0xf0] }
0x150e   : > { %7088 = vmatpush.bf16.msra.mxu2 %v11770_v20  ;;  %v11970_v0 = vor.u32 %v13545_v55, %v11969_v52  ;;  %v13537_v20 = vld [vmem:[#allocation15 + $0x6c] sm:$0xf0]  ;;  %v12161_v52 = vld [vmem:[#allocation15 + $0x220] sm:$0xf] }
0x150f   : > { %v15439_v4 = vpop.f32.mrf.mxu0  ;;  %v13593_v55 = vld [vmem:[#allocation15 + $0x22c] sm:$0xf0] }
0x1511   : > { %v15441_v54 = vpop.f32.mrf.mxu2  ;;  %7112 = vmatpush.bf16.msra.mxu1 %v11806_v16  ;;  %v11953_v16 = vld [vmem:[#allocation15 + $0x80] sm:$0xf] }
0x1514   : > { %v6259_v26 = vpop.f32.mrf.mxu1 }
0x1515   : > { %7113 = vmatpush.bf16.msra.mxu1 %v11790_v7  ;;  %v12226_v26 = vor.u32 %v13609_v44, %v12225_v29  ;;  %v11954_v7 = vor.u32 %v13541_v15, %v11953_v16  ;;  %v12370_v44 = vor.u32 %v13645_v38, %v12369_v37  ;;  %v12162_v15 = vor.u32 %v13593_v55, %v12161_v52  ;;  %v13565_v37 = vld [vmem:[#allocation15 + $0x14c] sm:$0xf0]  ;;  %v11971_v52 = vld [vmem:[#allocation15 + $0xb0] sm:$0xf0]  ;;  %v13607_v55 = vld [vmem:[#allocation15 + $0x2a4] sm:$0xf] }
0x1517   : > { %v6350_v1 = vpop.f32.mrf.mxu0 }
0x1519   : > { %v6376_v5 = vpop.f32.mrf.mxu2  ;;  %7114 = vmatpush.bf16.msra.mxu1 %v11774_v11  ;;  %v12129_v11 = vld [vmem:[#allocation15 + $0x1e0] sm:$0xf] }
0x151c   : > { %v15444_v18 = vpop.f32.mrf.mxu1 }
0x1521   : > { %v6463_v25 = vpop.f32.mrf.mxu2 }
0x1522   : > { %v6464_v33 = vadd.f32 %v6463_v25, %v6439_v57  ;;  %v15451_v28 = vpop.f32.mrf.mxu3  ;;  %v12385_v25 = vld [vmem:[#allocation15 + $0x3e0] sm:$0xf] }
0x1524   : > { %v6486_v50 = vmul.f32 %v6482_v24, %v6464_v33  ;;  %v6311_v30 = vpop.f32.mrf.mxu1  ;;  %v13585_v24 = vld [vmem:[#allocation15 + $0x1ec] sm:$0xf0] }
0x1525   : > { %v13649_v33 = vld [vmem:[#allocation15 + $0x3ec] sm:$0xf0] }
0x1526   : > { %v6494_v31 = vadd.f32 %v6490_v27, %v6486_v50  ;;  %v11938_v27 = vor.u32 %v13537_v20, %v11937_v14  ;;  %v11921_v50 = vld [vmem:[#allocation15 + $0x40] sm:$0xf]  ;;  %v13533_v30 = vld [vmem:[#allocation15 + $0x4c] sm:$0xf0] }
0x1527   : > { %v11922_v13 = vor.u32 %v13533_v30, %v11921_v50  ;;  %v12065_v30 = vld [vmem:[#allocation15 + $0x160] sm:$0xf] }
0x1528   : > { %v6496_v49 = vmax.f32 %v6494_v31, 0.0  ;;  %v12177_v31 = vld [vmem:[#allocation15 + $0x240] sm:$0xf] }
0x1529   : > { %v6465_v45 = vpop.f32.mrf.mxu2 }
0x152a   : > { %v6694_v51 = vpack.c.bf16 %v6496_v49, %v6496_v49  ;;  %v6389_v40 = vpop.f32.mrf.mxu3  ;;  %v12130_v49 = vor.u32 %v13585_v24, %v12129_v11  ;;  %v13581_v45 = vld [vmem:[#allocation15 + $0x1cc] sm:$0xf0]  ;;  %v6258_v24 = vadd.f32 %v15437_v19, %v15428_v56 }
0x152b   : > { %v12178_v40 = vor.u32 %v13597_v6, %v12177_v31  ;;  %v13637_v11 = vld [vmem:[#allocation15 + $0x38c] sm:$0xf0]  ;;  %v13547_v6 = vld [vmem:[#allocation15 + $0xc4] sm:$0xf] }
0x152c   : > { %7024 = vmatmul.bf16.vlgmr.msrb.gmra.mxu0 %v6694_v51  ;;  %7050 = vmatmul.bf16.vlgmr.msrb.gmra.mxu3 %v6694_v51  ;;  %v15453_v46 = vpop.f32.mrf.mxu1  ;;  %v12338_v50 = vor.u32 %v13637_v11, %v12337_v22  ;;  %v13633_v31 = vld [vmem:[#allocation15 + $0x36c] sm:$0xf0]  ;;  %v13535_v22 = vld [vmem:[#allocation15 + $0x64] sm:$0xf]  ;;  %v11939_v11 = vld [vmem:[#allocation15 + $0x70] sm:$0xf0] }
0x152d   : > { %7760 = vmatpush.bf16.msrb.mxu0 %v12002_v34  ;;  %7786 = vmatpush.bf16.msrb.mxu3 %v12258_v59  ;;  %v15455_v42 = vpop.f32.mrf.mxu0  ;;  %v12386_v34 = vor.u32 %v13649_v33, %v12385_v25  ;;  %v12113_v59 = vld [vmem:[#allocation15 + $0x1c0] sm:$0xf] }
0x152e   : > { %v12114_v29 = vor.u32 %v13581_v45, %v12113_v59  ;;  %v12049_v45 = vld [vmem:[#allocation15 + $0x140] sm:$0xf] }
0x1531   : > { %7761 = vmatpush.bf16.msrb.mxu0 %v11986_v8  ;;  %7787 = vmatpush.bf16.msrb.mxu3 %v12242_v41  ;;  %v11905_v8 = vld [vmem:[#allocation15 + $0x20] sm:$0xf]  ;;  %v13529_v41 = vld [vmem:[#allocation15 + $0x2c] sm:$0xf0] }
0x1532   : > { %v6476_v1 = vpop.f32.mrf.mxu3  ;;  %v11906_v16 = vor.u32 %v13529_v41, %v11905_v8  ;;  %v13629_v8 = vld [vmem:[#allocation15 + $0x34c] sm:$0xf0]  ;;  %v13543_v41 = vld [vmem:[#allocation15 + $0xa4] sm:$0xf] }
0x1533   : > { %v6477_v2 = vadd.f32 %v6476_v1, %v6440_v58  ;;  %v6323_v58 = vadd.f32 %v15431_v39, %v6203_v32  ;;  %v12003_v39 = vld [vmem:[#allocation15 + $0xf0] sm:$0xf0] }
0x1534   : > { %v6363_v5 = vpop.f32.mrf.mxu1  ;;  %v11987_v32 = vld [vmem:[#allocation15 + $0xd0] sm:$0xf0] }
0x1535   : > { %7762 = vmatpush.bf16.msrb.mxu0 %v11970_v0  ;;  %7788 = vmatpush.bf16.msrb.mxu3 %v12226_v26  ;;  %v6487_v9 = vmul.f32 %v6483_v62, %v6477_v2  ;;  %v6402_v60 = vpop.f32.mrf.mxu0  ;;  %v13577_v62 = vld [vmem:[#allocation15 + $0x1ac] sm:$0xf0]  ;;  %v12353_v0 = vld [vmem:[#allocation15 + $0x3a0] sm:$0xf]  ;;  %v6336_v1 = vadd.f32 %v15435_v10, %v6323_v58  ;;  %v11990_v38 = vor.u32 %v13547_v6, %v11987_v32  ;;  %v11923_v6 = vld [vmem:[#allocation15 + $0x50] sm:$0xf0] }
0x1536   : > { %v13641_v26 = vld [vmem:[#allocation15 + $0x3ac] sm:$0xf0]  ;;  %v12081_v2 = vld [vmem:[#allocation15 + $0x180] sm:$0xf]  ;;  %v12259_v60 = vld [vmem:[#allocation15 + $0x2f0] sm:$0xf0] }
0x1537   : > { %v6495_v57 = vadd.f32 %v6491_v3, %v6487_v9  ;;  %v12145_v3 = vld [vmem:[#allocation15 + $0x200] sm:$0xf]  ;;  %v13589_v5 = vld [vmem:[#allocation15 + $0x20c] sm:$0xf0]  ;;  %v12354_v14 = vor.u32 %v13641_v26, %v12353_v0  ;;  %v13615_v9 = vld [vmem:[#allocation15 + $0x2e4] sm:$0xf]  ;;  %v6349_v20 = vadd.f32 %v15439_v4, %v6336_v1  ;;  %v11974_v26 = vor.u32 %v13543_v41, %v11971_v52 }
0x1538   : > { %v12146_v10 = vor.u32 %v13589_v5, %v12145_v3  ;;  %v13569_v4 = vld [vmem:[#allocation15 + $0x16c] sm:$0xf0]  ;;  %v11955_v1 = vld [vmem:[#allocation15 + $0x90] sm:$0xf0]  ;;  %v13575_v52 = vld [vmem:[#allocation15 + $0x1a4] sm:$0xf] }
0x1539   : > { %7763 = vmatpush.bf16.msrb.mxu0 %v11954_v7  ;;  %7789 = vmatpush.bf16.msrb.mxu3 %v12210_v12  ;;  %v6497_v47 = vmax.f32 %v6495_v57, 0.0  ;;  %v13551_v7 = vld [vmem:[#allocation15 + $0xe4] sm:$0xf]  ;;  %v11890_v57 = vor.u32 %v13525_v61, %v11889_v17  ;;  %v6362_v25 = vadd.f32 %v15453_v46, %v6349_v20  ;;  %v12066_v46 = vor.u32 %v13569_v4, %v12065_v30  ;;  %v13561_v0 = vld [vmem:[#allocation15 + $0x12c] sm:$0xf0] }
0x153a   : > { %v6478_v48 = vpop.f32.mrf.mxu3  ;;  %v12006_v33 = vor.u32 %v13551_v7, %v12003_v39  ;;  %v13625_v17 = vld [vmem:[#allocation15 + $0x32c] sm:$0xf0]  ;;  %v13539_v61 = vld [vmem:[#allocation15 + $0x84] sm:$0xf]  ;;  %v12273_v39 = vld [vmem:[#allocation15 + $0x300] sm:$0xf]  ;;  %v11942_v4 = vor.u32 %v13535_v22, %v11939_v11 }
0x153b   : > { %v15459_v36 = vpack.c.bf16 %v6497_v47, %v6497_v47  ;;  %v12321_v47 = vld [vmem:[#allocation15 + $0x360] sm:$0xf]  ;;  %v13611_v48 = vld [vmem:[#allocation15 + $0x2c4] sm:$0xf]  ;;  %v15471_v56 = vpack.c.bf16 %v6362_v25, %v6362_v25  ;;  %v12195_v25 = vld [vmem:[#allocation15 + $0x270] sm:$0xf0] }
0x153c   : > { %7076 = vmatmul.bf16.vlgmr.msra.gmra.mxu0 %v6694_v51  ;;  %7102 = vmatmul.bf16.vlgmr.msra.gmra.mxu3 %v6694_v51  ;;  %v12097_v51 = vld [vmem:[#allocation15 + $0x1a0] sm:$0xf]  ;;  %v12322_v59 = vor.u32 %v13633_v31, %v12321_v47  ;;  %v13531_v31 = vld [vmem:[#allocation15 + $0x44] sm:$0xf]  ;;  %v12067_v22 = vld [vmem:[#allocation15 + $0x170] sm:$0xf0] }
0x153d   : > { %7764 = vmatpush.bf16.msrb.mxu0 %v11938_v27  ;;  %7790 = vmatpush.bf16.msrb.mxu3 %v12194_v23  ;;  %v12098_v12 = vor.u32 %v13577_v62, %v12097_v51  ;;  %v12262_v27 = vor.u32 %v13615_v9, %v12259_v60  ;;  %v12082_v23 = vor.u32 %v13573_v21, %v12081_v2  ;;  %v12033_v62 = vld [vmem:[#allocation15 + $0x120] sm:$0xf]  ;;  %v13603_v2 = vld [vmem:[#allocation15 + $0x284] sm:$0xf]  ;;  %v13621_v21 = vld [vmem:[#allocation15 + $0x30c] sm:$0xf0] }
0x153e   : > { %7037 = vmatmul.bf16.vlgmr.msrb.gmra.mxu2 %v15459_v36  ;;  %7063 = vmatmul.bf16.vlgmr.msrb.gmra.mxu1 %v15459_v36  ;;  %v12050_v51 = vor.u32 %v13565_v37, %v12049_v45  ;;  %v11958_v60 = vor.u32 %v13539_v61, %v11955_v1  ;;  %v13643_v45 = vld [vmem:[#allocation15 + $0x3c4] sm:$0xf]  ;;  %v12083_v1 = vld [vmem:[#allocation15 + $0x190] sm:$0xf0] }
0x153f   : > { %7773 = vmatpush.bf16.msrb.mxu2 %v12130_v49  ;;  %7799 = vmatpush.bf16.msrb.mxu1 %v12386_v34  ;;  %v12243_v49 = vld [vmem:[#allocation15 + $0x2d0] sm:$0xf0]  ;;  %v15469_v34 = vpack.c.bf16 %v6258_v24, %v6258_v24 }
0x1541   : > { %7765 = vmatpush.bf16.msrb.mxu0 %v11922_v13  ;;  %7791 = vmatpush.bf16.msrb.mxu3 %v12178_v40  ;;  %v12246_v13 = vor.u32 %v13611_v48, %v12243_v49  ;;  %v12305_v40 = vld [vmem:[#allocation15 + $0x340] sm:$0xf]  ;;  %v13579_v48 = vld [vmem:[#allocation15 + $0x1c4] sm:$0xf]  ;;  %v12115_v49 = vld [vmem:[#allocation15 + $0x1d0] sm:$0xf0] }
0x1542   : > { %v12306_v58 = vor.u32 %v13629_v8, %v12305_v40  ;;  %v11907_v40 = vld [vmem:[#allocation15 + $0x30] sm:$0xf0] }
0x1543   : > { %7774 = vmatpush.bf16.msrb.mxu2 %v12114_v29  ;;  %7800 = vmatpush.bf16.msrb.mxu1 %v12370_v44  ;;  %v12227_v29 = vld [vmem:[#allocation15 + $0x2b0] sm:$0xf0]  ;;  %v6204_v44 = vperm.slane %v15422_v43, 3 }
0x1544   : > { %v12211_v43 = vld [vmem:[#allocation15 + $0x290] sm:$0xf0] }
0x1545   : > { %7766 = vmatpush.bf16.msrb.mxu0 %v11906_v16  ;;  %7792 = vmatpush.bf16.msrb.mxu3 %v12162_v15  ;;  %v12230_v16 = vor.u32 %v13607_v55, %v12227_v29  ;;  %v12289_v15 = vld [vmem:[#allocation15 + $0x320] sm:$0xf]  ;;  %v6375_v3 = vadd.f32 %v15441_v54, %v6204_v44  ;;  %v12214_v20 = vor.u32 %v13603_v2, %v12211_v43  ;;  %v13599_v54 = vld [vmem:[#allocation15 + $0x264] sm:$0xf]  ;;  %v12099_v55 = vld [vmem:[#allocation15 + $0x1b0] sm:$0xf0] }
0x1546   : > { %v12290_v7 = vor.u32 %v13625_v17, %v12289_v15  ;;  %v12198_v32 = vor.u32 %v13599_v54, %v12195_v25  ;;  %v13591_v29 = vld [vmem:[#allocation15 + $0x224] sm:$0xf]  ;;  %v12163_v44 = vld [vmem:[#allocation15 + $0x230] sm:$0xf0]  ;;  %v13550_v25 = vld [vmem:[#allocation15 + $0xd4] sm:$0xf0] }
0x1547   : > { %7775 = vmatpush.bf16.msrb.mxu2 %v12098_v12  ;;  %7801 = vmatpush.bf16.msrb.mxu1 %v12354_v14  ;;  %v12017_v12 = vld [vmem:[#allocation15 + $0x100] sm:$0xf]  ;;  %v13557_v14 = vld [vmem:[#allocation15 + $0x10c] sm:$0xf0]  ;;  %v6388_v9 = vadd.f32 %v15451_v28, %v6375_v3  ;;  %v13571_v15 = vld [vmem:[#allocation15 + $0x184] sm:$0xf]  ;;  %v12166_v17 = vor.u32 %v13591_v29, %v12163_v44 }
0x1548   : > { %v12018_v28 = vor.u32 %v13557_v14, %v12017_v12  ;;  %v13587_v2 = vld [vmem:[#allocation15 + $0x204] sm:$0xf]  ;;  %v12147_v43 = vld [vmem:[#allocation15 + $0x210] sm:$0xf0]  ;;  %v12265_v12 = vld [vmem:[#allocation15 + $0x2e8] sm:$0xf] }
0x1549   : > { %7767 = vmatpush.bf16.msrb.mxu0 %v11890_v57  ;;  %7793 = vmatpush.bf16.msrb.mxu3 %v12146_v10  ;;  %v13583_v57 = vld [vmem:[#allocation15 + $0x1e4] sm:$0xf]  ;;  %v12131_v10 = vld [vmem:[#allocation15 + $0x1f0] sm:$0xf0]  ;;  %v6401_v24 = vadd.f32 %v15455_v42, %v6388_v9  ;;  %v13618_v14 = vld [vmem:[#allocation15 + $0x2f4] sm:$0xf0]  ;;  %v12086_v9 = vor.u32 %v13571_v15, %v12083_v1 }
0x154a   : > { %v12134_v47 = vor.u32 %v13583_v57, %v12131_v10  ;;  %v13635_v3 = vld [vmem:[#allocation15 + $0x384] sm:$0xf]  ;;  %v12266_v57 = vor.u32 %v13618_v14, %v12265_v12  ;;  %v12323_v54 = vld [vmem:[#allocation15 + $0x370] sm:$0xf0]  ;;  %v11945_v15 = vld [vmem:[#allocation15 + $0x68] sm:$0xf] }
0x154b   : > { %7776 = vmatpush.bf16.msrb.mxu2 %v12082_v23  ;;  %7802 = vmatpush.bf16.msrb.mxu1 %v12338_v50  ;;  %v6310_v23 = vadd.f32 %v15444_v18, %v15433_v63  ;;  %v12274_v50 = vor.u32 %v13621_v21, %v12273_v39  ;;  %v12371_v63 = vld [vmem:[#allocation15 + $0x3d0] sm:$0xf0]  ;;  %v13567_v21 = vld [vmem:[#allocation15 + $0x164] sm:$0xf]  ;;  %v13538_v1 = vld [vmem:[#allocation15 + $0x74] sm:$0xf0] }
0x154c   : > { %v15473_v19 = vpop.f32.mrf.mxu1  ;;  %7768 = vmatmul.bf16.vlgmr.msrb.gmra.mxu0 %v15469_v34  ;;  %7794 = vmatmul.bf16.vlgmr.msrb.gmra.mxu3 %v15471_v56  ;;  %v12374_v41 = vor.u32 %v13643_v45, %v12371_v63  ;;  %v13631_v10 = vld [vmem:[#allocation15 + $0x364] sm:$0xf]  ;;  %v12035_v63 = vld [vmem:[#allocation15 + $0x130] sm:$0xf0]  ;;  %v11946_v14 = vor.u32 %v13538_v1, %v11945_v15  ;;  %v11995_v1 = vld [vmem:[#allocation15 + $0xd8] sm:$0xf0] }
0x154d   : > { %7812 = vmatpush.bf16.msra.mxu0 %v12006_v33  ;;  %7838 = vmatpush.bf16.msra.mxu3 %v12262_v27  ;;  %v13647_v33 = vld [vmem:[#allocation15 + $0x3e4] sm:$0xf]  ;;  %v12387_v27 = vld [vmem:[#allocation15 + $0x3f0] sm:$0xf0]  ;;  %v6414_v30 = vadd.f32 %v15473_v19, %v6401_v24  ;;  %v15486_v18 = vpack.c.bf16 %v6310_v23, %v6310_v23  ;;  %v11926_v19 = vor.u32 %v13531_v31, %v11923_v6  ;;  %v11993_v24 = vld [vmem:[#allocation15 + $0xc8] sm:$0xf] }
0x154e   : > { %7089 = vmatmul.bf16.vlgmr.msra.gmra.mxu2 %v15459_v36  ;;  %7115 = vmatmul.bf16.vlgmr.msra.gmra.mxu1 %v15459_v36  ;;  %v12034_v36 = vor.u32 %v13561_v0, %v12033_v62  ;;  %v12390_v42 = vor.u32 %v13647_v33, %v12387_v27  ;;  %v12102_v0 = vor.u32 %v13575_v52, %v12099_v55  ;;  %v12249_v33 = vld [vmem:[#allocation15 + $0x2c8] sm:$0xf]  ;;  %v13614_v27 = vld [vmem:[#allocation15 + $0x2d4] sm:$0xf0]  ;;  %v13627_v31 = vld [vmem:[#allocation15 + $0x344] sm:$0xf] }
0x154f   : > { %7777 = vmatpush.bf16.msrb.mxu2 %v12066_v46  ;;  %7803 = vmatpush.bf16.msrb.mxu1 %v12322_v59  ;;  %v13595_v46 = vld [vmem:[#allocation15 + $0x244] sm:$0xf]  ;;  %v12179_v59 = vld [vmem:[#allocation15 + $0x250] sm:$0xf0]  ;;  %v15488_v37 = vpack.c.bf16 %v6414_v30, %v6414_v30  ;;  %v12070_v23 = vor.u32 %v13567_v21, %v12067_v22  ;;  %v12217_v52 = vld [vmem:[#allocation15 + $0x288] sm:$0xf] }
0x1550   : > { %v12182_v8 = vor.u32 %v13595_v46, %v12179_v59  ;;  %v12051_v30 = vld [vmem:[#allocation15 + $0x150] sm:$0xf0]  ;;  %v13559_v45 = vld [vmem:[#allocation15 + $0x124] sm:$0xf]  ;;  %v13606_v55 = vld [vmem:[#allocation15 + $0x294] sm:$0xf0] }
0x1551   : > { %7813 = vmatpush.bf16.msra.mxu0 %v11990_v38  ;;  %7839 = vmatpush.bf16.msra.mxu3 %v12246_v13  ;;  %v12118_v38 = vor.u32 %v13579_v48, %v12115_v49  ;;  %v13527_v13 = vld [vmem:[#allocation15 + $0x24] sm:$0xf]  ;;  %v12307_v6 = vld [vmem:[#allocation15 + $0x350] sm:$0xf0]  ;;  %v12233_v48 = vld [vmem:[#allocation15 + $0x2a8] sm:$0xf]  ;;  %v12038_v29 = vor.u32 %v13559_v45, %v12035_v63 }
0x1552   : > { %v11910_v62 = vor.u32 %v13527_v13, %v11907_v40  ;;  %v13610_v49 = vld [vmem:[#allocation15 + $0x2b4] sm:$0xf0]  ;;  %v12310_v59 = vor.u32 %v13627_v31, %v12307_v6  ;;  %v13623_v13 = vld [vmem:[#allocation15 + $0x324] sm:$0xf]  ;;  %v12291_v40 = vld [vmem:[#allocation15 + $0x330] sm:$0xf0] }
0x1553   : > { %7778 = vmatpush.bf16.msrb.mxu2 %v12050_v51  ;;  %7804 = vmatpush.bf16.msrb.mxu1 %v12306_v58  ;;  %v13639_v51 = vld [vmem:[#allocation15 + $0x3a4] sm:$0xf]  ;;  %v12355_v58 = vld [vmem:[#allocation15 + $0x3b0] sm:$0xf0]  ;;  %v13534_v22 = vld [vmem:[#allocation15 + $0x54] sm:$0xf0] }
0x1554   : > { %v6415_v5 = vpop.f32.mrf.mxu1  ;;  %v12358_v61 = vor.u32 %v13639_v51, %v12355_v58  ;;  %v13555_v44 = vld [vmem:[#allocation15 + $0x104] sm:$0xf]  ;;  %v12294_v51 = vor.u32 %v13623_v13, %v12291_v40  ;;  %v12019_v58 = vld [vmem:[#allocation15 + $0x110] sm:$0xf0]  ;;  %v12361_v31 = vld [vmem:[#allocation15 + $0x3a8] sm:$0xf] }
0x1555   : > { %7814 = vmatpush.bf16.msra.mxu0 %v11974_v26  ;;  %7840 = vmatpush.bf16.msra.mxu3 %v12230_v16  ;;  %v13523_v26 = vld [vmem:[#allocation15 + $0x4] sm:$0xf]  ;;  %v11891_v16 = vld [vmem:[#allocation15 + $0x10] sm:$0xf0]  ;;  %v13642_v6 = vld [vmem:[#allocation15 + $0x3b4] sm:$0xf0] }
0x1556   : > { %v12339_v5 = vld [vmem:[#allocation15 + $0x390] sm:$0xf0]  ;;  %v11894_v39 = vor.u32 %v13523_v26, %v11891_v16  ;;  %v12218_v16 = vor.u32 %v13606_v55, %v12217_v52  ;;  %v13574_v45 = vld [vmem:[#allocation15 + $0x194] sm:$0xf0]  ;;  %v12362_v63 = vor.u32 %v13642_v6, %v12361_v31  ;;  %v12345_v13 = vld [vmem:[#allocation15 + $0x388] sm:$0xf] }
0x1557   : > { %7779 = vmatpush.bf16.msrb.mxu2 %v12034_v36  ;;  %7805 = vmatpush.bf16.msrb.mxu1 %v12290_v7  ;;  %v12009_v36 = vld [vmem:[#allocation15 + $0xe8] sm:$0xf]  ;;  %v13554_v7 = vld [vmem:[#allocation15 + $0xf4] sm:$0xf0]  ;;  %v13616_v55 = vld [vmem:[#allocation15 + $0x2ec] sm:$0xf] }
0x1558   : > { %v12010_v11 = vor.u32 %v13554_v7, %v12009_v36  ;;  %v13650_v36 = vld [vmem:[#allocation15 + $0x3f4] sm:$0xf0] }
0x1559   : > { %7815 = vmatpush.bf16.msra.mxu0 %v11958_v60  ;;  %7841 = vmatpush.bf16.msra.mxu3 %v12214_v20  ;;  %v12150_v60 = vor.u32 %v13587_v2, %v12147_v43  ;;  %v12342_v20 = vor.u32 %v13635_v3, %v12339_v5  ;;  %v12201_v2 = vld [vmem:[#allocation15 + $0x268] sm:$0xf]  ;;  %v13602_v43 = vld [vmem:[#allocation15 + $0x274] sm:$0xf0]  ;;  %v12022_v3 = vor.u32 %v13555_v44, %v12019_v58 }
0x155a   : > { %v12393_v5 = vld [vmem:[#allocation15 + $0x3e8] sm:$0xf]  ;;  %v13638_v40 = vld [vmem:[#allocation15 + $0x394] sm:$0xf0] }
0x155b   : > { %7780 = vmatpush.bf16.msrb.mxu2 %v12018_v28  ;;  %7806 = vmatpush.bf16.msrb.mxu1 %v12274_v50  ;;  %v12326_v28 = vor.u32 %v13631_v10, %v12323_v54  ;;  %v13563_v50 = vld [vmem:[#allocation15 + $0x144] sm:$0xf]  ;;  %v12394_v21 = vor.u32 %v13650_v36, %v12393_v5  ;;  %v12377_v10 = vld [vmem:[#allocation15 + $0x3c8] sm:$0xf]  ;;  %v13646_v54 = vld [vmem:[#allocation15 + $0x3d4] sm:$0xf0]  ;;  %v12346_v58 = vor.u32 %v13638_v40, %v12345_v13 }
0x155c   : > { %v12054_v46 = vor.u32 %v13563_v50, %v12051_v30  ;;  %v12378_v50 = vor.u32 %v13646_v54, %v12377_v10  ;;  %v13530_v30 = vld [vmem:[#allocation15 + $0x34] sm:$0xf0]  ;;  %v12041_v54 = vld [vmem:[#allocation15 + $0x128] sm:$0xf]  ;;  %v13648_v40 = vld [vmem:[#allocation15 + $0x3ec] sm:$0xf] }
0x155d   : > { %7816 = vmatpush.bf16.msra.mxu0 %v11942_v4  ;;  %7842 = vmatpush.bf16.msra.mxu3 %v12198_v32  ;;  %v11994_v4 = vor.u32 %v13550_v25, %v11993_v24  ;;  %v11977_v32 = vld [vmem:[#allocation15 + $0xa8] sm:$0xf] }
0x155e   : > { %7781 = vmatmul.bf16.vlgmr.msrb.gmra.mxu2 %v15486_v18  ;;  %7807 = vmatmul.bf16.vlgmr.msrb.gmra.mxu1 %v15488_v37 }
0x155f   : > { %7825 = vmatpush.bf16.msra.mxu2 %v12134_v47  ;;  %7851 = vmatpush.bf16.msra.mxu1 %v12390_v42  ;;  %v12250_v47 = vor.u32 %v13614_v27, %v12249_v33  ;;  %v13546_v42 = vld [vmem:[#allocation15 + $0xb4] sm:$0xf0]  ;;  %v11913_v27 = vld [vmem:[#allocation15 + $0x28] sm:$0xf] }
0x1561   : > { %7817 = vmatpush.bf16.msra.mxu0 %v11926_v19  ;;  %7843 = vmatpush.bf16.msra.mxu3 %v12182_v8  ;;  %v11978_v19 = vor.u32 %v13546_v42, %v11977_v32  ;;  %v11961_v8 = vld [vmem:[#allocation15 + $0x88] sm:$0xf] }
0x1562   : > { %v11897_v42 = vld [vmem:[#allocation15 + $0x8] sm:$0xf] }
0x1563   : > { %7826 = vmatpush.bf16.msra.mxu2 %v12118_v38  ;;  %7852 = vmatpush.bf16.msra.mxu1 %v12374_v41  ;;  %v12234_v38 = vor.u32 %v13610_v49, %v12233_v48  ;;  %v13542_v41 = vld [vmem:[#allocation15 + $0x94] sm:$0xf0]  ;;  %v11914_v48 = vor.u32 %v13530_v30, %v11913_v27  ;;  %v12219_v30 = vld [vmem:[#allocation15 + $0x298] sm:$0xf0] }
0x1564   : > { %v11962_v26 = vor.u32 %v13542_v41, %v11961_v8  ;;  %v13552_v8 = vld [vmem:[#allocation15 + $0xec] sm:$0xf]  ;;  %v12011_v41 = vld [vmem:[#allocation15 + $0xf8] sm:$0xf0]  ;;  %v13626_v27 = vld [vmem:[#allocation15 + $0x334] sm:$0xf0] }
0x1565   : > { %7818 = vmatpush.bf16.msra.mxu0 %v11910_v62  ;;  %7844 = vmatpush.bf16.msra.mxu3 %v12166_v17  ;;  %v13619_v62 = vld [vmem:[#allocation15 + $0x304] sm:$0xf]  ;;  %v12137_v17 = vld [vmem:[#allocation15 + $0x1e8] sm:$0xf] }
0x1567   : > { %7827 = vmatpush.bf16.msra.mxu2 %v12102_v0  ;;  %7853 = vmatpush.bf16.msra.mxu1 %v12358_v61  ;;  %v12275_v0 = vld [vmem:[#allocation15 + $0x310] sm:$0xf0]  ;;  %v13586_v61 = vld [vmem:[#allocation15 + $0x1f4] sm:$0xf0] }
0x1568   : > { %v12278_v7 = vor.u32 %v13619_v62, %v12275_v0  ;;  %v12138_v12 = vor.u32 %v13586_v61, %v12137_v17  ;;  %v12014_v62 = vor.u32 %v13552_v8, %v12011_v41  ;;  %v12073_v0 = vld [vmem:[#allocation15 + $0x168] sm:$0xf]  ;;  %v13634_v17 = vld [vmem:[#allocation15 + $0x374] sm:$0xf0]  ;;  %v13548_v61 = vld [vmem:[#allocation15 + $0xcc] sm:$0xf] }
0x1569   : > { %7819 = vmatpush.bf16.msra.mxu0 %v11894_v39  ;;  %7845 = vmatpush.bf16.msra.mxu3 %v12150_v60  ;;  %v12202_v39 = vor.u32 %v13602_v43, %v12201_v2  ;;  %v12121_v60 = vld [vmem:[#allocation15 + $0x1c8] sm:$0xf]  ;;  %v13612_v2 = vld [vmem:[#allocation15 + $0x2cc] sm:$0xf]  ;;  %v12251_v43 = vld [vmem:[#allocation15 + $0x2d8] sm:$0xf0]  ;;  %v11998_v36 = vor.u32 %v13548_v61, %v11995_v1 }
0x156a   : > { %v12395_v8 = vld [vmem:[#allocation15 + $0x3f8] sm:$0xf0] }
0x156b   : > { %7828 = vmatpush.bf16.msra.mxu2 %v12086_v9  ;;  %7854 = vmatpush.bf16.msra.mxu1 %v12342_v20  ;;  %v11929_v9 = vld [vmem:[#allocation15 + $0x48] sm:$0xf]  ;;  %v13582_v20 = vld [vmem:[#allocation15 + $0x1d4] sm:$0xf0] }
0x156c   : > { %7820 = vmatmul.bf16.vlgmr.msra.gmra.mxu0 %v15469_v34  ;;  %7846 = vmatmul.bf16.vlgmr.msra.gmra.mxu3 %v15471_v56  ;;  %v12122_v24 = vor.u32 %v13582_v20, %v12121_v60  ;;  %v11930_v25 = vor.u32 %v13534_v22, %v11929_v9  ;;  %v13630_v9 = vld [vmem:[#allocation15 + $0x354] sm:$0xf0]  ;;  %v13544_v60 = vld [vmem:[#allocation15 + $0xac] sm:$0xf]  ;;  %v11979_v20 = vld [vmem:[#allocation15 + $0xb8] sm:$0xf0] }
0x156d   : > { %7864 = vmatpush.bf16.msrb.mxu0 %v12010_v11  ;;  %7890 = vmatpush.bf16.msrb.mxu3 %v12266_v57  ;;  %v12185_v11 = vld [vmem:[#allocation15 + $0x248] sm:$0xf]  ;;  %v13598_v57 = vld [vmem:[#allocation15 + $0x254] sm:$0xf0]  ;;  %v12235_v22 = vld [vmem:[#allocation15 + $0x2b8] sm:$0xf0]  ;;  %v11982_v10 = vor.u32 %v13544_v60, %v11979_v20 }
0x156e   : > { %v12186_v33 = vor.u32 %v13598_v57, %v12185_v11 }
0x156f   : > { %7829 = vmatpush.bf16.msra.mxu2 %v12070_v23  ;;  %7855 = vmatpush.bf16.msra.mxu1 %v12326_v28  ;;  %v12105_v23 = vld [vmem:[#allocation15 + $0x1a8] sm:$0xf]  ;;  %v13578_v28 = vld [vmem:[#allocation15 + $0x1b4] sm:$0xf0] }
0x1570   : > { %v12106_v32 = vor.u32 %v13578_v28, %v12105_v23  ;;  %v13540_v23 = vld [vmem:[#allocation15 + $0x8c] sm:$0xf]  ;;  %v11963_v28 = vld [vmem:[#allocation15 + $0x98] sm:$0xf0] }
0x1571   : > { %7865 = vmatpush.bf16.msrb.mxu0 %v11994_v4  ;;  %7891 = vmatpush.bf16.msrb.mxu3 %v12250_v47  ;;  %v12169_v4 = vld [vmem:[#allocation15 + $0x228] sm:$0xf]  ;;  %v13594_v47 = vld [vmem:[#allocation15 + $0x234] sm:$0xf0]  ;;  %v11966_v6 = vor.u32 %v13540_v23, %v11963_v28 }
0x1572   : > { %v12170_v49 = vor.u32 %v13594_v47, %v12169_v4  ;;  %v12025_v47 = vld [vmem:[#allocation15 + $0x108] sm:$0xf] }
0x1573   : > { %7830 = vmatpush.bf16.msra.mxu2 %v12054_v46  ;;  %7856 = vmatpush.bf16.msra.mxu1 %v12310_v59  ;;  %v13526_v46 = vld [vmem:[#allocation15 + $0x14] sm:$0xf0]  ;;  %v12089_v59 = vld [vmem:[#allocation15 + $0x188] sm:$0xf] }
0x1574   : > { %v12090_v52 = vor.u32 %v13574_v45, %v12089_v59  ;;  %v11898_v44 = vor.u32 %v13526_v46, %v11897_v42  ;;  %v12281_v42 = vld [vmem:[#allocation15 + $0x308] sm:$0xf]  ;;  %v13536_v46 = vld [vmem:[#allocation15 + $0x6c] sm:$0xf]  ;;  %v11947_v59 = vld [vmem:[#allocation15 + $0x78] sm:$0xf0] }
0x1575   : > { %7866 = vmatpush.bf16.msrb.mxu0 %v11978_v19  ;;  %7892 = vmatpush.bf16.msrb.mxu3 %v12234_v38  ;;  %v12153_v19 = vld [vmem:[#allocation15 + $0x208] sm:$0xf]  ;;  %v13590_v38 = vld [vmem:[#allocation15 + $0x214] sm:$0xf0]  ;;  %v13584_v45 = vld [vmem:[#allocation15 + $0x1ec] sm:$0xf] }
0x1577   : > { %7831 = vmatpush.bf16.msra.mxu2 %v12038_v29  ;;  %7857 = vmatpush.bf16.msra.mxu1 %v12294_v51  ;;  %v12267_v29 = vld [vmem:[#allocation15 + $0x2f8] sm:$0xf0]  ;;  %v12154_v51 = vor.u32 %v13590_v38, %v12153_v19  ;;  %v13600_v19 = vld [vmem:[#allocation15 + $0x26c] sm:$0xf] }
0x1578   : > { %v12270_v15 = vor.u32 %v13616_v55, %v12267_v29  ;;  %v12203_v38 = vld [vmem:[#allocation15 + $0x278] sm:$0xf0] }
0x1579   : > { %7867 = vmatpush.bf16.msrb.mxu0 %v11962_v26  ;;  %7893 = vmatpush.bf16.msrb.mxu3 %v12218_v16  ;;  %v13570_v26 = vld [vmem:[#allocation15 + $0x174] sm:$0xf0]  ;;  %v12329_v16 = vld [vmem:[#allocation15 + $0x368] sm:$0xf]  ;;  %v12206_v29 = vor.u32 %v13600_v19, %v12203_v38  ;;  %v13560_v38 = vld [vmem:[#allocation15 + $0x12c] sm:$0xf] }
0x157a   : > { %v12330_v5 = vor.u32 %v13634_v17, %v12329_v16  ;;  %v12187_v16 = vld [vmem:[#allocation15 + $0x258] sm:$0xf0] }
0x157b   : > { %7832 = vmatpush.bf16.msra.mxu2 %v12022_v3  ;;  %7858 = vmatpush.bf16.msra.mxu1 %v12278_v7  ;;  %v12074_v3 = vor.u32 %v13570_v26, %v12073_v0  ;;  %v12057_v7 = vld [vmem:[#allocation15 + $0x148] sm:$0xf]  ;;  %v12123_v0 = vld [vmem:[#allocation15 + $0x1d8] sm:$0xf0]  ;;  %v13596_v26 = vld [vmem:[#allocation15 + $0x24c] sm:$0xf] }
0x157c   : > { %v12379_v17 = vld [vmem:[#allocation15 + $0x3d8] sm:$0xf0] }
0x157d   : > { %7868 = vmatpush.bf16.msrb.mxu0 %v11946_v14  ;;  %7894 = vmatpush.bf16.msrb.mxu3 %v12202_v39  ;;  %v12313_v14 = vld [vmem:[#allocation15 + $0x348] sm:$0xf]  ;;  %v12254_v39 = vor.u32 %v13612_v2, %v12251_v43  ;;  %v12190_v2 = vor.u32 %v13596_v26, %v12187_v16  ;;  %v13528_v43 = vld [vmem:[#allocation15 + $0x2c] sm:$0xf] }
0x157e   : > { %7833 = vmatmul.bf16.vlgmr.msra.gmra.mxu2 %v15486_v18  ;;  %7859 = vmatmul.bf16.vlgmr.msra.gmra.mxu1 %v15488_v37  ;;  %v12314_v57 = vor.u32 %v13630_v9, %v12313_v14  ;;  %v12171_v14 = vld [vmem:[#allocation15 + $0x238] sm:$0xf0] }
0x157f   : > { %7877 = vmatpush.bf16.msrb.mxu2 %v12138_v12  ;;  %7903 = vmatpush.bf16.msrb.mxu1 %v12394_v21  ;;  %v13566_v12 = vld [vmem:[#allocation15 + $0x154] sm:$0xf0]  ;;  %v13608_v21 = vld [vmem:[#allocation15 + $0x2ac] sm:$0xf]  ;;  %v12363_v9 = vld [vmem:[#allocation15 + $0x3b8] sm:$0xf0] }
0x1580   : > { %v12058_v11 = vor.u32 %v13566_v12, %v12057_v7  ;;  %v12107_v7 = vld [vmem:[#allocation15 + $0x1b8] sm:$0xf0]  ;;  %v13592_v12 = vld [vmem:[#allocation15 + $0x22c] sm:$0xf] }
0x1581   : > { %7869 = vmatpush.bf16.msrb.mxu0 %v11930_v25  ;;  %7895 = vmatpush.bf16.msrb.mxu3 %v12186_v33  ;;  %v12297_v25 = vld [vmem:[#allocation15 + $0x328] sm:$0xf]  ;;  %v12238_v33 = vor.u32 %v13608_v21, %v12235_v22  ;;  %v12174_v21 = vor.u32 %v13592_v12, %v12171_v14  ;;  %v13524_v22 = vld [vmem:[#allocation15 + $0xc] sm:$0xf] }
0x1582   : > { %v12298_v31 = vor.u32 %v13626_v27, %v12297_v25  ;;  %v12155_v25 = vld [vmem:[#allocation15 + $0x218] sm:$0xf0] }
0x1583   : > { %7878 = vmatpush.bf16.msrb.mxu2 %v12122_v24  ;;  %7904 = vmatpush.bf16.msrb.mxu1 %v12378_v50  ;;  %v13562_v24 = vld [vmem:[#allocation15 + $0x134] sm:$0xf0]  ;;  %v13604_v50 = vld [vmem:[#allocation15 + $0x28c] sm:$0xf]  ;;  %v12347_v27 = vld [vmem:[#allocation15 + $0x398] sm:$0xf0] }
0x1584   : > { %v12042_v4 = vor.u32 %v13562_v24, %v12041_v54  ;;  %v12091_v54 = vld [vmem:[#allocation15 + $0x198] sm:$0xf0]  ;;  %v13588_v24 = vld [vmem:[#allocation15 + $0x20c] sm:$0xf] }
0x1585   : > { %7870 = vmatpush.bf16.msrb.mxu0 %v11914_v48  ;;  %7896 = vmatpush.bf16.msrb.mxu3 %v12170_v49  ;;  %v13622_v48 = vld [vmem:[#allocation15 + $0x314] sm:$0xf0]  ;;  %v12222_v49 = vor.u32 %v13604_v50, %v12219_v30  ;;  %v12158_v50 = vor.u32 %v13588_v24, %v12155_v25 }
0x1586   : > { %v12282_v41 = vor.u32 %v13622_v48, %v12281_v42  ;;  %v13564_v48 = vld [vmem:[#allocation15 + $0x14c] sm:$0xf] }
0x1587   : > { %7879 = vmatpush.bf16.msrb.mxu2 %v12106_v32  ;;  %7905 = vmatpush.bf16.msrb.mxu1 %v12362_v63  ;;  %v13558_v32 = vld [vmem:[#allocation15 + $0x114] sm:$0xf0]  ;;  %v12139_v63 = vld [vmem:[#allocation15 + $0x1f8] sm:$0xf0] }
0x1588   : > { %v12026_v13 = vor.u32 %v13558_v32, %v12025_v47  ;;  %v12142_v55 = vor.u32 %v13584_v45, %v12139_v63  ;;  %v12075_v47 = vld [vmem:[#allocation15 + $0x178] sm:$0xf0] }
0x1589   : > { %7871 = vmatpush.bf16.msrb.mxu0 %v11898_v44  ;;  %7897 = vmatpush.bf16.msrb.mxu3 %v12154_v51  ;;  %v13532_v44 = vld [vmem:[#allocation15 + $0x4c] sm:$0xf]  ;;  %v11931_v51 = vld [vmem:[#allocation15 + $0x58] sm:$0xf0] }
0x158a   : > { %v11934_v61 = vor.u32 %v13532_v44, %v11931_v51  ;;  %v12283_v44 = vld [vmem:[#allocation15 + $0x318] sm:$0xf0] }
0x158b   : > { %7880 = vmatpush.bf16.msrb.mxu2 %v12090_v52  ;;  %7906 = vmatpush.bf16.msrb.mxu1 %v12346_v58  ;;  %v11950_v52 = vor.u32 %v13536_v46, %v11947_v59  ;;  %v13580_v58 = vld [vmem:[#allocation15 + $0x1cc] sm:$0xf]  ;;  %v12315_v59 = vld [vmem:[#allocation15 + $0x358] sm:$0xf0] }
0x158c   : > { %7872 = vmatmul.bf16.vlgmr.msrb.gmra.mxu0 %v15469_v34  ;;  %7898 = vmatmul.bf16.vlgmr.msrb.gmra.mxu3 %v15471_v56  ;;  %v12126_v1 = vor.u32 %v13580_v58, %v12123_v0  ;;  %v13628_v46 = vld [vmem:[#allocation15 + $0x34c] sm:$0xf] }
0x158d   : > { %7916 = vmatpush.bf16.msra.mxu0 %v12014_v62  ;;  %7942 = vmatpush.bf16.msra.mxu3 %v12270_v15  ;;  %v12398_v62 = vor.u32 %v13648_v40, %v12395_v8  ;;  %v13644_v15 = vld [vmem:[#allocation15 + $0x3cc] sm:$0xf]  ;;  %v12318_v63 = vor.u32 %v13628_v46, %v12315_v59  ;;  %v12299_v8 = vld [vmem:[#allocation15 + $0x338] sm:$0xf0] }
0x158e   : > { %v13624_v40 = vld [vmem:[#allocation15 + $0x32c] sm:$0xf] }
0x158f   : > { %7881 = vmatpush.bf16.msrb.mxu2 %v12074_v3  ;;  %7907 = vmatpush.bf16.msrb.mxu1 %v12330_v5  ;;  %v11915_v3 = vld [vmem:[#allocation15 + $0x38] sm:$0xf0]  ;;  %v13576_v5 = vld [vmem:[#allocation15 + $0x1ac] sm:$0xf] }
0x1590   : > { %v11918_v60 = vor.u32 %v13528_v43, %v11915_v3  ;;  %v12110_v20 = vor.u32 %v13576_v5, %v12107_v7 }
0x1591   : > { %7917 = vmatpush.bf16.msra.mxu0 %v11998_v36  ;;  %7943 = vmatpush.bf16.msra.mxu3 %v12254_v39  ;;  %v12382_v36 = vor.u32 %v13644_v15, %v12379_v17  ;;  %v13640_v39 = vld [vmem:[#allocation15 + $0x3ac] sm:$0xf] }
0x1593   : > { %7882 = vmatpush.bf16.msrb.mxu2 %v12058_v11  ;;  %7908 = vmatpush.bf16.msrb.mxu1 %v12314_v57  ;;  %v11899_v11 = vld [vmem:[#allocation15 + $0x18] sm:$0xf0]  ;;  %v13572_v57 = vld [vmem:[#allocation15 + $0x18c] sm:$0xf] }
0x1594   : > { %v11902_v23 = vor.u32 %v13524_v22, %v11899_v11  ;;  %v12094_v28 = vor.u32 %v13572_v57, %v12091_v54 }
0x1595   : > { %7918 = vmatpush.bf16.msra.mxu0 %v11982_v10  ;;  %7944 = vmatpush.bf16.msra.mxu3 %v12238_v33  ;;  %v12366_v10 = vor.u32 %v13640_v39, %v12363_v9  ;;  %v13636_v33 = vld [vmem:[#allocation15 + $0x38c] sm:$0xf] }
0x1596   : > { %v12350_v30 = vor.u32 %v13636_v33, %v12347_v27 }
0x1597   : > { %7883 = vmatpush.bf16.msrb.mxu2 %v12042_v4  ;;  %7909 = vmatpush.bf16.msrb.mxu1 %v12298_v31  ;;  %v13568_v4 = vld [vmem:[#allocation15 + $0x16c] sm:$0xf] }
0x1598   : > { %v13632_v31 = vld [vmem:[#allocation15 + $0x36c] sm:$0xf]  ;;  %v12078_v32 = vor.u32 %v13568_v4, %v12075_v47 }
0x1599   : > { %7919 = vmatpush.bf16.msra.mxu0 %v11966_v6  ;;  %7945 = vmatpush.bf16.msra.mxu3 %v12222_v49  ;;  %v12331_v6 = vld [vmem:[#allocation15 + $0x378] sm:$0xf0] }
0x159a   : > { %v12334_v42 = vor.u32 %v13632_v31, %v12331_v6  ;;  %v12059_v49 = vld [vmem:[#allocation15 + $0x158] sm:$0xf0] }
0x159b   : > { %7884 = vmatpush.bf16.msrb.mxu2 %v12026_v13  ;;  %7910 = vmatpush.bf16.msrb.mxu1 %v12282_v41  ;;  %v12062_v45 = vor.u32 %v13564_v48, %v12059_v49  ;;  %v12043_v13 = vld [vmem:[#allocation15 + $0x138] sm:$0xf0] }
0x159c   : > { %v12046_v41 = vor.u32 %v13560_v38, %v12043_v13 }
0x159d   : > { %7920 = vmatpush.bf16.msra.mxu0 %v11950_v52  ;;  %7946 = vmatpush.bf16.msra.mxu3 %v12206_v29  ;;  %v12302_v52 = vor.u32 %v13624_v40, %v12299_v8  ;;  %v12027_v29 = vld [vmem:[#allocation15 + $0x118] sm:$0xf0] }
0x159e   : > { %7885 = vmatmul.bf16.vlgmr.msrb.gmra.mxu2 %v15486_v18  ;;  %7911 = vmatmul.bf16.vlgmr.msrb.gmra.mxu1 %v15488_v37 }
0x159f   : > { %7929 = vmatpush.bf16.msra.mxu2 %v12142_v55  ;;  %7955 = vmatpush.bf16.msra.mxu1 %v12398_v62  ;;  %v13556_v55 = vld [vmem:[#allocation15 + $0x10c] sm:$0xf] }
0x15a1   : > { %7921 = vmatpush.bf16.msra.mxu0 %v11934_v61  ;;  %7947 = vmatpush.bf16.msra.mxu3 %v12190_v2 }
0x15a3   : > { %7930 = vmatpush.bf16.msra.mxu2 %v12126_v1  ;;  %7956 = vmatpush.bf16.msra.mxu1 %v12382_v36 }
0x15a5   : > { %7922 = vmatpush.bf16.msra.mxu0 %v11918_v60  ;;  %7948 = vmatpush.bf16.msra.mxu3 %v12174_v21 }
0x15a7   : > { %7931 = vmatpush.bf16.msra.mxu2 %v12110_v20  ;;  %7957 = vmatpush.bf16.msra.mxu1 %v12366_v10 }
0x15a9   : > { %7923 = vmatpush.bf16.msra.mxu0 %v11902_v23  ;;  %7949 = vmatpush.bf16.msra.mxu3 %v12158_v50  ;;  %v7025_v19 = vpop.f32.mrf.mxu0 }
0x15ab   : > { %7932 = vmatpush.bf16.msra.mxu2 %v12094_v28  ;;  %7958 = vmatpush.bf16.msra.mxu1 %v12350_v30 }
0x15ac   : > { %7924 = vmatmul.bf16.vlgmr.msra.gmra.mxu0 %v15469_v34  ;;  %7950 = vmatmul.bf16.vlgmr.msra.gmra.mxu3 %v15471_v56  ;;  %v13620_v34 = vld [vmem:[#allocation15 + $0x30c] sm:$0xf]  ;;  %v12030_v56 = vor.u32 %v13556_v55, %v12027_v29 }
0x15ad   : > { %v12286_v58 = vor.u32 %v13620_v34, %v12283_v44  ;;  %v7968_v34 = vld [vmem:[%s15692_s20] sm:$0xf]  ;;  %s15696_s20 = sld [smem:[#allocation57_spill]] }
0x15ae   : > { %v7971_v44 = vperm.slane %v7968_v34, 1 }
0x15af   : > { %7933 = vmatpush.bf16.msra.mxu2 %v12078_v32  ;;  %7959 = vmatpush.bf16.msra.mxu1 %v12334_v42  ;;  %v7051_v51 = vpop.f32.mrf.mxu3 }
0x15b1   : > { %v7027_v62 = vpop.f32.mrf.mxu0 }
0x15b2   : > { %v7972_v62 = vperm.slane %v7968_v34, 2 }
0x15b3   : > { %7934 = vmatpush.bf16.msra.mxu2 %v12062_v45  ;;  %7960 = vmatpush.bf16.msra.mxu1 %v12318_v63 }
0x15b7   : > { %7935 = vmatpush.bf16.msra.mxu2 %v12046_v41  ;;  %7961 = vmatpush.bf16.msra.mxu1 %v12302_v52  ;;  %v7053_v0 = vpop.f32.mrf.mxu3 }
0x15b9   : > { %v7077_v26 = vpop.f32.mrf.mxu0 }
0x15bb   : > { %7936 = vmatpush.bf16.msra.mxu2 %v12030_v56  ;;  %7962 = vmatpush.bf16.msra.mxu1 %v12286_v58  ;;  %v7064_v16 = vpop.f32.mrf.mxu1  ;;  %v7970_v56 = vperm.slane %v7968_v34, 0 }
0x15bc   : > { %v7065_v15 = vadd.f32 %v7064_v16, %v7051_v51 }
0x15be   : > { %7937 = vmatmul.bf16.vlgmr.msra.gmra.mxu2 %v15486_v18  ;;  %7963 = vmatmul.bf16.vlgmr.msra.gmra.mxu1 %v15488_v37 }
0x15bf   : > { %v7103_v17 = vpop.f32.mrf.mxu3 }
0x15c1   : > { %v7038_v61 = vpop.f32.mrf.mxu2  ;;  %v7079_v1 = vpop.f32.mrf.mxu0 }
0x15c2   : > { %v7039_v2 = vadd.f32 %v7038_v61, %v7025_v19 }
0x15c3   : > { %v7066_v43 = vpop.f32.mrf.mxu1 }
0x15c4   : > { %v7973_v43 = vperm.slane %v7968_v34, 3  ;;  %v12593_v34 = vld [vmem:[#allocation18 + $0x180] sm:$0xf] }
0x15c7   : > { %v7105_v3 = vpop.f32.mrf.mxu3 }
0x15c9   : > { %v7040_v5 = vpop.f32.mrf.mxu2  ;;  %v7769_v36 = vpop.f32.mrf.mxu0 }
0x15ca   : > { %v7770_v7 = vadd.f32 %v7769_v36, %v7039_v2 }
0x15cb   : > { %v7116_v12 = vpop.f32.mrf.mxu1 }
0x15cc   : > { %v7117_v14 = vadd.f32 %v7116_v12, %v7103_v17 }
0x15cf   : > { %v7795_v39 = vpop.f32.mrf.mxu3 }
0x15d1   : > { %v7090_v9 = vpop.f32.mrf.mxu2  ;;  %v7771_v18 = vpop.f32.mrf.mxu0 }
0x15d2   : > { %v7091_v60 = vadd.f32 %v7090_v9, %v7077_v26 }
0x15d3   : > { %v7118_v20 = vpop.f32.mrf.mxu1 }
0x15d4   : > { %v12513_v20 = vld [vmem:[#allocation18 + $0xe0] sm:$0xf] }
0x15d7   : > { %v7797_v37 = vpop.f32.mrf.mxu3 }
0x15d8   : > { %v13745_v37 = vld [vmem:[#allocation18 + $0xec] sm:$0xf0] }
0x15d9   : > { %v7092_v21 = vpop.f32.mrf.mxu2 }
0x15da   : > { %v12641_v21 = vld [vmem:[#allocation18 + $0x1e0] sm:$0xf] }
0x15db   : > { %v7808_v22 = vpop.f32.mrf.mxu1 }
0x15e1   : > { %v7782_v11 = vpop.f32.mrf.mxu2 }
0x15e2   : > { %v7783_v57 = vadd.f32 %v7782_v11, %v7770_v7  ;;  %v13777_v11 = vld [vmem:[#allocation18 + $0x1ec] sm:$0xf0] }
0x15e3   : > { %v7810_v10 = vpop.f32.mrf.mxu1 }
0x15e4   : > { %v7796_v54 = vadd.f32 %v7795_v39, %v7783_v57  ;;  %v12769_v57 = vld [vmem:[#allocation18 + $0x2e0] sm:$0xf]  ;;  %v13809_v10 = vld [vmem:[#allocation18 + $0x2ec] sm:$0xf0] }
0x15e6   : > { %v7809_v24 = vadd.f32 %v7808_v22, %v7796_v54  ;;  %v12514_v22 = vor.u32 %v13745_v37, %v12513_v20  ;;  %v12642_v54 = vor.u32 %v13777_v11, %v12641_v21  ;;  %v13725_v20 = vld [vmem:[#allocation18 + $0x4c] sm:$0xf0] }
0x15e7   : > { %v13757_v11 = vld [vmem:[#allocation18 + $0x14c] sm:$0xf0] }
0x15e8   : > { %8839 = vmatpush.bf16.msrb.mxu0 %v12514_v22  ;;  %8852 = vmatpush.bf16.msrb.mxu2 %v12642_v54  ;;  %v12561_v22 = vld [vmem:[#allocation18 + $0x140] sm:$0xf]  ;;  %v13789_v54 = vld [vmem:[#allocation18 + $0x24c] sm:$0xf0] }
0x15e9   : > { %v7821_v25 = vpop.f32.mrf.mxu0  ;;  %v7784_v27 = vpop.f32.mrf.mxu2 }
0x15ea   : > { %v7822_v33 = vadd.f32 %v7821_v25, %v7065_v15  ;;  %v15507_v15 = vadd.f32 %v7970_v56, %v7809_v24  ;;  %v12770_v24 = vor.u32 %v13809_v10, %v12769_v57  ;;  %v12897_v25 = vld [vmem:[#allocation18 + $0x3e0] sm:$0xf] }
0x15eb   : > { %v12497_v27 = vld [vmem:[#allocation18 + $0xc0] sm:$0xf] }
0x15ec   : > { %v7984_v36 = vsel %vm4356_vm9, %v15507_v15, 0.0  ;;  %8865 = vmatpush.bf16.msrb.mxu3 %v12770_v24  ;;  %v12721_v56 = vld [vmem:[#allocation18 + $0x280] sm:$0xf] }
0x15ed   : > { %v12689_v57 = vld [vmem:[#allocation18 + $0x240] sm:$0xf] }
0x15ee   : > { %v12817_v24 = vld [vmem:[#allocation18 + $0x340] sm:$0xf] }
0x15ef   : > { %v7847_v23 = vpop.f32.mrf.mxu3 }
0x15f1   : > { %v7823_v28 = vpop.f32.mrf.mxu0 }
0x15f2   : > { %v13741_v28 = vld [vmem:[#allocation18 + $0xcc] sm:$0xf0] }
0x15f7   : > { %v7849_v50 = vpop.f32.mrf.mxu3 }
0x15f8   : > { %v12625_v50 = vld [vmem:[#allocation18 + $0x1c0] sm:$0xf] }
0x15fb   : > { %v7860_v30 = vpop.f32.mrf.mxu1 }
0x1601   : > { %v7834_v4 = vpop.f32.mrf.mxu2 }
0x1602   : > { %v7835_v47 = vadd.f32 %v7834_v4, %v7822_v33  ;;  %v13841_v33 = vld [vmem:[#allocation18 + $0x3ec] sm:$0xf0]  ;;  %v12498_v4 = vor.u32 %v13741_v28, %v12497_v27  ;;  %v12562_v28 = vor.u32 %v13757_v11, %v12561_v22  ;;  %v12899_v22 = vld [vmem:[#allocation18 + $0x3f0] sm:$0xf0]  ;;  %v13739_v11 = vld [vmem:[#allocation18 + $0xc4] sm:$0xf] }
0x1603   : > { %v7862_v6 = vpop.f32.mrf.mxu1 }
0x1604   : > { %v7848_v31 = vadd.f32 %v7847_v23, %v7835_v47  ;;  %v12898_v23 = vor.u32 %v13841_v33, %v12897_v25  ;;  %v13805_v6 = vld [vmem:[#allocation18 + $0x2cc] sm:$0xf0]  ;;  %8840 = vmatpush.bf16.msrb.mxu0 %v12498_v4  ;;  %v12417_v4 = vld [vmem:[#allocation18 + $0x20] sm:$0xf] }
0x1605   : > { %v13821_v25 = vld [vmem:[#allocation18 + $0x34c] sm:$0xf0] }
0x1606   : > { %v7861_v32 = vadd.f32 %v7860_v30, %v7848_v31  ;;  %v13773_v30 = vld [vmem:[#allocation18 + $0x1cc] sm:$0xf0]  ;;  %v12753_v31 = vld [vmem:[#allocation18 + $0x2c0] sm:$0xf]  ;;  %8878 = vmatpush.bf16.msrb.mxu1 %v12898_v23 }
0x1607   : > { %v12626_v47 = vor.u32 %v13773_v30, %v12625_v50  ;;  %v12690_v50 = vor.u32 %v13789_v54, %v12689_v57  ;;  %v12818_v30 = vor.u32 %v13821_v25, %v12817_v24  ;;  %v12499_v57 = vld [vmem:[#allocation18 + $0xd0] sm:$0xf0]  ;;  %v13771_v24 = vld [vmem:[#allocation18 + $0x1c4] sm:$0xf] }
0x1608   : > { %v15505_v0 = vadd.f32 %v7971_v44, %v7861_v32  ;;  %v12881_v32 = vld [vmem:[#allocation18 + $0x3c0] sm:$0xf]  ;;  %v12502_v54 = vor.u32 %v13739_v11, %v12499_v57  ;;  %v12627_v25 = vld [vmem:[#allocation18 + $0x1d0] sm:$0xf0]  ;;  %v13819_v11 = vld [vmem:[#allocation18 + $0x344] sm:$0xf] }
0x1609   : > { %v7873_v42 = vpop.f32.mrf.mxu0  ;;  %v7836_v48 = vpop.f32.mrf.mxu2  ;;  %8853 = vmatpush.bf16.msrb.mxu2 %v12626_v47  ;;  %v13721_v47 = vld [vmem:[#allocation18 + $0x2c] sm:$0xf0]  ;;  %v12819_v57 = vld [vmem:[#allocation18 + $0x350] sm:$0xf0] }
0x160a   : > { %v7874_v41 = vadd.f32 %v7873_v42, %v7091_v60  ;;  %v7985_v3 = vsel %vm4356_vm9, %v15505_v0, 0.0  ;;  %v12754_v42 = vor.u32 %v13805_v6, %v12753_v31  ;;  %v13837_v48 = vld [vmem:[#allocation18 + $0x3cc] sm:$0xf0]  ;;  %v12545_v31 = vld [vmem:[#allocation18 + $0x120] sm:$0xf] }
0x160b   : > { %v7986_v12 = vadd.f32 %v7985_v3, %v7984_v36  ;;  %v12577_v3 = vld [vmem:[#allocation18 + $0x160] sm:$0xf]  ;;  %v13761_v36 = vld [vmem:[#allocation18 + $0x16c] sm:$0xf0] }
0x160c   : > { %8866 = vmatpush.bf16.msrb.mxu3 %v12754_v42  ;;  %v12578_v37 = vor.u32 %v13761_v36, %v12577_v3  ;;  %v13813_v3 = vld [vmem:[#allocation18 + $0x30c] sm:$0xf0] }
0x160f   : > { %v7899_v49 = vpop.f32.mrf.mxu3 }
0x1611   : > { %v7875_v46 = vpop.f32.mrf.mxu0 }
0x1612   : > { %v13737_v46 = vld [vmem:[#allocation18 + $0xac] sm:$0xf0] }
0x1617   : > { %v7901_v59 = vpop.f32.mrf.mxu3 }
0x1618   : > { %v12882_v59 = vor.u32 %v13837_v48, %v12881_v32 }
0x161a   : > { %8879 = vmatpush.bf16.msrb.mxu1 %v12882_v59  ;;  %v13785_v59 = vld [vmem:[#allocation18 + $0x22c] sm:$0xf0] }
0x161b   : > { %v7912_v45 = vpop.f32.mrf.mxu1 }
0x1621   : > { %v7886_v63 = vpop.f32.mrf.mxu2 }
0x1622   : > { %v7887_v52 = vadd.f32 %v7886_v63, %v7874_v41  ;;  %v13769_v63 = vld [vmem:[#allocation18 + $0x1ac] sm:$0xf0] }
0x1623   : > { %v7914_v19 = vpop.f32.mrf.mxu1 }
0x1624   : > { %v7900_v29 = vadd.f32 %v7899_v49, %v7887_v52  ;;  %v12481_v49 = vld [vmem:[#allocation18 + $0xa0] sm:$0xf] }
0x1625   : > { %v12737_v19 = vld [vmem:[#allocation18 + $0x2a0] sm:$0xf] }
0x1626   : > { %v7913_v58 = vadd.f32 %v7912_v45, %v7900_v29  ;;  %v12609_v45 = vld [vmem:[#allocation18 + $0x1a0] sm:$0xf]  ;;  %v13733_v29 = vld [vmem:[#allocation18 + $0x8c] sm:$0xf0] }
0x1627   : > { %v12610_v41 = vor.u32 %v13769_v63, %v12609_v45  ;;  %v12801_v45 = vld [vmem:[#allocation18 + $0x320] sm:$0xf]  ;;  %v13817_v63 = vld [vmem:[#allocation18 + $0x32c] sm:$0xf0] }
0x1628   : > { %v15509_v61 = vadd.f32 %v7972_v62, %v7913_v58  ;;  %v13797_v58 = vld [vmem:[#allocation18 + $0x28c] sm:$0xf0]  ;;  %v12849_v62 = vld [vmem:[#allocation18 + $0x380] sm:$0xf] }
0x1629   : > { %v7925_v38 = vpop.f32.mrf.mxu0  ;;  %v7888_v13 = vpop.f32.mrf.mxu2  ;;  %8854 = vmatpush.bf16.msrb.mxu2 %v12610_v41  ;;  %v12802_v41 = vor.u32 %v13817_v63, %v12801_v45  ;;  %v13799_v45 = vld [vmem:[#allocation18 + $0x2a4] sm:$0xf]  ;;  %v12739_v63 = vld [vmem:[#allocation18 + $0x2b0] sm:$0xf0] }
0x162a   : > { %v7926_v26 = vadd.f32 %v7925_v38, %v7117_v14  ;;  %v7987_v7 = vsel %vm4356_vm9, %v15509_v61, 0.0  ;;  %v12482_v38 = vor.u32 %v13737_v46, %v12481_v49  ;;  %v13801_v13 = vld [vmem:[#allocation18 + $0x2ac] sm:$0xf0]  ;;  %v12673_v46 = vld [vmem:[#allocation18 + $0x220] sm:$0xf] }
0x162b   : > { %v7988_v9 = vadd.f32 %v7987_v7, %v7986_v12  ;;  %v12738_v52 = vor.u32 %v13801_v13, %v12737_v19  ;;  %v12705_v7 = vld [vmem:[#allocation18 + $0x260] sm:$0xf]  ;;  %v13793_v12 = vld [vmem:[#allocation18 + $0x26c] sm:$0xf0] }
0x162c   : > { %8841 = vmatpush.bf16.msrb.mxu0 %v12482_v38  ;;  %v12706_v21 = vor.u32 %v13793_v12, %v12705_v7  ;;  %v13753_v49 = vld [vmem:[#allocation18 + $0x12c] sm:$0xf0]  ;;  %v12674_v38 = vor.u32 %v13785_v59, %v12673_v46  ;;  %v12515_v7 = vld [vmem:[#allocation18 + $0xf0] sm:$0xf0]  ;;  %v13775_v12 = vld [vmem:[#allocation18 + $0x1e4] sm:$0xf] }
0x162d   : > { %8867 = vmatpush.bf16.msrb.mxu3 %v12738_v52  ;;  %v12611_v59 = vld [vmem:[#allocation18 + $0x1b0] sm:$0xf0] }
0x162f   : > { %v7951_v40 = vpop.f32.mrf.mxu3 }
0x1631   : > { %v7927_v8 = vpop.f32.mrf.mxu0 }
0x1632   : > { %v13833_v8 = vld [vmem:[#allocation18 + $0x3ac] sm:$0xf0] }
0x1637   : > { %v7953_v55 = vpop.f32.mrf.mxu3 }
0x1638   : > { %v12465_v55 = vld [vmem:[#allocation18 + $0x80] sm:$0xf] }
0x163b   : > { %v7964_v51 = vpop.f32.mrf.mxu1 }
0x1641   : > { %v7938_v16 = vpop.f32.mrf.mxu2 }
0x1642   : > { %v7939_v17 = vadd.f32 %v7938_v16, %v7926_v26  ;;  %v13829_v26 = vld [vmem:[#allocation18 + $0x38c] sm:$0xf0]  ;;  %v12466_v16 = vor.u32 %v13733_v29, %v12465_v55 }
0x1643   : > { %v7966_v2 = vpop.f32.mrf.mxu1 }
0x1644   : > { %v7952_v1 = vadd.f32 %v7951_v40, %v7939_v17  ;;  %v12865_v40 = vld [vmem:[#allocation18 + $0x3a0] sm:$0xf]  ;;  %8842 = vmatpush.bf16.msrb.mxu0 %v12466_v16 }
0x1645   : > { %v12866_v44 = vor.u32 %v13833_v8, %v12865_v40  ;;  %v12449_v2 = vld [vmem:[#allocation18 + $0x60] sm:$0xf] }
0x1646   : > { %v7965_v5 = vadd.f32 %v7964_v51, %v7952_v1  ;;  %v13765_v51 = vld [vmem:[#allocation18 + $0x18c] sm:$0xf0]  ;;  %v12722_v1 = vor.u32 %v13797_v58, %v12721_v56  ;;  %v12529_v58 = vld [vmem:[#allocation18 + $0x100] sm:$0xf] }
0x1647   : > { %v12594_v17 = vor.u32 %v13765_v51, %v12593_v34  ;;  %8880 = vmatpush.bf16.msrb.mxu1 %v12866_v44  ;;  %v12401_v51 = vld [vmem:[#allocation18] sm:$0xf]  ;;  %v13717_v56 = vld [vmem:[#allocation18 + $0xc] sm:$0xf0] }
0x1648   : > { %v15517_v14 = vadd.f32 %v7973_v43, %v7965_v5  ;;  %v13729_v43 = vld [vmem:[#allocation18 + $0x6c] sm:$0xf0]  ;;  %v12850_v5 = vor.u32 %v13829_v26, %v12849_v62  ;;  %8868 = vmatpush.bf16.msrb.mxu3 %v12722_v1  ;;  %v12402_v62 = vor.u32 %v13717_v56, %v12401_v51  ;;  %v12657_v16 = vld [vmem:[#allocation18 + $0x200] sm:$0xf]  ;;  %v12851_v51 = vld [vmem:[#allocation18 + $0x390] sm:$0xf0] }
0x1649   : > { %v7940_v39 = vpop.f32.mrf.mxu2  ;;  %8855 = vmatpush.bf16.msrb.mxu2 %v12594_v17  ;;  %v13749_v26 = vld [vmem:[#allocation18 + $0x10c] sm:$0xf0] }
0x164a   : > { %v7989_v18 = vsel %vm4356_vm9, %v15517_v14, 0.0  ;;  %v12833_v39 = vld [vmem:[#allocation18 + $0x360] sm:$0xf]  ;;  %v13781_v17 = vld [vmem:[#allocation18 + $0x20c] sm:$0xf0]  ;;  %v12530_v1 = vor.u32 %v13749_v26, %v12529_v58 }
0x164b   : > { %v7990_v60 = vadd.f32 %v7989_v18, %v7988_v9  ;;  %v13825_v9 = vld [vmem:[#allocation18 + $0x36c] sm:$0xf0]  ;;  %v12450_v18 = vor.u32 %v13729_v43, %v12449_v2  ;;  %8881 = vmatpush.bf16.msrb.mxu1 %v12850_v5  ;;  %v12658_v2 = vor.u32 %v13781_v17, %v12657_v16  ;;  %v12785_v43 = vld [vmem:[#allocation18 + $0x300] sm:$0xf]  ;;  %v13743_v5 = vld [vmem:[#allocation18 + $0xe4] sm:$0xf] }
0x164c   : > { %v12834_v10 = vor.u32 %v13825_v9, %v12833_v39  ;;  %8869 = vmatpush.bf16.msrb.mxu3 %v12706_v21  ;;  %v12786_v36 = vor.u32 %v13813_v3, %v12785_v43  ;;  %v12643_v39 = vld [vmem:[#allocation18 + $0x1f0] sm:$0xf0]  ;;  %v12518_v9 = vor.u32 %v13743_v5, %v12515_v7  ;;  %v13727_v58 = vld [vmem:[#allocation18 + $0x64] sm:$0xf] }
0x164d   : > { %7991 = vadd.xlane.f32.xlu1 %v7990_v60  ;;  %v12433_v60 = vld [vmem:[#allocation18 + $0x40] sm:$0xf]  ;;  %8843 = vmatpush.bf16.msrb.mxu0 %v12450_v18  ;;  %v12646_v18 = vor.u32 %v13775_v12, %v12643_v39  ;;  %v13759_v26 = vld [vmem:[#allocation18 + $0x164] sm:$0xf]  ;;  %v12579_v17 = vld [vmem:[#allocation18 + $0x170] sm:$0xf0] }
0x164e   : > { %v12434_v23 = vor.u32 %v13725_v20, %v12433_v60  ;;  %8856 = vmatpush.bf16.msrb.mxu2 %v12578_v37  ;;  %v13807_v60 = vld [vmem:[#allocation18 + $0x2e4] sm:$0xf]  ;;  %v12771_v20 = vld [vmem:[#allocation18 + $0x2f0] sm:$0xf0]  ;;  %v12582_v43 = vor.u32 %v13759_v26, %v12579_v17 }
0x164f   : > { %8882 = vmatpush.bf16.msrb.mxu1 %v12834_v10  ;;  %v13839_v37 = vld [vmem:[#allocation18 + $0x3e4] sm:$0xf]  ;;  %v12774_v21 = vor.u32 %v13807_v60, %v12771_v20  ;;  %v12435_v39 = vld [vmem:[#allocation18 + $0x50] sm:$0xf0] }
0x1650   : > { %8870 = vmatpush.bf16.msrb.mxu3 %v12690_v50  ;;  %v12902_v10 = vor.u32 %v13839_v37, %v12899_v22  ;;  %v12883_v50 = vld [vmem:[#allocation18 + $0x3d0] sm:$0xf0]  ;;  %v13823_v5 = vld [vmem:[#allocation18 + $0x364] sm:$0xf] }
0x1651   : > { %8844 = vmatpush.bf16.msrb.mxu0 %v12434_v23  ;;  %v12755_v23 = vld [vmem:[#allocation18 + $0x2d0] sm:$0xf0]  ;;  %v13723_v12 = vld [vmem:[#allocation18 + $0x44] sm:$0xf] }
0x1652   : > { %8857 = vmatpush.bf16.msrb.mxu2 %v12562_v28  ;;  %v13835_v28 = vld [vmem:[#allocation18 + $0x3c4] sm:$0xf]  ;;  %v12563_v60 = vld [vmem:[#allocation18 + $0x150] sm:$0xf0] }
0x1653   : > { %8883 = vmatpush.bf16.msrb.mxu1 %v12818_v30  ;;  %v13787_v20 = vld [vmem:[#allocation18 + $0x244] sm:$0xf]  ;;  %v12691_v37 = vld [vmem:[#allocation18 + $0x250] sm:$0xf0] }
0x1654   : > { %8871 = vmatpush.bf16.msrb.mxu3 %v12674_v38  ;;  %v13731_v38 = vld [vmem:[#allocation18 + $0x84] sm:$0xf]  ;;  %v12694_v22 = vor.u32 %v13787_v20, %v12691_v37  ;;  %v12521_v20 = vld [vmem:[#allocation18 + $0xe8] sm:$0xf] }
0x1657   : > { %8884 = vmatpush.bf16.msrb.mxu1 %v12802_v41  ;;  %v12595_v41 = vld [vmem:[#allocation18 + $0x190] sm:$0xf0] }
0x1658   : > { %8872 = vmatpush.bf16.msrb.mxu3 %v12658_v2  ;;  %v12707_v2 = vld [vmem:[#allocation18 + $0x270] sm:$0xf0] }
0x165b   : > { %8885 = vmatpush.bf16.msrb.mxu1 %v12786_v36  ;;  %v12835_v36 = vld [vmem:[#allocation18 + $0x370] sm:$0xf0] }
0x165c   : > { %8917 = vmatpush.bf16.msra.mxu3 %v12774_v21  ;;  %v12838_v7 = vor.u32 %v13823_v5, %v12835_v36 }
0x165f   : > { %8930 = vmatpush.bf16.msra.mxu1 %v12902_v10  ;;  %v12822_v10 = vor.u32 %v13819_v11, %v12819_v57  ;;  %v13746_v57 = vld [vmem:[#allocation18 + $0xf4] sm:$0xf0] }
0x16c0   : > { %v7992_v33 = vpop.xlane.xlu1 %7991 }
0x16c1   : > { %v7993_v27 = vmul.f32 %v7992_v33, %v15317_v35  ;;  %v13803_v33 = vld [vmem:[#allocation18 + $0x2c4] sm:$0xf] }
0x16c2   : > { %v12758_v30 = vor.u32 %v13803_v33, %v12755_v23  ;;  %v12547_v33 = vld [vmem:[#allocation18 + $0x130] sm:$0xf0] }
0x16c3   : > { %v15523_v6 = vsub.f32 %v15507_v15, %v7993_v27  ;;  %v15526_v32 = vsub.f32 %v15505_v0, %v7993_v27  ;;  %v15529_v42 = vsub.f32 %v15509_v61, %v7993_v27  ;;  %v15532_v48 = vsub.f32 %v15517_v14, %v7993_v27  ;;  %v12675_v23 = vld [vmem:[#allocation18 + $0x230] sm:$0xf0] }
0x16c4   : > { %v12418_v61 = vor.u32 %v13721_v47, %v12417_v4  ;;  %v12546_v14 = vor.u32 %v13753_v49, %v12545_v31  ;;  %v12630_v27 = vor.u32 %v13771_v24, %v12627_v25  ;;  %v12886_v4 = vor.u32 %v13835_v28, %v12883_v50  ;;  %v13735_v47 = vld [vmem:[#allocation18 + $0xa4] sm:$0xf]  ;;  %v12483_v31 = vld [vmem:[#allocation18 + $0xb0] sm:$0xf0]  ;;  %8918 = vmatpush.bf16.msra.mxu3 %v12758_v30 }
0x16c5   : > { %v7998_v19 = vmul.f32 %v15523_v6, %v15523_v6  ;;  %v7999_v15 = vmul.f32 %v15526_v32, %v15526_v32  ;;  %v8000_v0 = vmul.f32 %v15529_v42, %v15529_v42  ;;  %v8001_v13 = vmul.f32 %v15532_v48, %v15532_v48  ;;  %v13767_v49 = vld [vmem:[#allocation18 + $0x1a4] sm:$0xf]  ;;  %v12419_v24 = vld [vmem:[#allocation18 + $0x30] sm:$0xf0] }
0x16c6   : > { %8845 = vmatpush.bf16.msrb.mxu0 %v12418_v61  ;;  %8858 = vmatpush.bf16.msrb.mxu2 %v12546_v14  ;;  %v12486_v46 = vor.u32 %v13735_v47, %v12483_v31  ;;  %v12867_v61 = vld [vmem:[#allocation18 + $0x3b0] sm:$0xf0]  ;;  %v13751_v25 = vld [vmem:[#allocation18 + $0x124] sm:$0xf] }
0x16c7   : > { %v8002_v40 = vsel %vm4356_vm9, %v7998_v19, 0.0  ;;  %v8003_v8 = vsel %vm4356_vm9, %v7999_v15, 0.0  ;;  %v8005_v55 = vsel %vm4356_vm9, %v8000_v0, 0.0  ;;  %v8007_v34 = vsel %vm4356_vm9, %v8001_v13, 0.0  ;;  %v13831_v0 = vld [vmem:[#allocation18 + $0x3a4] sm:$0xf]  ;;  %8931 = vmatpush.bf16.msra.mxu1 %v12886_v4 }
0x16c8   : > { %v8004_v52 = vadd.f32 %v8003_v8, %v8002_v40  ;;  %v12614_v19 = vor.u32 %v13767_v49, %v12611_v59  ;;  %v12742_v15 = vor.u32 %v13799_v45, %v12739_v63  ;;  %v12870_v14 = vor.u32 %v13831_v0, %v12867_v61  ;;  %v12467_v13 = vld [vmem:[#allocation18 + $0x90] sm:$0xf0]  ;;  %v13763_v40 = vld [vmem:[#allocation18 + $0x184] sm:$0xf] }
0x16c9   : > { %v12470_v8 = vor.u32 %v13731_v38, %v12467_v13  ;;  %v12550_v50 = vor.u32 %v13751_v25, %v12547_v33  ;;  %v13815_v30 = vld [vmem:[#allocation18 + $0x324] sm:$0xf]  ;;  %v12803_v4 = vld [vmem:[#allocation18 + $0x330] sm:$0xf0]  ;;  %v12905_v25 = vld [vmem:[#allocation18 + $0x3e8] sm:$0xf] }
0x16ca   : > { %v8006_v29 = vadd.f32 %v8005_v55, %v8004_v52  ;;  %8846 = vmatpush.bf16.msrb.mxu0 %v12402_v62  ;;  %8859 = vmatpush.bf16.msrb.mxu2 %v12530_v1  ;;  %v13795_v52 = vld [vmem:[#allocation18 + $0x284] sm:$0xf]  ;;  %v12723_v55 = vld [vmem:[#allocation18 + $0x290] sm:$0xf0]  ;;  %v12806_v45 = vor.u32 %v13815_v30, %v12803_v4 }
0x16cb   : > { %8919 = vmatpush.bf16.msra.mxu3 %v12742_v15  ;;  %8932 = vmatpush.bf16.msra.mxu1 %v12870_v14  ;;  %v12451_v62 = vld [vmem:[#allocation18 + $0x70] sm:$0xf0]  ;;  %v13791_v1 = vld [vmem:[#allocation18 + $0x264] sm:$0xf] }
0x16cc   : > { %v8008_v44 = vadd.f32 %v8007_v34, %v8006_v29  ;;  %v12598_v29 = vor.u32 %v13763_v40, %v12595_v41  ;;  %v12726_v34 = vor.u32 %v13795_v52, %v12723_v55  ;;  %v12454_v16 = vor.u32 %v13727_v58, %v12451_v62  ;;  %v13715_v47 = vld [vmem:[#allocation18 + $0x4] sm:$0xf]  ;;  %v12403_v49 = vld [vmem:[#allocation18 + $0x10] sm:$0xf0] }
0x16cd   : > { %v12710_v3 = vor.u32 %v13791_v1, %v12707_v2  ;;  %v12531_v59 = vld [vmem:[#allocation18 + $0x110] sm:$0xf0]  ;;  %v13779_v63 = vld [vmem:[#allocation18 + $0x204] sm:$0xf]  ;;  %v12406_v61 = vor.u32 %v13715_v47, %v12403_v49  ;;  %v13742_v49 = vld [vmem:[#allocation18 + $0xd4] sm:$0xf0] }
0x16ce   : > { %8009 = vadd.xlane.f32.xlu2 %v8008_v44  ;;  %8891 = vmatpush.bf16.msra.mxu0 %v12518_v9  ;;  %v13827_v44 = vld [vmem:[#allocation18 + $0x384] sm:$0xf]  ;;  %v12787_v0 = vld [vmem:[#allocation18 + $0x310] sm:$0xf0] }
0x16cf   : > { %8904 = vmatpush.bf16.msra.mxu2 %v12646_v18  ;;  %v12854_v56 = vor.u32 %v13827_v44, %v12851_v51  ;;  %8920 = vmatpush.bf16.msra.mxu3 %v12726_v34  ;;  %v13755_v9 = vld [vmem:[#allocation18 + $0x144] sm:$0xf]  ;;  %v12438_v18 = vor.u32 %v13723_v12, %v12435_v39  ;;  %v7982_v44 = vld [vmem:[%s15693_s28] sm:$0xf]  ;;  %s15697_s28 = sld [smem:[#allocation58_spill]] }
0x16d0   : > { %v12566_v21 = vor.u32 %v13755_v9, %v12563_v60  ;;  %v13811_v15 = vld [vmem:[#allocation18 + $0x304] sm:$0xf]  ;;  %v8028_v58 = vperm.slane %v7982_v44, 0  ;;  %v8030_v26 = vperm.slane %v7982_v44, 2 }
0x16d1   : > { %8933 = vmatpush.bf16.msra.mxu1 %v12854_v56  ;;  %v7983_v56 = vld [vmem:[%s15694_s26] sm:$0xf] }
0x16d2   : > { %8892 = vmatpush.bf16.msra.mxu0 %v12502_v54  ;;  %v13719_v54 = vld [vmem:[#allocation18 + $0x24] sm:$0xf]  ;;  %v8041_v17 = vperm.slane %v7983_v56, 0  ;;  %v8042_v2 = vperm.slane %v7983_v56, 1 }
0x16d3   : > { %8905 = vmatpush.bf16.msra.mxu2 %v12630_v27  ;;  %8921 = vmatpush.bf16.msra.mxu3 %v12710_v3  ;;  %v13783_v27 = vld [vmem:[#allocation18 + $0x224] sm:$0xf]  ;;  %v12422_v28 = vor.u32 %v13719_v54, %v12419_v24  ;;  %v8044_v3 = vperm.slane %v7983_v56, 3  ;;  %v13778_v54 = vld [vmem:[#allocation18 + $0x1f4] sm:$0xf0] }
0x16d4   : > { %v12678_v31 = vor.u32 %v13783_v27, %v12675_v23  ;;  %v12777_v24 = vld [vmem:[#allocation18 + $0x2e8] sm:$0xf]  ;;  %v12522_v23 = vor.u32 %v13746_v57, %v12521_v20  ;;  %v13762_v20 = vld [vmem:[#allocation18 + $0x174] sm:$0xf0] }
0x16d5   : > { %8934 = vmatpush.bf16.msra.mxu1 %v12838_v7  ;;  %s1556_s26 = scalar_lea.vmem %s15697_s28, %s15700_s0 }
0x16d6   : > { %8893 = vmatpush.bf16.msra.mxu0 %v12486_v46  ;;  %v13747_v46 = vld [vmem:[#allocation18 + $0x104] sm:$0xf] }
0x16d7   : > { %8906 = vmatpush.bf16.msra.mxu2 %v12614_v19  ;;  %8922 = vmatpush.bf16.msra.mxu3 %v12694_v22  ;;  %v12659_v19 = vld [vmem:[#allocation18 + $0x210] sm:$0xf0]  ;;  %v12534_v14 = vor.u32 %v13747_v46, %v12531_v59 }
0x16d8   : > { %v12662_v13 = vor.u32 %v13779_v63, %v12659_v19  ;;  %v13774_v63 = vld [vmem:[#allocation18 + $0x1d4] sm:$0xf0]  ;;  %v12761_v19 = vld [vmem:[#allocation18 + $0x2c8] sm:$0xf] }
0x16d9   : > { %8935 = vmatpush.bf16.msra.mxu1 %v12822_v10  ;;  %v12649_v10 = vld [vmem:[#allocation18 + $0x1e8] sm:$0xf] }
0x16da   : > { %8894 = vmatpush.bf16.msra.mxu0 %v12470_v8  ;;  %v12790_v8 = vor.u32 %v13811_v15, %v12787_v0  ;;  %v13806_v15 = vld [vmem:[#allocation18 + $0x2d4] sm:$0xf0]  ;;  %v12889_v0 = vld [vmem:[#allocation18 + $0x3c8] sm:$0xf] }
0x16db   : > { %8907 = vmatpush.bf16.msra.mxu2 %v12598_v29  ;;  %8923 = vmatpush.bf16.msra.mxu3 %v12678_v31  ;;  %v12505_v31 = vld [vmem:[#allocation18 + $0xc8] sm:$0xf] }
0x16dd   : > { %8936 = vmatpush.bf16.msra.mxu1 %v12806_v45  ;;  %v12633_v45 = vld [vmem:[#allocation18 + $0x1c8] sm:$0xf] }
0x16de   : > { %8895 = vmatpush.bf16.msra.mxu0 %v12454_v16  ;;  %v8031_v16 = vperm.slane %v7982_v44, 3 }
0x16df   : > { %8908 = vmatpush.bf16.msra.mxu2 %v12582_v43  ;;  %8924 = vmatpush.bf16.msra.mxu3 %v12662_v13  ;;  %v8043_v43 = vperm.slane %v7983_v56, 2  ;;  %v12489_v13 = vld [vmem:[#allocation18 + $0xa8] sm:$0xf] }
0x16e1   : > { %8937 = vmatpush.bf16.msra.mxu1 %v12790_v8  ;;  %v12762_v8 = vor.u32 %v13806_v15, %v12761_v19  ;;  %v13754_v19 = vld [vmem:[#allocation18 + $0x134] sm:$0xf0]  ;;  %v12681_v15 = vld [vmem:[#allocation18 + $0x228] sm:$0xf] }
0x16e2   : > { %8896 = vmatpush.bf16.msra.mxu0 %v12438_v18 }
0x16e3   : > { %8909 = vmatpush.bf16.msra.mxu2 %v12566_v21 }
0x16e6   : > { %8897 = vmatpush.bf16.msra.mxu0 %v12422_v28  ;;  %v12650_v28 = vor.u32 %v13778_v54, %v12649_v10  ;;  %v12441_v54 = vld [vmem:[#allocation18 + $0x48] sm:$0xf] }
0x16e7   : > { %8910 = vmatpush.bf16.msra.mxu2 %v12550_v50 }
0x16ea   : > { %8898 = vmatpush.bf16.msra.mxu0 %v12406_v61  ;;  %v13838_v61 = vld [vmem:[#allocation18 + $0x3d4] sm:$0xf0] }
0x16eb   : > { %8911 = vmatpush.bf16.msra.mxu2 %v12534_v14  ;;  %v12506_v14 = vor.u32 %v13742_v49, %v12505_v31  ;;  %v12425_v49 = vld [vmem:[#allocation18 + $0x28] sm:$0xf] }
0x1741   : > { %v8010_v38 = vpop.xlane.xlu2 %8009 }
0x1742   : > { %v8011_v40 = vmul.f32 %v8010_v38, %v15317_v35  ;;  %v8029_v35 = vperm.slane %v7982_v44, 1  ;;  %v12634_v38 = vor.u32 %v13774_v63, %v12633_v45  ;;  %v12873_v44 = vld [vmem:[#allocation18 + $0x3a8] sm:$0xf] }
0x1743   : > { %v12553_v63 = vld [vmem:[#allocation18 + $0x128] sm:$0xf] }
0x1744   : > { %v8012_v41 = vadd.f32 1e-05, %v8011_v40  ;;  %v13738_v40 = vld [vmem:[#allocation18 + $0xb4] sm:$0xf0] }
0x1745   : > { %v12490_v56 = vor.u32 %v13738_v40, %v12489_v13  ;;  %v12554_v40 = vor.u32 %v13754_v19, %v12553_v63  ;;  %v13764_v19 = vld [vmem:[#allocation18 + $0x18c] sm:$0xf] }
0x1746   : > { %14149 = vrsqrt.f32 %v8012_v41  ;;  %vm8019_vm1 = vweird.f32 %v8012_v41 }
0x174c   : > { %v14150_v52 = vpop.eup %14149 }
0x174d   : > { %v8014_v55 = vmul.f32 %v14150_v52, %v8012_v41  ;;  %vm8020_vm0 = vweird.f32 %v14150_v52  ;;  %v12890_v41 = vor.u32 %v13838_v61, %v12889_v0  ;;  %v13786_v0 = vld [vmem:[#allocation18 + $0x234] sm:$0xf0]  ;;  %v12809_v61 = vld [vmem:[#allocation18 + $0x328] sm:$0xf] }
0x174e   : > { %vm8021_vm2 = vmor %vm8019_vm1, %vm8020_vm0 }
0x174f   : > { %v8015_v29 = vmul.f32 %v14150_v52, %v8014_v55  ;;  %v13770_v55 = vld [vmem:[#allocation18 + $0x1b4] sm:$0xf0] }
0x1751   : > { %v8016_v34 = vmul.f32 0.5, %v8015_v29  ;;  %v12745_v29 = vld [vmem:[#allocation18 + $0x2a8] sm:$0xf] }
0x1753   : > { %v8017_v51 = vsub.f32 1.5, %v8016_v34  ;;  %v13802_v34 = vld [vmem:[#allocation18 + $0x2b4] sm:$0xf0] }
0x1755   : > { %v8018_v62 = vmul.f32 %v14150_v52, %v8017_v51  ;;  %v13834_v51 = vld [vmem:[#allocation18 + $0x3b4] sm:$0xf0] }
0x1757   : > { %v8022_v1 = vsel %vm8021_vm2, %v14150_v52, %v8018_v62  ;;  %v12617_v52 = vld [vmem:[#allocation18 + $0x1a8] sm:$0xf] }
0x1758   : > { %v8023_v5 = vmul.f32 %v8022_v1, %v15523_v6  ;;  %v8024_v36 = vmul.f32 %v8022_v1, %v15526_v32  ;;  %v8025_v7 = vmul.f32 %v8022_v1, %v15529_v42  ;;  %v8026_v12 = vmul.f32 %v8022_v1, %v15532_v48  ;;  %v13810_v6 = vld [vmem:[#allocation18 + $0x2f4] sm:$0xf0]  ;;  %v12473_v62 = vld [vmem:[#allocation18 + $0x88] sm:$0xf] }
0x1759   : > { %v13842_v48 = vld [vmem:[#allocation18 + $0x3f4] sm:$0xf0]  ;;  %v12778_v46 = vor.u32 %v13810_v6, %v12777_v24 }
0x175a   : > { %v8036_v39 = vmul.f32 %v8028_v58, %v8023_v5  ;;  %v8037_v9 = vmul.f32 %v8029_v35, %v8024_v36  ;;  %v8038_v18 = vmul.f32 %v8030_v26, %v8025_v7  ;;  %v8039_v60 = vmul.f32 %v8031_v16, %v8026_v12  ;;  %v13734_v35 = vld [vmem:[#allocation18 + $0x94] sm:$0xf0]  ;;  %v12457_v12 = vld [vmem:[#allocation18 + $0x68] sm:$0xf] }
0x175b   : > { %v12906_v59 = vor.u32 %v13842_v48, %v12905_v25  ;;  %v12618_v58 = vor.u32 %v13770_v55, %v12617_v52  ;;  %v12746_v26 = vor.u32 %v13802_v34, %v12745_v29  ;;  %v12874_v16 = vor.u32 %v13834_v51, %v12873_v44  ;;  %v13766_v1 = vld [vmem:[#allocation18 + $0x194] sm:$0xf0]  ;;  %v12825_v48 = vld [vmem:[#allocation18 + $0x348] sm:$0xf] }
0x175c   : > { %v8049_v37 = vadd.f32 %v8041_v17, %v8036_v39  ;;  %v8050_v21 = vadd.f32 %v8042_v2, %v8037_v9  ;;  %v8051_v22 = vadd.f32 %v8043_v43, %v8038_v18  ;;  %v8052_v11 = vadd.f32 %v8044_v3, %v8039_v60  ;;  %v12601_v17 = vld [vmem:[#allocation18 + $0x188] sm:$0xf]  ;;  %v13798_v43 = vld [vmem:[#allocation18 + $0x294] sm:$0xf0] }
0x175d   : > { %v12729_v2 = vld [vmem:[#allocation18 + $0x288] sm:$0xf]  ;;  %v13830_v5 = vld [vmem:[#allocation18 + $0x394] sm:$0xf0]  ;;  %v12474_v36 = vor.u32 %v13734_v35, %v12473_v62  ;;  %v12602_v7 = vor.u32 %v13766_v1, %v12601_v17  ;;  %v12682_v55 = vor.u32 %v13786_v0, %v12681_v15  ;;  %v12523_v62 = vld [vmem:[#allocation18 + $0xf8] sm:$0xf0] }
0x175e   : > { %v8053_v32 = vmax.f32 %v8049_v37, 0.0  ;;  %v8054_v33 = vmax.f32 %v8050_v21, 0.0  ;;  %v8055_v42 = vmax.f32 %v8051_v22, 0.0  ;;  %v8056_v27 = vmax.f32 %v8052_v11, 0.0  ;;  %v12857_v3 = vld [vmem:[#allocation18 + $0x388] sm:$0xf] }
0x175f   : > { %v13730_v39 = vld [vmem:[#allocation18 + $0x74] sm:$0xf0]  ;;  %v12730_v9 = vor.u32 %v13798_v43, %v12729_v2  ;;  %v12858_v18 = vor.u32 %v13830_v5, %v12857_v3  ;;  %v12585_v60 = vld [vmem:[#allocation18 + $0x168] sm:$0xf]  ;;  %v13776_v35 = vld [vmem:[#allocation18 + $0x1ec] sm:$0xf] }
0x1760   : > { %v15553_v50 = vpack.c.bf16 %v8053_v32, %v8053_v32  ;;  %v15555_v30 = vpack.c.bf16 %v8054_v33, %v8054_v33  ;;  %v15557_v4 = vpack.c.bf16 %v8055_v42, %v8055_v42  ;;  %v15559_v47 = vpack.c.bf16 %v8056_v27, %v8056_v27  ;;  %v12713_v37 = vld [vmem:[#allocation18 + $0x268] sm:$0xf]  ;;  %v13794_v21 = vld [vmem:[#allocation18 + $0x274] sm:$0xf0]  ;;  %v12779_v2 = vld [vmem:[#allocation18 + $0x2f8] sm:$0xf0] }
0x1761   : > { %v12841_v22 = vld [vmem:[#allocation18 + $0x368] sm:$0xf]  ;;  %v13826_v11 = vld [vmem:[#allocation18 + $0x374] sm:$0xf0]  ;;  %v12458_v57 = vor.u32 %v13730_v39, %v12457_v12  ;;  %v12586_v10 = vor.u32 %v13762_v20, %v12585_v60  ;;  %v12714_v6 = vor.u32 %v13794_v21, %v12713_v37  ;;  %v13840_v43 = vld [vmem:[#allocation18 + $0x3ec] sm:$0xf] }
0x1762   : > { %8847 = vmatmul.bf16.vlgmr.msrb.gmra.mxu0 %v15553_v50  ;;  %8860 = vmatmul.bf16.vlgmr.msrb.gmra.mxu2 %v15555_v30  ;;  %v13726_v24 = vld [vmem:[#allocation18 + $0x54] sm:$0xf0]  ;;  %v12842_v25 = vor.u32 %v13826_v11, %v12841_v22  ;;  %v12569_v32 = vld [vmem:[#allocation18 + $0x148] sm:$0xf]  ;;  %v12907_v3 = vld [vmem:[#allocation18 + $0x3f8] sm:$0xf0] }
0x1763   : > { %8873 = vmatmul.bf16.vlgmr.msrb.gmra.mxu3 %v15557_v4  ;;  %8886 = vmatmul.bf16.vlgmr.msrb.gmra.mxu1 %v15559_v47  ;;  %v13758_v33 = vld [vmem:[#allocation18 + $0x154] sm:$0xf0]  ;;  %v12697_v42 = vld [vmem:[#allocation18 + $0x248] sm:$0xf]  ;;  %v13740_v39 = vld [vmem:[#allocation18 + $0xcc] sm:$0xf]  ;;  %v12910_v60 = vor.u32 %v13840_v43, %v12907_v3 }
0x1764   : > { %8943 = vmatpush.bf16.msrb.mxu0 %v12522_v23  ;;  %8956 = vmatpush.bf16.msrb.mxu2 %v12650_v28  ;;  %v13790_v27 = vld [vmem:[#allocation18 + $0x254] sm:$0xf0]  ;;  %v12442_v28 = vor.u32 %v13726_v24, %v12441_v54  ;;  %v12570_v31 = vor.u32 %v13758_v33, %v12569_v32  ;;  %v12665_v34 = vld [vmem:[#allocation18 + $0x208] sm:$0xf]  ;;  %v13772_v20 = vld [vmem:[#allocation18 + $0x1cc] sm:$0xf] }
0x1765   : > { %8969 = vmatpush.bf16.msrb.mxu3 %v12778_v46  ;;  %8982 = vmatpush.bf16.msrb.mxu1 %v12906_v59  ;;  %v13822_v23 = vld [vmem:[#allocation18 + $0x354] sm:$0xf0]  ;;  %v12698_v59 = vor.u32 %v13790_v27, %v12697_v42  ;;  %v12793_v51 = vld [vmem:[#allocation18 + $0x308] sm:$0xf]  ;;  %v12635_v37 = vld [vmem:[#allocation18 + $0x1d8] sm:$0xf0] }
0x1766   : > { %v13722_v46 = vld [vmem:[#allocation18 + $0x34] sm:$0xf0]  ;;  %v12826_v45 = vor.u32 %v13822_v23, %v12825_v48  ;;  %v13804_v21 = vld [vmem:[#allocation18 + $0x2cc] sm:$0xf]  ;;  %v12763_v22 = vld [vmem:[#allocation18 + $0x2d8] sm:$0xf0]  ;;  %v12638_v54 = vor.u32 %v13772_v20, %v12635_v37 }
0x1767   : > { %v12426_v13 = vor.u32 %v13722_v46, %v12425_v49  ;;  %v13750_v52 = vld [vmem:[#allocation18 + $0x114] sm:$0xf0]  ;;  %v13836_v11 = vld [vmem:[#allocation18 + $0x3cc] sm:$0xf]  ;;  %v12619_v42 = vld [vmem:[#allocation18 + $0x1b8] sm:$0xf0] }
0x1768   : > { %8944 = vmatpush.bf16.msrb.mxu0 %v12506_v14  ;;  %8957 = vmatpush.bf16.msrb.mxu2 %v12634_v38  ;;  %v13818_v14 = vld [vmem:[#allocation18 + $0x334] sm:$0xf0]  ;;  %v12409_v38 = vld [vmem:[#allocation18 + $0x8] sm:$0xf]  ;;  %v13736_v24 = vld [vmem:[#allocation18 + $0xac] sm:$0xf] }
0x1769   : > { %8970 = vmatpush.bf16.msrb.mxu3 %v12762_v8  ;;  %8983 = vmatpush.bf16.msrb.mxu1 %v12890_v41  ;;  %v13718_v8 = vld [vmem:[#allocation18 + $0x14] sm:$0xf0]  ;;  %v12537_v41 = vld [vmem:[#allocation18 + $0x108] sm:$0xf]  ;;  %v12810_v29 = vor.u32 %v13818_v14, %v12809_v61  ;;  %v13768_v33 = vld [vmem:[#allocation18 + $0x1ac] sm:$0xf] }
0x176a   : > { %v13782_v44 = vld [vmem:[#allocation18 + $0x214] sm:$0xf0]  ;;  %v12410_v17 = vor.u32 %v13718_v8, %v12409_v38  ;;  %v12538_v1 = vor.u32 %v13750_v52, %v12537_v41  ;;  %v13800_v27 = vld [vmem:[#allocation18 + $0x2ac] sm:$0xf]  ;;  %v12747_v48 = vld [vmem:[#allocation18 + $0x2b8] sm:$0xf0]  ;;  %v12622_v49 = vor.u32 %v13768_v33, %v12619_v42 }
0x176b   : > { %v12666_v5 = vor.u32 %v13782_v44, %v12665_v34  ;;  %v13832_v23 = vld [vmem:[#allocation18 + $0x3ac] sm:$0xf]  ;;  %v12603_v15 = vld [vmem:[#allocation18 + $0x198] sm:$0xf0] }
0x176c   : > { %8945 = vmatpush.bf16.msrb.mxu0 %v12490_v56  ;;  %8958 = vmatpush.bf16.msrb.mxu2 %v12618_v58  ;;  %v13814_v56 = vld [vmem:[#allocation18 + $0x314] sm:$0xf0]  ;;  %v13744_v58 = vld [vmem:[#allocation18 + $0xec] sm:$0xf]  ;;  %v12731_v61 = vld [vmem:[#allocation18 + $0x298] sm:$0xf0] }
0x176d   : > { %8971 = vmatpush.bf16.msrb.mxu3 %v12746_v26  ;;  %8984 = vmatpush.bf16.msrb.mxu1 %v12874_v16  ;;  %v12651_v26 = vld [vmem:[#allocation18 + $0x1f8] sm:$0xf0]  ;;  %v13808_v16 = vld [vmem:[#allocation18 + $0x2ec] sm:$0xf] }
0x176e   : > { %v12654_v12 = vor.u32 %v13776_v35, %v12651_v26  ;;  %v13732_v46 = vld [vmem:[#allocation18 + $0x8c] sm:$0xf]  ;;  %v12859_v38 = vld [vmem:[#allocation18 + $0x398] sm:$0xf0] }
0x176f   : > { %v13796_v0 = vld [vmem:[#allocation18 + $0x28c] sm:$0xf]  ;;  %v12459_v41 = vld [vmem:[#allocation18 + $0x78] sm:$0xf0] }
0x1770   : > { %8946 = vmatpush.bf16.msrb.mxu0 %v12474_v36  ;;  %8959 = vmatpush.bf16.msrb.mxu2 %v12602_v7  ;;  %v12794_v36 = vor.u32 %v13814_v56, %v12793_v51  ;;  %v12526_v7 = vor.u32 %v13744_v58, %v12523_v62  ;;  %v13828_v14 = vld [vmem:[#allocation18 + $0x38c] sm:$0xf]  ;;  %v12734_v52 = vor.u32 %v13796_v0, %v12731_v61  ;;  %v12587_v34 = vld [vmem:[#allocation18 + $0x178] sm:$0xf0]  ;;  %v13847_v0 = vld [vmem:[#allocation19 + $0x20] sm:$0xff] }
0x1771   : > { %8972 = vmatpush.bf16.msrb.mxu3 %v12730_v9  ;;  %8985 = vmatpush.bf16.msrb.mxu1 %v12858_v18  ;;  %v12507_v9 = vld [vmem:[#allocation18 + $0xd8] sm:$0xf0]  ;;  %v12782_v18 = vor.u32 %v13808_v16, %v12779_v2  ;;  %v13728_v8 = vld [vmem:[#allocation18 + $0x6c] sm:$0xf] }
0x1772   : > { %8899 = vmatmul.bf16.vlgmr.msra.gmra.mxu0 %v15553_v50  ;;  %8912 = vmatmul.bf16.vlgmr.msra.gmra.mxu2 %v15555_v30  ;;  %v13792_v44 = vld [vmem:[#allocation18 + $0x26c] sm:$0xf]  ;;  %v12715_v51 = vld [vmem:[#allocation18 + $0x278] sm:$0xf0]  ;;  %v12462_v62 = vor.u32 %v13728_v8, %v12459_v41  ;;  %v13853_v41 = vld [vmem:[#allocation19 + $0x50] sm:$0xff] }
0x1773   : > { %8925 = vmatmul.bf16.vlgmr.msra.gmra.mxu3 %v15557_v4  ;;  %8938 = vmatmul.bf16.vlgmr.msra.gmra.mxu1 %v15559_v47  ;;  %v13824_v56 = vld [vmem:[#allocation18 + $0x36c] sm:$0xf]  ;;  %v12843_v58 = vld [vmem:[#allocation18 + $0x378] sm:$0xf0] }
0x1774   : > { %8947 = vmatpush.bf16.msrb.mxu0 %v12458_v57  ;;  %8960 = vmatpush.bf16.msrb.mxu2 %v12586_v10  ;;  %v12891_v57 = vld [vmem:[#allocation18 + $0x3d8] sm:$0xf0]  ;;  %v12510_v10 = vor.u32 %v13740_v39, %v12507_v9  ;;  %v13724_v26 = vld [vmem:[#allocation18 + $0x4c] sm:$0xf] }
0x1775   : > { %8973 = vmatpush.bf16.msrb.mxu3 %v12714_v6  ;;  %8986 = vmatpush.bf16.msrb.mxu1 %v12842_v25  ;;  %v12491_v6 = vld [vmem:[#allocation18 + $0xb8] sm:$0xf0]  ;;  %v12766_v25 = vor.u32 %v13804_v21, %v12763_v22  ;;  %v12894_v32 = vor.u32 %v13836_v11, %v12891_v57  ;;  %v13756_v2 = vld [vmem:[#allocation18 + $0x14c] sm:$0xf] }
0x1776   : > { %v12443_v16 = vld [vmem:[#allocation18 + $0x58] sm:$0xf0]  ;;  %v13788_v3 = vld [vmem:[#allocation18 + $0x24c] sm:$0xf] }
0x1777   : > { %v12571_v43 = vld [vmem:[#allocation18 + $0x158] sm:$0xf0]  ;;  %v13720_v9 = vld [vmem:[#allocation18 + $0x2c] sm:$0xf] }
0x1778   : > { %8948 = vmatpush.bf16.msrb.mxu0 %v12442_v28  ;;  %8961 = vmatpush.bf16.msrb.mxu2 %v12570_v31  ;;  %v12875_v28 = vld [vmem:[#allocation18 + $0x3b8] sm:$0xf0]  ;;  %v12494_v31 = vor.u32 %v13736_v24, %v12491_v6  ;;  %v12574_v39 = vor.u32 %v13756_v2, %v12571_v43  ;;  %v13752_v37 = vld [vmem:[#allocation18 + $0x12c] sm:$0xf]  ;;  %v15585_v2 = vld [vmem:[%s14856_s8] sm:$0xf] }
0x1779   : > { %8974 = vmatpush.bf16.msrb.mxu3 %v12698_v59  ;;  %8987 = vmatpush.bf16.msrb.mxu1 %v12826_v45  ;;  %v12475_v59 = vld [vmem:[#allocation18 + $0x98] sm:$0xf0]  ;;  %v12750_v45 = vor.u32 %v13800_v27, %v12747_v48  ;;  %v12878_v63 = vor.u32 %v13832_v23, %v12875_v28  ;;  %v13784_v22 = vld [vmem:[#allocation18 + $0x22c] sm:$0xf] }
0x177a   : > { %v12555_v21 = vld [vmem:[#allocation18 + $0x138] sm:$0xf0]  ;;  %v13816_v57 = vld [vmem:[#allocation18 + $0x32c] sm:$0xf] }
0x177b   : > { %v12683_v11 = vld [vmem:[#allocation18 + $0x238] sm:$0xf0]  ;;  %v12558_v24 = vor.u32 %v13752_v37, %v12555_v21  ;;  %v13716_v6 = vld [vmem:[#allocation18 + $0xc] sm:$0xf] }
0x177c   : > { %8949 = vmatpush.bf16.msrb.mxu0 %v12426_v13  ;;  %8962 = vmatpush.bf16.msrb.mxu2 %v12554_v40  ;;  %v12478_v13 = vor.u32 %v13732_v46, %v12475_v59  ;;  %v12606_v40 = vor.u32 %v13764_v19, %v12603_v15  ;;  %v13748_v42 = vld [vmem:[#allocation18 + $0x10c] sm:$0xf]  ;;  %v12539_v27 = vld [vmem:[#allocation18 + $0x118] sm:$0xf0]  ;;  %v13849_v19 = vld [vmem:[#allocation19 + $0x30] sm:$0xff] }
0x177d   : > { %8975 = vmatpush.bf16.msrb.mxu3 %v12682_v55  ;;  %8988 = vmatpush.bf16.msrb.mxu1 %v12810_v29  ;;  %v12862_v55 = vor.u32 %v13828_v14, %v12859_v38  ;;  %v13760_v29 = vld [vmem:[#allocation18 + $0x16c] sm:$0xf]  ;;  %v12667_v23 = vld [vmem:[#allocation18 + $0x218] sm:$0xf0]  ;;  %v12542_v46 = vor.u32 %v13748_v42, %v12539_v27  ;;  %v13845_v38 = vld [vmem:[#allocation19 + $0x10] sm:$0xff] }
0x177e   : > { %v12590_v35 = vor.u32 %v13760_v29, %v12587_v34  ;;  %v13780_v48 = vld [vmem:[#allocation18 + $0x20c] sm:$0xf]  ;;  %v13846_v61 = vld [vmem:[#allocation19 + $0x18] sm:$0xff]  ;;  %v13873_v27 = vld [vmem:[#allocation19 + $0xf0] sm:$0xff] }
0x177f   : > { %v13812_v28 = vld [vmem:[#allocation18 + $0x30c] sm:$0xf]  ;;  %v12670_v59 = vor.u32 %v13780_v48, %v12667_v23  ;;  %v13858_v14 = vld [vmem:[#allocation19 + $0x78] sm:$0xff] }
0x1780   : > { %8950 = vmatpush.bf16.msrb.mxu0 %v12410_v17  ;;  %8963 = vmatpush.bf16.msrb.mxu2 %v12538_v1  ;;  %v12718_v17 = vor.u32 %v13792_v44, %v12715_v51  ;;  %v12846_v1 = vor.u32 %v13824_v56, %v12843_v58  ;;  %v13848_v15 = vld [vmem:[#allocation19 + $0x28] sm:$0xff]  ;;  %v13866_v8 = vld [vmem:[#allocation19 + $0xb8] sm:$0xff]  ;;  %v13851_v58 = vld [vmem:[#allocation19 + $0x40] sm:$0xff] }
0x1781   : > { %8976 = vmatpush.bf16.msrb.mxu3 %v12666_v5  ;;  %8989 = vmatpush.bf16.msrb.mxu1 %v12794_v36  ;;  %v12699_v5 = vld [vmem:[#allocation18 + $0x258] sm:$0xf0]  ;;  %v13820_v36 = vld [vmem:[#allocation18 + $0x34c] sm:$0xf] }
0x1782   : > { %v13852_v34 = vld [vmem:[#allocation19 + $0x48] sm:$0xff] }
0x1783   : > { %8951 = vmatmul.bf16.vlgmr.msrb.gmra.mxu0 %v15553_v50  ;;  %8964 = vmatmul.bf16.vlgmr.msrb.gmra.mxu2 %v15555_v30  ;;  %v13864_v44 = vld [vmem:[#allocation19 + $0xa8] sm:$0xff] }
0x1784   : > { %8995 = vmatpush.bf16.msra.mxu0 %v12526_v7  ;;  %9008 = vmatpush.bf16.msra.mxu2 %v12654_v12  ;;  %v12827_v7 = vld [vmem:[#allocation18 + $0x358] sm:$0xf0]  ;;  %v12446_v12 = vor.u32 %v13724_v26, %v12443_v16  ;;  %v15582_v16 = vld [vmem:[%s15696_s20] sm:$0xf] }
0x1785   : > { %9021 = vmatpush.bf16.msra.mxu3 %v12782_v18  ;;  %9034 = vmatpush.bf16.msra.mxu1 %v12910_v60  ;;  %v12427_v18 = vld [vmem:[#allocation18 + $0x38] sm:$0xf0]  ;;  %v12702_v60 = vor.u32 %v13788_v3, %v12699_v5  ;;  %v12830_v20 = vor.u32 %v13820_v36, %v12827_v7  ;;  %v9049_v36 = vperm.slane %v15582_v16, 0 }
0x1786   : > { %8977 = vmatmul.bf16.vlgmr.msrb.gmra.mxu3 %v15557_v4  ;;  %8990 = vmatmul.bf16.vlgmr.msrb.gmra.mxu1 %v15559_v47  ;;  %v13862_v3 = vld [vmem:[#allocation19 + $0x98] sm:$0xff] }
0x1788   : > { %8996 = vmatpush.bf16.msra.mxu0 %v12510_v10  ;;  %9009 = vmatpush.bf16.msra.mxu2 %v12638_v54  ;;  %v12811_v10 = vld [vmem:[#allocation18 + $0x338] sm:$0xf0]  ;;  %v12430_v54 = vor.u32 %v13720_v9, %v12427_v18  ;;  %v13861_v9 = vld [vmem:[#allocation19 + $0x90] sm:$0xff] }
0x1789   : > { %9022 = vmatpush.bf16.msra.mxu3 %v12766_v25  ;;  %9035 = vmatpush.bf16.msra.mxu1 %v12894_v32  ;;  %v12411_v25 = vld [vmem:[#allocation18 + $0x18] sm:$0xf0]  ;;  %v12686_v32 = vor.u32 %v13784_v22, %v12683_v11  ;;  %v12814_v33 = vor.u32 %v13816_v57, %v12811_v10  ;;  %v13860_v22 = vld [vmem:[#allocation19 + $0x88] sm:$0xff] }
0x178c   : > { %8997 = vmatpush.bf16.msra.mxu0 %v12494_v31  ;;  %9010 = vmatpush.bf16.msra.mxu2 %v12622_v49  ;;  %v12795_v31 = vld [vmem:[#allocation18 + $0x318] sm:$0xf0]  ;;  %v12414_v49 = vor.u32 %v13716_v6, %v12411_v25 }
0x178d   : > { %9023 = vmatpush.bf16.msra.mxu3 %v12750_v45  ;;  %9036 = vmatpush.bf16.msra.mxu1 %v12878_v63  ;;  %v12798_v45 = vor.u32 %v13812_v28, %v12795_v31  ;;  %v13850_v63 = vld [vmem:[#allocation19 + $0x38] sm:$0xff]  ;;  %v9050_v28 = vperm.slane %v15582_v16, 1 }
0x178e   : > { %v13874_v6 = vld [vmem:[#allocation19 + $0xf8] sm:$0xff] }
0x1790   : > { %8998 = vmatpush.bf16.msra.mxu0 %v12478_v13  ;;  %9011 = vmatpush.bf16.msra.mxu2 %v12606_v40  ;;  %v13857_v13 = vld [vmem:[#allocation19 + $0x70] sm:$0xff]  ;;  %v13854_v40 = vld [vmem:[#allocation19 + $0x58] sm:$0xff] }
0x1791   : > { %9024 = vmatpush.bf16.msra.mxu3 %v12734_v52  ;;  %9037 = vmatpush.bf16.msra.mxu1 %v12862_v55  ;;  %v13865_v52 = vld [vmem:[#allocation19 + $0xb0] sm:$0xff]  ;;  %v15578_v55 = vld [vmem:[%s15695_s16] sm:$0xf] }
0x1792   : > { %v8831_v51 = vperm.slane %v15578_v55, 0  ;;  %v8832_v57 = vperm.slane %v15578_v55, 1 }
0x1794   : > { %8999 = vmatpush.bf16.msra.mxu0 %v12462_v62  ;;  %9012 = vmatpush.bf16.msra.mxu2 %v12590_v35  ;;  %v13863_v62 = vld [vmem:[#allocation19 + $0xa0] sm:$0xff] }
0x1795   : > { %9025 = vmatpush.bf16.msra.mxu3 %v12718_v17  ;;  %9038 = vmatpush.bf16.msra.mxu1 %v12846_v1 }
0x1798   : > { %9000 = vmatpush.bf16.msra.mxu0 %v12446_v12  ;;  %9013 = vmatpush.bf16.msra.mxu2 %v12574_v39  ;;  %v9063_v39 = vperm.slane %v15585_v2, 0 }
0x1799   : > { %9026 = vmatpush.bf16.msra.mxu3 %v12702_v60  ;;  %9039 = vmatpush.bf16.msra.mxu1 %v12830_v20 }
0x179c   : > { %9001 = vmatpush.bf16.msra.mxu0 %v12430_v54  ;;  %9014 = vmatpush.bf16.msra.mxu2 %v12558_v24  ;;  %v13859_v24 = vld [vmem:[#allocation19 + $0x80] sm:$0xff] }
0x179d   : > { %9027 = vmatpush.bf16.msra.mxu3 %v12686_v32  ;;  %9040 = vmatpush.bf16.msra.mxu1 %v12814_v33 }
0x17a0   : > { %9002 = vmatpush.bf16.msra.mxu0 %v12414_v49  ;;  %9015 = vmatpush.bf16.msra.mxu2 %v12542_v46  ;;  %v13872_v49 = vld [vmem:[#allocation19 + $0xe8] sm:$0xff] }
0x17a1   : > { %9028 = vmatpush.bf16.msra.mxu3 %v12670_v59  ;;  %9041 = vmatpush.bf16.msra.mxu1 %v12798_v45  ;;  %v9064_v59 = vperm.slane %v15585_v2, 1 }
0x17a3   : > { %9003 = vmatmul.bf16.vlgmr.msra.gmra.mxu0 %v15553_v50  ;;  %9016 = vmatmul.bf16.vlgmr.msra.gmra.mxu2 %v15555_v30  ;;  %v13844_v50 = vld [vmem:[#allocation19 + $0x8] sm:$0xff] }
0x17a4   : > { %9340 = vmatpush.bf16.msrb.mxu0 %v13850_v63  ;;  %9029 = vmatmul.bf16.vlgmr.msra.gmra.mxu3 %v15557_v4  ;;  %v13856_v30 = vld [vmem:[#allocation19 + $0x68] sm:$0xff]  ;;  %v13843_v4 = vld [vmem:[#allocation19] sm:$0xff] }
0x17a5   : > { %9042 = vmatmul.bf16.vlgmr.msra.gmra.mxu1 %v15559_v47  ;;  %9353 = vmatpush.bf16.msrb.mxu2 %v13858_v14  ;;  %v13855_v47 = vld [vmem:[#allocation19 + $0x60] sm:$0xff] }
0x17a6   : > { %9366 = vmatpush.bf16.msrb.mxu3 %v13866_v8  ;;  %9379 = vmatpush.bf16.msrb.mxu1 %v13874_v6 }
0x17a8   : > { %9341 = vmatpush.bf16.msrb.mxu0 %v13849_v19 }
0x17a9   : > { %9354 = vmatpush.bf16.msrb.mxu2 %v13857_v13  ;;  %v8833_v13 = vperm.slane %v15578_v55, 2 }
0x17aa   : > { %9367 = vmatpush.bf16.msrb.mxu3 %v13865_v52  ;;  %9380 = vmatpush.bf16.msrb.mxu1 %v13873_v27 }
0x17ac   : > { %9342 = vmatpush.bf16.msrb.mxu0 %v13848_v15 }
0x17ad   : > { %9355 = vmatpush.bf16.msrb.mxu2 %v13856_v30  ;;  %v13870_v30 = vld [vmem:[#allocation19 + $0xd8] sm:$0xff] }
0x17ae   : > { %9368 = vmatpush.bf16.msrb.mxu3 %v13864_v44  ;;  %9381 = vmatpush.bf16.msrb.mxu1 %v13872_v49 }
0x17b0   : > { %9343 = vmatpush.bf16.msrb.mxu0 %v13847_v0  ;;  %v13871_v0 = vld [vmem:[#allocation19 + $0xe0] sm:$0xff] }
0x17b1   : > { %9356 = vmatpush.bf16.msrb.mxu2 %v13855_v47 }
0x17b2   : > { %9369 = vmatpush.bf16.msrb.mxu3 %v13863_v62  ;;  %9382 = vmatpush.bf16.msrb.mxu1 %v13871_v0 }
0x17b4   : > { %9344 = vmatpush.bf16.msrb.mxu0 %v13846_v61 }
0x17b5   : > { %9357 = vmatpush.bf16.msrb.mxu2 %v13854_v40  ;;  %v13869_v40 = vld [vmem:[#allocation19 + $0xd0] sm:$0xff] }
0x17b6   : > { %9370 = vmatpush.bf16.msrb.mxu3 %v13862_v3  ;;  %9383 = vmatpush.bf16.msrb.mxu1 %v13870_v30 }
0x17b8   : > { %9345 = vmatpush.bf16.msrb.mxu0 %v13845_v38 }
0x17b9   : > { %9358 = vmatpush.bf16.msrb.mxu2 %v13853_v41 }
0x17ba   : > { %9371 = vmatpush.bf16.msrb.mxu3 %v13861_v9  ;;  %9384 = vmatpush.bf16.msrb.mxu1 %v13869_v40 }
0x17bc   : > { %9346 = vmatpush.bf16.msrb.mxu0 %v13844_v50 }
0x17bd   : > { %9359 = vmatpush.bf16.msrb.mxu2 %v13852_v34  ;;  %v9051_v34 = vperm.slane %v15582_v16, 2 }
0x17be   : > { %9372 = vmatpush.bf16.msrb.mxu3 %v13860_v22 }
0x17c0   : > { %9347 = vmatpush.bf16.msrb.mxu0 %v13843_v4 }
0x17c1   : > { %9360 = vmatpush.bf16.msrb.mxu2 %v13851_v58  ;;  %v9065_v58 = vperm.slane %v15585_v2, 2 }
0x17c2   : > { %9373 = vmatpush.bf16.msrb.mxu3 %v13859_v24 }
0x17df   : > { %v8848_v29 = vpop.f32.mrf.mxu0 }
0x17e0   : > { %v8887_v56 = vpop.f32.mrf.mxu1  ;;  %v8849_v35 = vadd.f32 %v8848_v29, %v8831_v51  ;;  %v13868_v51 = vld [vmem:[#allocation19 + $0xc8] sm:$0xff] }
0x17e1   : > { %9385 = vmatpush.bf16.msrb.mxu1 %v13868_v51 }
0x17e5   : > { %v8861_v26 = vpop.f32.mrf.mxu2 }
0x17e6   : > { %v8862_v17 = vadd.f32 %v8861_v26, %v8849_v35  ;;  %v8874_v1 = vpop.f32.mrf.mxu3  ;;  %v13867_v26 = vld [vmem:[#allocation19 + $0xc0] sm:$0xff] }
0x17e7   : > { %v8850_v43 = vpop.f32.mrf.mxu0  ;;  %9386 = vmatpush.bf16.msrb.mxu1 %v13867_v26 }
0x17e8   : > { %v8875_v5 = vadd.f32 %v8874_v1, %v8862_v17  ;;  %v8889_v7 = vpop.f32.mrf.mxu1 }
0x17ea   : > { %v8888_v12 = vadd.f32 %v8887_v56, %v8875_v5 }
0x17ec   : > { %v9057_v18 = vmul.f32 %v9049_v36, %v8888_v12  ;;  %v8834_v36 = vperm.slane %v15578_v55, 3 }
0x17ed   : > { %v8863_v60 = vpop.f32.mrf.mxu2 }
0x17ee   : > { %v9071_v20 = vadd.f32 %v9063_v39, %v9057_v18  ;;  %v8876_v37 = vpop.f32.mrf.mxu3 }
0x17ef   : > { %v8900_v21 = vpop.f32.mrf.mxu0  ;;  %v9052_v37 = vperm.slane %v15582_v16, 3  ;;  %v9147_v16 = vld [vmem:[#allocation21] sm:$0x1] }
0x17f0   : > { %v9075_v11 = vmax.f32 %v9071_v20, 0.0  ;;  %v8939_v10 = vpop.f32.mrf.mxu1  ;;  %v8901_v25 = vadd.f32 %v8900_v21, %v8832_v57 }
0x17f2   : > { %v9143_v54 = vpack.c.bf16 %v9075_v11, %v9075_v11  ;;  %v9066_v11 = vperm.slane %v15585_v2, 3 }
0x17f4   : > { %9348 = vmatmul.bf16.vlgmr.msrb.gmra.mxu0 %v9143_v54 }
0x17f5   : > { %v8913_v32 = vpop.f32.mrf.mxu2 }
0x17f6   : > { %v8914_v33 = vadd.f32 %v8913_v32, %v8901_v25  ;;  %v8926_v42 = vpop.f32.mrf.mxu3 }
0x17f7   : > { %v8902_v48 = vpop.f32.mrf.mxu0 }
0x17f8   : > { %v8927_v23 = vadd.f32 %v8926_v42, %v8914_v33  ;;  %v8941_v31 = vpop.f32.mrf.mxu1 }
0x17fa   : > { %v8940_v46 = vadd.f32 %v8939_v10, %v8927_v23 }
0x17fc   : > { %v9058_v45 = vmul.f32 %v9050_v28, %v8940_v46 }
0x17fd   : > { %v8915_v63 = vpop.f32.mrf.mxu2 }
0x17fe   : > { %v9072_v19 = vadd.f32 %v9064_v59, %v9058_v45  ;;  %v8928_v15 = vpop.f32.mrf.mxu3 }
0x1800   : > { %v9076_v61 = vmax.f32 %v9072_v19, 0.0  ;;  %v8952_v14 = vpop.f32.mrf.mxu0 }
0x1801   : > { %v8953_v4 = vadd.f32 %v8952_v14, %v8833_v13 }
0x1802   : > { %v9144_v38 = vpack.c.bf16 %v9076_v61, %v9076_v61 }
0x1803   : > { %v8991_v50 = vpop.f32.mrf.mxu1 }
0x1804   : > { %9361 = vmatmul.bf16.vlgmr.msrb.gmra.mxu2 %v9144_v38 }
0x1806   : > { %v8965_v47 = vpop.f32.mrf.mxu2 }
0x1807   : > { %v8966_v8 = vadd.f32 %v8965_v47, %v8953_v4 }
0x1808   : > { %v8954_v52 = vpop.f32.mrf.mxu0 }
0x1809   : > { %v8978_v41 = vpop.f32.mrf.mxu3 }
0x180a   : > { %v8979_v29 = vadd.f32 %v8978_v41, %v8966_v8 }
0x180b   : > { %v8993_v44 = vpop.f32.mrf.mxu1 }
0x180c   : > { %v8992_v56 = vadd.f32 %v8991_v50, %v8979_v29 }
0x180e   : > { %v9059_v62 = vmul.f32 %v9051_v34, %v8992_v56  ;;  %v8967_v35 = vpop.f32.mrf.mxu2 }
0x1810   : > { %v9073_v17 = vadd.f32 %v9065_v58, %v9059_v62 }
0x1811   : > { %v8980_v1 = vpop.f32.mrf.mxu3 }
0x1812   : > { %v9077_v43 = vmax.f32 %v9073_v17, 0.0 }
0x1814   : > { %v9145_v3 = vpack.c.bf16 %v9077_v43, %v9077_v43 }
0x1816   : > { %9374 = vmatmul.bf16.vlgmr.msrb.gmra.mxu3 %v9145_v3 }
0x1820   : > { %v9004_v5 = vpop.f32.mrf.mxu0 }
0x1821   : > { %v9005_v12 = vadd.f32 %v9004_v5, %v8834_v36 }
0x1822   : > { %v9043_v7 = vpop.f32.mrf.mxu1 }
0x1826   : > { %v9017_v39 = vpop.f32.mrf.mxu2 }
0x1827   : > { %v9018_v9 = vadd.f32 %v9017_v39, %v9005_v12  ;;  %v9030_v18 = vpop.f32.mrf.mxu3 }
0x1828   : > { %v9006_v60 = vpop.f32.mrf.mxu0 }
0x1829   : > { %v9031_v20 = vadd.f32 %v9030_v18, %v9018_v9 }
0x182a   : > { %v9045_v21 = vpop.f32.mrf.mxu1 }
0x182b   : > { %v9044_v22 = vadd.f32 %v9043_v7, %v9031_v20 }
0x182d   : > { %v9060_v57 = vmul.f32 %v9052_v37, %v9044_v22 }
0x182e   : > { %v9019_v10 = vpop.f32.mrf.mxu2 }
0x182f   : > { %v9074_v54 = vadd.f32 %v9066_v11, %v9060_v57  ;;  %v9032_v24 = vpop.f32.mrf.mxu3 }
0x1831   : > { %v9078_v6 = vmax.f32 %v9074_v54, 0.0 }
0x1833   : > { %v9146_v25 = vpack.c.bf16 %v9078_v6, %v9078_v6 }
0x1835   : > { %9387 = vmatmul.bf16.vlgmr.msrb.gmra.mxu1 %v9146_v25 }
0x1871   : > { %v9349_v55 = vpop.f32.mrf.mxu0 }
0x1872   : > { %v9350_v23 = vadd.f32 %v9349_v55, %v9147_v16 }
0x1879   : > { %v9351_v32 = vpop.f32.mrf.mxu0 }
0x1887   : > { %v9362_v33 = vpop.f32.mrf.mxu2 }
0x1888   : > { %v9363_v28 = vadd.f32 %v9362_v33, %v9350_v23 }
0x188f   : > { %v9364_v42 = vpop.f32.mrf.mxu2 }
0x1899   : > { %v9375_v27 = vpop.f32.mrf.mxu3 }
0x189a   : > { %v9376_v31 = vadd.f32 %v9375_v27, %v9363_v28 }
0x18a1   : > { %v9377_v48 = vpop.f32.mrf.mxu3 }
0x18b2   : > { %v9388_v2 = vpop.f32.mrf.mxu1 }
0x18b3   : > { %v9389_v49 = vadd.f32 %v9388_v2, %v9376_v31 }
0x18b5   : > { %14151 = vtanh.f32 %v9389_v49 }
0x18ba   : > { %v9390_v46 = vpop.f32.mrf.mxu1 }
0x18bb   : > { %v14152_v59 = vpop.eup %14151 }
0x18bc   : > { %v9394_v45 = vsel %vm9392_vm3, %v14152_v59, %v9389_v49 }
0x18bd   : > { %9395 = vst [vmem:[%s1556_s26] sm:$0x1] %v9394_v45 }
0x18be PF: > { %s15698_s16 = sld [smem:[#allocation59_spill]] }
0x18c4   : > { %s106_s28 = sadd.s32 1, %s15698_s16  }
0x18c5   : > { %p103_p2 = scmp.ge.s32.totalorder %s106_s28, 4  }
0x18c7   :  { %105 = sbr.rel (!%p103_p2) target bundleno = 91 (0x5b), region = 345 }
0x18cc   :  { %9413 = vsyncpa [#allocation3], 1 }
0x18cd   :  { %9415 = vsyncpa [#allocation3 + $0x1], 1 }
0x18ce   :  { %9416 = vsyncpa [#allocation5], 1 }
0x18cf   :  { %9417 = vsyncpa [#allocation8], 1 }
0x18d0   :  { %9418 = vsyncpa [#allocation11], 1 }
0x18d1   :  { %9419 = vsyncpa [#allocation14], 1 }
0x18d2   :  { %9420 = vsyncpa [#allocation17], 1 }
0x18d3   :  { %9421 = vsyncpa [#allocation20], 1 }

</bundles_post_ra>
